<compile_context>
chip_gen: v7x
topology: tpu7x:2x2x1
jax: 0.10.0
libtpu: 0.0.40
codegen_flags: <defaults>
</compile_context>

<pallas_src>
import numpy as np

import jax
import jax.numpy as jnp
from jax import lax
from jax.experimental import pallas as pl
from jax.experimental.pallas import tpu as pltpu


# (cin, cout, stride); all 3x3, padding=1
RES_CFG = [
    (1, 1, 1), (1, 1, 1), (1, 2, 2),
    (2, 2, 1), (2, 2, 1), (2, 4, 2),
    (4, 4, 1), (4, 4, 1), (4, 8, 2),
    (8, 8, 1), (8, 8, 1), (8, 16, 2),
]

CIN_PAD = 8       # pad the contraction (cin) axis to a full sublane for MXU dots
PADL = 128        # left zero-gutter in the staging buffer (>= Hg + 1 for all layers)


# ----------------------------------------------------------------------------
# Fused forward builder
# ----------------------------------------------------------------------------


def build_basic_res(params, batch, h_in):
    """Packs parameters/constants once and returns a jitted fused forward(x)."""
    B = int(batch)
    H0 = int(h_in)
    H1 = H0 - 6                               # spatial after the 7x7 VALID conv
    M1 = H1 * H1
    fw, fb = params["fc"]
    n_class = int(fw.shape[0])

    # Static per-layer config: (cin, cout, stride, input spatial size).
    res_cfg = []
    Hc = H1
    for (w, b, stride, _changes) in params["res"]:
        cout, cin = int(w.shape[0]), int(w.shape[1])
        # In this architecture channel change <=> stride 2 (matches PyTorch branch).
        assert (cin != cout) == (stride == 2)
        res_cfg.append((cin, cout, stride, Hc))
        if stride == 2:
            Hc //= 2
    Hf = Hc                                   # final spatial size (2)
    P = Hf * Hf
    C_last = res_cfg[-1][1]
    assert P * C_last == int(fw.shape[1]), "input size inconsistent with fc"
    n_layers = len(res_cfg)

    uniq_geoms = sorted({g for (_, _, _, g) in res_cfg}, reverse=True)
    s2_geoms = sorted({g for (_, _, s, g) in res_cfg if s == 2}, reverse=True)

    # ---- constant helper matrices (numpy -> baked-in device constants) ------
    def boundary_masks(Hg):
        # mask[t, m] == 1 iff tap t=(ki,kj) of flat output position m stays
        # inside the image; kills cross-row wraps and gutter reads.
        M = Hg * Hg
        idx = np.arange(M)
        h = idx // Hg
        w = idx % Hg
        m = np.zeros((9, M), np.float32)
        for ki in range(3):
            for kj in range(3):
                ok = ((h + ki - 1 >= 0) & (h + ki - 1 < Hg) &
                      (w + kj - 1 >= 0) & (w + kj - 1 < Hg))
                m[ki * 3 + kj] = ok.astype(np.float32)
        return m

    def downsample_sel(Hg):
        # 0/1 matrix selecting (even h, even w) positions of one image:
        # stride-2 conv output == stride-1 conv output at (2ho, 2wo).
        Ho = Hg // 2
        s = np.zeros((Hg * Hg, Ho * Ho), np.float32)
        for ho in range(Ho):
            for wo in range(Ho):
                s[(2 * ho) * Hg + 2 * wo, ho * Ho + wo] = 1.0
        return s

    masks = {g: jnp.asarray(boundary_masks(g)) for g in uniq_geoms}
    sels = {g: jnp.asarray(downsample_sel(g)) for g in s2_geoms}

    # ---- parameters rearranged once into kernel-friendly shapes -------------
    w_taps, biases = [], []
    for (w, b, _s, _c) in params["res"]:
        cout, cin = int(w.shape[0]), int(w.shape[1])
        w9 = jnp.transpose(w.astype(jnp.float32), (2, 3, 0, 1)).reshape(9, cout, cin)
        # Zero-pad the cin axis to 8: the matching staging rows are always 0,
        # so the dot is exact and sublane-aligned.
        w9 = jnp.pad(w9, ((0, 0), (0, 0), (0, CIN_PAD - cin)))
        w_taps.append(w9)
        biases.append(b.astype(jnp.float32).reshape(cout, 1))

    # fc weight regrouped so h_fc[p] is the (C_last, n_class) slab for spatial
    # position p (= h*Wf + w), matching PyTorch's .view(-1, C*Hf*Wf) ordering.
    h_fc = jnp.transpose(jnp.reshape(fw.astype(jnp.float32), (n_class, C_last, P)),
                         (2, 1, 0))                       # (P, C_last, n_class)
    fcb = fb.astype(jnp.float32).reshape(1, n_class)

    const_inputs = (w_taps + biases
                    + [masks[g] for g in uniq_geoms]
                    + [sels[g] for g in s2_geoms]
                    + [h_fc, fcb])

    # ---- per-image staging scratch geometry ----------------------------------
    max_M = max(g * g for g in uniq_geoms)                # 1024
    xs_rows = CIN_PAD
    xs_w = ((PADL + max_M + PADL) // 128) * 128           # 1280 lanes

    # ---- the fused kernel (one grid step == one image) -----------------------
    def kernel(*refs):
        it = iter(refs)
        x1_ref = next(it)                                  # (1, 1, M1)
        w_refs = [next(it) for _ in range(n_layers)]
        b_refs = [next(it) for _ in range(n_layers)]
        mask_refs = {g: next(it) for g in uniq_geoms}
        sel_refs = {g: next(it) for g in s2_geoms}
        h_ref = next(it)                                   # (P, C_last, n_class)
        fcb_ref = next(it)                                 # (1, n_class)
        out_ref = next(it)                                 # (1, 1, n_class)
        xs = next(it)                                      # (8, xs_w) VMEM staging

        # Zero the small per-image staging buffer once per grid step so the
        # gutters and never-written channel rows read back as exact 0.0
        # (masked taps and zero-padded weight columns then contribute nothing).
        xs[...] = jnp.zeros(xs.shape, xs.dtype)

        # Stage block1's (already computed) activation, channel-major flat.
        x_cur = x1_ref[0]                                  # (1, M1)
        xs[0:1, pl.ds(PADL, M1)] = x_cur

        # -------- 12 residual 3x3 conv layers ---------------------------------
        for l, (cin, cout, stride, Hg) in enumerate(res_cfg):
            M = Hg * Hg
            w_ref, b_ref, m_ref = w_refs[l], b_refs[l], mask_refs[Hg]
            acc = jnp.zeros((cout, M), jnp.float32)
            for t in range(9):
                ki, kj = t // 3, t % 3
                shift = (ki - 1) * Hg + (kj - 1)           # static offsets
                if cin == 1:
                    # Single input channel: one broadcast multiply (VPU filler).
                    tap = xs[0:1, pl.ds(PADL + shift, M)] * m_ref[t:t + 1, :]
                    acc = acc + w_ref[t][:, 0:1] * tap
                else:
                    # MXU contraction over the (zero-padded) channel axis.
                    tap = xs[0:CIN_PAD, pl.ds(PADL + shift, M)] * m_ref[t:t + 1, :]
                    acc = acc + jnp.dot(w_ref[t], tap,
                                        preferred_element_type=jnp.float32)
            if stride == 2:
                # Exact 0/1 selection matmul == stride-2 subsampling (one dot).
                y = jnp.dot(acc, sel_refs[Hg][...],
                            preferred_element_type=jnp.float32)
                M = M // 4
                y = y + b_ref[...]
                x_cur = jnp.maximum(y, 0.0) + y            # relu(y) + AvgPool2d(1)(y)
            else:
                y = acc + b_ref[...]
                x_cur = jnp.maximum(y, 0.0) + x_cur        # relu(y) + residual
            if l + 1 < n_layers:                           # stage for next layer taps
                xs[0:cout, pl.ds(PADL, M)] = x_cur

        # -------- fc: logits[n] = fb[n] + sum_{c,p} fw[n, c*P+p] * x[c, p] -----
        y_fc = jnp.zeros((C_last, n_class), jnp.float32)
        for p in range(P):
            y_fc = y_fc + x_cur[:, p:p + 1] * h_ref[p]     # (C_last,1)*(C_last,n)
        logits = jnp.sum(y_fc, axis=0, keepdims=True) + fcb_ref[...]   # (1, n_class)
        out_ref[0] = logits

    def const_spec(arr):
        nd = arr.ndim
        return pl.BlockSpec(arr.shape, lambda b, _n=nd: (0,) * _n)

    in_specs = ([pl.BlockSpec((1, 1, M1), lambda b: (b, 0, 0))]
                + [const_spec(a) for a in const_inputs])

    fused = pl.pallas_call(
        kernel,
        out_shape=jax.ShapeDtypeStruct((B, 1, n_class), jnp.float32),
        grid_spec=pltpu.PrefetchScalarGridSpec(
            num_scalar_prefetch=0,
            grid=(B,),
            in_specs=in_specs,
            out_specs=pl.BlockSpec((1, 1, n_class), lambda b: (b, 0, 0)),
            scratch_shapes=[pltpu.VMEM((xs_rows, xs_w), jnp.float32)]),
        compiler_params=pltpu.CompilerParams(
            dimension_semantics=("parallel",)),
    )

    w7 = params["block1"][0].astype(jnp.float32)           # (1, 1, 7, 7)
    b7 = params["block1"][1].astype(jnp.float32)            # (1,)

    @jax.jit
    def forward(x_nchw):
        assert x_nchw.shape == (B, 1, H0, H0), x_nchw.shape
        # block1 (Dropout=identity -> 7x7 VALID conv -> ReLU) hoisted into the
        # wrapper as a plain XLA conv per the performance review; ~8 KB of HBM
        # traffic feeds the kernel the already-cropped activation.
        y = lax.conv_general_dilated(
            x_nchw.astype(jnp.float32), w7, (1, 1), "VALID",
            dimension_numbers=("NCHW", "OIHW", "NCHW"),
            precision=lax.Precision.HIGHEST)
        y = jnp.maximum(y + b7.reshape(1, -1, 1, 1), 0.0)
        x1 = y.reshape(B, 1, M1)                            # channel-major flat
        out = fused(x1, *const_inputs)                      # (B, 1, n_class)
        return out.reshape(B, n_class)

    return forward


# ----------------------------------------------------------------------------
# Deterministic parameter init (PyTorch-convention shapes)
# ----------------------------------------------------------------------------


def init_params(key, n_class):
    n_keys = 2 * (1 + len(RES_CFG) + 1)
    keys = iter(jax.random.split(key, n_keys))

    def conv_init(cin, cout, k):
        fan_in = cin * k * k
        w = jax.random.normal(next(keys), (cout, cin, k, k), jnp.float32) / jnp.sqrt(
            float(fan_in))
        b = 0.01 * jax.random.normal(next(keys), (cout,), jnp.float32)
        return w, b

    params = {"block1": conv_init(1, 1, 7)}
    res = []
    for cin, cout, s in RES_CFG:
        w, b = conv_init(cin, cout, 3)
        res.append((w, b, s, cin != cout))
    params["res"] = res
    fw = jax.random.normal(next(keys), (n_class, 64), jnp.float32) / jnp.sqrt(64.0)
    fb = 0.01 * jax.random.normal(next(keys), (n_class,), jnp.float32)
    params["fc"] = (fw, fb)
    return params


# ----------------------------------------------------------------------------
# Pure-JAX reference (NCHW, matches the PyTorch forward in eval mode)
# ----------------------------------------------------------------------------


def reference_forward(x, params):
    def conv(x, w, b, stride, padding):
        y = lax.conv_general_dilated(
            x, w, window_strides=(stride, stride),
            padding=[(padding, padding), (padding, padding)],
            dimension_numbers=("NCHW", "OIHW", "NCHW"),
            precision=lax.Precision.HIGHEST)
        return y + b.reshape(1, -1, 1, 1)

    w, b = params["block1"]
    x = jax.nn.relu(conv(x, w, b, 1, 0))
    for (w, b, s, changes) in params["res"]:
        residual = x
        y = conv(x, w, b, s, 1)
        x = jax.nn.relu(y)
        if changes:
            x = x + y            # AvgPool2d(1)(conv(residual)) == y (eval mode)
        else:
            x = x + residual
    B = x.shape[0]
    x = x.reshape(B, -1)
    fw, fb = params["fc"]
    return jnp.dot(x, fw.T, precision=lax.Precision.HIGHEST) + fb


# ----------------------------------------------------------------------------


if __name__ == "__main__":
    n_class = 10
    key = jax.random.PRNGKey(0)
    k_x, k_p = jax.random.split(key)

    # Input spatial 38x38 so that conv7 -> 32 -> four stride-2 halvings -> 2x2,
    # matching the fc's expected 16*2*2 features.
    batch, h_in = 2, 38
    x = jax.random.normal(k_x, (batch, 1, h_in, h_in), jnp.float32)
    params = init_params(k_p, n_class)

    forward = build_basic_res(params, batch=batch, h_in=h_in)
    out = jax.block_until_ready(forward(x))

    ref = jax.block_until_ready(reference_forward(x, params))
    assert out.shape == (batch, n_class), out.shape
    err = float(jnp.max(jnp.abs(out - ref)))
    assert jnp.allclose(out, ref, rtol=2e-2, atol=2e-2), err

    print("KERNEL_OK")
</pallas_src>

<mosaic_0001>
module attributes {stable_mosaic.version = 11 : i64} {
  func.func @kernel(%arg0: i32, %arg1: memref<1x1x1024xf32, #tpu.memory_space<vmem>>, %arg2: memref<9x1x8xf32, #tpu.memory_space<vmem>>, %arg3: memref<9x1x8xf32, #tpu.memory_space<vmem>>, %arg4: memref<9x2x8xf32, #tpu.memory_space<vmem>>, %arg5: memref<9x2x8xf32, #tpu.memory_space<vmem>>, %arg6: memref<9x2x8xf32, #tpu.memory_space<vmem>>, %arg7: memref<9x4x8xf32, #tpu.memory_space<vmem>>, %arg8: memref<9x4x8xf32, #tpu.memory_space<vmem>>, %arg9: memref<9x4x8xf32, #tpu.memory_space<vmem>>, %arg10: memref<9x8x8xf32, #tpu.memory_space<vmem>>, %arg11: memref<9x8x8xf32, #tpu.memory_space<vmem>>, %arg12: memref<9x8x8xf32, #tpu.memory_space<vmem>>, %arg13: memref<9x16x8xf32, #tpu.memory_space<vmem>>, %arg14: memref<1x1xf32, #tpu.memory_space<vmem>>, %arg15: memref<1x1xf32, #tpu.memory_space<vmem>>, %arg16: memref<2x1xf32, #tpu.memory_space<vmem>>, %arg17: memref<2x1xf32, #tpu.memory_space<vmem>>, %arg18: memref<2x1xf32, #tpu.memory_space<vmem>>, %arg19: memref<4x1xf32, #tpu.memory_space<vmem>>, %arg20: memref<4x1xf32, #tpu.memory_space<vmem>>, %arg21: memref<4x1xf32, #tpu.memory_space<vmem>>, %arg22: memref<8x1xf32, #tpu.memory_space<vmem>>, %arg23: memref<8x1xf32, #tpu.memory_space<vmem>>, %arg24: memref<8x1xf32, #tpu.memory_space<vmem>>, %arg25: memref<16x1xf32, #tpu.memory_space<vmem>>, %arg26: memref<9x1024xf32, #tpu.memory_space<vmem>>, %arg27: memref<9x256xf32, #tpu.memory_space<vmem>>, %arg28: memref<9x64xf32, #tpu.memory_space<vmem>>, %arg29: memref<9x16xf32, #tpu.memory_space<vmem>>, %arg30: memref<1024x256xf32, #tpu.memory_space<vmem>>, %arg31: memref<256x64xf32, #tpu.memory_space<vmem>>, %arg32: memref<64x16xf32, #tpu.memory_space<vmem>>, %arg33: memref<16x4xf32, #tpu.memory_space<vmem>>, %arg34: memref<4x16x10xf32, #tpu.memory_space<vmem>>, %arg35: memref<1x10xf32, #tpu.memory_space<vmem>>, %arg36: memref<1x1x10xf32, #tpu.memory_space<vmem>>, %arg37: memref<8x1280xf32, #tpu.memory_space<vmem>>) attributes {dimension_semantics = [#tpu.dimension_semantics<parallel>], iteration_bounds = array<i64: 2>, scalar_prefetch = 0 : i64, scratch_operands = 1 : i64, tpu.core_type = #tpu.core_type<tc>, window_params = [{transform_indices = @transform_0, window_bounds = array<i64: 1, 1, 1024>}, {pipeline_mode = #tpu.pipeline_mode<synchronous>, transform_indices = @transform_1, window_bounds = array<i64: 9, 1, 8>}, {pipeline_mode = #tpu.pipeline_mode<synchronous>, transform_indices = @transform_2, window_bounds = array<i64: 9, 1, 8>}, {pipeline_mode = #tpu.pipeline_mode<synchronous>, transform_indices = @transform_3, window_bounds = array<i64: 9, 2, 8>}, {pipeline_mode = #tpu.pipeline_mode<synchronous>, transform_indices = @transform_4, window_bounds = array<i64: 9, 2, 8>}, {pipeline_mode = #tpu.pipeline_mode<synchronous>, transform_indices = @transform_5, window_bounds = array<i64: 9, 2, 8>}, {pipeline_mode = #tpu.pipeline_mode<synchronous>, transform_indices = @transform_6, window_bounds = array<i64: 9, 4, 8>}, {pipeline_mode = #tpu.pipeline_mode<synchronous>, transform_indices = @transform_7, window_bounds = array<i64: 9, 4, 8>}, {pipeline_mode = #tpu.pipeline_mode<synchronous>, transform_indices = @transform_8, window_bounds = array<i64: 9, 4, 8>}, {pipeline_mode = #tpu.pipeline_mode<synchronous>, transform_indices = @transform_9, window_bounds = array<i64: 9, 8, 8>}, {pipeline_mode = #tpu.pipeline_mode<synchronous>, transform_indices = @transform_10, window_bounds = array<i64: 9, 8, 8>}, {pipeline_mode = #tpu.pipeline_mode<synchronous>, transform_indices = @transform_11, window_bounds = array<i64: 9, 8, 8>}, {pipeline_mode = #tpu.pipeline_mode<synchronous>, transform_indices = @transform_12, window_bounds = array<i64: 9, 16, 8>}, {pipeline_mode = #tpu.pipeline_mode<synchronous>, transform_indices = @transform_13, window_bounds = array<i64: 1, 1>}, {pipeline_mode = #tpu.pipeline_mode<synchronous>, transform_indices = @transform_14, window_bounds = array<i64: 1, 1>}, {pipeline_mode = #tpu.pipeline_mode<synchronous>, transform_indices = @transform_15, window_bounds = array<i64: 2, 1>}, {pipeline_mode = #tpu.pipeline_mode<synchronous>, transform_indices = @transform_16, window_bounds = array<i64: 2, 1>}, {pipeline_mode = #tpu.pipeline_mode<synchronous>, transform_indices = @transform_17, window_bounds = array<i64: 2, 1>}, {pipeline_mode = #tpu.pipeline_mode<synchronous>, transform_indices = @transform_18, window_bounds = array<i64: 4, 1>}, {pipeline_mode = #tpu.pipeline_mode<synchronous>, transform_indices = @transform_19, window_bounds = array<i64: 4, 1>}, {pipeline_mode = #tpu.pipeline_mode<synchronous>, transform_indices = @transform_20, window_bounds = array<i64: 4, 1>}, {pipeline_mode = #tpu.pipeline_mode<synchronous>, transform_indices = @transform_21, window_bounds = array<i64: 8, 1>}, {pipeline_mode = #tpu.pipeline_mode<synchronous>, transform_indices = @transform_22, window_bounds = array<i64: 8, 1>}, {pipeline_mode = #tpu.pipeline_mode<synchronous>, transform_indices = @transform_23, window_bounds = array<i64: 8, 1>}, {pipeline_mode = #tpu.pipeline_mode<synchronous>, transform_indices = @transform_24, window_bounds = array<i64: 16, 1>}, {pipeline_mode = #tpu.pipeline_mode<synchronous>, transform_indices = @transform_25, window_bounds = array<i64: 9, 1024>}, {pipeline_mode = #tpu.pipeline_mode<synchronous>, transform_indices = @transform_26, window_bounds = array<i64: 9, 256>}, {pipeline_mode = #tpu.pipeline_mode<synchronous>, transform_indices = @transform_27, window_bounds = array<i64: 9, 64>}, {pipeline_mode = #tpu.pipeline_mode<synchronous>, transform_indices = @transform_28, window_bounds = array<i64: 9, 16>}, {pipeline_mode = #tpu.pipeline_mode<synchronous>, transform_indices = @transform_29, window_bounds = array<i64: 1024, 256>}, {pipeline_mode = #tpu.pipeline_mode<synchronous>, transform_indices = @transform_30, window_bounds = array<i64: 256, 64>}, {pipeline_mode = #tpu.pipeline_mode<synchronous>, transform_indices = @transform_31, window_bounds = array<i64: 64, 16>}, {pipeline_mode = #tpu.pipeline_mode<synchronous>, transform_indices = @transform_32, window_bounds = array<i64: 16, 4>}, {pipeline_mode = #tpu.pipeline_mode<synchronous>, transform_indices = @transform_33, window_bounds = array<i64: 4, 16, 10>}, {pipeline_mode = #tpu.pipeline_mode<synchronous>, transform_indices = @transform_34, window_bounds = array<i64: 1, 10>}, {transform_indices = @transform_35, window_bounds = array<i64: 1, 1, 10>}]} {
    %cst = arith.constant 0.000000e+00 : f32
    %0 = vector.broadcast %cst : f32 to vector<8x1280xf32>
    %c0 = arith.constant 0 : index
    %c0_0 = arith.constant 0 : index
    %1 = vector.load %arg37[%c0, %c0_0] : memref<8x1280xf32, #tpu.memory_space<vmem>>, vector<8x1280xf32>
    tpu.vector_store %arg37[%c0, %c0_0], %0 {strides = array<i32>} : memref<8x1280xf32, #tpu.memory_space<vmem>>, vector<8x1280xf32>,
    %c0_1 = arith.constant 0 : index
    %c0_2 = arith.constant 0 : index
    %c0_3 = arith.constant 0 : index
    %2 = vector.load %arg1[%c0_1, %c0_2, %c0_3] : memref<1x1x1024xf32, #tpu.memory_space<vmem>>, vector<1x1x1024xf32>
    %3 = vector.shape_cast %2 : vector<1x1x1024xf32> to vector<1x1024xf32>
    %c0_4 = arith.constant 0 : index
    %c128 = arith.constant 128 : index
    %4 = vector.load %arg37[%c0_4, %c128] : memref<8x1280xf32, #tpu.memory_space<vmem>>, vector<1x1024xf32>
    tpu.vector_store %arg37[%c0_4, %c128], %3 {strides = array<i32>} : memref<8x1280xf32, #tpu.memory_space<vmem>>, vector<1x1024xf32>,
    %cst_5 = arith.constant 0.000000e+00 : f32
    %5 = vector.broadcast %cst_5 : f32 to vector<1x1024xf32>
    %c0_6 = arith.constant 0 : index
    %c95 = arith.constant 95 : index
    %6 = vector.load %arg37[%c0_6, %c95] : memref<8x1280xf32, #tpu.memory_space<vmem>>, vector<1x1024xf32>
    %c0_7 = arith.constant 0 : index
    %c0_8 = arith.constant 0 : index
    %7 = vector.load %arg26[%c0_7, %c0_8] : memref<9x1024xf32, #tpu.memory_space<vmem>>, vector<1x1024xf32>
    %8 = arith.mulf %6, %7 : vector<1x1024xf32>
    %c0_9 = arith.constant 0 : index
    %c0_10 = arith.constant 0 : index
    %c0_11 = arith.constant 0 : index
    %9 = vector.load %arg2[%c0_9, %c0_10, %c0_11] : memref<9x1x8xf32, #tpu.memory_space<vmem>>, vector<1x1x8xf32>
    %10 = vector.shape_cast %9 : vector<1x1x8xf32> to vector<1x8xf32>
    %11 = vector.extract_strided_slice %10 {offsets = [0, 0], sizes = [1, 1], strides = [1, 1]} : vector<1x8xf32> to vector<1x1xf32>
    %12 = vector.broadcast %11 : vector<1x1xf32> to vector<1x1024xf32>
    %13 = arith.mulf %12, %8 : vector<1x1024xf32>
    %14 = arith.addf %5, %13 : vector<1x1024xf32>
    %c0_12 = arith.constant 0 : index
    %c96 = arith.constant 96 : index
    %15 = vector.load %arg37[%c0_12, %c96] : memref<8x1280xf32, #tpu.memory_space<vmem>>, vector<1x1024xf32>
    %c1 = arith.constant 1 : index
    %c0_13 = arith.constant 0 : index
    %16 = vector.load %arg26[%c1, %c0_13] : memref<9x1024xf32, #tpu.memory_space<vmem>>, vector<1x1024xf32>
    %17 = arith.mulf %15, %16 : vector<1x1024xf32>
    %c1_14 = arith.constant 1 : index
    %c0_15 = arith.constant 0 : index
    %c0_16 = arith.constant 0 : index
    %18 = vector.load %arg2[%c1_14, %c0_15, %c0_16] : memref<9x1x8xf32, #tpu.memory_space<vmem>>, vector<1x1x8xf32>
    %19 = vector.shape_cast %18 : vector<1x1x8xf32> to vector<1x8xf32>
    %20 = vector.extract_strided_slice %19 {offsets = [0, 0], sizes = [1, 1], strides = [1, 1]} : vector<1x8xf32> to vector<1x1xf32>
    %21 = vector.broadcast %20 : vector<1x1xf32> to vector<1x1024xf32>
    %22 = arith.mulf %21, %17 : vector<1x1024xf32>
    %23 = arith.addf %14, %22 : vector<1x1024xf32>
    %c0_17 = arith.constant 0 : index
    %c97 = arith.constant 97 : index
    %24 = vector.load %arg37[%c0_17, %c97] : memref<8x1280xf32, #tpu.memory_space<vmem>>, vector<1x1024xf32>
    %c2 = arith.constant 2 : index
    %c0_18 = arith.constant 0 : index
    %25 = vector.load %arg26[%c2, %c0_18] : memref<9x1024xf32, #tpu.memory_space<vmem>>, vector<1x1024xf32>
    %26 = arith.mulf %24, %25 : vector<1x1024xf32>
    %c2_19 = arith.constant 2 : index
    %c0_20 = arith.constant 0 : index
    %c0_21 = arith.constant 0 : index
    %27 = vector.load %arg2[%c2_19, %c0_20, %c0_21] : memref<9x1x8xf32, #tpu.memory_space<vmem>>, vector<1x1x8xf32>
    %28 = vector.shape_cast %27 : vector<1x1x8xf32> to vector<1x8xf32>
    %29 = vector.extract_strided_slice %28 {offsets = [0, 0], sizes = [1, 1], strides = [1, 1]} : vector<1x8xf32> to vector<1x1xf32>
    %30 = vector.broadcast %29 : vector<1x1xf32> to vector<1x1024xf32>
    %31 = arith.mulf %30, %26 : vector<1x1024xf32>
    %32 = arith.addf %23, %31 : vector<1x1024xf32>
    %c0_22 = arith.constant 0 : index
    %c127 = arith.constant 127 : index
    %33 = vector.load %arg37[%c0_22, %c127] : memref<8x1280xf32, #tpu.memory_space<vmem>>, vector<1x1024xf32>
    %c3 = arith.constant 3 : index
    %c0_23 = arith.constant 0 : index
    %34 = vector.load %arg26[%c3, %c0_23] : memref<9x1024xf32, #tpu.memory_space<vmem>>, vector<1x1024xf32>
    %35 = arith.mulf %33, %34 : vector<1x1024xf32>
    %c3_24 = arith.constant 3 : index
    %c0_25 = arith.constant 0 : index
    %c0_26 = arith.constant 0 : index
    %36 = vector.load %arg2[%c3_24, %c0_25, %c0_26] : memref<9x1x8xf32, #tpu.memory_space<vmem>>, vector<1x1x8xf32>
    %37 = vector.shape_cast %36 : vector<1x1x8xf32> to vector<1x8xf32>
    %38 = vector.extract_strided_slice %37 {offsets = [0, 0], sizes = [1, 1], strides = [1, 1]} : vector<1x8xf32> to vector<1x1xf32>
    %39 = vector.broadcast %38 : vector<1x1xf32> to vector<1x1024xf32>
    %40 = arith.mulf %39, %35 : vector<1x1024xf32>
    %41 = arith.addf %32, %40 : vector<1x1024xf32>
    %c0_27 = arith.constant 0 : index
    %c128_28 = arith.constant 128 : index
    %42 = vector.load %arg37[%c0_27, %c128_28] : memref<8x1280xf32, #tpu.memory_space<vmem>>, vector<1x1024xf32>
    %c4 = arith.constant 4 : index
    %c0_29 = arith.constant 0 : index
    %43 = vector.load %arg26[%c4, %c0_29] : memref<9x1024xf32, #tpu.memory_space<vmem>>, vector<1x1024xf32>
    %44 = arith.mulf %42, %43 : vector<1x1024xf32>
    %c4_30 = arith.constant 4 : index
    %c0_31 = arith.constant 0 : index
    %c0_32 = arith.constant 0 : index
    %45 = vector.load %arg2[%c4_30, %c0_31, %c0_32] : memref<9x1x8xf32, #tpu.memory_space<vmem>>, vector<1x1x8xf32>
    %46 = vector.shape_cast %45 : vector<1x1x8xf32> to vector<1x8xf32>
    %47 = vector.extract_strided_slice %46 {offsets = [0, 0], sizes = [1, 1], strides = [1, 1]} : vector<1x8xf32> to vector<1x1xf32>
    %48 = vector.broadcast %47 : vector<1x1xf32> to vector<1x1024xf32>
    %49 = arith.mulf %48, %44 : vector<1x1024xf32>
    %50 = arith.addf %41, %49 : vector<1x1024xf32>
    %c0_33 = arith.constant 0 : index
    %c129 = arith.constant 129 : index
    %51 = vector.load %arg37[%c0_33, %c129] : memref<8x1280xf32, #tpu.memory_space<vmem>>, vector<1x1024xf32>
    %c5 = arith.constant 5 : index
    %c0_34 = arith.constant 0 : index
    %52 = vector.load %arg26[%c5, %c0_34] : memref<9x1024xf32, #tpu.memory_space<vmem>>, vector<1x1024xf32>
    %53 = arith.mulf %51, %52 : vector<1x1024xf32>
    %c5_35 = arith.constant 5 : index
    %c0_36 = arith.constant 0 : index
    %c0_37 = arith.constant 0 : index
    %54 = vector.load %arg2[%c5_35, %c0_36, %c0_37] : memref<9x1x8xf32, #tpu.memory_space<vmem>>, vector<1x1x8xf32>
    %55 = vector.shape_cast %54 : vector<1x1x8xf32> to vector<1x8xf32>
    %56 = vector.extract_strided_slice %55 {offsets = [0, 0], sizes = [1, 1], strides = [1, 1]} : vector<1x8xf32> to vector<1x1xf32>
    %57 = vector.broadcast %56 : vector<1x1xf32> to vector<1x1024xf32>
    %58 = arith.mulf %57, %53 : vector<1x1024xf32>
    %59 = arith.addf %50, %58 : vector<1x1024xf32>
    %c0_38 = arith.constant 0 : index
    %c159 = arith.constant 159 : index
    %60 = vector.load %arg37[%c0_38, %c159] : memref<8x1280xf32, #tpu.memory_space<vmem>>, vector<1x1024xf32>
    %c6 = arith.constant 6 : index
    %c0_39 = arith.constant 0 : index
    %61 = vector.load %arg26[%c6, %c0_39] : memref<9x1024xf32, #tpu.memory_space<vmem>>, vector<1x1024xf32>
    %62 = arith.mulf %60, %61 : vector<1x1024xf32>
    %c6_40 = arith.constant 6 : index
    %c0_41 = arith.constant 0 : index
    %c0_42 = arith.constant 0 : index
    %63 = vector.load %arg2[%c6_40, %c0_41, %c0_42] : memref<9x1x8xf32, #tpu.memory_space<vmem>>, vector<1x1x8xf32>
    %64 = vector.shape_cast %63 : vector<1x1x8xf32> to vector<1x8xf32>
    %65 = vector.extract_strided_slice %64 {offsets = [0, 0], sizes = [1, 1], strides = [1, 1]} : vector<1x8xf32> to vector<1x1xf32>
    %66 = vector.broadcast %65 : vector<1x1xf32> to vector<1x1024xf32>
    %67 = arith.mulf %66, %62 : vector<1x1024xf32>
    %68 = arith.addf %59, %67 : vector<1x1024xf32>
    %c0_43 = arith.constant 0 : index
    %c160 = arith.constant 160 : index
    %69 = vector.load %arg37[%c0_43, %c160] : memref<8x1280xf32, #tpu.memory_space<vmem>>, vector<1x1024xf32>
    %c7 = arith.constant 7 : index
    %c0_44 = arith.constant 0 : index
    %70 = vector.load %arg26[%c7, %c0_44] : memref<9x1024xf32, #tpu.memory_space<vmem>>, vector<1x1024xf32>
    %71 = arith.mulf %69, %70 : vector<1x1024xf32>
    %c7_45 = arith.constant 7 : index
    %c0_46 = arith.constant 0 : index
    %c0_47 = arith.constant 0 : index
    %72 = vector.load %arg2[%c7_45, %c0_46, %c0_47] : memref<9x1x8xf32, #tpu.memory_space<vmem>>, vector<1x1x8xf32>
    %73 = vector.shape_cast %72 : vector<1x1x8xf32> to vector<1x8xf32>
    %74 = vector.extract_strided_slice %73 {offsets = [0, 0], sizes = [1, 1], strides = [1, 1]} : vector<1x8xf32> to vector<1x1xf32>
    %75 = vector.broadcast %74 : vector<1x1xf32> to vector<1x1024xf32>
    %76 = arith.mulf %75, %71 : vector<1x1024xf32>
    %77 = arith.addf %68, %76 : vector<1x1024xf32>
    %c0_48 = arith.constant 0 : index
    %c161 = arith.constant 161 : index
    %78 = vector.load %arg37[%c0_48, %c161] : memref<8x1280xf32, #tpu.memory_space<vmem>>, vector<1x1024xf32>
    %c8 = arith.constant 8 : index
    %c0_49 = arith.constant 0 : index
    %79 = vector.load %arg26[%c8, %c0_49] : memref<9x1024xf32, #tpu.memory_space<vmem>>, vector<1x1024xf32>
    %80 = arith.mulf %78, %79 : vector<1x1024xf32>
    %c8_50 = arith.constant 8 : index
    %c0_51 = arith.constant 0 : index
    %c0_52 = arith.constant 0 : index
    %81 = vector.load %arg2[%c8_50, %c0_51, %c0_52] : memref<9x1x8xf32, #tpu.memory_space<vmem>>, vector<1x1x8xf32>
    %82 = vector.shape_cast %81 : vector<1x1x8xf32> to vector<1x8xf32>
    %83 = vector.extract_strided_slice %82 {offsets = [0, 0], sizes = [1, 1], strides = [1, 1]} : vector<1x8xf32> to vector<1x1xf32>
    %84 = vector.broadcast %83 : vector<1x1xf32> to vector<1x1024xf32>
    %85 = arith.mulf %84, %80 : vector<1x1024xf32>
    %86 = arith.addf %77, %85 : vector<1x1024xf32>
    %c0_53 = arith.constant 0 : index
    %c0_54 = arith.constant 0 : index
    %87 = vector.load %arg14[%c0_53, %c0_54] : memref<1x1xf32, #tpu.memory_space<vmem>>, vector<1x1xf32>
    %88 = vector.broadcast %87 : vector<1x1xf32> to vector<1x1024xf32>
    %89 = arith.addf %86, %88 : vector<1x1024xf32>
    %cst_55 = arith.constant 0.000000e+00 : f32
    %90 = vector.broadcast %cst_55 : f32 to vector<1x1024xf32>
    %91 = arith.maximumf %89, %90 : vector<1x1024xf32>
    %92 = arith.addf %91, %3 : vector<1x1024xf32>
    %c0_56 = arith.constant 0 : index
    %c128_57 = arith.constant 128 : index
    %93 = vector.load %arg37[%c0_56, %c128_57] : memref<8x1280xf32, #tpu.memory_space<vmem>>, vector<1x1024xf32>
    tpu.vector_store %arg37[%c0_56, %c128_57], %92 {strides = array<i32>} : memref<8x1280xf32, #tpu.memory_space<vmem>>, vector<1x1024xf32>,
    %cst_58 = arith.constant 0.000000e+00 : f32
    %94 = vector.broadcast %cst_58 : f32 to vector<1x1024xf32>
    %c0_59 = arith.constant 0 : index
    %c95_60 = arith.constant 95 : index
    %95 = vector.load %arg37[%c0_59, %c95_60] : memref<8x1280xf32, #tpu.memory_space<vmem>>, vector<1x1024xf32>
    %c0_61 = arith.constant 0 : index
    %c0_62 = arith.constant 0 : index
    %96 = vector.load %arg26[%c0_61, %c0_62] : memref<9x1024xf32, #tpu.memory_space<vmem>>, vector<1x1024xf32>
    %97 = arith.mulf %95, %96 : vector<1x1024xf32>
    %c0_63 = arith.constant 0 : index
    %c0_64 = arith.constant 0 : index
    %c0_65 = arith.constant 0 : index
    %98 = vector.load %arg3[%c0_63, %c0_64, %c0_65] : memref<9x1x8xf32, #tpu.memory_space<vmem>>, vector<1x1x8xf32>
    %99 = vector.shape_cast %98 : vector<1x1x8xf32> to vector<1x8xf32>
    %100 = vector.extract_strided_slice %99 {offsets = [0, 0], sizes = [1, 1], strides = [1, 1]} : vector<1x8xf32> to vector<1x1xf32>
    %101 = vector.broadcast %100 : vector<1x1xf32> to vector<1x1024xf32>
    %102 = arith.mulf %101, %97 : vector<1x1024xf32>
    %103 = arith.addf %94, %102 : vector<1x1024xf32>
    %c0_66 = arith.constant 0 : index
    %c96_67 = arith.constant 96 : index
    %104 = vector.load %arg37[%c0_66, %c96_67] : memref<8x1280xf32, #tpu.memory_space<vmem>>, vector<1x1024xf32>
    %c1_68 = arith.constant 1 : index
    %c0_69 = arith.constant 0 : index
    %105 = vector.load %arg26[%c1_68, %c0_69] : memref<9x1024xf32, #tpu.memory_space<vmem>>, vector<1x1024xf32>
    %106 = arith.mulf %104, %105 : vector<1x1024xf32>
    %c1_70 = arith.constant 1 : index
    %c0_71 = arith.constant 0 : index
    %c0_72 = arith.constant 0 : index
    %107 = vector.load %arg3[%c1_70, %c0_71, %c0_72] : memref<9x1x8xf32, #tpu.memory_space<vmem>>, vector<1x1x8xf32>
    %108 = vector.shape_cast %107 : vector<1x1x8xf32> to vector<1x8xf32>
    %109 = vector.extract_strided_slice %108 {offsets = [0, 0], sizes = [1, 1], strides = [1, 1]} : vector<1x8xf32> to vector<1x1xf32>
    %110 = vector.broadcast %109 : vector<1x1xf32> to vector<1x1024xf32>
    %111 = arith.mulf %110, %106 : vector<1x1024xf32>
    %112 = arith.addf %103, %111 : vector<1x1024xf32>
    %c0_73 = arith.constant 0 : index
    %c97_74 = arith.constant 97 : index
    %113 = vector.load %arg37[%c0_73, %c97_74] : memref<8x1280xf32, #tpu.memory_space<vmem>>, vector<1x1024xf32>
    %c2_75 = arith.constant 2 : index
    %c0_76 = arith.constant 0 : index
    %114 = vector.load %arg26[%c2_75, %c0_76] : memref<9x1024xf32, #tpu.memory_space<vmem>>, vector<1x1024xf32>
    %115 = arith.mulf %113, %114 : vector<1x1024xf32>
    %c2_77 = arith.constant 2 : index
    %c0_78 = arith.constant 0 : index
    %c0_79 = arith.constant 0 : index
    %116 = vector.load %arg3[%c2_77, %c0_78, %c0_79] : memref<9x1x8xf32, #tpu.memory_space<vmem>>, vector<1x1x8xf32>
    %117 = vector.shape_cast %116 : vector<1x1x8xf32> to vector<1x8xf32>
    %118 = vector.extract_strided_slice %117 {offsets = [0, 0], sizes = [1, 1], strides = [1, 1]} : vector<1x8xf32> to vector<1x1xf32>
    %119 = vector.broadcast %118 : vector<1x1xf32> to vector<1x1024xf32>
    %120 = arith.mulf %119, %115 : vector<1x1024xf32>
    %121 = arith.addf %112, %120 : vector<1x1024xf32>
    %c0_80 = arith.constant 0 : index
    %c127_81 = arith.constant 127 : index
    %122 = vector.load %arg37[%c0_80, %c127_81] : memref<8x1280xf32, #tpu.memory_space<vmem>>, vector<1x1024xf32>
    %c3_82 = arith.constant 3 : index
    %c0_83 = arith.constant 0 : index
    %123 = vector.load %arg26[%c3_82, %c0_83] : memref<9x1024xf32, #tpu.memory_space<vmem>>, vector<1x1024xf32>
    %124 = arith.mulf %122, %123 : vector<1x1024xf32>
    %c3_84 = arith.constant 3 : index
    %c0_85 = arith.constant 0 : index
    %c0_86 = arith.constant 0 : index
    %125 = vector.load %arg3[%c3_84, %c0_85, %c0_86] : memref<9x1x8xf32, #tpu.memory_space<vmem>>, vector<1x1x8xf32>
    %126 = vector.shape_cast %125 : vector<1x1x8xf32> to vector<1x8xf32>
    %127 = vector.extract_strided_slice %126 {offsets = [0, 0], sizes = [1, 1], strides = [1, 1]} : vector<1x8xf32> to vector<1x1xf32>
    %128 = vector.broadcast %127 : vector<1x1xf32> to vector<1x1024xf32>
    %129 = arith.mulf %128, %124 : vector<1x1024xf32>
    %130 = arith.addf %121, %129 : vector<1x1024xf32>
    %c0_87 = arith.constant 0 : index
    %c128_88 = arith.constant 128 : index
    %131 = vector.load %arg37[%c0_87, %c128_88] : memref<8x1280xf32, #tpu.memory_space<vmem>>, vector<1x1024xf32>
    %c4_89 = arith.constant 4 : index
    %c0_90 = arith.constant 0 : index
    %132 = vector.load %arg26[%c4_89, %c0_90] : memref<9x1024xf32, #tpu.memory_space<vmem>>, vector<1x1024xf32>
    %133 = arith.mulf %131, %132 : vector<1x1024xf32>
    %c4_91 = arith.constant 4 : index
    %c0_92 = arith.constant 0 : index
    %c0_93 = arith.constant 0 : index
    %134 = vector.load %arg3[%c4_91, %c0_92, %c0_93] : memref<9x1x8xf32, #tpu.memory_space<vmem>>, vector<1x1x8xf32>
    %135 = vector.shape_cast %134 : vector<1x1x8xf32> to vector<1x8xf32>
    %136 = vector.extract_strided_slice %135 {offsets = [0, 0], sizes = [1, 1], strides = [1, 1]} : vector<1x8xf32> to vector<1x1xf32>
    %137 = vector.broadcast %136 : vector<1x1xf32> to vector<1x1024xf32>
    %138 = arith.mulf %137, %133 : vector<1x1024xf32>
    %139 = arith.addf %130, %138 : vector<1x1024xf32>
    %c0_94 = arith.constant 0 : index
    %c129_95 = arith.constant 129 : index
    %140 = vector.load %arg37[%c0_94, %c129_95] : memref<8x1280xf32, #tpu.memory_space<vmem>>, vector<1x1024xf32>
    %c5_96 = arith.constant 5 : index
    %c0_97 = arith.constant 0 : index
    %141 = vector.load %arg26[%c5_96, %c0_97] : memref<9x1024xf32, #tpu.memory_space<vmem>>, vector<1x1024xf32>
    %142 = arith.mulf %140, %141 : vector<1x1024xf32>
    %c5_98 = arith.constant 5 : index
    %c0_99 = arith.constant 0 : index
    %c0_100 = arith.constant 0 : index
    %143 = vector.load %arg3[%c5_98, %c0_99, %c0_100] : memref<9x1x8xf32, #tpu.memory_space<vmem>>, vector<1x1x8xf32>
    %144 = vector.shape_cast %143 : vector<1x1x8xf32> to vector<1x8xf32>
    %145 = vector.extract_strided_slice %144 {offsets = [0, 0], sizes = [1, 1], strides = [1, 1]} : vector<1x8xf32> to vector<1x1xf32>
    %146 = vector.broadcast %145 : vector<1x1xf32> to vector<1x1024xf32>
    %147 = arith.mulf %146, %142 : vector<1x1024xf32>
    %148 = arith.addf %139, %147 : vector<1x1024xf32>
    %c0_101 = arith.constant 0 : index
    %c159_102 = arith.constant 159 : index
    %149 = vector.load %arg37[%c0_101, %c159_102] : memref<8x1280xf32, #tpu.memory_space<vmem>>, vector<1x1024xf32>
    %c6_103 = arith.constant 6 : index
    %c0_104 = arith.constant 0 : index
    %150 = vector.load %arg26[%c6_103, %c0_104] : memref<9x1024xf32, #tpu.memory_space<vmem>>, vector<1x1024xf32>
    %151 = arith.mulf %149, %150 : vector<1x1024xf32>
    %c6_105 = arith.constant 6 : index
    %c0_106 = arith.constant 0 : index
    %c0_107 = arith.constant 0 : index
    %152 = vector.load %arg3[%c6_105, %c0_106, %c0_107] : memref<9x1x8xf32, #tpu.memory_space<vmem>>, vector<1x1x8xf32>
    %153 = vector.shape_cast %152 : vector<1x1x8xf32> to vector<1x8xf32>
    %154 = vector.extract_strided_slice %153 {offsets = [0, 0], sizes = [1, 1], strides = [1, 1]} : vector<1x8xf32> to vector<1x1xf32>
    %155 = vector.broadcast %154 : vector<1x1xf32> to vector<1x1024xf32>
    %156 = arith.mulf %155, %151 : vector<1x1024xf32>
    %157 = arith.addf %148, %156 : vector<1x1024xf32>
    %c0_108 = arith.constant 0 : index
    %c160_109 = arith.constant 160 : index
    %158 = vector.load %arg37[%c0_108, %c160_109] : memref<8x1280xf32, #tpu.memory_space<vmem>>, vector<1x1024xf32>
    %c7_110 = arith.constant 7 : index
    %c0_111 = arith.constant 0 : index
    %159 = vector.load %arg26[%c7_110, %c0_111] : memref<9x1024xf32, #tpu.memory_space<vmem>>, vector<1x1024xf32>
    %160 = arith.mulf %158, %159 : vector<1x1024xf32>
    %c7_112 = arith.constant 7 : index
    %c0_113 = arith.constant 0 : index
    %c0_114 = arith.constant 0 : index
    %161 = vector.load %arg3[%c7_112, %c0_113, %c0_114] : memref<9x1x8xf32, #tpu.memory_space<vmem>>, vector<1x1x8xf32>
    %162 = vector.shape_cast %161 : vector<1x1x8xf32> to vector<1x8xf32>
    %163 = vector.extract_strided_slice %162 {offsets = [0, 0], sizes = [1, 1], strides = [1, 1]} : vector<1x8xf32> to vector<1x1xf32>
    %164 = vector.broadcast %163 : vector<1x1xf32> to vector<1x1024xf32>
    %165 = arith.mulf %164, %160 : vector<1x1024xf32>
    %166 = arith.addf %157, %165 : vector<1x1024xf32>
    %c0_115 = arith.constant 0 : index
    %c161_116 = arith.constant 161 : index
    %167 = vector.load %arg37[%c0_115, %c161_116] : memref<8x1280xf32, #tpu.memory_space<vmem>>, vector<1x1024xf32>
    %c8_117 = arith.constant 8 : index
    %c0_118 = arith.constant 0 : index
    %168 = vector.load %arg26[%c8_117, %c0_118] : memref<9x1024xf32, #tpu.memory_space<vmem>>, vector<1x1024xf32>
    %169 = arith.mulf %167, %168 : vector<1x1024xf32>
    %c8_119 = arith.constant 8 : index
    %c0_120 = arith.constant 0 : index
    %c0_121 = arith.constant 0 : index
    %170 = vector.load %arg3[%c8_119, %c0_120, %c0_121] : memref<9x1x8xf32, #tpu.memory_space<vmem>>, vector<1x1x8xf32>
    %171 = vector.shape_cast %170 : vector<1x1x8xf32> to vector<1x8xf32>
    %172 = vector.extract_strided_slice %171 {offsets = [0, 0], sizes = [1, 1], strides = [1, 1]} : vector<1x8xf32> to vector<1x1xf32>
    %173 = vector.broadcast %172 : vector<1x1xf32> to vector<1x1024xf32>
    %174 = arith.mulf %173, %169 : vector<1x1024xf32>
    %175 = arith.addf %166, %174 : vector<1x1024xf32>
    %c0_122 = arith.constant 0 : index
    %c0_123 = arith.constant 0 : index
    %176 = vector.load %arg15[%c0_122, %c0_123] : memref<1x1xf32, #tpu.memory_space<vmem>>, vector<1x1xf32>
    %177 = vector.broadcast %176 : vector<1x1xf32> to vector<1x1024xf32>
    %178 = arith.addf %175, %177 : vector<1x1024xf32>
    %cst_124 = arith.constant 0.000000e+00 : f32
    %179 = vector.broadcast %cst_124 : f32 to vector<1x1024xf32>
    %180 = arith.maximumf %178, %179 : vector<1x1024xf32>
    %181 = arith.addf %180, %92 : vector<1x1024xf32>
    %c0_125 = arith.constant 0 : index
    %c128_126 = arith.constant 128 : index
    %182 = vector.load %arg37[%c0_125, %c128_126] : memref<8x1280xf32, #tpu.memory_space<vmem>>, vector<1x1024xf32>
    tpu.vector_store %arg37[%c0_125, %c128_126], %181 {strides = array<i32>} : memref<8x1280xf32, #tpu.memory_space<vmem>>, vector<1x1024xf32>,
    %cst_127 = arith.constant 0.000000e+00 : f32
    %183 = vector.broadcast %cst_127 : f32 to vector<2x1024xf32>
    %c0_128 = arith.constant 0 : index
    %c95_129 = arith.constant 95 : index
    %184 = vector.load %arg37[%c0_128, %c95_129] : memref<8x1280xf32, #tpu.memory_space<vmem>>, vector<1x1024xf32>
    %c0_130 = arith.constant 0 : index
    %c0_131 = arith.constant 0 : index
    %185 = vector.load %arg26[%c0_130, %c0_131] : memref<9x1024xf32, #tpu.memory_space<vmem>>, vector<1x1024xf32>
    %186 = arith.mulf %184, %185 : vector<1x1024xf32>
    %c0_132 = arith.constant 0 : index
    %c0_133 = arith.constant 0 : index
    %c0_134 = arith.constant 0 : index
    %187 = vector.load %arg4[%c0_132, %c0_133, %c0_134] : memref<9x2x8xf32, #tpu.memory_space<vmem>>, vector<1x2x8xf32>
    %188 = vector.shape_cast %187 : vector<1x2x8xf32> to vector<2x8xf32>
    %189 = vector.extract_strided_slice %188 {offsets = [0, 0], sizes = [2, 1], strides = [1, 1]} : vector<2x8xf32> to vector<2x1xf32>
    %190 = vector.broadcast %189 : vector<2x1xf32> to vector<2x1024xf32>
    %191 = vector.broadcast %186 : vector<1x1024xf32> to vector<2x1024xf32>
    %192 = arith.mulf %190, %191 : vector<2x1024xf32>
    %193 = arith.addf %183, %192 : vector<2x1024xf32>
    %c0_135 = arith.constant 0 : index
    %c96_136 = arith.constant 96 : index
    %194 = vector.load %arg37[%c0_135, %c96_136] : memref<8x1280xf32, #tpu.memory_space<vmem>>, vector<1x1024xf32>
    %c1_137 = arith.constant 1 : index
    %c0_138 = arith.constant 0 : index
    %195 = vector.load %arg26[%c1_137, %c0_138] : memref<9x1024xf32, #tpu.memory_space<vmem>>, vector<1x1024xf32>
    %196 = arith.mulf %194, %195 : vector<1x1024xf32>
    %c1_139 = arith.constant 1 : index
    %c0_140 = arith.constant 0 : index
    %c0_141 = arith.constant 0 : index
    %197 = vector.load %arg4[%c1_139, %c0_140, %c0_141] : memref<9x2x8xf32, #tpu.memory_space<vmem>>, vector<1x2x8xf32>
    %198 = vector.shape_cast %197 : vector<1x2x8xf32> to vector<2x8xf32>
    %199 = vector.extract_strided_slice %198 {offsets = [0, 0], sizes = [2, 1], strides = [1, 1]} : vector<2x8xf32> to vector<2x1xf32>
    %200 = vector.broadcast %199 : vector<2x1xf32> to vector<2x1024xf32>
    %201 = vector.broadcast %196 : vector<1x1024xf32> to vector<2x1024xf32>
    %202 = arith.mulf %200, %201 : vector<2x1024xf32>
    %203 = arith.addf %193, %202 : vector<2x1024xf32>
    %c0_142 = arith.constant 0 : index
    %c97_143 = arith.constant 97 : index
    %204 = vector.load %arg37[%c0_142, %c97_143] : memref<8x1280xf32, #tpu.memory_space<vmem>>, vector<1x1024xf32>
    %c2_144 = arith.constant 2 : index
    %c0_145 = arith.constant 0 : index
    %205 = vector.load %arg26[%c2_144, %c0_145] : memref<9x1024xf32, #tpu.memory_space<vmem>>, vector<1x1024xf32>
    %206 = arith.mulf %204, %205 : vector<1x1024xf32>
    %c2_146 = arith.constant 2 : index
    %c0_147 = arith.constant 0 : index
    %c0_148 = arith.constant 0 : index
    %207 = vector.load %arg4[%c2_146, %c0_147, %c0_148] : memref<9x2x8xf32, #tpu.memory_space<vmem>>, vector<1x2x8xf32>
    %208 = vector.shape_cast %207 : vector<1x2x8xf32> to vector<2x8xf32>
    %209 = vector.extract_strided_slice %208 {offsets = [0, 0], sizes = [2, 1], strides = [1, 1]} : vector<2x8xf32> to vector<2x1xf32>
    %210 = vector.broadcast %209 : vector<2x1xf32> to vector<2x1024xf32>
    %211 = vector.broadcast %206 : vector<1x1024xf32> to vector<2x1024xf32>
    %212 = arith.mulf %210, %211 : vector<2x1024xf32>
    %213 = arith.addf %203, %212 : vector<2x1024xf32>
    %c0_149 = arith.constant 0 : index
    %c127_150 = arith.constant 127 : index
    %214 = vector.load %arg37[%c0_149, %c127_150] : memref<8x1280xf32, #tpu.memory_space<vmem>>, vector<1x1024xf32>
    %c3_151 = arith.constant 3 : index
    %c0_152 = arith.constant 0 : index
    %215 = vector.load %arg26[%c3_151, %c0_152] : memref<9x1024xf32, #tpu.memory_space<vmem>>, vector<1x1024xf32>
    %216 = arith.mulf %214, %215 : vector<1x1024xf32>
    %c3_153 = arith.constant 3 : index
    %c0_154 = arith.constant 0 : index
    %c0_155 = arith.constant 0 : index
    %217 = vector.load %arg4[%c3_153, %c0_154, %c0_155] : memref<9x2x8xf32, #tpu.memory_space<vmem>>, vector<1x2x8xf32>
    %218 = vector.shape_cast %217 : vector<1x2x8xf32> to vector<2x8xf32>
    %219 = vector.extract_strided_slice %218 {offsets = [0, 0], sizes = [2, 1], strides = [1, 1]} : vector<2x8xf32> to vector<2x1xf32>
    %220 = vector.broadcast %219 : vector<2x1xf32> to vector<2x1024xf32>
    %221 = vector.broadcast %216 : vector<1x1024xf32> to vector<2x1024xf32>
    %222 = arith.mulf %220, %221 : vector<2x1024xf32>
    %223 = arith.addf %213, %222 : vector<2x1024xf32>
    %c0_156 = arith.constant 0 : index
    %c128_157 = arith.constant 128 : index
    %224 = vector.load %arg37[%c0_156, %c128_157] : memref<8x1280xf32, #tpu.memory_space<vmem>>, vector<1x1024xf32>
    %c4_158 = arith.constant 4 : index
    %c0_159 = arith.constant 0 : index
    %225 = vector.load %arg26[%c4_158, %c0_159] : memref<9x1024xf32, #tpu.memory_space<vmem>>, vector<1x1024xf32>
    %226 = arith.mulf %224, %225 : vector<1x1024xf32>
    %c4_160 = arith.constant 4 : index
    %c0_161 = arith.constant 0 : index
    %c0_162 = arith.constant 0 : index
    %227 = vector.load %arg4[%c4_160, %c0_161, %c0_162] : memref<9x2x8xf32, #tpu.memory_space<vmem>>, vector<1x2x8xf32>
    %228 = vector.shape_cast %227 : vector<1x2x8xf32> to vector<2x8xf32>
    %229 = vector.extract_strided_slice %228 {offsets = [0, 0], sizes = [2, 1], strides = [1, 1]} : vector<2x8xf32> to vector<2x1xf32>
    %230 = vector.broadcast %229 : vector<2x1xf32> to vector<2x1024xf32>
    %231 = vector.broadcast %226 : vector<1x1024xf32> to vector<2x1024xf32>
    %232 = arith.mulf %230, %231 : vector<2x1024xf32>
    %233 = arith.addf %223, %232 : vector<2x1024xf32>
    %c0_163 = arith.constant 0 : index
    %c129_164 = arith.constant 129 : index
    %234 = vector.load %arg37[%c0_163, %c129_164] : memref<8x1280xf32, #tpu.memory_space<vmem>>, vector<1x1024xf32>
    %c5_165 = arith.constant 5 : index
    %c0_166 = arith.constant 0 : index
    %235 = vector.load %arg26[%c5_165, %c0_166] : memref<9x1024xf32, #tpu.memory_space<vmem>>, vector<1x1024xf32>
    %236 = arith.mulf %234, %235 : vector<1x1024xf32>
    %c5_167 = arith.constant 5 : index
    %c0_168 = arith.constant 0 : index
    %c0_169 = arith.constant 0 : index
    %237 = vector.load %arg4[%c5_167, %c0_168, %c0_169] : memref<9x2x8xf32, #tpu.memory_space<vmem>>, vector<1x2x8xf32>
    %238 = vector.shape_cast %237 : vector<1x2x8xf32> to vector<2x8xf32>
    %239 = vector.extract_strided_slice %238 {offsets = [0, 0], sizes = [2, 1], strides = [1, 1]} : vector<2x8xf32> to vector<2x1xf32>
    %240 = vector.broadcast %239 : vector<2x1xf32> to vector<2x1024xf32>
    %241 = vector.broadcast %236 : vector<1x1024xf32> to vector<2x1024xf32>
    %242 = arith.mulf %240, %241 : vector<2x1024xf32>
    %243 = arith.addf %233, %242 : vector<2x1024xf32>
    %c0_170 = arith.constant 0 : index
    %c159_171 = arith.constant 159 : index
    %244 = vector.load %arg37[%c0_170, %c159_171] : memref<8x1280xf32, #tpu.memory_space<vmem>>, vector<1x1024xf32>
    %c6_172 = arith.constant 6 : index
    %c0_173 = arith.constant 0 : index
    %245 = vector.load %arg26[%c6_172, %c0_173] : memref<9x1024xf32, #tpu.memory_space<vmem>>, vector<1x1024xf32>
    %246 = arith.mulf %244, %245 : vector<1x1024xf32>
    %c6_174 = arith.constant 6 : index
    %c0_175 = arith.constant 0 : index
    %c0_176 = arith.constant 0 : index
    %247 = vector.load %arg4[%c6_174, %c0_175, %c0_176] : memref<9x2x8xf32, #tpu.memory_space<vmem>>, vector<1x2x8xf32>
    %248 = vector.shape_cast %247 : vector<1x2x8xf32> to vector<2x8xf32>
    %249 = vector.extract_strided_slice %248 {offsets = [0, 0], sizes = [2, 1], strides = [1, 1]} : vector<2x8xf32> to vector<2x1xf32>
    %250 = vector.broadcast %249 : vector<2x1xf32> to vector<2x1024xf32>
    %251 = vector.broadcast %246 : vector<1x1024xf32> to vector<2x1024xf32>
    %252 = arith.mulf %250, %251 : vector<2x1024xf32>
    %253 = arith.addf %243, %252 : vector<2x1024xf32>
    %c0_177 = arith.constant 0 : index
    %c160_178 = arith.constant 160 : index
    %254 = vector.load %arg37[%c0_177, %c160_178] : memref<8x1280xf32, #tpu.memory_space<vmem>>, vector<1x1024xf32>
    %c7_179 = arith.constant 7 : index
    %c0_180 = arith.constant 0 : index
    %255 = vector.load %arg26[%c7_179, %c0_180] : memref<9x1024xf32, #tpu.memory_space<vmem>>, vector<1x1024xf32>
    %256 = arith.mulf %254, %255 : vector<1x1024xf32>
    %c7_181 = arith.constant 7 : index
    %c0_182 = arith.constant 0 : index
    %c0_183 = arith.constant 0 : index
    %257 = vector.load %arg4[%c7_181, %c0_182, %c0_183] : memref<9x2x8xf32, #tpu.memory_space<vmem>>, vector<1x2x8xf32>
    %258 = vector.shape_cast %257 : vector<1x2x8xf32> to vector<2x8xf32>
    %259 = vector.extract_strided_slice %258 {offsets = [0, 0], sizes = [2, 1], strides = [1, 1]} : vector<2x8xf32> to vector<2x1xf32>
    %260 = vector.broadcast %259 : vector<2x1xf32> to vector<2x1024xf32>
    %261 = vector.broadcast %256 : vector<1x1024xf32> to vector<2x1024xf32>
    %262 = arith.mulf %260, %261 : vector<2x1024xf32>
    %263 = arith.addf %253, %262 : vector<2x1024xf32>
    %c0_184 = arith.constant 0 : index
    %c161_185 = arith.constant 161 : index
    %264 = vector.load %arg37[%c0_184, %c161_185] : memref<8x1280xf32, #tpu.memory_space<vmem>>, vector<1x1024xf32>
    %c8_186 = arith.constant 8 : index
    %c0_187 = arith.constant 0 : index
    %265 = vector.load %arg26[%c8_186, %c0_187] : memref<9x1024xf32, #tpu.memory_space<vmem>>, vector<1x1024xf32>
    %266 = arith.mulf %264, %265 : vector<1x1024xf32>
    %c8_188 = arith.constant 8 : index
    %c0_189 = arith.constant 0 : index
    %c0_190 = arith.constant 0 : index
    %267 = vector.load %arg4[%c8_188, %c0_189, %c0_190] : memref<9x2x8xf32, #tpu.memory_space<vmem>>, vector<1x2x8xf32>
    %268 = vector.shape_cast %267 : vector<1x2x8xf32> to vector<2x8xf32>
    %269 = vector.extract_strided_slice %268 {offsets = [0, 0], sizes = [2, 1], strides = [1, 1]} : vector<2x8xf32> to vector<2x1xf32>
    %270 = vector.broadcast %269 : vector<2x1xf32> to vector<2x1024xf32>
    %271 = vector.broadcast %266 : vector<1x1024xf32> to vector<2x1024xf32>
    %272 = arith.mulf %270, %271 : vector<2x1024xf32>
    %273 = arith.addf %263, %272 : vector<2x1024xf32>
    %c0_191 = arith.constant 0 : index
    %c0_192 = arith.constant 0 : index
    %274 = vector.load %arg30[%c0_191, %c0_192] : memref<1024x256xf32, #tpu.memory_space<vmem>>, vector<1024x256xf32>
    %cst_193 = arith.constant dense<0.000000e+00> : vector<2x256xf32>
    %275 = tpu.matmul %273, %274, %cst_193 {dimension_numbers = #tpu.dot_dimension_numbers<[1], [0], [0], [1], [0, 0, 1, 1], [], []>} : vector<2x1024xf32>, vector<1024x256xf32>, vector<2x256xf32> -> vector<2x256xf32>
    %c0_194 = arith.constant 0 : index
    %c0_195 = arith.constant 0 : index
    %276 = vector.load %arg16[%c0_194, %c0_195] : memref<2x1xf32, #tpu.memory_space<vmem>>, vector<2x1xf32>
    %277 = vector.broadcast %276 : vector<2x1xf32> to vector<2x256xf32>
    %278 = arith.addf %275, %277 : vector<2x256xf32>
    %cst_196 = arith.constant 0.000000e+00 : f32
    %279 = vector.broadcast %cst_196 : f32 to vector<2x256xf32>
    %280 = arith.maximumf %278, %279 : vector<2x256xf32>
    %281 = arith.addf %280, %278 : vector<2x256xf32>
    %c0_197 = arith.constant 0 : index
    %c128_198 = arith.constant 128 : index
    %282 = vector.load %arg37[%c0_197, %c128_198] : memref<8x1280xf32, #tpu.memory_space<vmem>>, vector<2x256xf32>
    tpu.vector_store %arg37[%c0_197, %c128_198], %281 {strides = array<i32>} : memref<8x1280xf32, #tpu.memory_space<vmem>>, vector<2x256xf32>,
    %cst_199 = arith.constant 0.000000e+00 : f32
    %283 = vector.broadcast %cst_199 : f32 to vector<2x256xf32>
    %c0_200 = arith.constant 0 : index
    %c111 = arith.constant 111 : index
    %284 = vector.load %arg37[%c0_200, %c111] : memref<8x1280xf32, #tpu.memory_space<vmem>>, vector<8x256xf32>
    %c0_201 = arith.constant 0 : index
    %c0_202 = arith.constant 0 : index
    %285 = vector.load %arg27[%c0_201, %c0_202] : memref<9x256xf32, #tpu.memory_space<vmem>>, vector<1x256xf32>
    %286 = vector.broadcast %285 : vector<1x256xf32> to vector<8x256xf32>
    %287 = arith.mulf %284, %286 : vector<8x256xf32>
    %c0_203 = arith.constant 0 : index
    %c0_204 = arith.constant 0 : index
    %c0_205 = arith.constant 0 : index
    %288 = vector.load %arg5[%c0_203, %c0_204, %c0_205] : memref<9x2x8xf32, #tpu.memory_space<vmem>>, vector<1x2x8xf32>
    %289 = vector.shape_cast %288 : vector<1x2x8xf32> to vector<2x8xf32>
    %cst_206 = arith.constant dense<0.000000e+00> : vector<2x256xf32>
    %290 = tpu.matmul %289, %287, %cst_206 {dimension_numbers = #tpu.dot_dimension_numbers<[1], [0], [0], [1], [0, 0, 1, 1], [], []>} : vector<2x8xf32>, vector<8x256xf32>, vector<2x256xf32> -> vector<2x256xf32>
    %291 = arith.addf %283, %290 : vector<2x256xf32>
    %c0_207 = arith.constant 0 : index
    %c112 = arith.constant 112 : index
    %292 = vector.load %arg37[%c0_207, %c112] : memref<8x1280xf32, #tpu.memory_space<vmem>>, vector<8x256xf32>
    %c1_208 = arith.constant 1 : index
    %c0_209 = arith.constant 0 : index
    %293 = vector.load %arg27[%c1_208, %c0_209] : memref<9x256xf32, #tpu.memory_space<vmem>>, vector<1x256xf32>
    %294 = vector.broadcast %293 : vector<1x256xf32> to vector<8x256xf32>
    %295 = arith.mulf %292, %294 : vector<8x256xf32>
    %c1_210 = arith.constant 1 : index
    %c0_211 = arith.constant 0 : index
    %c0_212 = arith.constant 0 : index
    %296 = vector.load %arg5[%c1_210, %c0_211, %c0_212] : memref<9x2x8xf32, #tpu.memory_space<vmem>>, vector<1x2x8xf32>
    %297 = vector.shape_cast %296 : vector<1x2x8xf32> to vector<2x8xf32>
    %cst_213 = arith.constant dense<0.000000e+00> : vector<2x256xf32>
    %298 = tpu.matmul %297, %295, %cst_213 {dimension_numbers = #tpu.dot_dimension_numbers<[1], [0], [0], [1], [0, 0, 1, 1], [], []>} : vector<2x8xf32>, vector<8x256xf32>, vector<2x256xf32> -> vector<2x256xf32>
    %299 = arith.addf %291, %298 : vector<2x256xf32>
    %c0_214 = arith.constant 0 : index
    %c113 = arith.constant 113 : index
    %300 = vector.load %arg37[%c0_214, %c113] : memref<8x1280xf32, #tpu.memory_space<vmem>>, vector<8x256xf32>
    %c2_215 = arith.constant 2 : index
    %c0_216 = arith.constant 0 : index
    %301 = vector.load %arg27[%c2_215, %c0_216] : memref<9x256xf32, #tpu.memory_space<vmem>>, vector<1x256xf32>
    %302 = vector.broadcast %301 : vector<1x256xf32> to vector<8x256xf32>
    %303 = arith.mulf %300, %302 : vector<8x256xf32>
    %c2_217 = arith.constant 2 : index
    %c0_218 = arith.constant 0 : index
    %c0_219 = arith.constant 0 : index
    %304 = vector.load %arg5[%c2_217, %c0_218, %c0_219] : memref<9x2x8xf32, #tpu.memory_space<vmem>>, vector<1x2x8xf32>
    %305 = vector.shape_cast %304 : vector<1x2x8xf32> to vector<2x8xf32>
    %cst_220 = arith.constant dense<0.000000e+00> : vector<2x256xf32>
    %306 = tpu.matmul %305, %303, %cst_220 {dimension_numbers = #tpu.dot_dimension_numbers<[1], [0], [0], [1], [0, 0, 1, 1], [], []>} : vector<2x8xf32>, vector<8x256xf32>, vector<2x256xf32> -> vector<2x256xf32>
    %307 = arith.addf %299, %306 : vector<2x256xf32>
    %c0_221 = arith.constant 0 : index
    %c127_222 = arith.constant 127 : index
    %308 = vector.load %arg37[%c0_221, %c127_222] : memref<8x1280xf32, #tpu.memory_space<vmem>>, vector<8x256xf32>
    %c3_223 = arith.constant 3 : index
    %c0_224 = arith.constant 0 : index
    %309 = vector.load %arg27[%c3_223, %c0_224] : memref<9x256xf32, #tpu.memory_space<vmem>>, vector<1x256xf32>
    %310 = vector.broadcast %309 : vector<1x256xf32> to vector<8x256xf32>
    %311 = arith.mulf %308, %310 : vector<8x256xf32>
    %c3_225 = arith.constant 3 : index
    %c0_226 = arith.constant 0 : index
    %c0_227 = arith.constant 0 : index
    %312 = vector.load %arg5[%c3_225, %c0_226, %c0_227] : memref<9x2x8xf32, #tpu.memory_space<vmem>>, vector<1x2x8xf32>
    %313 = vector.shape_cast %312 : vector<1x2x8xf32> to vector<2x8xf32>
    %cst_228 = arith.constant dense<0.000000e+00> : vector<2x256xf32>
    %314 = tpu.matmul %313, %311, %cst_228 {dimension_numbers = #tpu.dot_dimension_numbers<[1], [0], [0], [1], [0, 0, 1, 1], [], []>} : vector<2x8xf32>, vector<8x256xf32>, vector<2x256xf32> -> vector<2x256xf32>
    %315 = arith.addf %307, %314 : vector<2x256xf32>
    %c0_229 = arith.constant 0 : index
    %c128_230 = arith.constant 128 : index
    %316 = vector.load %arg37[%c0_229, %c128_230] : memref<8x1280xf32, #tpu.memory_space<vmem>>, vector<8x256xf32>
    %c4_231 = arith.constant 4 : index
    %c0_232 = arith.constant 0 : index
    %317 = vector.load %arg27[%c4_231, %c0_232] : memref<9x256xf32, #tpu.memory_space<vmem>>, vector<1x256xf32>
    %318 = vector.broadcast %317 : vector<1x256xf32> to vector<8x256xf32>
    %319 = arith.mulf %316, %318 : vector<8x256xf32>
    %c4_233 = arith.constant 4 : index
    %c0_234 = arith.constant 0 : index
    %c0_235 = arith.constant 0 : index
    %320 = vector.load %arg5[%c4_233, %c0_234, %c0_235] : memref<9x2x8xf32, #tpu.memory_space<vmem>>, vector<1x2x8xf32>
    %321 = vector.shape_cast %320 : vector<1x2x8xf32> to vector<2x8xf32>
    %cst_236 = arith.constant dense<0.000000e+00> : vector<2x256xf32>
    %322 = tpu.matmul %321, %319, %cst_236 {dimension_numbers = #tpu.dot_dimension_numbers<[1], [0], [0], [1], [0, 0, 1, 1], [], []>} : vector<2x8xf32>, vector<8x256xf32>, vector<2x256xf32> -> vector<2x256xf32>
    %323 = arith.addf %315, %322 : vector<2x256xf32>
    %c0_237 = arith.constant 0 : index
    %c129_238 = arith.constant 129 : index
    %324 = vector.load %arg37[%c0_237, %c129_238] : memref<8x1280xf32, #tpu.memory_space<vmem>>, vector<8x256xf32>
    %c5_239 = arith.constant 5 : index
    %c0_240 = arith.constant 0 : index
    %325 = vector.load %arg27[%c5_239, %c0_240] : memref<9x256xf32, #tpu.memory_space<vmem>>, vector<1x256xf32>
    %326 = vector.broadcast %325 : vector<1x256xf32> to vector<8x256xf32>
    %327 = arith.mulf %324, %326 : vector<8x256xf32>
    %c5_241 = arith.constant 5 : index
    %c0_242 = arith.constant 0 : index
    %c0_243 = arith.constant 0 : index
    %328 = vector.load %arg5[%c5_241, %c0_242, %c0_243] : memref<9x2x8xf32, #tpu.memory_space<vmem>>, vector<1x2x8xf32>
    %329 = vector.shape_cast %328 : vector<1x2x8xf32> to vector<2x8xf32>
    %cst_244 = arith.constant dense<0.000000e+00> : vector<2x256xf32>
    %330 = tpu.matmul %329, %327, %cst_244 {dimension_numbers = #tpu.dot_dimension_numbers<[1], [0], [0], [1], [0, 0, 1, 1], [], []>} : vector<2x8xf32>, vector<8x256xf32>, vector<2x256xf32> -> vector<2x256xf32>
    %331 = arith.addf %323, %330 : vector<2x256xf32>
    %c0_245 = arith.constant 0 : index
    %c143 = arith.constant 143 : index
    %332 = vector.load %arg37[%c0_245, %c143] : memref<8x1280xf32, #tpu.memory_space<vmem>>, vector<8x256xf32>
    %c6_246 = arith.constant 6 : index
    %c0_247 = arith.constant 0 : index
    %333 = vector.load %arg27[%c6_246, %c0_247] : memref<9x256xf32, #tpu.memory_space<vmem>>, vector<1x256xf32>
    %334 = vector.broadcast %333 : vector<1x256xf32> to vector<8x256xf32>
    %335 = arith.mulf %332, %334 : vector<8x256xf32>
    %c6_248 = arith.constant 6 : index
    %c0_249 = arith.constant 0 : index
    %c0_250 = arith.constant 0 : index
    %336 = vector.load %arg5[%c6_248, %c0_249, %c0_250] : memref<9x2x8xf32, #tpu.memory_space<vmem>>, vector<1x2x8xf32>
    %337 = vector.shape_cast %336 : vector<1x2x8xf32> to vector<2x8xf32>
    %cst_251 = arith.constant dense<0.000000e+00> : vector<2x256xf32>
    %338 = tpu.matmul %337, %335, %cst_251 {dimension_numbers = #tpu.dot_dimension_numbers<[1], [0], [0], [1], [0, 0, 1, 1], [], []>} : vector<2x8xf32>, vector<8x256xf32>, vector<2x256xf32> -> vector<2x256xf32>
    %339 = arith.addf %331, %338 : vector<2x256xf32>
    %c0_252 = arith.constant 0 : index
    %c144 = arith.constant 144 : index
    %340 = vector.load %arg37[%c0_252, %c144] : memref<8x1280xf32, #tpu.memory_space<vmem>>, vector<8x256xf32>
    %c7_253 = arith.constant 7 : index
    %c0_254 = arith.constant 0 : index
    %341 = vector.load %arg27[%c7_253, %c0_254] : memref<9x256xf32, #tpu.memory_space<vmem>>, vector<1x256xf32>
    %342 = vector.broadcast %341 : vector<1x256xf32> to vector<8x256xf32>
    %343 = arith.mulf %340, %342 : vector<8x256xf32>
    %c7_255 = arith.constant 7 : index
    %c0_256 = arith.constant 0 : index
    %c0_257 = arith.constant 0 : index
    %344 = vector.load %arg5[%c7_255, %c0_256, %c0_257] : memref<9x2x8xf32, #tpu.memory_space<vmem>>, vector<1x2x8xf32>
    %345 = vector.shape_cast %344 : vector<1x2x8xf32> to vector<2x8xf32>
    %cst_258 = arith.constant dense<0.000000e+00> : vector<2x256xf32>
    %346 = tpu.matmul %345, %343, %cst_258 {dimension_numbers = #tpu.dot_dimension_numbers<[1], [0], [0], [1], [0, 0, 1, 1], [], []>} : vector<2x8xf32>, vector<8x256xf32>, vector<2x256xf32> -> vector<2x256xf32>
    %347 = arith.addf %339, %346 : vector<2x256xf32>
    %c0_259 = arith.constant 0 : index
    %c145 = arith.constant 145 : index
    %348 = vector.load %arg37[%c0_259, %c145] : memref<8x1280xf32, #tpu.memory_space<vmem>>, vector<8x256xf32>
    %c8_260 = arith.constant 8 : index
    %c0_261 = arith.constant 0 : index
    %349 = vector.load %arg27[%c8_260, %c0_261] : memref<9x256xf32, #tpu.memory_space<vmem>>, vector<1x256xf32>
    %350 = vector.broadcast %349 : vector<1x256xf32> to vector<8x256xf32>
    %351 = arith.mulf %348, %350 : vector<8x256xf32>
    %c8_262 = arith.constant 8 : index
    %c0_263 = arith.constant 0 : index
    %c0_264 = arith.constant 0 : index
    %352 = vector.load %arg5[%c8_262, %c0_263, %c0_264] : memref<9x2x8xf32, #tpu.memory_space<vmem>>, vector<1x2x8xf32>
    %353 = vector.shape_cast %352 : vector<1x2x8xf32> to vector<2x8xf32>
    %cst_265 = arith.constant dense<0.000000e+00> : vector<2x256xf32>
    %354 = tpu.matmul %353, %351, %cst_265 {dimension_numbers = #tpu.dot_dimension_numbers<[1], [0], [0], [1], [0, 0, 1, 1], [], []>} : vector<2x8xf32>, vector<8x256xf32>, vector<2x256xf32> -> vector<2x256xf32>
    %355 = arith.addf %347, %354 : vector<2x256xf32>
    %c0_266 = arith.constant 0 : index
    %c0_267 = arith.constant 0 : index
    %356 = vector.load %arg17[%c0_266, %c0_267] : memref<2x1xf32, #tpu.memory_space<vmem>>, vector<2x1xf32>
    %357 = vector.broadcast %356 : vector<2x1xf32> to vector<2x256xf32>
    %358 = arith.addf %355, %357 : vector<2x256xf32>
    %cst_268 = arith.constant 0.000000e+00 : f32
    %359 = vector.broadcast %cst_268 : f32 to vector<2x256xf32>
    %360 = arith.maximumf %358, %359 : vector<2x256xf32>
    %361 = arith.addf %360, %281 : vector<2x256xf32>
    %c0_269 = arith.constant 0 : index
    %c128_270 = arith.constant 128 : index
    %362 = vector.load %arg37[%c0_269, %c128_270] : memref<8x1280xf32, #tpu.memory_space<vmem>>, vector<2x256xf32>
    tpu.vector_store %arg37[%c0_269, %c128_270], %361 {strides = array<i32>} : memref<8x1280xf32, #tpu.memory_space<vmem>>, vector<2x256xf32>,
    %cst_271 = arith.constant 0.000000e+00 : f32
    %363 = vector.broadcast %cst_271 : f32 to vector<2x256xf32>
    %c0_272 = arith.constant 0 : index
    %c111_273 = arith.constant 111 : index
    %364 = vector.load %arg37[%c0_272, %c111_273] : memref<8x1280xf32, #tpu.memory_space<vmem>>, vector<8x256xf32>
    %c0_274 = arith.constant 0 : index
    %c0_275 = arith.constant 0 : index
    %365 = vector.load %arg27[%c0_274, %c0_275] : memref<9x256xf32, #tpu.memory_space<vmem>>, vector<1x256xf32>
    %366 = vector.broadcast %365 : vector<1x256xf32> to vector<8x256xf32>
    %367 = arith.mulf %364, %366 : vector<8x256xf32>
    %c0_276 = arith.constant 0 : index
    %c0_277 = arith.constant 0 : index
    %c0_278 = arith.constant 0 : index
    %368 = vector.load %arg6[%c0_276, %c0_277, %c0_278] : memref<9x2x8xf32, #tpu.memory_space<vmem>>, vector<1x2x8xf32>
    %369 = vector.shape_cast %368 : vector<1x2x8xf32> to vector<2x8xf32>
    %cst_279 = arith.constant dense<0.000000e+00> : vector<2x256xf32>
    %370 = tpu.matmul %369, %367, %cst_279 {dimension_numbers = #tpu.dot_dimension_numbers<[1], [0], [0], [1], [0, 0, 1, 1], [], []>} : vector<2x8xf32>, vector<8x256xf32>, vector<2x256xf32> -> vector<2x256xf32>
    %371 = arith.addf %363, %370 : vector<2x256xf32>
    %c0_280 = arith.constant 0 : index
    %c112_281 = arith.constant 112 : index
    %372 = vector.load %arg37[%c0_280, %c112_281] : memref<8x1280xf32, #tpu.memory_space<vmem>>, vector<8x256xf32>
    %c1_282 = arith.constant 1 : index
    %c0_283 = arith.constant 0 : index
    %373 = vector.load %arg27[%c1_282, %c0_283] : memref<9x256xf32, #tpu.memory_space<vmem>>, vector<1x256xf32>
    %374 = vector.broadcast %373 : vector<1x256xf32> to vector<8x256xf32>
    %375 = arith.mulf %372, %374 : vector<8x256xf32>
    %c1_284 = arith.constant 1 : index
    %c0_285 = arith.constant 0 : index
    %c0_286 = arith.constant 0 : index
    %376 = vector.load %arg6[%c1_284, %c0_285, %c0_286] : memref<9x2x8xf32, #tpu.memory_space<vmem>>, vector<1x2x8xf32>
    %377 = vector.shape_cast %376 : vector<1x2x8xf32> to vector<2x8xf32>
    %cst_287 = arith.constant dense<0.000000e+00> : vector<2x256xf32>
    %378 = tpu.matmul %377, %375, %cst_287 {dimension_numbers = #tpu.dot_dimension_numbers<[1], [0], [0], [1], [0, 0, 1, 1], [], []>} : vector<2x8xf32>, vector<8x256xf32>, vector<2x256xf32> -> vector<2x256xf32>
    %379 = arith.addf %371, %378 : vector<2x256xf32>
    %c0_288 = arith.constant 0 : index
    %c113_289 = arith.constant 113 : index
    %380 = vector.load %arg37[%c0_288, %c113_289] : memref<8x1280xf32, #tpu.memory_space<vmem>>, vector<8x256xf32>
    %c2_290 = arith.constant 2 : index
    %c0_291 = arith.constant 0 : index
    %381 = vector.load %arg27[%c2_290, %c0_291] : memref<9x256xf32, #tpu.memory_space<vmem>>, vector<1x256xf32>
    %382 = vector.broadcast %381 : vector<1x256xf32> to vector<8x256xf32>
    %383 = arith.mulf %380, %382 : vector<8x256xf32>
    %c2_292 = arith.constant 2 : index
    %c0_293 = arith.constant 0 : index
    %c0_294 = arith.constant 0 : index
    %384 = vector.load %arg6[%c2_292, %c0_293, %c0_294] : memref<9x2x8xf32, #tpu.memory_space<vmem>>, vector<1x2x8xf32>
    %385 = vector.shape_cast %384 : vector<1x2x8xf32> to vector<2x8xf32>
    %cst_295 = arith.constant dense<0.000000e+00> : vector<2x256xf32>
    %386 = tpu.matmul %385, %383, %cst_295 {dimension_numbers = #tpu.dot_dimension_numbers<[1], [0], [0], [1], [0, 0, 1, 1], [], []>} : vector<2x8xf32>, vector<8x256xf32>, vector<2x256xf32> -> vector<2x256xf32>
    %387 = arith.addf %379, %386 : vector<2x256xf32>
    %c0_296 = arith.constant 0 : index
    %c127_297 = arith.constant 127 : index
    %388 = vector.load %arg37[%c0_296, %c127_297] : memref<8x1280xf32, #tpu.memory_space<vmem>>, vector<8x256xf32>
    %c3_298 = arith.constant 3 : index
    %c0_299 = arith.constant 0 : index
    %389 = vector.load %arg27[%c3_298, %c0_299] : memref<9x256xf32, #tpu.memory_space<vmem>>, vector<1x256xf32>
    %390 = vector.broadcast %389 : vector<1x256xf32> to vector<8x256xf32>
    %391 = arith.mulf %388, %390 : vector<8x256xf32>
    %c3_300 = arith.constant 3 : index
    %c0_301 = arith.constant 0 : index
    %c0_302 = arith.constant 0 : index
    %392 = vector.load %arg6[%c3_300, %c0_301, %c0_302] : memref<9x2x8xf32, #tpu.memory_space<vmem>>, vector<1x2x8xf32>
    %393 = vector.shape_cast %392 : vector<1x2x8xf32> to vector<2x8xf32>
    %cst_303 = arith.constant dense<0.000000e+00> : vector<2x256xf32>
    %394 = tpu.matmul %393, %391, %cst_303 {dimension_numbers = #tpu.dot_dimension_numbers<[1], [0], [0], [1], [0, 0, 1, 1], [], []>} : vector<2x8xf32>, vector<8x256xf32>, vector<2x256xf32> -> vector<2x256xf32>
    %395 = arith.addf %387, %394 : vector<2x256xf32>
    %c0_304 = arith.constant 0 : index
    %c128_305 = arith.constant 128 : index
    %396 = vector.load %arg37[%c0_304, %c128_305] : memref<8x1280xf32, #tpu.memory_space<vmem>>, vector<8x256xf32>
    %c4_306 = arith.constant 4 : index
    %c0_307 = arith.constant 0 : index
    %397 = vector.load %arg27[%c4_306, %c0_307] : memref<9x256xf32, #tpu.memory_space<vmem>>, vector<1x256xf32>
    %398 = vector.broadcast %397 : vector<1x256xf32> to vector<8x256xf32>
    %399 = arith.mulf %396, %398 : vector<8x256xf32>
    %c4_308 = arith.constant 4 : index
    %c0_309 = arith.constant 0 : index
    %c0_310 = arith.constant 0 : index
    %400 = vector.load %arg6[%c4_308, %c0_309, %c0_310] : memref<9x2x8xf32, #tpu.memory_space<vmem>>, vector<1x2x8xf32>
    %401 = vector.shape_cast %400 : vector<1x2x8xf32> to vector<2x8xf32>
    %cst_311 = arith.constant dense<0.000000e+00> : vector<2x256xf32>
    %402 = tpu.matmul %401, %399, %cst_311 {dimension_numbers = #tpu.dot_dimension_numbers<[1], [0], [0], [1], [0, 0, 1, 1], [], []>} : vector<2x8xf32>, vector<8x256xf32>, vector<2x256xf32> -> vector<2x256xf32>
    %403 = arith.addf %395, %402 : vector<2x256xf32>
    %c0_312 = arith.constant 0 : index
    %c129_313 = arith.constant 129 : index
    %404 = vector.load %arg37[%c0_312, %c129_313] : memref<8x1280xf32, #tpu.memory_space<vmem>>, vector<8x256xf32>
    %c5_314 = arith.constant 5 : index
    %c0_315 = arith.constant 0 : index
    %405 = vector.load %arg27[%c5_314, %c0_315] : memref<9x256xf32, #tpu.memory_space<vmem>>, vector<1x256xf32>
    %406 = vector.broadcast %405 : vector<1x256xf32> to vector<8x256xf32>
    %407 = arith.mulf %404, %406 : vector<8x256xf32>
    %c5_316 = arith.constant 5 : index
    %c0_317 = arith.constant 0 : index
    %c0_318 = arith.constant 0 : index
    %408 = vector.load %arg6[%c5_316, %c0_317, %c0_318] : memref<9x2x8xf32, #tpu.memory_space<vmem>>, vector<1x2x8xf32>
    %409 = vector.shape_cast %408 : vector<1x2x8xf32> to vector<2x8xf32>
    %cst_319 = arith.constant dense<0.000000e+00> : vector<2x256xf32>
    %410 = tpu.matmul %409, %407, %cst_319 {dimension_numbers = #tpu.dot_dimension_numbers<[1], [0], [0], [1], [0, 0, 1, 1], [], []>} : vector<2x8xf32>, vector<8x256xf32>, vector<2x256xf32> -> vector<2x256xf32>
    %411 = arith.addf %403, %410 : vector<2x256xf32>
    %c0_320 = arith.constant 0 : index
    %c143_321 = arith.constant 143 : index
    %412 = vector.load %arg37[%c0_320, %c143_321] : memref<8x1280xf32, #tpu.memory_space<vmem>>, vector<8x256xf32>
    %c6_322 = arith.constant 6 : index
    %c0_323 = arith.constant 0 : index
    %413 = vector.load %arg27[%c6_322, %c0_323] : memref<9x256xf32, #tpu.memory_space<vmem>>, vector<1x256xf32>
    %414 = vector.broadcast %413 : vector<1x256xf32> to vector<8x256xf32>
    %415 = arith.mulf %412, %414 : vector<8x256xf32>
    %c6_324 = arith.constant 6 : index
    %c0_325 = arith.constant 0 : index
    %c0_326 = arith.constant 0 : index
    %416 = vector.load %arg6[%c6_324, %c0_325, %c0_326] : memref<9x2x8xf32, #tpu.memory_space<vmem>>, vector<1x2x8xf32>
    %417 = vector.shape_cast %416 : vector<1x2x8xf32> to vector<2x8xf32>
    %cst_327 = arith.constant dense<0.000000e+00> : vector<2x256xf32>
    %418 = tpu.matmul %417, %415, %cst_327 {dimension_numbers = #tpu.dot_dimension_numbers<[1], [0], [0], [1], [0, 0, 1, 1], [], []>} : vector<2x8xf32>, vector<8x256xf32>, vector<2x256xf32> -> vector<2x256xf32>
    %419 = arith.addf %411, %418 : vector<2x256xf32>
    %c0_328 = arith.constant 0 : index
    %c144_329 = arith.constant 144 : index
    %420 = vector.load %arg37[%c0_328, %c144_329] : memref<8x1280xf32, #tpu.memory_space<vmem>>, vector<8x256xf32>
    %c7_330 = arith.constant 7 : index
    %c0_331 = arith.constant 0 : index
    %421 = vector.load %arg27[%c7_330, %c0_331] : memref<9x256xf32, #tpu.memory_space<vmem>>, vector<1x256xf32>
    %422 = vector.broadcast %421 : vector<1x256xf32> to vector<8x256xf32>
    %423 = arith.mulf %420, %422 : vector<8x256xf32>
    %c7_332 = arith.constant 7 : index
    %c0_333 = arith.constant 0 : index
    %c0_334 = arith.constant 0 : index
    %424 = vector.load %arg6[%c7_332, %c0_333, %c0_334] : memref<9x2x8xf32, #tpu.memory_space<vmem>>, vector<1x2x8xf32>
    %425 = vector.shape_cast %424 : vector<1x2x8xf32> to vector<2x8xf32>
    %cst_335 = arith.constant dense<0.000000e+00> : vector<2x256xf32>
    %426 = tpu.matmul %425, %423, %cst_335 {dimension_numbers = #tpu.dot_dimension_numbers<[1], [0], [0], [1], [0, 0, 1, 1], [], []>} : vector<2x8xf32>, vector<8x256xf32>, vector<2x256xf32> -> vector<2x256xf32>
    %427 = arith.addf %419, %426 : vector<2x256xf32>
    %c0_336 = arith.constant 0 : index
    %c145_337 = arith.constant 145 : index
    %428 = vector.load %arg37[%c0_336, %c145_337] : memref<8x1280xf32, #tpu.memory_space<vmem>>, vector<8x256xf32>
    %c8_338 = arith.constant 8 : index
    %c0_339 = arith.constant 0 : index
    %429 = vector.load %arg27[%c8_338, %c0_339] : memref<9x256xf32, #tpu.memory_space<vmem>>, vector<1x256xf32>
    %430 = vector.broadcast %429 : vector<1x256xf32> to vector<8x256xf32>
    %431 = arith.mulf %428, %430 : vector<8x256xf32>
    %c8_340 = arith.constant 8 : index
    %c0_341 = arith.constant 0 : index
    %c0_342 = arith.constant 0 : index
    %432 = vector.load %arg6[%c8_340, %c0_341, %c0_342] : memref<9x2x8xf32, #tpu.memory_space<vmem>>, vector<1x2x8xf32>
    %433 = vector.shape_cast %432 : vector<1x2x8xf32> to vector<2x8xf32>
    %cst_343 = arith.constant dense<0.000000e+00> : vector<2x256xf32>
    %434 = tpu.matmul %433, %431, %cst_343 {dimension_numbers = #tpu.dot_dimension_numbers<[1], [0], [0], [1], [0, 0, 1, 1], [], []>} : vector<2x8xf32>, vector<8x256xf32>, vector<2x256xf32> -> vector<2x256xf32>
    %435 = arith.addf %427, %434 : vector<2x256xf32>
    %c0_344 = arith.constant 0 : index
    %c0_345 = arith.constant 0 : index
    %436 = vector.load %arg18[%c0_344, %c0_345] : memref<2x1xf32, #tpu.memory_space<vmem>>, vector<2x1xf32>
    %437 = vector.broadcast %436 : vector<2x1xf32> to vector<2x256xf32>
    %438 = arith.addf %435, %437 : vector<2x256xf32>
    %cst_346 = arith.constant 0.000000e+00 : f32
    %439 = vector.broadcast %cst_346 : f32 to vector<2x256xf32>
    %440 = arith.maximumf %438, %439 : vector<2x256xf32>
    %441 = arith.addf %440, %361 : vector<2x256xf32>
    %c0_347 = arith.constant 0 : index
    %c128_348 = arith.constant 128 : index
    %442 = vector.load %arg37[%c0_347, %c128_348] : memref<8x1280xf32, #tpu.memory_space<vmem>>, vector<2x256xf32>
    tpu.vector_store %arg37[%c0_347, %c128_348], %441 {strides = array<i32>} : memref<8x1280xf32, #tpu.memory_space<vmem>>, vector<2x256xf32>,
    %cst_349 = arith.constant 0.000000e+00 : f32
    %443 = vector.broadcast %cst_349 : f32 to vector<4x256xf32>
    %c0_350 = arith.constant 0 : index
    %c111_351 = arith.constant 111 : index
    %444 = vector.load %arg37[%c0_350, %c111_351] : memref<8x1280xf32, #tpu.memory_space<vmem>>, vector<8x256xf32>
    %c0_352 = arith.constant 0 : index
    %c0_353 = arith.constant 0 : index
    %445 = vector.load %arg27[%c0_352, %c0_353] : memref<9x256xf32, #tpu.memory_space<vmem>>, vector<1x256xf32>
    %446 = vector.broadcast %445 : vector<1x256xf32> to vector<8x256xf32>
    %447 = arith.mulf %444, %446 : vector<8x256xf32>
    %c0_354 = arith.constant 0 : index
    %c0_355 = arith.constant 0 : index
    %c0_356 = arith.constant 0 : index
    %448 = vector.load %arg7[%c0_354, %c0_355, %c0_356] : memref<9x4x8xf32, #tpu.memory_space<vmem>>, vector<1x4x8xf32>
    %449 = vector.shape_cast %448 : vector<1x4x8xf32> to vector<4x8xf32>
    %cst_357 = arith.constant dense<0.000000e+00> : vector<4x256xf32>
    %450 = tpu.matmul %449, %447, %cst_357 {dimension_numbers = #tpu.dot_dimension_numbers<[1], [0], [0], [1], [0, 0, 1, 1], [], []>} : vector<4x8xf32>, vector<8x256xf32>, vector<4x256xf32> -> vector<4x256xf32>
    %451 = arith.addf %443, %450 : vector<4x256xf32>
    %c0_358 = arith.constant 0 : index
    %c112_359 = arith.constant 112 : index
    %452 = vector.load %arg37[%c0_358, %c112_359] : memref<8x1280xf32, #tpu.memory_space<vmem>>, vector<8x256xf32>
    %c1_360 = arith.constant 1 : index
    %c0_361 = arith.constant 0 : index
    %453 = vector.load %arg27[%c1_360, %c0_361] : memref<9x256xf32, #tpu.memory_space<vmem>>, vector<1x256xf32>
    %454 = vector.broadcast %453 : vector<1x256xf32> to vector<8x256xf32>
    %455 = arith.mulf %452, %454 : vector<8x256xf32>
    %c1_362 = arith.constant 1 : index
    %c0_363 = arith.constant 0 : index
    %c0_364 = arith.constant 0 : index
    %456 = vector.load %arg7[%c1_362, %c0_363, %c0_364] : memref<9x4x8xf32, #tpu.memory_space<vmem>>, vector<1x4x8xf32>
    %457 = vector.shape_cast %456 : vector<1x4x8xf32> to vector<4x8xf32>
    %cst_365 = arith.constant dense<0.000000e+00> : vector<4x256xf32>
    %458 = tpu.matmul %457, %455, %cst_365 {dimension_numbers = #tpu.dot_dimension_numbers<[1], [0], [0], [1], [0, 0, 1, 1], [], []>} : vector<4x8xf32>, vector<8x256xf32>, vector<4x256xf32> -> vector<4x256xf32>
    %459 = arith.addf %451, %458 : vector<4x256xf32>
    %c0_366 = arith.constant 0 : index
    %c113_367 = arith.constant 113 : index
    %460 = vector.load %arg37[%c0_366, %c113_367] : memref<8x1280xf32, #tpu.memory_space<vmem>>, vector<8x256xf32>
    %c2_368 = arith.constant 2 : index
    %c0_369 = arith.constant 0 : index
    %461 = vector.load %arg27[%c2_368, %c0_369] : memref<9x256xf32, #tpu.memory_space<vmem>>, vector<1x256xf32>
    %462 = vector.broadcast %461 : vector<1x256xf32> to vector<8x256xf32>
    %463 = arith.mulf %460, %462 : vector<8x256xf32>
    %c2_370 = arith.constant 2 : index
    %c0_371 = arith.constant 0 : index
    %c0_372 = arith.constant 0 : index
    %464 = vector.load %arg7[%c2_370, %c0_371, %c0_372] : memref<9x4x8xf32, #tpu.memory_space<vmem>>, vector<1x4x8xf32>
    %465 = vector.shape_cast %464 : vector<1x4x8xf32> to vector<4x8xf32>
    %cst_373 = arith.constant dense<0.000000e+00> : vector<4x256xf32>
    %466 = tpu.matmul %465, %463, %cst_373 {dimension_numbers = #tpu.dot_dimension_numbers<[1], [0], [0], [1], [0, 0, 1, 1], [], []>} : vector<4x8xf32>, vector<8x256xf32>, vector<4x256xf32> -> vector<4x256xf32>
    %467 = arith.addf %459, %466 : vector<4x256xf32>
    %c0_374 = arith.constant 0 : index
    %c127_375 = arith.constant 127 : index
    %468 = vector.load %arg37[%c0_374, %c127_375] : memref<8x1280xf32, #tpu.memory_space<vmem>>, vector<8x256xf32>
    %c3_376 = arith.constant 3 : index
    %c0_377 = arith.constant 0 : index
    %469 = vector.load %arg27[%c3_376, %c0_377] : memref<9x256xf32, #tpu.memory_space<vmem>>, vector<1x256xf32>
    %470 = vector.broadcast %469 : vector<1x256xf32> to vector<8x256xf32>
    %471 = arith.mulf %468, %470 : vector<8x256xf32>
    %c3_378 = arith.constant 3 : index
    %c0_379 = arith.constant 0 : index
    %c0_380 = arith.constant 0 : index
    %472 = vector.load %arg7[%c3_378, %c0_379, %c0_380] : memref<9x4x8xf32, #tpu.memory_space<vmem>>, vector<1x4x8xf32>
    %473 = vector.shape_cast %472 : vector<1x4x8xf32> to vector<4x8xf32>
    %cst_381 = arith.constant dense<0.000000e+00> : vector<4x256xf32>
    %474 = tpu.matmul %473, %471, %cst_381 {dimension_numbers = #tpu.dot_dimension_numbers<[1], [0], [0], [1], [0, 0, 1, 1], [], []>} : vector<4x8xf32>, vector<8x256xf32>, vector<4x256xf32> -> vector<4x256xf32>
    %475 = arith.addf %467, %474 : vector<4x256xf32>
    %c0_382 = arith.constant 0 : index
    %c128_383 = arith.constant 128 : index
    %476 = vector.load %arg37[%c0_382, %c128_383] : memref<8x1280xf32, #tpu.memory_space<vmem>>, vector<8x256xf32>
    %c4_384 = arith.constant 4 : index
    %c0_385 = arith.constant 0 : index
    %477 = vector.load %arg27[%c4_384, %c0_385] : memref<9x256xf32, #tpu.memory_space<vmem>>, vector<1x256xf32>
    %478 = vector.broadcast %477 : vector<1x256xf32> to vector<8x256xf32>
    %479 = arith.mulf %476, %478 : vector<8x256xf32>
    %c4_386 = arith.constant 4 : index
    %c0_387 = arith.constant 0 : index
    %c0_388 = arith.constant 0 : index
    %480 = vector.load %arg7[%c4_386, %c0_387, %c0_388] : memref<9x4x8xf32, #tpu.memory_space<vmem>>, vector<1x4x8xf32>
    %481 = vector.shape_cast %480 : vector<1x4x8xf32> to vector<4x8xf32>
    %cst_389 = arith.constant dense<0.000000e+00> : vector<4x256xf32>
    %482 = tpu.matmul %481, %479, %cst_389 {dimension_numbers = #tpu.dot_dimension_numbers<[1], [0], [0], [1], [0, 0, 1, 1], [], []>} : vector<4x8xf32>, vector<8x256xf32>, vector<4x256xf32> -> vector<4x256xf32>
    %483 = arith.addf %475, %482 : vector<4x256xf32>
    %c0_390 = arith.constant 0 : index
    %c129_391 = arith.constant 129 : index
    %484 = vector.load %arg37[%c0_390, %c129_391] : memref<8x1280xf32, #tpu.memory_space<vmem>>, vector<8x256xf32>
    %c5_392 = arith.constant 5 : index
    %c0_393 = arith.constant 0 : index
    %485 = vector.load %arg27[%c5_392, %c0_393] : memref<9x256xf32, #tpu.memory_space<vmem>>, vector<1x256xf32>
    %486 = vector.broadcast %485 : vector<1x256xf32> to vector<8x256xf32>
    %487 = arith.mulf %484, %486 : vector<8x256xf32>
    %c5_394 = arith.constant 5 : index
    %c0_395 = arith.constant 0 : index
    %c0_396 = arith.constant 0 : index
    %488 = vector.load %arg7[%c5_394, %c0_395, %c0_396] : memref<9x4x8xf32, #tpu.memory_space<vmem>>, vector<1x4x8xf32>
    %489 = vector.shape_cast %488 : vector<1x4x8xf32> to vector<4x8xf32>
    %cst_397 = arith.constant dense<0.000000e+00> : vector<4x256xf32>
    %490 = tpu.matmul %489, %487, %cst_397 {dimension_numbers = #tpu.dot_dimension_numbers<[1], [0], [0], [1], [0, 0, 1, 1], [], []>} : vector<4x8xf32>, vector<8x256xf32>, vector<4x256xf32> -> vector<4x256xf32>
    %491 = arith.addf %483, %490 : vector<4x256xf32>
    %c0_398 = arith.constant 0 : index
    %c143_399 = arith.constant 143 : index
    %492 = vector.load %arg37[%c0_398, %c143_399] : memref<8x1280xf32, #tpu.memory_space<vmem>>, vector<8x256xf32>
    %c6_400 = arith.constant 6 : index
    %c0_401 = arith.constant 0 : index
    %493 = vector.load %arg27[%c6_400, %c0_401] : memref<9x256xf32, #tpu.memory_space<vmem>>, vector<1x256xf32>
    %494 = vector.broadcast %493 : vector<1x256xf32> to vector<8x256xf32>
    %495 = arith.mulf %492, %494 : vector<8x256xf32>
    %c6_402 = arith.constant 6 : index
    %c0_403 = arith.constant 0 : index
    %c0_404 = arith.constant 0 : index
    %496 = vector.load %arg7[%c6_402, %c0_403, %c0_404] : memref<9x4x8xf32, #tpu.memory_space<vmem>>, vector<1x4x8xf32>
    %497 = vector.shape_cast %496 : vector<1x4x8xf32> to vector<4x8xf32>
    %cst_405 = arith.constant dense<0.000000e+00> : vector<4x256xf32>
    %498 = tpu.matmul %497, %495, %cst_405 {dimension_numbers = #tpu.dot_dimension_numbers<[1], [0], [0], [1], [0, 0, 1, 1], [], []>} : vector<4x8xf32>, vector<8x256xf32>, vector<4x256xf32> -> vector<4x256xf32>
    %499 = arith.addf %491, %498 : vector<4x256xf32>
    %c0_406 = arith.constant 0 : index
    %c144_407 = arith.constant 144 : index
    %500 = vector.load %arg37[%c0_406, %c144_407] : memref<8x1280xf32, #tpu.memory_space<vmem>>, vector<8x256xf32>
    %c7_408 = arith.constant 7 : index
    %c0_409 = arith.constant 0 : index
    %501 = vector.load %arg27[%c7_408, %c0_409] : memref<9x256xf32, #tpu.memory_space<vmem>>, vector<1x256xf32>
    %502 = vector.broadcast %501 : vector<1x256xf32> to vector<8x256xf32>
    %503 = arith.mulf %500, %502 : vector<8x256xf32>
    %c7_410 = arith.constant 7 : index
    %c0_411 = arith.constant 0 : index
    %c0_412 = arith.constant 0 : index
    %504 = vector.load %arg7[%c7_410, %c0_411, %c0_412] : memref<9x4x8xf32, #tpu.memory_space<vmem>>, vector<1x4x8xf32>
    %505 = vector.shape_cast %504 : vector<1x4x8xf32> to vector<4x8xf32>
    %cst_413 = arith.constant dense<0.000000e+00> : vector<4x256xf32>
    %506 = tpu.matmul %505, %503, %cst_413 {dimension_numbers = #tpu.dot_dimension_numbers<[1], [0], [0], [1], [0, 0, 1, 1], [], []>} : vector<4x8xf32>, vector<8x256xf32>, vector<4x256xf32> -> vector<4x256xf32>
    %507 = arith.addf %499, %506 : vector<4x256xf32>
    %c0_414 = arith.constant 0 : index
    %c145_415 = arith.constant 145 : index
    %508 = vector.load %arg37[%c0_414, %c145_415] : memref<8x1280xf32, #tpu.memory_space<vmem>>, vector<8x256xf32>
    %c8_416 = arith.constant 8 : index
    %c0_417 = arith.constant 0 : index
    %509 = vector.load %arg27[%c8_416, %c0_417] : memref<9x256xf32, #tpu.memory_space<vmem>>, vector<1x256xf32>
    %510 = vector.broadcast %509 : vector<1x256xf32> to vector<8x256xf32>
    %511 = arith.mulf %508, %510 : vector<8x256xf32>
    %c8_418 = arith.constant 8 : index
    %c0_419 = arith.constant 0 : index
    %c0_420 = arith.constant 0 : index
    %512 = vector.load %arg7[%c8_418, %c0_419, %c0_420] : memref<9x4x8xf32, #tpu.memory_space<vmem>>, vector<1x4x8xf32>
    %513 = vector.shape_cast %512 : vector<1x4x8xf32> to vector<4x8xf32>
    %cst_421 = arith.constant dense<0.000000e+00> : vector<4x256xf32>
    %514 = tpu.matmul %513, %511, %cst_421 {dimension_numbers = #tpu.dot_dimension_numbers<[1], [0], [0], [1], [0, 0, 1, 1], [], []>} : vector<4x8xf32>, vector<8x256xf32>, vector<4x256xf32> -> vector<4x256xf32>
    %515 = arith.addf %507, %514 : vector<4x256xf32>
    %c0_422 = arith.constant 0 : index
    %c0_423 = arith.constant 0 : index
    %516 = vector.load %arg31[%c0_422, %c0_423] : memref<256x64xf32, #tpu.memory_space<vmem>>, vector<256x64xf32>
    %cst_424 = arith.constant dense<0.000000e+00> : vector<4x64xf32>
    %517 = tpu.matmul %515, %516, %cst_424 {dimension_numbers = #tpu.dot_dimension_numbers<[1], [0], [0], [1], [0, 0, 1, 1], [], []>} : vector<4x256xf32>, vector<256x64xf32>, vector<4x64xf32> -> vector<4x64xf32>
    %c0_425 = arith.constant 0 : index
    %c0_426 = arith.constant 0 : index
    %518 = vector.load %arg19[%c0_425, %c0_426] : memref<4x1xf32, #tpu.memory_space<vmem>>, vector<4x1xf32>
    %519 = vector.broadcast %518 : vector<4x1xf32> to vector<4x64xf32>
    %520 = arith.addf %517, %519 : vector<4x64xf32>
    %cst_427 = arith.constant 0.000000e+00 : f32
    %521 = vector.broadcast %cst_427 : f32 to vector<4x64xf32>
    %522 = arith.maximumf %520, %521 : vector<4x64xf32>
    %523 = arith.addf %522, %520 : vector<4x64xf32>
    %c0_428 = arith.constant 0 : index
    %c128_429 = arith.constant 128 : index
    %524 = vector.load %arg37[%c0_428, %c128_429] : memref<8x1280xf32, #tpu.memory_space<vmem>>, vector<4x64xf32>
    tpu.vector_store %arg37[%c0_428, %c128_429], %523 {strides = array<i32>} : memref<8x1280xf32, #tpu.memory_space<vmem>>, vector<4x64xf32>,
    %cst_430 = arith.constant 0.000000e+00 : f32
    %525 = vector.broadcast %cst_430 : f32 to vector<4x64xf32>
    %c0_431 = arith.constant 0 : index
    %c119 = arith.constant 119 : index
    %526 = vector.load %arg37[%c0_431, %c119] : memref<8x1280xf32, #tpu.memory_space<vmem>>, vector<8x64xf32>
    %c0_432 = arith.constant 0 : index
    %c0_433 = arith.constant 0 : index
    %527 = vector.load %arg28[%c0_432, %c0_433] : memref<9x64xf32, #tpu.memory_space<vmem>>, vector<1x64xf32>
    %528 = vector.broadcast %527 : vector<1x64xf32> to vector<8x64xf32>
    %529 = arith.mulf %526, %528 : vector<8x64xf32>
    %c0_434 = arith.constant 0 : index
    %c0_435 = arith.constant 0 : index
    %c0_436 = arith.constant 0 : index
    %530 = vector.load %arg8[%c0_434, %c0_435, %c0_436] : memref<9x4x8xf32, #tpu.memory_space<vmem>>, vector<1x4x8xf32>
    %531 = vector.shape_cast %530 : vector<1x4x8xf32> to vector<4x8xf32>
    %cst_437 = arith.constant dense<0.000000e+00> : vector<4x64xf32>
    %532 = tpu.matmul %531, %529, %cst_437 {dimension_numbers = #tpu.dot_dimension_numbers<[1], [0], [0], [1], [0, 0, 1, 1], [], []>} : vector<4x8xf32>, vector<8x64xf32>, vector<4x64xf32> -> vector<4x64xf32>
    %533 = arith.addf %525, %532 : vector<4x64xf32>
    %c0_438 = arith.constant 0 : index
    %c120 = arith.constant 120 : index
    %534 = vector.load %arg37[%c0_438, %c120] : memref<8x1280xf32, #tpu.memory_space<vmem>>, vector<8x64xf32>
    %c1_439 = arith.constant 1 : index
    %c0_440 = arith.constant 0 : index
    %535 = vector.load %arg28[%c1_439, %c0_440] : memref<9x64xf32, #tpu.memory_space<vmem>>, vector<1x64xf32>
    %536 = vector.broadcast %535 : vector<1x64xf32> to vector<8x64xf32>
    %537 = arith.mulf %534, %536 : vector<8x64xf32>
    %c1_441 = arith.constant 1 : index
    %c0_442 = arith.constant 0 : index
    %c0_443 = arith.constant 0 : index
    %538 = vector.load %arg8[%c1_441, %c0_442, %c0_443] : memref<9x4x8xf32, #tpu.memory_space<vmem>>, vector<1x4x8xf32>
    %539 = vector.shape_cast %538 : vector<1x4x8xf32> to vector<4x8xf32>
    %cst_444 = arith.constant dense<0.000000e+00> : vector<4x64xf32>
    %540 = tpu.matmul %539, %537, %cst_444 {dimension_numbers = #tpu.dot_dimension_numbers<[1], [0], [0], [1], [0, 0, 1, 1], [], []>} : vector<4x8xf32>, vector<8x64xf32>, vector<4x64xf32> -> vector<4x64xf32>
    %541 = arith.addf %533, %540 : vector<4x64xf32>
    %c0_445 = arith.constant 0 : index
    %c121 = arith.constant 121 : index
    %542 = vector.load %arg37[%c0_445, %c121] : memref<8x1280xf32, #tpu.memory_space<vmem>>, vector<8x64xf32>
    %c2_446 = arith.constant 2 : index
    %c0_447 = arith.constant 0 : index
    %543 = vector.load %arg28[%c2_446, %c0_447] : memref<9x64xf32, #tpu.memory_space<vmem>>, vector<1x64xf32>
    %544 = vector.broadcast %543 : vector<1x64xf32> to vector<8x64xf32>
    %545 = arith.mulf %542, %544 : vector<8x64xf32>
    %c2_448 = arith.constant 2 : index
    %c0_449 = arith.constant 0 : index
    %c0_450 = arith.constant 0 : index
    %546 = vector.load %arg8[%c2_448, %c0_449, %c0_450] : memref<9x4x8xf32, #tpu.memory_space<vmem>>, vector<1x4x8xf32>
    %547 = vector.shape_cast %546 : vector<1x4x8xf32> to vector<4x8xf32>
    %cst_451 = arith.constant dense<0.000000e+00> : vector<4x64xf32>
    %548 = tpu.matmul %547, %545, %cst_451 {dimension_numbers = #tpu.dot_dimension_numbers<[1], [0], [0], [1], [0, 0, 1, 1], [], []>} : vector<4x8xf32>, vector<8x64xf32>, vector<4x64xf32> -> vector<4x64xf32>
    %549 = arith.addf %541, %548 : vector<4x64xf32>
    %c0_452 = arith.constant 0 : index
    %c127_453 = arith.constant 127 : index
    %550 = vector.load %arg37[%c0_452, %c127_453] : memref<8x1280xf32, #tpu.memory_space<vmem>>, vector<8x64xf32>
    %c3_454 = arith.constant 3 : index
    %c0_455 = arith.constant 0 : index
    %551 = vector.load %arg28[%c3_454, %c0_455] : memref<9x64xf32, #tpu.memory_space<vmem>>, vector<1x64xf32>
    %552 = vector.broadcast %551 : vector<1x64xf32> to vector<8x64xf32>
    %553 = arith.mulf %550, %552 : vector<8x64xf32>
    %c3_456 = arith.constant 3 : index
    %c0_457 = arith.constant 0 : index
    %c0_458 = arith.constant 0 : index
    %554 = vector.load %arg8[%c3_456, %c0_457, %c0_458] : memref<9x4x8xf32, #tpu.memory_space<vmem>>, vector<1x4x8xf32>
    %555 = vector.shape_cast %554 : vector<1x4x8xf32> to vector<4x8xf32>
    %cst_459 = arith.constant dense<0.000000e+00> : vector<4x64xf32>
    %556 = tpu.matmul %555, %553, %cst_459 {dimension_numbers = #tpu.dot_dimension_numbers<[1], [0], [0], [1], [0, 0, 1, 1], [], []>} : vector<4x8xf32>, vector<8x64xf32>, vector<4x64xf32> -> vector<4x64xf32>
    %557 = arith.addf %549, %556 : vector<4x64xf32>
    %c0_460 = arith.constant 0 : index
    %c128_461 = arith.constant 128 : index
    %558 = vector.load %arg37[%c0_460, %c128_461] : memref<8x1280xf32, #tpu.memory_space<vmem>>, vector<8x64xf32>
    %c4_462 = arith.constant 4 : index
    %c0_463 = arith.constant 0 : index
    %559 = vector.load %arg28[%c4_462, %c0_463] : memref<9x64xf32, #tpu.memory_space<vmem>>, vector<1x64xf32>
    %560 = vector.broadcast %559 : vector<1x64xf32> to vector<8x64xf32>
    %561 = arith.mulf %558, %560 : vector<8x64xf32>
    %c4_464 = arith.constant 4 : index
    %c0_465 = arith.constant 0 : index
    %c0_466 = arith.constant 0 : index
    %562 = vector.load %arg8[%c4_464, %c0_465, %c0_466] : memref<9x4x8xf32, #tpu.memory_space<vmem>>, vector<1x4x8xf32>
    %563 = vector.shape_cast %562 : vector<1x4x8xf32> to vector<4x8xf32>
    %cst_467 = arith.constant dense<0.000000e+00> : vector<4x64xf32>
    %564 = tpu.matmul %563, %561, %cst_467 {dimension_numbers = #tpu.dot_dimension_numbers<[1], [0], [0], [1], [0, 0, 1, 1], [], []>} : vector<4x8xf32>, vector<8x64xf32>, vector<4x64xf32> -> vector<4x64xf32>
    %565 = arith.addf %557, %564 : vector<4x64xf32>
    %c0_468 = arith.constant 0 : index
    %c129_469 = arith.constant 129 : index
    %566 = vector.load %arg37[%c0_468, %c129_469] : memref<8x1280xf32, #tpu.memory_space<vmem>>, vector<8x64xf32>
    %c5_470 = arith.constant 5 : index
    %c0_471 = arith.constant 0 : index
    %567 = vector.load %arg28[%c5_470, %c0_471] : memref<9x64xf32, #tpu.memory_space<vmem>>, vector<1x64xf32>
    %568 = vector.broadcast %567 : vector<1x64xf32> to vector<8x64xf32>
    %569 = arith.mulf %566, %568 : vector<8x64xf32>
    %c5_472 = arith.constant 5 : index
    %c0_473 = arith.constant 0 : index
    %c0_474 = arith.constant 0 : index
    %570 = vector.load %arg8[%c5_472, %c0_473, %c0_474] : memref<9x4x8xf32, #tpu.memory_space<vmem>>, vector<1x4x8xf32>
    %571 = vector.shape_cast %570 : vector<1x4x8xf32> to vector<4x8xf32>
    %cst_475 = arith.constant dense<0.000000e+00> : vector<4x64xf32>
    %572 = tpu.matmul %571, %569, %cst_475 {dimension_numbers = #tpu.dot_dimension_numbers<[1], [0], [0], [1], [0, 0, 1, 1], [], []>} : vector<4x8xf32>, vector<8x64xf32>, vector<4x64xf32> -> vector<4x64xf32>
    %573 = arith.addf %565, %572 : vector<4x64xf32>
    %c0_476 = arith.constant 0 : index
    %c135 = arith.constant 135 : index
    %574 = vector.load %arg37[%c0_476, %c135] : memref<8x1280xf32, #tpu.memory_space<vmem>>, vector<8x64xf32>
    %c6_477 = arith.constant 6 : index
    %c0_478 = arith.constant 0 : index
    %575 = vector.load %arg28[%c6_477, %c0_478] : memref<9x64xf32, #tpu.memory_space<vmem>>, vector<1x64xf32>
    %576 = vector.broadcast %575 : vector<1x64xf32> to vector<8x64xf32>
    %577 = arith.mulf %574, %576 : vector<8x64xf32>
    %c6_479 = arith.constant 6 : index
    %c0_480 = arith.constant 0 : index
    %c0_481 = arith.constant 0 : index
    %578 = vector.load %arg8[%c6_479, %c0_480, %c0_481] : memref<9x4x8xf32, #tpu.memory_space<vmem>>, vector<1x4x8xf32>
    %579 = vector.shape_cast %578 : vector<1x4x8xf32> to vector<4x8xf32>
    %cst_482 = arith.constant dense<0.000000e+00> : vector<4x64xf32>
    %580 = tpu.matmul %579, %577, %cst_482 {dimension_numbers = #tpu.dot_dimension_numbers<[1], [0], [0], [1], [0, 0, 1, 1], [], []>} : vector<4x8xf32>, vector<8x64xf32>, vector<4x64xf32> -> vector<4x64xf32>
    %581 = arith.addf %573, %580 : vector<4x64xf32>
    %c0_483 = arith.constant 0 : index
    %c136 = arith.constant 136 : index
    %582 = vector.load %arg37[%c0_483, %c136] : memref<8x1280xf32, #tpu.memory_space<vmem>>, vector<8x64xf32>
    %c7_484 = arith.constant 7 : index
    %c0_485 = arith.constant 0 : index
    %583 = vector.load %arg28[%c7_484, %c0_485] : memref<9x64xf32, #tpu.memory_space<vmem>>, vector<1x64xf32>
    %584 = vector.broadcast %583 : vector<1x64xf32> to vector<8x64xf32>
    %585 = arith.mulf %582, %584 : vector<8x64xf32>
    %c7_486 = arith.constant 7 : index
    %c0_487 = arith.constant 0 : index
    %c0_488 = arith.constant 0 : index
    %586 = vector.load %arg8[%c7_486, %c0_487, %c0_488] : memref<9x4x8xf32, #tpu.memory_space<vmem>>, vector<1x4x8xf32>
    %587 = vector.shape_cast %586 : vector<1x4x8xf32> to vector<4x8xf32>
    %cst_489 = arith.constant dense<0.000000e+00> : vector<4x64xf32>
    %588 = tpu.matmul %587, %585, %cst_489 {dimension_numbers = #tpu.dot_dimension_numbers<[1], [0], [0], [1], [0, 0, 1, 1], [], []>} : vector<4x8xf32>, vector<8x64xf32>, vector<4x64xf32> -> vector<4x64xf32>
    %589 = arith.addf %581, %588 : vector<4x64xf32>
    %c0_490 = arith.constant 0 : index
    %c137 = arith.constant 137 : index
    %590 = vector.load %arg37[%c0_490, %c137] : memref<8x1280xf32, #tpu.memory_space<vmem>>, vector<8x64xf32>
    %c8_491 = arith.constant 8 : index
    %c0_492 = arith.constant 0 : index
    %591 = vector.load %arg28[%c8_491, %c0_492] : memref<9x64xf32, #tpu.memory_space<vmem>>, vector<1x64xf32>
    %592 = vector.broadcast %591 : vector<1x64xf32> to vector<8x64xf32>
    %593 = arith.mulf %590, %592 : vector<8x64xf32>
    %c8_493 = arith.constant 8 : index
    %c0_494 = arith.constant 0 : index
    %c0_495 = arith.constant 0 : index
    %594 = vector.load %arg8[%c8_493, %c0_494, %c0_495] : memref<9x4x8xf32, #tpu.memory_space<vmem>>, vector<1x4x8xf32>
    %595 = vector.shape_cast %594 : vector<1x4x8xf32> to vector<4x8xf32>
    %cst_496 = arith.constant dense<0.000000e+00> : vector<4x64xf32>
    %596 = tpu.matmul %595, %593, %cst_496 {dimension_numbers = #tpu.dot_dimension_numbers<[1], [0], [0], [1], [0, 0, 1, 1], [], []>} : vector<4x8xf32>, vector<8x64xf32>, vector<4x64xf32> -> vector<4x64xf32>
    %597 = arith.addf %589, %596 : vector<4x64xf32>
    %c0_497 = arith.constant 0 : index
    %c0_498 = arith.constant 0 : index
    %598 = vector.load %arg20[%c0_497, %c0_498] : memref<4x1xf32, #tpu.memory_space<vmem>>, vector<4x1xf32>
    %599 = vector.broadcast %598 : vector<4x1xf32> to vector<4x64xf32>
    %600 = arith.addf %597, %599 : vector<4x64xf32>
    %cst_499 = arith.constant 0.000000e+00 : f32
    %601 = vector.broadcast %cst_499 : f32 to vector<4x64xf32>
    %602 = arith.maximumf %600, %601 : vector<4x64xf32>
    %603 = arith.addf %602, %523 : vector<4x64xf32>
    %c0_500 = arith.constant 0 : index
    %c128_501 = arith.constant 128 : index
    %604 = vector.load %arg37[%c0_500, %c128_501] : memref<8x1280xf32, #tpu.memory_space<vmem>>, vector<4x64xf32>
    tpu.vector_store %arg37[%c0_500, %c128_501], %603 {strides = array<i32>} : memref<8x1280xf32, #tpu.memory_space<vmem>>, vector<4x64xf32>,
    %cst_502 = arith.constant 0.000000e+00 : f32
    %605 = vector.broadcast %cst_502 : f32 to vector<4x64xf32>
    %c0_503 = arith.constant 0 : index
    %c119_504 = arith.constant 119 : index
    %606 = vector.load %arg37[%c0_503, %c119_504] : memref<8x1280xf32, #tpu.memory_space<vmem>>, vector<8x64xf32>
    %c0_505 = arith.constant 0 : index
    %c0_506 = arith.constant 0 : index
    %607 = vector.load %arg28[%c0_505, %c0_506] : memref<9x64xf32, #tpu.memory_space<vmem>>, vector<1x64xf32>
    %608 = vector.broadcast %607 : vector<1x64xf32> to vector<8x64xf32>
    %609 = arith.mulf %606, %608 : vector<8x64xf32>
    %c0_507 = arith.constant 0 : index
    %c0_508 = arith.constant 0 : index
    %c0_509 = arith.constant 0 : index
    %610 = vector.load %arg9[%c0_507, %c0_508, %c0_509] : memref<9x4x8xf32, #tpu.memory_space<vmem>>, vector<1x4x8xf32>
    %611 = vector.shape_cast %610 : vector<1x4x8xf32> to vector<4x8xf32>
    %cst_510 = arith.constant dense<0.000000e+00> : vector<4x64xf32>
    %612 = tpu.matmul %611, %609, %cst_510 {dimension_numbers = #tpu.dot_dimension_numbers<[1], [0], [0], [1], [0, 0, 1, 1], [], []>} : vector<4x8xf32>, vector<8x64xf32>, vector<4x64xf32> -> vector<4x64xf32>
    %613 = arith.addf %605, %612 : vector<4x64xf32>
    %c0_511 = arith.constant 0 : index
    %c120_512 = arith.constant 120 : index
    %614 = vector.load %arg37[%c0_511, %c120_512] : memref<8x1280xf32, #tpu.memory_space<vmem>>, vector<8x64xf32>
    %c1_513 = arith.constant 1 : index
    %c0_514 = arith.constant 0 : index
    %615 = vector.load %arg28[%c1_513, %c0_514] : memref<9x64xf32, #tpu.memory_space<vmem>>, vector<1x64xf32>
    %616 = vector.broadcast %615 : vector<1x64xf32> to vector<8x64xf32>
    %617 = arith.mulf %614, %616 : vector<8x64xf32>
    %c1_515 = arith.constant 1 : index
    %c0_516 = arith.constant 0 : index
    %c0_517 = arith.constant 0 : index
    %618 = vector.load %arg9[%c1_515, %c0_516, %c0_517] : memref<9x4x8xf32, #tpu.memory_space<vmem>>, vector<1x4x8xf32>
    %619 = vector.shape_cast %618 : vector<1x4x8xf32> to vector<4x8xf32>
    %cst_518 = arith.constant dense<0.000000e+00> : vector<4x64xf32>
    %620 = tpu.matmul %619, %617, %cst_518 {dimension_numbers = #tpu.dot_dimension_numbers<[1], [0], [0], [1], [0, 0, 1, 1], [], []>} : vector<4x8xf32>, vector<8x64xf32>, vector<4x64xf32> -> vector<4x64xf32>
    %621 = arith.addf %613, %620 : vector<4x64xf32>
    %c0_519 = arith.constant 0 : index
    %c121_520 = arith.constant 121 : index
    %622 = vector.load %arg37[%c0_519, %c121_520] : memref<8x1280xf32, #tpu.memory_space<vmem>>, vector<8x64xf32>
    %c2_521 = arith.constant 2 : index
    %c0_522 = arith.constant 0 : index
    %623 = vector.load %arg28[%c2_521, %c0_522] : memref<9x64xf32, #tpu.memory_space<vmem>>, vector<1x64xf32>
    %624 = vector.broadcast %623 : vector<1x64xf32> to vector<8x64xf32>
    %625 = arith.mulf %622, %624 : vector<8x64xf32>
    %c2_523 = arith.constant 2 : index
    %c0_524 = arith.constant 0 : index
    %c0_525 = arith.constant 0 : index
    %626 = vector.load %arg9[%c2_523, %c0_524, %c0_525] : memref<9x4x8xf32, #tpu.memory_space<vmem>>, vector<1x4x8xf32>
    %627 = vector.shape_cast %626 : vector<1x4x8xf32> to vector<4x8xf32>
    %cst_526 = arith.constant dense<0.000000e+00> : vector<4x64xf32>
    %628 = tpu.matmul %627, %625, %cst_526 {dimension_numbers = #tpu.dot_dimension_numbers<[1], [0], [0], [1], [0, 0, 1, 1], [], []>} : vector<4x8xf32>, vector<8x64xf32>, vector<4x64xf32> -> vector<4x64xf32>
    %629 = arith.addf %621, %628 : vector<4x64xf32>
    %c0_527 = arith.constant 0 : index
    %c127_528 = arith.constant 127 : index
    %630 = vector.load %arg37[%c0_527, %c127_528] : memref<8x1280xf32, #tpu.memory_space<vmem>>, vector<8x64xf32>
    %c3_529 = arith.constant 3 : index
    %c0_530 = arith.constant 0 : index
    %631 = vector.load %arg28[%c3_529, %c0_530] : memref<9x64xf32, #tpu.memory_space<vmem>>, vector<1x64xf32>
    %632 = vector.broadcast %631 : vector<1x64xf32> to vector<8x64xf32>
    %633 = arith.mulf %630, %632 : vector<8x64xf32>
    %c3_531 = arith.constant 3 : index
    %c0_532 = arith.constant 0 : index
    %c0_533 = arith.constant 0 : index
    %634 = vector.load %arg9[%c3_531, %c0_532, %c0_533] : memref<9x4x8xf32, #tpu.memory_space<vmem>>, vector<1x4x8xf32>
    %635 = vector.shape_cast %634 : vector<1x4x8xf32> to vector<4x8xf32>
    %cst_534 = arith.constant dense<0.000000e+00> : vector<4x64xf32>
    %636 = tpu.matmul %635, %633, %cst_534 {dimension_numbers = #tpu.dot_dimension_numbers<[1], [0], [0], [1], [0, 0, 1, 1], [], []>} : vector<4x8xf32>, vector<8x64xf32>, vector<4x64xf32> -> vector<4x64xf32>
    %637 = arith.addf %629, %636 : vector<4x64xf32>
    %c0_535 = arith.constant 0 : index
    %c128_536 = arith.constant 128 : index
    %638 = vector.load %arg37[%c0_535, %c128_536] : memref<8x1280xf32, #tpu.memory_space<vmem>>, vector<8x64xf32>
    %c4_537 = arith.constant 4 : index
    %c0_538 = arith.constant 0 : index
    %639 = vector.load %arg28[%c4_537, %c0_538] : memref<9x64xf32, #tpu.memory_space<vmem>>, vector<1x64xf32>
    %640 = vector.broadcast %639 : vector<1x64xf32> to vector<8x64xf32>
    %641 = arith.mulf %638, %640 : vector<8x64xf32>
    %c4_539 = arith.constant 4 : index
    %c0_540 = arith.constant 0 : index
    %c0_541 = arith.constant 0 : index
    %642 = vector.load %arg9[%c4_539, %c0_540, %c0_541] : memref<9x4x8xf32, #tpu.memory_space<vmem>>, vector<1x4x8xf32>
    %643 = vector.shape_cast %642 : vector<1x4x8xf32> to vector<4x8xf32>
    %cst_542 = arith.constant dense<0.000000e+00> : vector<4x64xf32>
    %644 = tpu.matmul %643, %641, %cst_542 {dimension_numbers = #tpu.dot_dimension_numbers<[1], [0], [0], [1], [0, 0, 1, 1], [], []>} : vector<4x8xf32>, vector<8x64xf32>, vector<4x64xf32> -> vector<4x64xf32>
    %645 = arith.addf %637, %644 : vector<4x64xf32>
    %c0_543 = arith.constant 0 : index
    %c129_544 = arith.constant 129 : index
    %646 = vector.load %arg37[%c0_543, %c129_544] : memref<8x1280xf32, #tpu.memory_space<vmem>>, vector<8x64xf32>
    %c5_545 = arith.constant 5 : index
    %c0_546 = arith.constant 0 : index
    %647 = vector.load %arg28[%c5_545, %c0_546] : memref<9x64xf32, #tpu.memory_space<vmem>>, vector<1x64xf32>
    %648 = vector.broadcast %647 : vector<1x64xf32> to vector<8x64xf32>
    %649 = arith.mulf %646, %648 : vector<8x64xf32>
    %c5_547 = arith.constant 5 : index
    %c0_548 = arith.constant 0 : index
    %c0_549 = arith.constant 0 : index
    %650 = vector.load %arg9[%c5_547, %c0_548, %c0_549] : memref<9x4x8xf32, #tpu.memory_space<vmem>>, vector<1x4x8xf32>
    %651 = vector.shape_cast %650 : vector<1x4x8xf32> to vector<4x8xf32>
    %cst_550 = arith.constant dense<0.000000e+00> : vector<4x64xf32>
    %652 = tpu.matmul %651, %649, %cst_550 {dimension_numbers = #tpu.dot_dimension_numbers<[1], [0], [0], [1], [0, 0, 1, 1], [], []>} : vector<4x8xf32>, vector<8x64xf32>, vector<4x64xf32> -> vector<4x64xf32>
    %653 = arith.addf %645, %652 : vector<4x64xf32>
    %c0_551 = arith.constant 0 : index
    %c135_552 = arith.constant 135 : index
    %654 = vector.load %arg37[%c0_551, %c135_552] : memref<8x1280xf32, #tpu.memory_space<vmem>>, vector<8x64xf32>
    %c6_553 = arith.constant 6 : index
    %c0_554 = arith.constant 0 : index
    %655 = vector.load %arg28[%c6_553, %c0_554] : memref<9x64xf32, #tpu.memory_space<vmem>>, vector<1x64xf32>
    %656 = vector.broadcast %655 : vector<1x64xf32> to vector<8x64xf32>
    %657 = arith.mulf %654, %656 : vector<8x64xf32>
    %c6_555 = arith.constant 6 : index
    %c0_556 = arith.constant 0 : index
    %c0_557 = arith.constant 0 : index
    %658 = vector.load %arg9[%c6_555, %c0_556, %c0_557] : memref<9x4x8xf32, #tpu.memory_space<vmem>>, vector<1x4x8xf32>
    %659 = vector.shape_cast %658 : vector<1x4x8xf32> to vector<4x8xf32>
    %cst_558 = arith.constant dense<0.000000e+00> : vector<4x64xf32>
    %660 = tpu.matmul %659, %657, %cst_558 {dimension_numbers = #tpu.dot_dimension_numbers<[1], [0], [0], [1], [0, 0, 1, 1], [], []>} : vector<4x8xf32>, vector<8x64xf32>, vector<4x64xf32> -> vector<4x64xf32>
    %661 = arith.addf %653, %660 : vector<4x64xf32>
    %c0_559 = arith.constant 0 : index
    %c136_560 = arith.constant 136 : index
    %662 = vector.load %arg37[%c0_559, %c136_560] : memref<8x1280xf32, #tpu.memory_space<vmem>>, vector<8x64xf32>
    %c7_561 = arith.constant 7 : index
    %c0_562 = arith.constant 0 : index
    %663 = vector.load %arg28[%c7_561, %c0_562] : memref<9x64xf32, #tpu.memory_space<vmem>>, vector<1x64xf32>
    %664 = vector.broadcast %663 : vector<1x64xf32> to vector<8x64xf32>
    %665 = arith.mulf %662, %664 : vector<8x64xf32>
    %c7_563 = arith.constant 7 : index
    %c0_564 = arith.constant 0 : index
    %c0_565 = arith.constant 0 : index
    %666 = vector.load %arg9[%c7_563, %c0_564, %c0_565] : memref<9x4x8xf32, #tpu.memory_space<vmem>>, vector<1x4x8xf32>
    %667 = vector.shape_cast %666 : vector<1x4x8xf32> to vector<4x8xf32>
    %cst_566 = arith.constant dense<0.000000e+00> : vector<4x64xf32>
    %668 = tpu.matmul %667, %665, %cst_566 {dimension_numbers = #tpu.dot_dimension_numbers<[1], [0], [0], [1], [0, 0, 1, 1], [], []>} : vector<4x8xf32>, vector<8x64xf32>, vector<4x64xf32> -> vector<4x64xf32>
    %669 = arith.addf %661, %668 : vector<4x64xf32>
    %c0_567 = arith.constant 0 : index
    %c137_568 = arith.constant 137 : index
    %670 = vector.load %arg37[%c0_567, %c137_568] : memref<8x1280xf32, #tpu.memory_space<vmem>>, vector<8x64xf32>
    %c8_569 = arith.constant 8 : index
    %c0_570 = arith.constant 0 : index
    %671 = vector.load %arg28[%c8_569, %c0_570] : memref<9x64xf32, #tpu.memory_space<vmem>>, vector<1x64xf32>
    %672 = vector.broadcast %671 : vector<1x64xf32> to vector<8x64xf32>
    %673 = arith.mulf %670, %672 : vector<8x64xf32>
    %c8_571 = arith.constant 8 : index
    %c0_572 = arith.constant 0 : index
    %c0_573 = arith.constant 0 : index
    %674 = vector.load %arg9[%c8_571, %c0_572, %c0_573] : memref<9x4x8xf32, #tpu.memory_space<vmem>>, vector<1x4x8xf32>
    %675 = vector.shape_cast %674 : vector<1x4x8xf32> to vector<4x8xf32>
    %cst_574 = arith.constant dense<0.000000e+00> : vector<4x64xf32>
    %676 = tpu.matmul %675, %673, %cst_574 {dimension_numbers = #tpu.dot_dimension_numbers<[1], [0], [0], [1], [0, 0, 1, 1], [], []>} : vector<4x8xf32>, vector<8x64xf32>, vector<4x64xf32> -> vector<4x64xf32>
    %677 = arith.addf %669, %676 : vector<4x64xf32>
    %c0_575 = arith.constant 0 : index
    %c0_576 = arith.constant 0 : index
    %678 = vector.load %arg21[%c0_575, %c0_576] : memref<4x1xf32, #tpu.memory_space<vmem>>, vector<4x1xf32>
    %679 = vector.broadcast %678 : vector<4x1xf32> to vector<4x64xf32>
    %680 = arith.addf %677, %679 : vector<4x64xf32>
    %cst_577 = arith.constant 0.000000e+00 : f32
    %681 = vector.broadcast %cst_577 : f32 to vector<4x64xf32>
    %682 = arith.maximumf %680, %681 : vector<4x64xf32>
    %683 = arith.addf %682, %603 : vector<4x64xf32>
    %c0_578 = arith.constant 0 : index
    %c128_579 = arith.constant 128 : index
    %684 = vector.load %arg37[%c0_578, %c128_579] : memref<8x1280xf32, #tpu.memory_space<vmem>>, vector<4x64xf32>
    tpu.vector_store %arg37[%c0_578, %c128_579], %683 {strides = array<i32>} : memref<8x1280xf32, #tpu.memory_space<vmem>>, vector<4x64xf32>,
    %cst_580 = arith.constant 0.000000e+00 : f32
    %685 = vector.broadcast %cst_580 : f32 to vector<8x64xf32>
    %c0_581 = arith.constant 0 : index
    %c119_582 = arith.constant 119 : index
    %686 = vector.load %arg37[%c0_581, %c119_582] : memref<8x1280xf32, #tpu.memory_space<vmem>>, vector<8x64xf32>
    %c0_583 = arith.constant 0 : index
    %c0_584 = arith.constant 0 : index
    %687 = vector.load %arg28[%c0_583, %c0_584] : memref<9x64xf32, #tpu.memory_space<vmem>>, vector<1x64xf32>
    %688 = vector.broadcast %687 : vector<1x64xf32> to vector<8x64xf32>
    %689 = arith.mulf %686, %688 : vector<8x64xf32>
    %c0_585 = arith.constant 0 : index
    %c0_586 = arith.constant 0 : index
    %c0_587 = arith.constant 0 : index
    %690 = vector.load %arg10[%c0_585, %c0_586, %c0_587] : memref<9x8x8xf32, #tpu.memory_space<vmem>>, vector<1x8x8xf32>
    %691 = vector.shape_cast %690 : vector<1x8x8xf32> to vector<8x8xf32>
    %cst_588 = arith.constant dense<0.000000e+00> : vector<8x64xf32>
    %692 = tpu.matmul %691, %689, %cst_588 {dimension_numbers = #tpu.dot_dimension_numbers<[1], [0], [0], [1], [0, 0, 1, 1], [], []>} : vector<8x8xf32>, vector<8x64xf32>, vector<8x64xf32> -> vector<8x64xf32>
    %693 = arith.addf %685, %692 : vector<8x64xf32>
    %c0_589 = arith.constant 0 : index
    %c120_590 = arith.constant 120 : index
    %694 = vector.load %arg37[%c0_589, %c120_590] : memref<8x1280xf32, #tpu.memory_space<vmem>>, vector<8x64xf32>
    %c1_591 = arith.constant 1 : index
    %c0_592 = arith.constant 0 : index
    %695 = vector.load %arg28[%c1_591, %c0_592] : memref<9x64xf32, #tpu.memory_space<vmem>>, vector<1x64xf32>
    %696 = vector.broadcast %695 : vector<1x64xf32> to vector<8x64xf32>
    %697 = arith.mulf %694, %696 : vector<8x64xf32>
    %c1_593 = arith.constant 1 : index
    %c0_594 = arith.constant 0 : index
    %c0_595 = arith.constant 0 : index
    %698 = vector.load %arg10[%c1_593, %c0_594, %c0_595] : memref<9x8x8xf32, #tpu.memory_space<vmem>>, vector<1x8x8xf32>
    %699 = vector.shape_cast %698 : vector<1x8x8xf32> to vector<8x8xf32>
    %cst_596 = arith.constant dense<0.000000e+00> : vector<8x64xf32>
    %700 = tpu.matmul %699, %697, %cst_596 {dimension_numbers = #tpu.dot_dimension_numbers<[1], [0], [0], [1], [0, 0, 1, 1], [], []>} : vector<8x8xf32>, vector<8x64xf32>, vector<8x64xf32> -> vector<8x64xf32>
    %701 = arith.addf %693, %700 : vector<8x64xf32>
    %c0_597 = arith.constant 0 : index
    %c121_598 = arith.constant 121 : index
    %702 = vector.load %arg37[%c0_597, %c121_598] : memref<8x1280xf32, #tpu.memory_space<vmem>>, vector<8x64xf32>
    %c2_599 = arith.constant 2 : index
    %c0_600 = arith.constant 0 : index
    %703 = vector.load %arg28[%c2_599, %c0_600] : memref<9x64xf32, #tpu.memory_space<vmem>>, vector<1x64xf32>
    %704 = vector.broadcast %703 : vector<1x64xf32> to vector<8x64xf32>
    %705 = arith.mulf %702, %704 : vector<8x64xf32>
    %c2_601 = arith.constant 2 : index
    %c0_602 = arith.constant 0 : index
    %c0_603 = arith.constant 0 : index
    %706 = vector.load %arg10[%c2_601, %c0_602, %c0_603] : memref<9x8x8xf32, #tpu.memory_space<vmem>>, vector<1x8x8xf32>
    %707 = vector.shape_cast %706 : vector<1x8x8xf32> to vector<8x8xf32>
    %cst_604 = arith.constant dense<0.000000e+00> : vector<8x64xf32>
    %708 = tpu.matmul %707, %705, %cst_604 {dimension_numbers = #tpu.dot_dimension_numbers<[1], [0], [0], [1], [0, 0, 1, 1], [], []>} : vector<8x8xf32>, vector<8x64xf32>, vector<8x64xf32> -> vector<8x64xf32>
    %709 = arith.addf %701, %708 : vector<8x64xf32>
    %c0_605 = arith.constant 0 : index
    %c127_606 = arith.constant 127 : index
    %710 = vector.load %arg37[%c0_605, %c127_606] : memref<8x1280xf32, #tpu.memory_space<vmem>>, vector<8x64xf32>
    %c3_607 = arith.constant 3 : index
    %c0_608 = arith.constant 0 : index
    %711 = vector.load %arg28[%c3_607, %c0_608] : memref<9x64xf32, #tpu.memory_space<vmem>>, vector<1x64xf32>
    %712 = vector.broadcast %711 : vector<1x64xf32> to vector<8x64xf32>
    %713 = arith.mulf %710, %712 : vector<8x64xf32>
    %c3_609 = arith.constant 3 : index
    %c0_610 = arith.constant 0 : index
    %c0_611 = arith.constant 0 : index
    %714 = vector.load %arg10[%c3_609, %c0_610, %c0_611] : memref<9x8x8xf32, #tpu.memory_space<vmem>>, vector<1x8x8xf32>
    %715 = vector.shape_cast %714 : vector<1x8x8xf32> to vector<8x8xf32>
    %cst_612 = arith.constant dense<0.000000e+00> : vector<8x64xf32>
    %716 = tpu.matmul %715, %713, %cst_612 {dimension_numbers = #tpu.dot_dimension_numbers<[1], [0], [0], [1], [0, 0, 1, 1], [], []>} : vector<8x8xf32>, vector<8x64xf32>, vector<8x64xf32> -> vector<8x64xf32>
    %717 = arith.addf %709, %716 : vector<8x64xf32>
    %c0_613 = arith.constant 0 : index
    %c128_614 = arith.constant 128 : index
    %718 = vector.load %arg37[%c0_613, %c128_614] : memref<8x1280xf32, #tpu.memory_space<vmem>>, vector<8x64xf32>
    %c4_615 = arith.constant 4 : index
    %c0_616 = arith.constant 0 : index
    %719 = vector.load %arg28[%c4_615, %c0_616] : memref<9x64xf32, #tpu.memory_space<vmem>>, vector<1x64xf32>
    %720 = vector.broadcast %719 : vector<1x64xf32> to vector<8x64xf32>
    %721 = arith.mulf %718, %720 : vector<8x64xf32>
    %c4_617 = arith.constant 4 : index
    %c0_618 = arith.constant 0 : index
    %c0_619 = arith.constant 0 : index
    %722 = vector.load %arg10[%c4_617, %c0_618, %c0_619] : memref<9x8x8xf32, #tpu.memory_space<vmem>>, vector<1x8x8xf32>
    %723 = vector.shape_cast %722 : vector<1x8x8xf32> to vector<8x8xf32>
    %cst_620 = arith.constant dense<0.000000e+00> : vector<8x64xf32>
    %724 = tpu.matmul %723, %721, %cst_620 {dimension_numbers = #tpu.dot_dimension_numbers<[1], [0], [0], [1], [0, 0, 1, 1], [], []>} : vector<8x8xf32>, vector<8x64xf32>, vector<8x64xf32> -> vector<8x64xf32>
    %725 = arith.addf %717, %724 : vector<8x64xf32>
    %c0_621 = arith.constant 0 : index
    %c129_622 = arith.constant 129 : index
    %726 = vector.load %arg37[%c0_621, %c129_622] : memref<8x1280xf32, #tpu.memory_space<vmem>>, vector<8x64xf32>
    %c5_623 = arith.constant 5 : index
    %c0_624 = arith.constant 0 : index
    %727 = vector.load %arg28[%c5_623, %c0_624] : memref<9x64xf32, #tpu.memory_space<vmem>>, vector<1x64xf32>
    %728 = vector.broadcast %727 : vector<1x64xf32> to vector<8x64xf32>
    %729 = arith.mulf %726, %728 : vector<8x64xf32>
    %c5_625 = arith.constant 5 : index
    %c0_626 = arith.constant 0 : index
    %c0_627 = arith.constant 0 : index
    %730 = vector.load %arg10[%c5_625, %c0_626, %c0_627] : memref<9x8x8xf32, #tpu.memory_space<vmem>>, vector<1x8x8xf32>
    %731 = vector.shape_cast %730 : vector<1x8x8xf32> to vector<8x8xf32>
    %cst_628 = arith.constant dense<0.000000e+00> : vector<8x64xf32>
    %732 = tpu.matmul %731, %729, %cst_628 {dimension_numbers = #tpu.dot_dimension_numbers<[1], [0], [0], [1], [0, 0, 1, 1], [], []>} : vector<8x8xf32>, vector<8x64xf32>, vector<8x64xf32> -> vector<8x64xf32>
    %733 = arith.addf %725, %732 : vector<8x64xf32>
    %c0_629 = arith.constant 0 : index
    %c135_630 = arith.constant 135 : index
    %734 = vector.load %arg37[%c0_629, %c135_630] : memref<8x1280xf32, #tpu.memory_space<vmem>>, vector<8x64xf32>
    %c6_631 = arith.constant 6 : index
    %c0_632 = arith.constant 0 : index
    %735 = vector.load %arg28[%c6_631, %c0_632] : memref<9x64xf32, #tpu.memory_space<vmem>>, vector<1x64xf32>
    %736 = vector.broadcast %735 : vector<1x64xf32> to vector<8x64xf32>
    %737 = arith.mulf %734, %736 : vector<8x64xf32>
    %c6_633 = arith.constant 6 : index
    %c0_634 = arith.constant 0 : index
    %c0_635 = arith.constant 0 : index
    %738 = vector.load %arg10[%c6_633, %c0_634, %c0_635] : memref<9x8x8xf32, #tpu.memory_space<vmem>>, vector<1x8x8xf32>
    %739 = vector.shape_cast %738 : vector<1x8x8xf32> to vector<8x8xf32>
    %cst_636 = arith.constant dense<0.000000e+00> : vector<8x64xf32>
    %740 = tpu.matmul %739, %737, %cst_636 {dimension_numbers = #tpu.dot_dimension_numbers<[1], [0], [0], [1], [0, 0, 1, 1], [], []>} : vector<8x8xf32>, vector<8x64xf32>, vector<8x64xf32> -> vector<8x64xf32>
    %741 = arith.addf %733, %740 : vector<8x64xf32>
    %c0_637 = arith.constant 0 : index
    %c136_638 = arith.constant 136 : index
    %742 = vector.load %arg37[%c0_637, %c136_638] : memref<8x1280xf32, #tpu.memory_space<vmem>>, vector<8x64xf32>
    %c7_639 = arith.constant 7 : index
    %c0_640 = arith.constant 0 : index
    %743 = vector.load %arg28[%c7_639, %c0_640] : memref<9x64xf32, #tpu.memory_space<vmem>>, vector<1x64xf32>
    %744 = vector.broadcast %743 : vector<1x64xf32> to vector<8x64xf32>
    %745 = arith.mulf %742, %744 : vector<8x64xf32>
    %c7_641 = arith.constant 7 : index
    %c0_642 = arith.constant 0 : index
    %c0_643 = arith.constant 0 : index
    %746 = vector.load %arg10[%c7_641, %c0_642, %c0_643] : memref<9x8x8xf32, #tpu.memory_space<vmem>>, vector<1x8x8xf32>
    %747 = vector.shape_cast %746 : vector<1x8x8xf32> to vector<8x8xf32>
    %cst_644 = arith.constant dense<0.000000e+00> : vector<8x64xf32>
    %748 = tpu.matmul %747, %745, %cst_644 {dimension_numbers = #tpu.dot_dimension_numbers<[1], [0], [0], [1], [0, 0, 1, 1], [], []>} : vector<8x8xf32>, vector<8x64xf32>, vector<8x64xf32> -> vector<8x64xf32>
    %749 = arith.addf %741, %748 : vector<8x64xf32>
    %c0_645 = arith.constant 0 : index
    %c137_646 = arith.constant 137 : index
    %750 = vector.load %arg37[%c0_645, %c137_646] : memref<8x1280xf32, #tpu.memory_space<vmem>>, vector<8x64xf32>
    %c8_647 = arith.constant 8 : index
    %c0_648 = arith.constant 0 : index
    %751 = vector.load %arg28[%c8_647, %c0_648] : memref<9x64xf32, #tpu.memory_space<vmem>>, vector<1x64xf32>
    %752 = vector.broadcast %751 : vector<1x64xf32> to vector<8x64xf32>
    %753 = arith.mulf %750, %752 : vector<8x64xf32>
    %c8_649 = arith.constant 8 : index
    %c0_650 = arith.constant 0 : index
    %c0_651 = arith.constant 0 : index
    %754 = vector.load %arg10[%c8_649, %c0_650, %c0_651] : memref<9x8x8xf32, #tpu.memory_space<vmem>>, vector<1x8x8xf32>
    %755 = vector.shape_cast %754 : vector<1x8x8xf32> to vector<8x8xf32>
    %cst_652 = arith.constant dense<0.000000e+00> : vector<8x64xf32>
    %756 = tpu.matmul %755, %753, %cst_652 {dimension_numbers = #tpu.dot_dimension_numbers<[1], [0], [0], [1], [0, 0, 1, 1], [], []>} : vector<8x8xf32>, vector<8x64xf32>, vector<8x64xf32> -> vector<8x64xf32>
    %757 = arith.addf %749, %756 : vector<8x64xf32>
    %c0_653 = arith.constant 0 : index
    %c0_654 = arith.constant 0 : index
    %758 = vector.load %arg32[%c0_653, %c0_654] : memref<64x16xf32, #tpu.memory_space<vmem>>, vector<64x16xf32>
    %cst_655 = arith.constant dense<0.000000e+00> : vector<8x16xf32>
    %759 = tpu.matmul %757, %758, %cst_655 {dimension_numbers = #tpu.dot_dimension_numbers<[1], [0], [0], [1], [0, 0, 1, 1], [], []>} : vector<8x64xf32>, vector<64x16xf32>, vector<8x16xf32> -> vector<8x16xf32>
    %c0_656 = arith.constant 0 : index
    %c0_657 = arith.constant 0 : index
    %760 = vector.load %arg22[%c0_656, %c0_657] : memref<8x1xf32, #tpu.memory_space<vmem>>, vector<8x1xf32>
    %761 = vector.broadcast %760 : vector<8x1xf32> to vector<8x16xf32>
    %762 = arith.addf %759, %761 : vector<8x16xf32>
    %cst_658 = arith.constant 0.000000e+00 : f32
    %763 = vector.broadcast %cst_658 : f32 to vector<8x16xf32>
    %764 = arith.maximumf %762, %763 : vector<8x16xf32>
    %765 = arith.addf %764, %762 : vector<8x16xf32>
    %c0_659 = arith.constant 0 : index
    %c128_660 = arith.constant 128 : index
    %766 = vector.load %arg37[%c0_659, %c128_660] : memref<8x1280xf32, #tpu.memory_space<vmem>>, vector<8x16xf32>
    tpu.vector_store %arg37[%c0_659, %c128_660], %765 {strides = array<i32>} : memref<8x1280xf32, #tpu.memory_space<vmem>>, vector<8x16xf32>,
    %cst_661 = arith.constant 0.000000e+00 : f32
    %767 = vector.broadcast %cst_661 : f32 to vector<8x16xf32>
    %c0_662 = arith.constant 0 : index
    %c123 = arith.constant 123 : index
    %768 = vector.load %arg37[%c0_662, %c123] : memref<8x1280xf32, #tpu.memory_space<vmem>>, vector<8x16xf32>
    %c0_663 = arith.constant 0 : index
    %c0_664 = arith.constant 0 : index
    %769 = vector.load %arg29[%c0_663, %c0_664] : memref<9x16xf32, #tpu.memory_space<vmem>>, vector<1x16xf32>
    %770 = vector.broadcast %769 : vector<1x16xf32> to vector<8x16xf32>
    %771 = arith.mulf %768, %770 : vector<8x16xf32>
    %c0_665 = arith.constant 0 : index
    %c0_666 = arith.constant 0 : index
    %c0_667 = arith.constant 0 : index
    %772 = vector.load %arg11[%c0_665, %c0_666, %c0_667] : memref<9x8x8xf32, #tpu.memory_space<vmem>>, vector<1x8x8xf32>
    %773 = vector.shape_cast %772 : vector<1x8x8xf32> to vector<8x8xf32>
    %cst_668 = arith.constant dense<0.000000e+00> : vector<8x16xf32>
    %774 = tpu.matmul %773, %771, %cst_668 {dimension_numbers = #tpu.dot_dimension_numbers<[1], [0], [0], [1], [0, 0, 1, 1], [], []>} : vector<8x8xf32>, vector<8x16xf32>, vector<8x16xf32> -> vector<8x16xf32>
    %775 = arith.addf %767, %774 : vector<8x16xf32>
    %c0_669 = arith.constant 0 : index
    %c124 = arith.constant 124 : index
    %776 = vector.load %arg37[%c0_669, %c124] : memref<8x1280xf32, #tpu.memory_space<vmem>>, vector<8x16xf32>
    %c1_670 = arith.constant 1 : index
    %c0_671 = arith.constant 0 : index
    %777 = vector.load %arg29[%c1_670, %c0_671] : memref<9x16xf32, #tpu.memory_space<vmem>>, vector<1x16xf32>
    %778 = vector.broadcast %777 : vector<1x16xf32> to vector<8x16xf32>
    %779 = arith.mulf %776, %778 : vector<8x16xf32>
    %c1_672 = arith.constant 1 : index
    %c0_673 = arith.constant 0 : index
    %c0_674 = arith.constant 0 : index
    %780 = vector.load %arg11[%c1_672, %c0_673, %c0_674] : memref<9x8x8xf32, #tpu.memory_space<vmem>>, vector<1x8x8xf32>
    %781 = vector.shape_cast %780 : vector<1x8x8xf32> to vector<8x8xf32>
    %cst_675 = arith.constant dense<0.000000e+00> : vector<8x16xf32>
    %782 = tpu.matmul %781, %779, %cst_675 {dimension_numbers = #tpu.dot_dimension_numbers<[1], [0], [0], [1], [0, 0, 1, 1], [], []>} : vector<8x8xf32>, vector<8x16xf32>, vector<8x16xf32> -> vector<8x16xf32>
    %783 = arith.addf %775, %782 : vector<8x16xf32>
    %c0_676 = arith.constant 0 : index
    %c125 = arith.constant 125 : index
    %784 = vector.load %arg37[%c0_676, %c125] : memref<8x1280xf32, #tpu.memory_space<vmem>>, vector<8x16xf32>
    %c2_677 = arith.constant 2 : index
    %c0_678 = arith.constant 0 : index
    %785 = vector.load %arg29[%c2_677, %c0_678] : memref<9x16xf32, #tpu.memory_space<vmem>>, vector<1x16xf32>
    %786 = vector.broadcast %785 : vector<1x16xf32> to vector<8x16xf32>
    %787 = arith.mulf %784, %786 : vector<8x16xf32>
    %c2_679 = arith.constant 2 : index
    %c0_680 = arith.constant 0 : index
    %c0_681 = arith.constant 0 : index
    %788 = vector.load %arg11[%c2_679, %c0_680, %c0_681] : memref<9x8x8xf32, #tpu.memory_space<vmem>>, vector<1x8x8xf32>
    %789 = vector.shape_cast %788 : vector<1x8x8xf32> to vector<8x8xf32>
    %cst_682 = arith.constant dense<0.000000e+00> : vector<8x16xf32>
    %790 = tpu.matmul %789, %787, %cst_682 {dimension_numbers = #tpu.dot_dimension_numbers<[1], [0], [0], [1], [0, 0, 1, 1], [], []>} : vector<8x8xf32>, vector<8x16xf32>, vector<8x16xf32> -> vector<8x16xf32>
    %791 = arith.addf %783, %790 : vector<8x16xf32>
    %c0_683 = arith.constant 0 : index
    %c127_684 = arith.constant 127 : index
    %792 = vector.load %arg37[%c0_683, %c127_684] : memref<8x1280xf32, #tpu.memory_space<vmem>>, vector<8x16xf32>
    %c3_685 = arith.constant 3 : index
    %c0_686 = arith.constant 0 : index
    %793 = vector.load %arg29[%c3_685, %c0_686] : memref<9x16xf32, #tpu.memory_space<vmem>>, vector<1x16xf32>
    %794 = vector.broadcast %793 : vector<1x16xf32> to vector<8x16xf32>
    %795 = arith.mulf %792, %794 : vector<8x16xf32>
    %c3_687 = arith.constant 3 : index
    %c0_688 = arith.constant 0 : index
    %c0_689 = arith.constant 0 : index
    %796 = vector.load %arg11[%c3_687, %c0_688, %c0_689] : memref<9x8x8xf32, #tpu.memory_space<vmem>>, vector<1x8x8xf32>
    %797 = vector.shape_cast %796 : vector<1x8x8xf32> to vector<8x8xf32>
    %cst_690 = arith.constant dense<0.000000e+00> : vector<8x16xf32>
    %798 = tpu.matmul %797, %795, %cst_690 {dimension_numbers = #tpu.dot_dimension_numbers<[1], [0], [0], [1], [0, 0, 1, 1], [], []>} : vector<8x8xf32>, vector<8x16xf32>, vector<8x16xf32> -> vector<8x16xf32>
    %799 = arith.addf %791, %798 : vector<8x16xf32>
    %c0_691 = arith.constant 0 : index
    %c128_692 = arith.constant 128 : index
    %800 = vector.load %arg37[%c0_691, %c128_692] : memref<8x1280xf32, #tpu.memory_space<vmem>>, vector<8x16xf32>
    %c4_693 = arith.constant 4 : index
    %c0_694 = arith.constant 0 : index
    %801 = vector.load %arg29[%c4_693, %c0_694] : memref<9x16xf32, #tpu.memory_space<vmem>>, vector<1x16xf32>
    %802 = vector.broadcast %801 : vector<1x16xf32> to vector<8x16xf32>
    %803 = arith.mulf %800, %802 : vector<8x16xf32>
    %c4_695 = arith.constant 4 : index
    %c0_696 = arith.constant 0 : index
    %c0_697 = arith.constant 0 : index
    %804 = vector.load %arg11[%c4_695, %c0_696, %c0_697] : memref<9x8x8xf32, #tpu.memory_space<vmem>>, vector<1x8x8xf32>
    %805 = vector.shape_cast %804 : vector<1x8x8xf32> to vector<8x8xf32>
    %cst_698 = arith.constant dense<0.000000e+00> : vector<8x16xf32>
    %806 = tpu.matmul %805, %803, %cst_698 {dimension_numbers = #tpu.dot_dimension_numbers<[1], [0], [0], [1], [0, 0, 1, 1], [], []>} : vector<8x8xf32>, vector<8x16xf32>, vector<8x16xf32> -> vector<8x16xf32>
    %807 = arith.addf %799, %806 : vector<8x16xf32>
    %c0_699 = arith.constant 0 : index
    %c129_700 = arith.constant 129 : index
    %808 = vector.load %arg37[%c0_699, %c129_700] : memref<8x1280xf32, #tpu.memory_space<vmem>>, vector<8x16xf32>
    %c5_701 = arith.constant 5 : index
    %c0_702 = arith.constant 0 : index
    %809 = vector.load %arg29[%c5_701, %c0_702] : memref<9x16xf32, #tpu.memory_space<vmem>>, vector<1x16xf32>
    %810 = vector.broadcast %809 : vector<1x16xf32> to vector<8x16xf32>
    %811 = arith.mulf %808, %810 : vector<8x16xf32>
    %c5_703 = arith.constant 5 : index
    %c0_704 = arith.constant 0 : index
    %c0_705 = arith.constant 0 : index
    %812 = vector.load %arg11[%c5_703, %c0_704, %c0_705] : memref<9x8x8xf32, #tpu.memory_space<vmem>>, vector<1x8x8xf32>
    %813 = vector.shape_cast %812 : vector<1x8x8xf32> to vector<8x8xf32>
    %cst_706 = arith.constant dense<0.000000e+00> : vector<8x16xf32>
    %814 = tpu.matmul %813, %811, %cst_706 {dimension_numbers = #tpu.dot_dimension_numbers<[1], [0], [0], [1], [0, 0, 1, 1], [], []>} : vector<8x8xf32>, vector<8x16xf32>, vector<8x16xf32> -> vector<8x16xf32>
    %815 = arith.addf %807, %814 : vector<8x16xf32>
    %c0_707 = arith.constant 0 : index
    %c131 = arith.constant 131 : index
    %816 = vector.load %arg37[%c0_707, %c131] : memref<8x1280xf32, #tpu.memory_space<vmem>>, vector<8x16xf32>
    %c6_708 = arith.constant 6 : index
    %c0_709 = arith.constant 0 : index
    %817 = vector.load %arg29[%c6_708, %c0_709] : memref<9x16xf32, #tpu.memory_space<vmem>>, vector<1x16xf32>
    %818 = vector.broadcast %817 : vector<1x16xf32> to vector<8x16xf32>
    %819 = arith.mulf %816, %818 : vector<8x16xf32>
    %c6_710 = arith.constant 6 : index
    %c0_711 = arith.constant 0 : index
    %c0_712 = arith.constant 0 : index
    %820 = vector.load %arg11[%c6_710, %c0_711, %c0_712] : memref<9x8x8xf32, #tpu.memory_space<vmem>>, vector<1x8x8xf32>
    %821 = vector.shape_cast %820 : vector<1x8x8xf32> to vector<8x8xf32>
    %cst_713 = arith.constant dense<0.000000e+00> : vector<8x16xf32>
    %822 = tpu.matmul %821, %819, %cst_713 {dimension_numbers = #tpu.dot_dimension_numbers<[1], [0], [0], [1], [0, 0, 1, 1], [], []>} : vector<8x8xf32>, vector<8x16xf32>, vector<8x16xf32> -> vector<8x16xf32>
    %823 = arith.addf %815, %822 : vector<8x16xf32>
    %c0_714 = arith.constant 0 : index
    %c132 = arith.constant 132 : index
    %824 = vector.load %arg37[%c0_714, %c132] : memref<8x1280xf32, #tpu.memory_space<vmem>>, vector<8x16xf32>
    %c7_715 = arith.constant 7 : index
    %c0_716 = arith.constant 0 : index
    %825 = vector.load %arg29[%c7_715, %c0_716] : memref<9x16xf32, #tpu.memory_space<vmem>>, vector<1x16xf32>
    %826 = vector.broadcast %825 : vector<1x16xf32> to vector<8x16xf32>
    %827 = arith.mulf %824, %826 : vector<8x16xf32>
    %c7_717 = arith.constant 7 : index
    %c0_718 = arith.constant 0 : index
    %c0_719 = arith.constant 0 : index
    %828 = vector.load %arg11[%c7_717, %c0_718, %c0_719] : memref<9x8x8xf32, #tpu.memory_space<vmem>>, vector<1x8x8xf32>
    %829 = vector.shape_cast %828 : vector<1x8x8xf32> to vector<8x8xf32>
    %cst_720 = arith.constant dense<0.000000e+00> : vector<8x16xf32>
    %830 = tpu.matmul %829, %827, %cst_720 {dimension_numbers = #tpu.dot_dimension_numbers<[1], [0], [0], [1], [0, 0, 1, 1], [], []>} : vector<8x8xf32>, vector<8x16xf32>, vector<8x16xf32> -> vector<8x16xf32>
    %831 = arith.addf %823, %830 : vector<8x16xf32>
    %c0_721 = arith.constant 0 : index
    %c133 = arith.constant 133 : index
    %832 = vector.load %arg37[%c0_721, %c133] : memref<8x1280xf32, #tpu.memory_space<vmem>>, vector<8x16xf32>
    %c8_722 = arith.constant 8 : index
    %c0_723 = arith.constant 0 : index
    %833 = vector.load %arg29[%c8_722, %c0_723] : memref<9x16xf32, #tpu.memory_space<vmem>>, vector<1x16xf32>
    %834 = vector.broadcast %833 : vector<1x16xf32> to vector<8x16xf32>
    %835 = arith.mulf %832, %834 : vector<8x16xf32>
    %c8_724 = arith.constant 8 : index
    %c0_725 = arith.constant 0 : index
    %c0_726 = arith.constant 0 : index
    %836 = vector.load %arg11[%c8_724, %c0_725, %c0_726] : memref<9x8x8xf32, #tpu.memory_space<vmem>>, vector<1x8x8xf32>
    %837 = vector.shape_cast %836 : vector<1x8x8xf32> to vector<8x8xf32>
    %cst_727 = arith.constant dense<0.000000e+00> : vector<8x16xf32>
    %838 = tpu.matmul %837, %835, %cst_727 {dimension_numbers = #tpu.dot_dimension_numbers<[1], [0], [0], [1], [0, 0, 1, 1], [], []>} : vector<8x8xf32>, vector<8x16xf32>, vector<8x16xf32> -> vector<8x16xf32>
    %839 = arith.addf %831, %838 : vector<8x16xf32>
    %c0_728 = arith.constant 0 : index
    %c0_729 = arith.constant 0 : index
    %840 = vector.load %arg23[%c0_728, %c0_729] : memref<8x1xf32, #tpu.memory_space<vmem>>, vector<8x1xf32>
    %841 = vector.broadcast %840 : vector<8x1xf32> to vector<8x16xf32>
    %842 = arith.addf %839, %841 : vector<8x16xf32>
    %cst_730 = arith.constant 0.000000e+00 : f32
    %843 = vector.broadcast %cst_730 : f32 to vector<8x16xf32>
    %844 = arith.maximumf %842, %843 : vector<8x16xf32>
    %845 = arith.addf %844, %765 : vector<8x16xf32>
    %c0_731 = arith.constant 0 : index
    %c128_732 = arith.constant 128 : index
    %846 = vector.load %arg37[%c0_731, %c128_732] : memref<8x1280xf32, #tpu.memory_space<vmem>>, vector<8x16xf32>
    tpu.vector_store %arg37[%c0_731, %c128_732], %845 {strides = array<i32>} : memref<8x1280xf32, #tpu.memory_space<vmem>>, vector<8x16xf32>,
    %cst_733 = arith.constant 0.000000e+00 : f32
    %847 = vector.broadcast %cst_733 : f32 to vector<8x16xf32>
    %c0_734 = arith.constant 0 : index
    %c123_735 = arith.constant 123 : index
    %848 = vector.load %arg37[%c0_734, %c123_735] : memref<8x1280xf32, #tpu.memory_space<vmem>>, vector<8x16xf32>
    %c0_736 = arith.constant 0 : index
    %c0_737 = arith.constant 0 : index
    %849 = vector.load %arg29[%c0_736, %c0_737] : memref<9x16xf32, #tpu.memory_space<vmem>>, vector<1x16xf32>
    %850 = vector.broadcast %849 : vector<1x16xf32> to vector<8x16xf32>
    %851 = arith.mulf %848, %850 : vector<8x16xf32>
    %c0_738 = arith.constant 0 : index
    %c0_739 = arith.constant 0 : index
    %c0_740 = arith.constant 0 : index
    %852 = vector.load %arg12[%c0_738, %c0_739, %c0_740] : memref<9x8x8xf32, #tpu.memory_space<vmem>>, vector<1x8x8xf32>
    %853 = vector.shape_cast %852 : vector<1x8x8xf32> to vector<8x8xf32>
    %cst_741 = arith.constant dense<0.000000e+00> : vector<8x16xf32>
    %854 = tpu.matmul %853, %851, %cst_741 {dimension_numbers = #tpu.dot_dimension_numbers<[1], [0], [0], [1], [0, 0, 1, 1], [], []>} : vector<8x8xf32>, vector<8x16xf32>, vector<8x16xf32> -> vector<8x16xf32>
    %855 = arith.addf %847, %854 : vector<8x16xf32>
    %c0_742 = arith.constant 0 : index
    %c124_743 = arith.constant 124 : index
    %856 = vector.load %arg37[%c0_742, %c124_743] : memref<8x1280xf32, #tpu.memory_space<vmem>>, vector<8x16xf32>
    %c1_744 = arith.constant 1 : index
    %c0_745 = arith.constant 0 : index
    %857 = vector.load %arg29[%c1_744, %c0_745] : memref<9x16xf32, #tpu.memory_space<vmem>>, vector<1x16xf32>
    %858 = vector.broadcast %857 : vector<1x16xf32> to vector<8x16xf32>
    %859 = arith.mulf %856, %858 : vector<8x16xf32>
    %c1_746 = arith.constant 1 : index
    %c0_747 = arith.constant 0 : index
    %c0_748 = arith.constant 0 : index
    %860 = vector.load %arg12[%c1_746, %c0_747, %c0_748] : memref<9x8x8xf32, #tpu.memory_space<vmem>>, vector<1x8x8xf32>
    %861 = vector.shape_cast %860 : vector<1x8x8xf32> to vector<8x8xf32>
    %cst_749 = arith.constant dense<0.000000e+00> : vector<8x16xf32>
    %862 = tpu.matmul %861, %859, %cst_749 {dimension_numbers = #tpu.dot_dimension_numbers<[1], [0], [0], [1], [0, 0, 1, 1], [], []>} : vector<8x8xf32>, vector<8x16xf32>, vector<8x16xf32> -> vector<8x16xf32>
    %863 = arith.addf %855, %862 : vector<8x16xf32>
    %c0_750 = arith.constant 0 : index
    %c125_751 = arith.constant 125 : index
    %864 = vector.load %arg37[%c0_750, %c125_751] : memref<8x1280xf32, #tpu.memory_space<vmem>>, vector<8x16xf32>
    %c2_752 = arith.constant 2 : index
    %c0_753 = arith.constant 0 : index
    %865 = vector.load %arg29[%c2_752, %c0_753] : memref<9x16xf32, #tpu.memory_space<vmem>>, vector<1x16xf32>
    %866 = vector.broadcast %865 : vector<1x16xf32> to vector<8x16xf32>
    %867 = arith.mulf %864, %866 : vector<8x16xf32>
    %c2_754 = arith.constant 2 : index
    %c0_755 = arith.constant 0 : index
    %c0_756 = arith.constant 0 : index
    %868 = vector.load %arg12[%c2_754, %c0_755, %c0_756] : memref<9x8x8xf32, #tpu.memory_space<vmem>>, vector<1x8x8xf32>
    %869 = vector.shape_cast %868 : vector<1x8x8xf32> to vector<8x8xf32>
    %cst_757 = arith.constant dense<0.000000e+00> : vector<8x16xf32>
    %870 = tpu.matmul %869, %867, %cst_757 {dimension_numbers = #tpu.dot_dimension_numbers<[1], [0], [0], [1], [0, 0, 1, 1], [], []>} : vector<8x8xf32>, vector<8x16xf32>, vector<8x16xf32> -> vector<8x16xf32>
    %871 = arith.addf %863, %870 : vector<8x16xf32>
    %c0_758 = arith.constant 0 : index
    %c127_759 = arith.constant 127 : index
    %872 = vector.load %arg37[%c0_758, %c127_759] : memref<8x1280xf32, #tpu.memory_space<vmem>>, vector<8x16xf32>
    %c3_760 = arith.constant 3 : index
    %c0_761 = arith.constant 0 : index
    %873 = vector.load %arg29[%c3_760, %c0_761] : memref<9x16xf32, #tpu.memory_space<vmem>>, vector<1x16xf32>
    %874 = vector.broadcast %873 : vector<1x16xf32> to vector<8x16xf32>
    %875 = arith.mulf %872, %874 : vector<8x16xf32>
    %c3_762 = arith.constant 3 : index
    %c0_763 = arith.constant 0 : index
    %c0_764 = arith.constant 0 : index
    %876 = vector.load %arg12[%c3_762, %c0_763, %c0_764] : memref<9x8x8xf32, #tpu.memory_space<vmem>>, vector<1x8x8xf32>
    %877 = vector.shape_cast %876 : vector<1x8x8xf32> to vector<8x8xf32>
    %cst_765 = arith.constant dense<0.000000e+00> : vector<8x16xf32>
    %878 = tpu.matmul %877, %875, %cst_765 {dimension_numbers = #tpu.dot_dimension_numbers<[1], [0], [0], [1], [0, 0, 1, 1], [], []>} : vector<8x8xf32>, vector<8x16xf32>, vector<8x16xf32> -> vector<8x16xf32>
    %879 = arith.addf %871, %878 : vector<8x16xf32>
    %c0_766 = arith.constant 0 : index
    %c128_767 = arith.constant 128 : index
    %880 = vector.load %arg37[%c0_766, %c128_767] : memref<8x1280xf32, #tpu.memory_space<vmem>>, vector<8x16xf32>
    %c4_768 = arith.constant 4 : index
    %c0_769 = arith.constant 0 : index
    %881 = vector.load %arg29[%c4_768, %c0_769] : memref<9x16xf32, #tpu.memory_space<vmem>>, vector<1x16xf32>
    %882 = vector.broadcast %881 : vector<1x16xf32> to vector<8x16xf32>
    %883 = arith.mulf %880, %882 : vector<8x16xf32>
    %c4_770 = arith.constant 4 : index
    %c0_771 = arith.constant 0 : index
    %c0_772 = arith.constant 0 : index
    %884 = vector.load %arg12[%c4_770, %c0_771, %c0_772] : memref<9x8x8xf32, #tpu.memory_space<vmem>>, vector<1x8x8xf32>
    %885 = vector.shape_cast %884 : vector<1x8x8xf32> to vector<8x8xf32>
    %cst_773 = arith.constant dense<0.000000e+00> : vector<8x16xf32>
    %886 = tpu.matmul %885, %883, %cst_773 {dimension_numbers = #tpu.dot_dimension_numbers<[1], [0], [0], [1], [0, 0, 1, 1], [], []>} : vector<8x8xf32>, vector<8x16xf32>, vector<8x16xf32> -> vector<8x16xf32>
    %887 = arith.addf %879, %886 : vector<8x16xf32>
    %c0_774 = arith.constant 0 : index
    %c129_775 = arith.constant 129 : index
    %888 = vector.load %arg37[%c0_774, %c129_775] : memref<8x1280xf32, #tpu.memory_space<vmem>>, vector<8x16xf32>
    %c5_776 = arith.constant 5 : index
    %c0_777 = arith.constant 0 : index
    %889 = vector.load %arg29[%c5_776, %c0_777] : memref<9x16xf32, #tpu.memory_space<vmem>>, vector<1x16xf32>
    %890 = vector.broadcast %889 : vector<1x16xf32> to vector<8x16xf32>
    %891 = arith.mulf %888, %890 : vector<8x16xf32>
    %c5_778 = arith.constant 5 : index
    %c0_779 = arith.constant 0 : index
    %c0_780 = arith.constant 0 : index
    %892 = vector.load %arg12[%c5_778, %c0_779, %c0_780] : memref<9x8x8xf32, #tpu.memory_space<vmem>>, vector<1x8x8xf32>
    %893 = vector.shape_cast %892 : vector<1x8x8xf32> to vector<8x8xf32>
    %cst_781 = arith.constant dense<0.000000e+00> : vector<8x16xf32>
    %894 = tpu.matmul %893, %891, %cst_781 {dimension_numbers = #tpu.dot_dimension_numbers<[1], [0], [0], [1], [0, 0, 1, 1], [], []>} : vector<8x8xf32>, vector<8x16xf32>, vector<8x16xf32> -> vector<8x16xf32>
    %895 = arith.addf %887, %894 : vector<8x16xf32>
    %c0_782 = arith.constant 0 : index
    %c131_783 = arith.constant 131 : index
    %896 = vector.load %arg37[%c0_782, %c131_783] : memref<8x1280xf32, #tpu.memory_space<vmem>>, vector<8x16xf32>
    %c6_784 = arith.constant 6 : index
    %c0_785 = arith.constant 0 : index
    %897 = vector.load %arg29[%c6_784, %c0_785] : memref<9x16xf32, #tpu.memory_space<vmem>>, vector<1x16xf32>
    %898 = vector.broadcast %897 : vector<1x16xf32> to vector<8x16xf32>
    %899 = arith.mulf %896, %898 : vector<8x16xf32>
    %c6_786 = arith.constant 6 : index
    %c0_787 = arith.constant 0 : index
    %c0_788 = arith.constant 0 : index
    %900 = vector.load %arg12[%c6_786, %c0_787, %c0_788] : memref<9x8x8xf32, #tpu.memory_space<vmem>>, vector<1x8x8xf32>
    %901 = vector.shape_cast %900 : vector<1x8x8xf32> to vector<8x8xf32>
    %cst_789 = arith.constant dense<0.000000e+00> : vector<8x16xf32>
    %902 = tpu.matmul %901, %899, %cst_789 {dimension_numbers = #tpu.dot_dimension_numbers<[1], [0], [0], [1], [0, 0, 1, 1], [], []>} : vector<8x8xf32>, vector<8x16xf32>, vector<8x16xf32> -> vector<8x16xf32>
    %903 = arith.addf %895, %902 : vector<8x16xf32>
    %c0_790 = arith.constant 0 : index
    %c132_791 = arith.constant 132 : index
    %904 = vector.load %arg37[%c0_790, %c132_791] : memref<8x1280xf32, #tpu.memory_space<vmem>>, vector<8x16xf32>
    %c7_792 = arith.constant 7 : index
    %c0_793 = arith.constant 0 : index
    %905 = vector.load %arg29[%c7_792, %c0_793] : memref<9x16xf32, #tpu.memory_space<vmem>>, vector<1x16xf32>
    %906 = vector.broadcast %905 : vector<1x16xf32> to vector<8x16xf32>
    %907 = arith.mulf %904, %906 : vector<8x16xf32>
    %c7_794 = arith.constant 7 : index
    %c0_795 = arith.constant 0 : index
    %c0_796 = arith.constant 0 : index
    %908 = vector.load %arg12[%c7_794, %c0_795, %c0_796] : memref<9x8x8xf32, #tpu.memory_space<vmem>>, vector<1x8x8xf32>
    %909 = vector.shape_cast %908 : vector<1x8x8xf32> to vector<8x8xf32>
    %cst_797 = arith.constant dense<0.000000e+00> : vector<8x16xf32>
    %910 = tpu.matmul %909, %907, %cst_797 {dimension_numbers = #tpu.dot_dimension_numbers<[1], [0], [0], [1], [0, 0, 1, 1], [], []>} : vector<8x8xf32>, vector<8x16xf32>, vector<8x16xf32> -> vector<8x16xf32>
    %911 = arith.addf %903, %910 : vector<8x16xf32>
    %c0_798 = arith.constant 0 : index
    %c133_799 = arith.constant 133 : index
    %912 = vector.load %arg37[%c0_798, %c133_799] : memref<8x1280xf32, #tpu.memory_space<vmem>>, vector<8x16xf32>
    %c8_800 = arith.constant 8 : index
    %c0_801 = arith.constant 0 : index
    %913 = vector.load %arg29[%c8_800, %c0_801] : memref<9x16xf32, #tpu.memory_space<vmem>>, vector<1x16xf32>
    %914 = vector.broadcast %913 : vector<1x16xf32> to vector<8x16xf32>
    %915 = arith.mulf %912, %914 : vector<8x16xf32>
    %c8_802 = arith.constant 8 : index
    %c0_803 = arith.constant 0 : index
    %c0_804 = arith.constant 0 : index
    %916 = vector.load %arg12[%c8_802, %c0_803, %c0_804] : memref<9x8x8xf32, #tpu.memory_space<vmem>>, vector<1x8x8xf32>
    %917 = vector.shape_cast %916 : vector<1x8x8xf32> to vector<8x8xf32>
    %cst_805 = arith.constant dense<0.000000e+00> : vector<8x16xf32>
    %918 = tpu.matmul %917, %915, %cst_805 {dimension_numbers = #tpu.dot_dimension_numbers<[1], [0], [0], [1], [0, 0, 1, 1], [], []>} : vector<8x8xf32>, vector<8x16xf32>, vector<8x16xf32> -> vector<8x16xf32>
    %919 = arith.addf %911, %918 : vector<8x16xf32>
    %c0_806 = arith.constant 0 : index
    %c0_807 = arith.constant 0 : index
    %920 = vector.load %arg24[%c0_806, %c0_807] : memref<8x1xf32, #tpu.memory_space<vmem>>, vector<8x1xf32>
    %921 = vector.broadcast %920 : vector<8x1xf32> to vector<8x16xf32>
    %922 = arith.addf %919, %921 : vector<8x16xf32>
    %cst_808 = arith.constant 0.000000e+00 : f32
    %923 = vector.broadcast %cst_808 : f32 to vector<8x16xf32>
    %924 = arith.maximumf %922, %923 : vector<8x16xf32>
    %925 = arith.addf %924, %845 : vector<8x16xf32>
    %c0_809 = arith.constant 0 : index
    %c128_810 = arith.constant 128 : index
    %926 = vector.load %arg37[%c0_809, %c128_810] : memref<8x1280xf32, #tpu.memory_space<vmem>>, vector<8x16xf32>
    tpu.vector_store %arg37[%c0_809, %c128_810], %925 {strides = array<i32>} : memref<8x1280xf32, #tpu.memory_space<vmem>>, vector<8x16xf32>,
    %cst_811 = arith.constant 0.000000e+00 : f32
    %927 = vector.broadcast %cst_811 : f32 to vector<16x16xf32>
    %c0_812 = arith.constant 0 : index
    %c123_813 = arith.constant 123 : index
    %928 = vector.load %arg37[%c0_812, %c123_813] : memref<8x1280xf32, #tpu.memory_space<vmem>>, vector<8x16xf32>
    %c0_814 = arith.constant 0 : index
    %c0_815 = arith.constant 0 : index
    %929 = vector.load %arg29[%c0_814, %c0_815] : memref<9x16xf32, #tpu.memory_space<vmem>>, vector<1x16xf32>
    %930 = vector.broadcast %929 : vector<1x16xf32> to vector<8x16xf32>
    %931 = arith.mulf %928, %930 : vector<8x16xf32>
    %c0_816 = arith.constant 0 : index
    %c0_817 = arith.constant 0 : index
    %c0_818 = arith.constant 0 : index
    %932 = vector.load %arg13[%c0_816, %c0_817, %c0_818] : memref<9x16x8xf32, #tpu.memory_space<vmem>>, vector<1x16x8xf32>
    %933 = vector.shape_cast %932 : vector<1x16x8xf32> to vector<16x8xf32>
    %cst_819 = arith.constant dense<0.000000e+00> : vector<16x16xf32>
    %934 = tpu.matmul %933, %931, %cst_819 {dimension_numbers = #tpu.dot_dimension_numbers<[1], [0], [0], [1], [0, 0, 1, 1], [], []>} : vector<16x8xf32>, vector<8x16xf32>, vector<16x16xf32> -> vector<16x16xf32>
    %935 = arith.addf %927, %934 : vector<16x16xf32>
    %c0_820 = arith.constant 0 : index
    %c124_821 = arith.constant 124 : index
    %936 = vector.load %arg37[%c0_820, %c124_821] : memref<8x1280xf32, #tpu.memory_space<vmem>>, vector<8x16xf32>
    %c1_822 = arith.constant 1 : index
    %c0_823 = arith.constant 0 : index
    %937 = vector.load %arg29[%c1_822, %c0_823] : memref<9x16xf32, #tpu.memory_space<vmem>>, vector<1x16xf32>
    %938 = vector.broadcast %937 : vector<1x16xf32> to vector<8x16xf32>
    %939 = arith.mulf %936, %938 : vector<8x16xf32>
    %c1_824 = arith.constant 1 : index
    %c0_825 = arith.constant 0 : index
    %c0_826 = arith.constant 0 : index
    %940 = vector.load %arg13[%c1_824, %c0_825, %c0_826] : memref<9x16x8xf32, #tpu.memory_space<vmem>>, vector<1x16x8xf32>
    %941 = vector.shape_cast %940 : vector<1x16x8xf32> to vector<16x8xf32>
    %cst_827 = arith.constant dense<0.000000e+00> : vector<16x16xf32>
    %942 = tpu.matmul %941, %939, %cst_827 {dimension_numbers = #tpu.dot_dimension_numbers<[1], [0], [0], [1], [0, 0, 1, 1], [], []>} : vector<16x8xf32>, vector<8x16xf32>, vector<16x16xf32> -> vector<16x16xf32>
    %943 = arith.addf %935, %942 : vector<16x16xf32>
    %c0_828 = arith.constant 0 : index
    %c125_829 = arith.constant 125 : index
    %944 = vector.load %arg37[%c0_828, %c125_829] : memref<8x1280xf32, #tpu.memory_space<vmem>>, vector<8x16xf32>
    %c2_830 = arith.constant 2 : index
    %c0_831 = arith.constant 0 : index
    %945 = vector.load %arg29[%c2_830, %c0_831] : memref<9x16xf32, #tpu.memory_space<vmem>>, vector<1x16xf32>
    %946 = vector.broadcast %945 : vector<1x16xf32> to vector<8x16xf32>
    %947 = arith.mulf %944, %946 : vector<8x16xf32>
    %c2_832 = arith.constant 2 : index
    %c0_833 = arith.constant 0 : index
    %c0_834 = arith.constant 0 : index
    %948 = vector.load %arg13[%c2_832, %c0_833, %c0_834] : memref<9x16x8xf32, #tpu.memory_space<vmem>>, vector<1x16x8xf32>
    %949 = vector.shape_cast %948 : vector<1x16x8xf32> to vector<16x8xf32>
    %cst_835 = arith.constant dense<0.000000e+00> : vector<16x16xf32>
    %950 = tpu.matmul %949, %947, %cst_835 {dimension_numbers = #tpu.dot_dimension_numbers<[1], [0], [0], [1], [0, 0, 1, 1], [], []>} : vector<16x8xf32>, vector<8x16xf32>, vector<16x16xf32> -> vector<16x16xf32>
    %951 = arith.addf %943, %950 : vector<16x16xf32>
    %c0_836 = arith.constant 0 : index
    %c127_837 = arith.constant 127 : index
    %952 = vector.load %arg37[%c0_836, %c127_837] : memref<8x1280xf32, #tpu.memory_space<vmem>>, vector<8x16xf32>
    %c3_838 = arith.constant 3 : index
    %c0_839 = arith.constant 0 : index
    %953 = vector.load %arg29[%c3_838, %c0_839] : memref<9x16xf32, #tpu.memory_space<vmem>>, vector<1x16xf32>
    %954 = vector.broadcast %953 : vector<1x16xf32> to vector<8x16xf32>
    %955 = arith.mulf %952, %954 : vector<8x16xf32>
    %c3_840 = arith.constant 3 : index
    %c0_841 = arith.constant 0 : index
    %c0_842 = arith.constant 0 : index
    %956 = vector.load %arg13[%c3_840, %c0_841, %c0_842] : memref<9x16x8xf32, #tpu.memory_space<vmem>>, vector<1x16x8xf32>
    %957 = vector.shape_cast %956 : vector<1x16x8xf32> to vector<16x8xf32>
    %cst_843 = arith.constant dense<0.000000e+00> : vector<16x16xf32>
    %958 = tpu.matmul %957, %955, %cst_843 {dimension_numbers = #tpu.dot_dimension_numbers<[1], [0], [0], [1], [0, 0, 1, 1], [], []>} : vector<16x8xf32>, vector<8x16xf32>, vector<16x16xf32> -> vector<16x16xf32>
    %959 = arith.addf %951, %958 : vector<16x16xf32>
    %c0_844 = arith.constant 0 : index
    %c128_845 = arith.constant 128 : index
    %960 = vector.load %arg37[%c0_844, %c128_845] : memref<8x1280xf32, #tpu.memory_space<vmem>>, vector<8x16xf32>
    %c4_846 = arith.constant 4 : index
    %c0_847 = arith.constant 0 : index
    %961 = vector.load %arg29[%c4_846, %c0_847] : memref<9x16xf32, #tpu.memory_space<vmem>>, vector<1x16xf32>
    %962 = vector.broadcast %961 : vector<1x16xf32> to vector<8x16xf32>
    %963 = arith.mulf %960, %962 : vector<8x16xf32>
    %c4_848 = arith.constant 4 : index
    %c0_849 = arith.constant 0 : index
    %c0_850 = arith.constant 0 : index
    %964 = vector.load %arg13[%c4_848, %c0_849, %c0_850] : memref<9x16x8xf32, #tpu.memory_space<vmem>>, vector<1x16x8xf32>
    %965 = vector.shape_cast %964 : vector<1x16x8xf32> to vector<16x8xf32>
    %cst_851 = arith.constant dense<0.000000e+00> : vector<16x16xf32>
    %966 = tpu.matmul %965, %963, %cst_851 {dimension_numbers = #tpu.dot_dimension_numbers<[1], [0], [0], [1], [0, 0, 1, 1], [], []>} : vector<16x8xf32>, vector<8x16xf32>, vector<16x16xf32> -> vector<16x16xf32>
    %967 = arith.addf %959, %966 : vector<16x16xf32>
    %c0_852 = arith.constant 0 : index
    %c129_853 = arith.constant 129 : index
    %968 = vector.load %arg37[%c0_852, %c129_853] : memref<8x1280xf32, #tpu.memory_space<vmem>>, vector<8x16xf32>
    %c5_854 = arith.constant 5 : index
    %c0_855 = arith.constant 0 : index
    %969 = vector.load %arg29[%c5_854, %c0_855] : memref<9x16xf32, #tpu.memory_space<vmem>>, vector<1x16xf32>
    %970 = vector.broadcast %969 : vector<1x16xf32> to vector<8x16xf32>
    %971 = arith.mulf %968, %970 : vector<8x16xf32>
    %c5_856 = arith.constant 5 : index
    %c0_857 = arith.constant 0 : index
    %c0_858 = arith.constant 0 : index
    %972 = vector.load %arg13[%c5_856, %c0_857, %c0_858] : memref<9x16x8xf32, #tpu.memory_space<vmem>>, vector<1x16x8xf32>
    %973 = vector.shape_cast %972 : vector<1x16x8xf32> to vector<16x8xf32>
    %cst_859 = arith.constant dense<0.000000e+00> : vector<16x16xf32>
    %974 = tpu.matmul %973, %971, %cst_859 {dimension_numbers = #tpu.dot_dimension_numbers<[1], [0], [0], [1], [0, 0, 1, 1], [], []>} : vector<16x8xf32>, vector<8x16xf32>, vector<16x16xf32> -> vector<16x16xf32>
    %975 = arith.addf %967, %974 : vector<16x16xf32>
    %c0_860 = arith.constant 0 : index
    %c131_861 = arith.constant 131 : index
    %976 = vector.load %arg37[%c0_860, %c131_861] : memref<8x1280xf32, #tpu.memory_space<vmem>>, vector<8x16xf32>
    %c6_862 = arith.constant 6 : index
    %c0_863 = arith.constant 0 : index
    %977 = vector.load %arg29[%c6_862, %c0_863] : memref<9x16xf32, #tpu.memory_space<vmem>>, vector<1x16xf32>
    %978 = vector.broadcast %977 : vector<1x16xf32> to vector<8x16xf32>
    %979 = arith.mulf %976, %978 : vector<8x16xf32>
    %c6_864 = arith.constant 6 : index
    %c0_865 = arith.constant 0 : index
    %c0_866 = arith.constant 0 : index
    %980 = vector.load %arg13[%c6_864, %c0_865, %c0_866] : memref<9x16x8xf32, #tpu.memory_space<vmem>>, vector<1x16x8xf32>
    %981 = vector.shape_cast %980 : vector<1x16x8xf32> to vector<16x8xf32>
    %cst_867 = arith.constant dense<0.000000e+00> : vector<16x16xf32>
    %982 = tpu.matmul %981, %979, %cst_867 {dimension_numbers = #tpu.dot_dimension_numbers<[1], [0], [0], [1], [0, 0, 1, 1], [], []>} : vector<16x8xf32>, vector<8x16xf32>, vector<16x16xf32> -> vector<16x16xf32>
    %983 = arith.addf %975, %982 : vector<16x16xf32>
    %c0_868 = arith.constant 0 : index
    %c132_869 = arith.constant 132 : index
    %984 = vector.load %arg37[%c0_868, %c132_869] : memref<8x1280xf32, #tpu.memory_space<vmem>>, vector<8x16xf32>
    %c7_870 = arith.constant 7 : index
    %c0_871 = arith.constant 0 : index
    %985 = vector.load %arg29[%c7_870, %c0_871] : memref<9x16xf32, #tpu.memory_space<vmem>>, vector<1x16xf32>
    %986 = vector.broadcast %985 : vector<1x16xf32> to vector<8x16xf32>
    %987 = arith.mulf %984, %986 : vector<8x16xf32>
    %c7_872 = arith.constant 7 : index
    %c0_873 = arith.constant 0 : index
    %c0_874 = arith.constant 0 : index
    %988 = vector.load %arg13[%c7_872, %c0_873, %c0_874] : memref<9x16x8xf32, #tpu.memory_space<vmem>>, vector<1x16x8xf32>
    %989 = vector.shape_cast %988 : vector<1x16x8xf32> to vector<16x8xf32>
    %cst_875 = arith.constant dense<0.000000e+00> : vector<16x16xf32>
    %990 = tpu.matmul %989, %987, %cst_875 {dimension_numbers = #tpu.dot_dimension_numbers<[1], [0], [0], [1], [0, 0, 1, 1], [], []>} : vector<16x8xf32>, vector<8x16xf32>, vector<16x16xf32> -> vector<16x16xf32>
    %991 = arith.addf %983, %990 : vector<16x16xf32>
    %c0_876 = arith.constant 0 : index
    %c133_877 = arith.constant 133 : index
    %992 = vector.load %arg37[%c0_876, %c133_877] : memref<8x1280xf32, #tpu.memory_space<vmem>>, vector<8x16xf32>
    %c8_878 = arith.constant 8 : index
    %c0_879 = arith.constant 0 : index
    %993 = vector.load %arg29[%c8_878, %c0_879] : memref<9x16xf32, #tpu.memory_space<vmem>>, vector<1x16xf32>
    %994 = vector.broadcast %993 : vector<1x16xf32> to vector<8x16xf32>
    %995 = arith.mulf %992, %994 : vector<8x16xf32>
    %c8_880 = arith.constant 8 : index
    %c0_881 = arith.constant 0 : index
    %c0_882 = arith.constant 0 : index
    %996 = vector.load %arg13[%c8_880, %c0_881, %c0_882] : memref<9x16x8xf32, #tpu.memory_space<vmem>>, vector<1x16x8xf32>
    %997 = vector.shape_cast %996 : vector<1x16x8xf32> to vector<16x8xf32>
    %cst_883 = arith.constant dense<0.000000e+00> : vector<16x16xf32>
    %998 = tpu.matmul %997, %995, %cst_883 {dimension_numbers = #tpu.dot_dimension_numbers<[1], [0], [0], [1], [0, 0, 1, 1], [], []>} : vector<16x8xf32>, vector<8x16xf32>, vector<16x16xf32> -> vector<16x16xf32>
    %999 = arith.addf %991, %998 : vector<16x16xf32>
    %c0_884 = arith.constant 0 : index
    %c0_885 = arith.constant 0 : index
    %1000 = vector.load %arg33[%c0_884, %c0_885] : memref<16x4xf32, #tpu.memory_space<vmem>>, vector<16x4xf32>
    %cst_886 = arith.constant dense<0.000000e+00> : vector<16x4xf32>
    %1001 = tpu.matmul %999, %1000, %cst_886 {dimension_numbers = #tpu.dot_dimension_numbers<[1], [0], [0], [1], [0, 0, 1, 1], [], []>} : vector<16x16xf32>, vector<16x4xf32>, vector<16x4xf32> -> vector<16x4xf32>
    %c0_887 = arith.constant 0 : index
    %c0_888 = arith.constant 0 : index
    %1002 = vector.load %arg25[%c0_887, %c0_888] : memref<16x1xf32, #tpu.memory_space<vmem>>, vector<16x1xf32>
    %1003 = vector.broadcast %1002 : vector<16x1xf32> to vector<16x4xf32>
    %1004 = arith.addf %1001, %1003 : vector<16x4xf32>
    %cst_889 = arith.constant 0.000000e+00 : f32
    %1005 = vector.broadcast %cst_889 : f32 to vector<16x4xf32>
    %1006 = arith.maximumf %1004, %1005 : vector<16x4xf32>
    %1007 = arith.addf %1006, %1004 : vector<16x4xf32>
    %cst_890 = arith.constant 0.000000e+00 : f32
    %1008 = vector.broadcast %cst_890 : f32 to vector<16x10xf32>
    %1009 = vector.extract_strided_slice %1007 {offsets = [0, 0], sizes = [16, 1], strides = [1, 1]} : vector<16x4xf32> to vector<16x1xf32>
    %c0_891 = arith.constant 0 : index
    %c0_892 = arith.constant 0 : index
    %c0_893 = arith.constant 0 : index
    %1010 = vector.load %arg34[%c0_891, %c0_892, %c0_893] : memref<4x16x10xf32, #tpu.memory_space<vmem>>, vector<1x16x10xf32>
    %1011 = vector.shape_cast %1010 : vector<1x16x10xf32> to vector<16x10xf32>
    %1012 = vector.broadcast %1009 : vector<16x1xf32> to vector<16x10xf32>
    %1013 = arith.mulf %1012, %1011 : vector<16x10xf32>
    %1014 = arith.addf %1008, %1013 : vector<16x10xf32>
    %1015 = vector.extract_strided_slice %1007 {offsets = [0, 1], sizes = [16, 1], strides = [1, 1]} : vector<16x4xf32> to vector<16x1xf32>
    %c1_894 = arith.constant 1 : index
    %c0_895 = arith.constant 0 : index
    %c0_896 = arith.constant 0 : index
    %1016 = vector.load %arg34[%c1_894, %c0_895, %c0_896] : memref<4x16x10xf32, #tpu.memory_space<vmem>>, vector<1x16x10xf32>
    %1017 = vector.shape_cast %1016 : vector<1x16x10xf32> to vector<16x10xf32>
    %1018 = vector.broadcast %1015 : vector<16x1xf32> to vector<16x10xf32>
    %1019 = arith.mulf %1018, %1017 : vector<16x10xf32>
    %1020 = arith.addf %1014, %1019 : vector<16x10xf32>
    %1021 = vector.extract_strided_slice %1007 {offsets = [0, 2], sizes = [16, 1], strides = [1, 1]} : vector<16x4xf32> to vector<16x1xf32>
    %c2_897 = arith.constant 2 : index
    %c0_898 = arith.constant 0 : index
    %c0_899 = arith.constant 0 : index
    %1022 = vector.load %arg34[%c2_897, %c0_898, %c0_899] : memref<4x16x10xf32, #tpu.memory_space<vmem>>, vector<1x16x10xf32>
    %1023 = vector.shape_cast %1022 : vector<1x16x10xf32> to vector<16x10xf32>
    %1024 = vector.broadcast %1021 : vector<16x1xf32> to vector<16x10xf32>
    %1025 = arith.mulf %1024, %1023 : vector<16x10xf32>
    %1026 = arith.addf %1020, %1025 : vector<16x10xf32>
    %1027 = vector.extract_strided_slice %1007 {offsets = [0, 3], sizes = [16, 1], strides = [1, 1]} : vector<16x4xf32> to vector<16x1xf32>
    %c3_900 = arith.constant 3 : index
    %c0_901 = arith.constant 0 : index
    %c0_902 = arith.constant 0 : index
    %1028 = vector.load %arg34[%c3_900, %c0_901, %c0_902] : memref<4x16x10xf32, #tpu.memory_space<vmem>>, vector<1x16x10xf32>
    %1029 = vector.shape_cast %1028 : vector<1x16x10xf32> to vector<16x10xf32>
    %1030 = vector.broadcast %1027 : vector<16x1xf32> to vector<16x10xf32>
    %1031 = arith.mulf %1030, %1029 : vector<16x10xf32>
    %1032 = arith.addf %1026, %1031 : vector<16x10xf32>
    %cst_903 = arith.constant dense<0.000000e+00> : vector<10xf32>
    %1033 = vector.multi_reduction <add>, %1032, %cst_903 [0] : vector<16x10xf32> to vector<10xf32>
    %1034 = vector.shape_cast %1033 : vector<10xf32> to vector<1x10xf32>
    %c0_904 = arith.constant 0 : index
    %c0_905 = arith.constant 0 : index
    %1035 = vector.load %arg35[%c0_904, %c0_905] : memref<1x10xf32, #tpu.memory_space<vmem>>, vector<1x10xf32>
    %1036 = arith.addf %1034, %1035 : vector<1x10xf32>
    %c0_906 = arith.constant 0 : index
    %c0_907 = arith.constant 0 : index
    %c0_908 = arith.constant 0 : index
    %1037 = vector.load %arg36[%c0_906, %c0_907, %c0_908] : memref<1x1x10xf32, #tpu.memory_space<vmem>>, vector<1x1x10xf32>
    %1038 = vector.shape_cast %1037 : vector<1x1x10xf32> to vector<1x10xf32>
    %1039 = vector.shape_cast %1036 : vector<1x10xf32> to vector<1x1x10xf32>
    tpu.vector_store %arg36[%c0_906, %c0_907, %c0_908], %1039 {strides = array<i32>} : memref<1x1x10xf32, #tpu.memory_space<vmem>>, vector<1x1x10xf32>,
    return
  }
  func.func @transform_0(%arg0: i32) -> (i32, i32, i32) {
    %c0_i32 = arith.constant 0 : i32
    %c0_i32_0 = arith.constant 0 : i32
    %c0_i32_1 = arith.constant 0 : i32
    return %arg0, %c0_i32, %c0_i32_0 : i32, i32, i32
  }
  func.func @transform_1(%arg0: i32) -> (i32, i32, i32) {
    %c0_i32 = arith.constant 0 : i32
    %c0_i32_0 = arith.constant 0 : i32
    %c0_i32_1 = arith.constant 0 : i32
    %c0_i32_2 = arith.constant 0 : i32
    return %c0_i32, %c0_i32_0, %c0_i32_1 : i32, i32, i32
  }
  func.func @transform_2(%arg0: i32) -> (i32, i32, i32) {
    %c0_i32 = arith.constant 0 : i32
    %c0_i32_0 = arith.constant 0 : i32
    %c0_i32_1 = arith.constant 0 : i32
    %c0_i32_2 = arith.constant 0 : i32
    return %c0_i32, %c0_i32_0, %c0_i32_1 : i32, i32, i32
  }
  func.func @transform_3(%arg0: i32) -> (i32, i32, i32) {
    %c0_i32 = arith.constant 0 : i32
    %c0_i32_0 = arith.constant 0 : i32
    %c0_i32_1 = arith.constant 0 : i32
    %c0_i32_2 = arith.constant 0 : i32
    return %c0_i32, %c0_i32_0, %c0_i32_1 : i32, i32, i32
  }
  func.func @transform_4(%arg0: i32) -> (i32, i32, i32) {
    %c0_i32 = arith.constant 0 : i32
    %c0_i32_0 = arith.constant 0 : i32
    %c0_i32_1 = arith.constant 0 : i32
    %c0_i32_2 = arith.constant 0 : i32
    return %c0_i32, %c0_i32_0, %c0_i32_1 : i32, i32, i32
  }
  func.func @transform_5(%arg0: i32) -> (i32, i32, i32) {
    %c0_i32 = arith.constant 0 : i32
    %c0_i32_0 = arith.constant 0 : i32
    %c0_i32_1 = arith.constant 0 : i32
    %c0_i32_2 = arith.constant 0 : i32
    return %c0_i32, %c0_i32_0, %c0_i32_1 : i32, i32, i32
  }
  func.func @transform_6(%arg0: i32) -> (i32, i32, i32) {
    %c0_i32 = arith.constant 0 : i32
    %c0_i32_0 = arith.constant 0 : i32
    %c0_i32_1 = arith.constant 0 : i32
    %c0_i32_2 = arith.constant 0 : i32
    return %c0_i32, %c0_i32_0, %c0_i32_1 : i32, i32, i32
  }
  func.func @transform_7(%arg0: i32) -> (i32, i32, i32) {
    %c0_i32 = arith.constant 0 : i32
    %c0_i32_0 = arith.constant 0 : i32
    %c0_i32_1 = arith.constant 0 : i32
    %c0_i32_2 = arith.constant 0 : i32
    return %c0_i32, %c0_i32_0, %c0_i32_1 : i32, i32, i32
  }
  func.func @transform_8(%arg0: i32) -> (i32, i32, i32) {
    %c0_i32 = arith.constant 0 : i32
    %c0_i32_0 = arith.constant 0 : i32
    %c0_i32_1 = arith.constant 0 : i32
    %c0_i32_2 = arith.constant 0 : i32
    return %c0_i32, %c0_i32_0, %c0_i32_1 : i32, i32, i32
  }
  func.func @transform_9(%arg0: i32) -> (i32, i32, i32) {
    %c0_i32 = arith.constant 0 : i32
    %c0_i32_0 = arith.constant 0 : i32
    %c0_i32_1 = arith.constant 0 : i32
    %c0_i32_2 = arith.constant 0 : i32
    return %c0_i32, %c0_i32_0, %c0_i32_1 : i32, i32, i32
  }
  func.func @transform_10(%arg0: i32) -> (i32, i32, i32) {
    %c0_i32 = arith.constant 0 : i32
    %c0_i32_0 = arith.constant 0 : i32
    %c0_i32_1 = arith.constant 0 : i32
    %c0_i32_2 = arith.constant 0 : i32
    return %c0_i32, %c0_i32_0, %c0_i32_1 : i32, i32, i32
  }
  func.func @transform_11(%arg0: i32) -> (i32, i32, i32) {
    %c0_i32 = arith.constant 0 : i32
    %c0_i32_0 = arith.constant 0 : i32
    %c0_i32_1 = arith.constant 0 : i32
    %c0_i32_2 = arith.constant 0 : i32
    return %c0_i32, %c0_i32_0, %c0_i32_1 : i32, i32, i32
  }
  func.func @transform_12(%arg0: i32) -> (i32, i32, i32) {
    %c0_i32 = arith.constant 0 : i32
    %c0_i32_0 = arith.constant 0 : i32
    %c0_i32_1 = arith.constant 0 : i32
    %c0_i32_2 = arith.constant 0 : i32
    return %c0_i32, %c0_i32_0, %c0_i32_1 : i32, i32, i32
  }
  func.func @transform_13(%arg0: i32) -> (i32, i32) {
    %c0_i32 = arith.constant 0 : i32
    %c0_i32_0 = arith.constant 0 : i32
    %c0_i32_1 = arith.constant 0 : i32
    return %c0_i32, %c0_i32_0 : i32, i32
  }
  func.func @transform_14(%arg0: i32) -> (i32, i32) {
    %c0_i32 = arith.constant 0 : i32
    %c0_i32_0 = arith.constant 0 : i32
    %c0_i32_1 = arith.constant 0 : i32
    return %c0_i32, %c0_i32_0 : i32, i32
  }
  func.func @transform_15(%arg0: i32) -> (i32, i32) {
    %c0_i32 = arith.constant 0 : i32
    %c0_i32_0 = arith.constant 0 : i32
    %c0_i32_1 = arith.constant 0 : i32
    return %c0_i32, %c0_i32_0 : i32, i32
  }
  func.func @transform_16(%arg0: i32) -> (i32, i32) {
    %c0_i32 = arith.constant 0 : i32
    %c0_i32_0 = arith.constant 0 : i32
    %c0_i32_1 = arith.constant 0 : i32
    return %c0_i32, %c0_i32_0 : i32, i32
  }
  func.func @transform_17(%arg0: i32) -> (i32, i32) {
    %c0_i32 = arith.constant 0 : i32
    %c0_i32_0 = arith.constant 0 : i32
    %c0_i32_1 = arith.constant 0 : i32
    return %c0_i32, %c0_i32_0 : i32, i32
  }
  func.func @transform_18(%arg0: i32) -> (i32, i32) {
    %c0_i32 = arith.constant 0 : i32
    %c0_i32_0 = arith.constant 0 : i32
    %c0_i32_1 = arith.constant 0 : i32
    return %c0_i32, %c0_i32_0 : i32, i32
  }
  func.func @transform_19(%arg0: i32) -> (i32, i32) {
    %c0_i32 = arith.constant 0 : i32
    %c0_i32_0 = arith.constant 0 : i32
    %c0_i32_1 = arith.constant 0 : i32
    return %c0_i32, %c0_i32_0 : i32, i32
  }
  func.func @transform_20(%arg0: i32) -> (i32, i32) {
    %c0_i32 = arith.constant 0 : i32
    %c0_i32_0 = arith.constant 0 : i32
    %c0_i32_1 = arith.constant 0 : i32
    return %c0_i32, %c0_i32_0 : i32, i32
  }
  func.func @transform_21(%arg0: i32) -> (i32, i32) {
    %c0_i32 = arith.constant 0 : i32
    %c0_i32_0 = arith.constant 0 : i32
    %c0_i32_1 = arith.constant 0 : i32
    return %c0_i32, %c0_i32_0 : i32, i32
  }
  func.func @transform_22(%arg0: i32) -> (i32, i32) {
    %c0_i32 = arith.constant 0 : i32
    %c0_i32_0 = arith.constant 0 : i32
    %c0_i32_1 = arith.constant 0 : i32
    return %c0_i32, %c0_i32_0 : i32, i32
  }
  func.func @transform_23(%arg0: i32) -> (i32, i32) {
    %c0_i32 = arith.constant 0 : i32
    %c0_i32_0 = arith.constant 0 : i32
    %c0_i32_1 = arith.constant 0 : i32
    return %c0_i32, %c0_i32_0 : i32, i32
  }
  func.func @transform_24(%arg0: i32) -> (i32, i32) {
    %c0_i32 = arith.constant 0 : i32
    %c0_i32_0 = arith.constant 0 : i32
    %c0_i32_1 = arith.constant 0 : i32
    return %c0_i32, %c0_i32_0 : i32, i32
  }
  func.func @transform_25(%arg0: i32) -> (i32, i32) {
    %c0_i32 = arith.constant 0 : i32
    %c0_i32_0 = arith.constant 0 : i32
    %c0_i32_1 = arith.constant 0 : i32
    return %c0_i32, %c0_i32_0 : i32, i32
  }
  func.func @transform_26(%arg0: i32) -> (i32, i32) {
    %c0_i32 = arith.constant 0 : i32
    %c0_i32_0 = arith.constant 0 : i32
    %c0_i32_1 = arith.constant 0 : i32
    return %c0_i32, %c0_i32_0 : i32, i32
  }
  func.func @transform_27(%arg0: i32) -> (i32, i32) {
    %c0_i32 = arith.constant 0 : i32
    %c0_i32_0 = arith.constant 0 : i32
    %c0_i32_1 = arith.constant 0 : i32
    return %c0_i32, %c0_i32_0 : i32, i32
  }
  func.func @transform_28(%arg0: i32) -> (i32, i32) {
    %c0_i32 = arith.constant 0 : i32
    %c0_i32_0 = arith.constant 0 : i32
    %c0_i32_1 = arith.constant 0 : i32
    return %c0_i32, %c0_i32_0 : i32, i32
  }
  func.func @transform_29(%arg0: i32) -> (i32, i32) {
    %c0_i32 = arith.constant 0 : i32
    %c0_i32_0 = arith.constant 0 : i32
    %c0_i32_1 = arith.constant 0 : i32
    return %c0_i32, %c0_i32_0 : i32, i32
  }
  func.func @transform_30(%arg0: i32) -> (i32, i32) {
    %c0_i32 = arith.constant 0 : i32
    %c0_i32_0 = arith.constant 0 : i32
    %c0_i32_1 = arith.constant 0 : i32
    return %c0_i32, %c0_i32_0 : i32, i32
  }
  func.func @transform_31(%arg0: i32) -> (i32, i32) {
    %c0_i32 = arith.constant 0 : i32
    %c0_i32_0 = arith.constant 0 : i32
    %c0_i32_1 = arith.constant 0 : i32
    return %c0_i32, %c0_i32_0 : i32, i32
  }
  func.func @transform_32(%arg0: i32) -> (i32, i32) {
    %c0_i32 = arith.constant 0 : i32
    %c0_i32_0 = arith.constant 0 : i32
    %c0_i32_1 = arith.constant 0 : i32
    return %c0_i32, %c0_i32_0 : i32, i32
  }
  func.func @transform_33(%arg0: i32) -> (i32, i32, i32) {
    %c0_i32 = arith.constant 0 : i32
    %c0_i32_0 = arith.constant 0 : i32
    %c0_i32_1 = arith.constant 0 : i32
    %c0_i32_2 = arith.constant 0 : i32
    return %c0_i32, %c0_i32_0, %c0_i32_1 : i32, i32, i32
  }
  func.func @transform_34(%arg0: i32) -> (i32, i32) {
    %c0_i32 = arith.constant 0 : i32
    %c0_i32_0 = arith.constant 0 : i32
    %c0_i32_1 = arith.constant 0 : i32
    return %c0_i32, %c0_i32_0 : i32, i32
  }
  func.func @transform_35(%arg0: i32) -> (i32, i32, i32) {
    %c0_i32 = arith.constant 0 : i32
    %c0_i32_0 = arith.constant 0 : i32
    %c0_i32_1 = arith.constant 0 : i32
    return %arg0, %c0_i32, %c0_i32_0 : i32, i32, i32
  }
}

</mosaic_0001>

<bundles_post_ra>
// kernel: forward.1
= control target key start
LH: loop header
LB: loop body
LE: loop exit
PB: predicated region body
PF: predicated region fallthrough
CT: control target
= control target key end

     0   :  { %s13475_s6 = smov 1   ;;  %s13476_s10 = smov 2   ;;  %s16229_s0 = inlined_call_operand.smem [shape: u32[36], index: -1, kind: input, shape index: {}] }
   0x1   :  { %s13557_s5 = sld [smem:[%s16229_s0]]   ;;  %s13477_s14 = smov 3  }
   0x2   :  { %s13562_s9 = sld [smem:[%s16229_s0 + %s13475_s6]]   ;;  %s13478_s18 = smov 4  }
   0x3   :  { %s13567_s13 = sld [smem:[%s16229_s0 + %s13476_s10]]   ;;  %s13479_s22 = smov 5  }
   0x4   :  { %s13572_s17 = sld [smem:[%s16229_s0 + %s13477_s14]]   ;;  %s13480_s26 = smov 6  }
   0x5   :  { %s13577_s21 = sld [smem:[%s16229_s0 + %s13478_s18]]   ;;  %s13481_s30 = smov 7  }
   0x6   :  { %s13582_s25 = sld [smem:[%s16229_s0 + %s13479_s22]]   ;;  %s13482_s4 = smov 8  }
   0x7   :  { %16307 = sst [smem:[#allocation8_spill]] %s13557_s5  ;;  %s13483_s10 = smov 9  }
   0x8   :  { %16308 = sst [smem:[#allocation9_spill]] %s13562_s9  ;;  %s13484_s15 = smov 10  }
   0x9   :  { %16309 = sst [smem:[#allocation10_spill]] %s13567_s13  ;;  %s13485_s20 = smov 11  }
   0xa   :  { %s13587_s29 = sld [smem:[%s16229_s0 + %s13480_s26]]   ;;  %s13486_s26 = smov 12  }
   0xb   :  { %s13592_s3 = sld [smem:[%s16229_s0 + %s13481_s30]]   ;;  %s13487_s1 = smov 13  }
   0xc   :  { %s13597_s8 = sld [smem:[%s16229_s0 + %s13482_s4]]   ;;  %s13488_s7 = smov 15  }
   0xd   :  { %s13602_s14 = sld [smem:[%s16229_s0 + %s13483_s10]]   ;;  %s13490_s22 = smov 17  }
   0xe   :  { %s13607_s19 = sld [smem:[%s16229_s0 + %s13484_s15]]   ;;  %s13489_s15 = smov 16  }
   0xf   :  { %s13612_s24 = sld [smem:[%s16229_s0 + %s13485_s20]]   ;;  %s13491_s28 = smov 18  }
  0x10   :  { %s13617_s30 = sld [smem:[%s16229_s0 + %s13486_s26]]   ;;  %s13496_s10 = smov 23  }
  0x11   :  { %16310 = sst [smem:[#allocation11_spill]] %s13592_s3 }
  0x12   :  { %16311 = sst [smem:[#allocation12_spill]] %s13597_s8 }
  0x13   :  { %16312 = sst [smem:[#allocation13_spill]] %s13602_s14  ;;  %s13500_s14 = smov 27  }
  0x14   :  { %16313 = sst [smem:[#allocation14_spill]] %s13607_s19  ;;  %s13499_s19 = smov 26  }
  0x15   :  { %16314 = sst [smem:[#allocation15_spill]] %s13612_s24 }
  0x16   :  { %16315 = sst [smem:[#allocation16_spill]] %s13617_s30 }
  0x17   :  { %s12053_s6 = sld [smem:[%s16229_s0 + %s13487_s1]]  }
  0x18   :  { %s13625_s12 = sld [smem:[%s16229_s0 + %s13488_s7]]   ;;  %s13492_s7 = smov 19  }
  0x19   :  { %s13630_s20 = sld [smem:[%s16229_s0 + %s13489_s15]]   ;;  %s13493_s15 = smov 20  }
  0x1a   :  { %s13635_s27 = sld [smem:[%s16229_s0 + %s13490_s22]]   ;;  %s13494_s22 = smov 21  }
  0x1b   :  { %s13640_s4 = sld [smem:[%s16229_s0 + %s13491_s28]]   ;;  %s13495_s28 = smov 22  }
  0x1c   :  { %s13645_s30 = sld [smem:[%s16229_s0 + %s13492_s7]]  }
  0x1d   :  { %s13650_s24 = sld [smem:[%s16229_s0 + %s13493_s15]]   ;;  %v76_v0 = vstv %s12053_s6  ;;  %s13497_s6 = smov 24  }
  0x1e   :  { %s13655_s1 = sld [smem:[%s16229_s0 + %s13494_s22]]   ;;  %77 = vst [vmem:[#allocation3] sm:$0x1] %v76_v0  ;;  %s13498_s22 = smov 25  }
  0x1f   :  { %s13660_s7 = sld [smem:[%s16229_s0 + %s13495_s28]]  }
  0x20   :  { %s13665_s15 = sld [smem:[%s16229_s0 + %s13496_s10]]  }
  0x21   :  { %16316 = sst [smem:[#allocation17_spill]] %s13640_s4 }
  0x22   :  { %16317 = sst [smem:[#allocation18_spill]] %s13645_s30 }
  0x23   :  { %16318 = sst [smem:[#allocation19_spill]] %s13650_s24 }
  0x24   :  { %16319 = sst [smem:[#allocation20_spill]] %s13655_s1  ;;  %s13502_s1 = smov 29  }
  0x25   :  { %16320 = sst [smem:[#allocation21_spill]] %s13660_s7 }
  0x26   :  { %16321 = sst [smem:[#allocation22_spill]] %s13665_s15 }
  0x27   :  { %s13670_s23 = sld [smem:[%s16229_s0 + %s13497_s6]]   ;;  %s13501_s6 = smov 28  }
  0x28   :  { %s13675_s8 = sld [smem:[%s16229_s0 + %s13498_s22]]  }
  0x29   :  { %s13680_s7 = sld [smem:[%s16229_s0 + %s13499_s19]]   ;;  %s13503_s19 = smov 30  }
  0x2a   :  { %s13685_s15 = sld [smem:[%s16229_s0 + %s13500_s14]]   ;;  %s13504_s14 = smov 31  }
  0x2b   :  { %s13695_s24 = sld [smem:[%s16229_s0 + %s13502_s1]]   ;;  %s13506_s1 = smov 33  }
  0x2c   :  { %s13700_s3 = sld [smem:[%s16229_s0 + %s13503_s19]]   ;;  %s13507_s19 = smov 34  }
  0x2d   :  { %16322 = sst [smem:[#allocation23_spill]] %s13670_s23 }
  0x2e   :  { %16323 = sst [smem:[#allocation24_spill]] %s13675_s8 }
  0x2f   :  { %16324 = sst [smem:[#allocation25_spill]] %s13680_s7 }
  0x30   :  { %16325 = sst [smem:[#allocation26_spill]] %s13685_s15 }
  0x31   :  { %s13690_s23 = sld [smem:[%s16229_s0 + %s13501_s6]]   ;;  %s13505_s6 = smov 32  }
  0x32   :  { %16327 = sst [smem:[#allocation28_spill]] %s13700_s3 }
  0x33   :  { %s13705_s30 = sld [smem:[%s16229_s0 + %s13504_s14]]   ;;  %s13508_s14 = smov 35  }
  0x34   :  { %s13715_s15 = sld [smem:[%s16229_s0 + %s13506_s1]]  }
  0x35   :  { %s13720_s3 = sld [smem:[%s16229_s0 + %s13507_s19]]  }
  0x37   :  { %16326 = sst [smem:[#allocation27_spill]] %s13690_s23 }
  0x38   :  { %s13710_s23 = sld [smem:[%s16229_s0 + %s13505_s6]]   ;;  %s13509_s6 = smov 14  }
  0x39   :  { %16328 = sst [smem:[#allocation29_spill]] %s13705_s30 }
  0x3a   :  { %s13725_s30 = sld [smem:[%s16229_s0 + %s13508_s14]]  }
  0x3b   :  { %16330 = sst [smem:[#allocation31_spill]] %s13720_s3 }
  0x3e   :  { %16329 = sst [smem:[#allocation30_spill]] %s13710_s23 }
  0x3f   :  { %s12054_s23 = sld [smem:[%s16229_s0 + %s13509_s6]]  }
  0x45   :  { %v78_v1 = vstv %s12054_s23 }
  0x46   :  { %79 = vst [vmem:[#allocation4] sm:$0x1] %v78_v1 }
  0x47   :  { %80 = vsyncpa [#allocation6], 0 }
  0x48   :  { %82 = vsyncpa [#allocation6 + $0x1], 0  ;;  %s13730_s1 = smov 0   ;;  %s13732_s22 = smov 0  }
  0x49   :  { %s13734_s26 = smov 0   ;;  %s13736_s19 = smov 0  }
  0x4a LB: > { %s16331_s8 = sld [smem:[#allocation24_spill]]  ;;  %s16332_s7 = sld [smem:[#allocation25_spill]]  ;;  %s13473_s19 = sphi %s13736_s19, %s16425_s19   ;;  %s13469_s26 = sphi %s13734_s26, %s16430_s26   ;;  %s13465_s22 = sphi %s13732_s22, %s16429_s22   ;;  %s13461_s1 = sphi %s13730_s1, %s16428_s1  }
  0x4b   : > { %s16333_s13 = sld [smem:[#allocation10_spill]]  ;;  %s16334_s9 = sld [smem:[#allocation9_spill]] }
  0x4c   : > { %16335 = sst [smem:[#allocation32_spill]] %s13461_s1  ;;  %s13751_s0 = sadd.s32 4294967295, %s13473_s19  }
  0x4d   : > { %16336 = sst [smem:[#allocation33_spill]] %s13469_s26  ;;  %s12077_s23 = sadd.s32 4294967294, %s13473_s19  }
  0x4e   : > { %s13755_s28 = sadd.s32 1, %s13473_s19   ;;  %s835_s2 = sadd.s32 1, %s13469_s26 }
  0x4f   : > { %16337 = sst [smem:[#allocation34_spill]] %s13755_s28  ;;  %s832_s14 = ssub.s32 %s13473_s19, %s13755_s28 }
  0x50   : > { %p845_p0 = scmp.ne.s32.totalorder %s13469_s26, %s13465_s22  ;;  %p833_p1 = scmp.eq.s32.totalorder %s832_s14, 0 }
  0x51   : > { %p846_p2 = scmp.eq.s32.totalorder %s13751_s0, 1  ;;  %p851_p3 = scmp.ne.s32.totalorder %s13465_s22, %s13461_s1 }
  0x52   : > { %p852_p4 = scmp.eq.s32.totalorder %s12077_s23, 1  ;;  %p12080_p7 = scmp.ge.s32.totalorder %s13473_s19, 1 }
  0x53   : > { %s13766_s10 = scalar_select %p833_p1, %s13469_s26, %s835_s2  }
  0x54   : > { %p13768_p5 = por %p846_p2, %p845_p0  ;;  %p13772_p6 = por %p852_p4, %p851_p3 }
  0x55   : > { %16338 = sst [smem:[#allocation35_spill]] %s13766_s10  ;;  %p979_p8 = scmp.lt.s32.totalorder %s13473_s19, 3 }
  0x56   : > { %s16340_s6 = scalar_select %p13772_p6, 1, 0 }
  0x57   : > { %p980_p9 = pnand %p12080_p7, %p979_p8 }
  0x58   : > { %16341 = sst [smem:[#allocation36_spill]] %s16340_s6 }
  0x59   : > { %983 = sbr.rel (%p980_p9) target bundleno = 6283 (0x188b), region = 160 }
  0x60   : > { %v12084_v2 = vld [vmem:[%s16334_s9 + $0x1] sm:$0x1]  ;;  %v16275_v4 = vmov 0   ;;  %v12087_v7 = vld [vmem:[%s16334_s9 + $0x2] sm:$0x1]  ;;  %s16244_s16 = smov 96   ;;  %v1107_v39 = vlaneseq }
  0x61   : > { %v12082_v3 = vld [vmem:[%s16331_s8 + $0x1] ss:$8 sm:$0xf]  ;;  %13379 = vset.pattern.permute.xlu0 %v16275_v4  ;;  %13380 = vset.pattern.permute.xlu1 %v16275_v4  ;;  %v12085_v8 = vld [vmem:[%s16331_s8 + $0x2] ss:$8 sm:$0xf] }
  0x62   : > { %v12083_v5 = vld [vmem:[%s16331_s8 + $0x1] ss:$8 sm:$0xf0]  ;;  %1133 = vperm.xlu0 %13379, %v12084_v2   ;;  %v12086_v9 = vld [vmem:[%s16331_s8 + $0x2] ss:$8 sm:$0xf0] }
  0x63   : > { %v1118_v6 = vor.u32 %v12083_v5, %v12082_v3  ;;  %v12090_v10 = vld [vmem:[%s16334_s9 + $0x3] sm:$0x1]  ;;  %v1161_v11 = vor.u32 %v12086_v9, %v12085_v8  ;;  %v12093_v14 = vld [vmem:[%s16334_s9 + $0x4] sm:$0x1]  ;;  %s16242_s18 = smov 97   ;;  %p1065_p10 = scmp.lt.s32.totalorder %s13751_s0, 1 }
  0x64   : > { %v12088_v12 = vld [vmem:[%s16331_s8 + $0x3] ss:$8 sm:$0xf]  ;;  %v12096_v16 = vld [vmem:[%s16334_s9 + $0x5] sm:$0x1]  ;;  %s16254_s23 = smov 127  }
  0x65   : > { %1120 = vrot.lane.b32.xlu1 %v1118_v6, %s16244_s16  ;;  %v12089_v13 = vld [vmem:[%s16331_s8 + $0x3] ss:$8 sm:$0xf0]  ;;  %v12094_v17 = vld [vmem:[%s16331_s8 + $0x5] ss:$8 sm:$0xf] }
  0x66   : > { %1176 = vperm.xlu0 %13379, %v12087_v7   ;;  %v1203_v15 = vor.u32 %v12089_v13, %v12088_v12  ;;  %v12095_v18 = vld [vmem:[%s16331_s8 + $0x5] ss:$8 sm:$0xf0]  ;;  %v13514_v19 = vmov 0.0   ;;  %s16342_s5 = sld [smem:[#allocation8_spill]]  ;;  %s16246_s16 = smov 1  }
  0x67   : > { %1069 = vst [vmem:[#allocation2] sm:$0xff] %v13514_v19  ;;  %1070 = vst [vmem:[#allocation2 + $0x8] sm:$0xff] %v13514_v19  ;;  %3662 = vmatprep.mubr.f32.mxu1 %v13514_v19  ;;  %v12099_v20 = vld [vmem:[%s16334_s9 + $0x6] sm:$0x1]  ;;  %s1066_s2 = scalar_select %p1065_p10, %s13751_s0, 1  ;;  %v1278_v21 = vor.u32 %v12095_v18, %v12094_v17  ;;  %v13822_v42 = vshrl.u32 %v1107_v39, 7 }
  0x68   : > { %1071 = vst [vmem:[#allocation2 + $0x10] sm:$0xff] %v13514_v19  ;;  %1072 = vst [vmem:[#allocation2 + $0x18] sm:$0xff] %v13514_v19  ;;  %v12097_v22 = vld [vmem:[%s16331_s8 + $0x6] ss:$8 sm:$0xf]  ;;  %vm1123_vm0 = vcmask 785408  }
  0x69   : > { %1217 = vperm.xlu1 %13380, %v12090_v10   ;;  %1073 = vst [vmem:[#allocation2 + $0x20] sm:$0xff] %v13514_v19  ;;  %1074 = vst [vmem:[#allocation2 + $0x28] sm:$0xff] %v13514_v19  ;;  %v12098_v23 = vld [vmem:[%s16331_s8 + $0x6] ss:$8 sm:$0xf0]  ;;  %s12081_s14 = sshll.u32 %s1066_s2, 3 }
  0x6a   : > { %1163 = vrot.lane.b32.xlu0 %v1161_v11, %s16242_s18  ;;  %1075 = vst [vmem:[#allocation2 + $0x30] sm:$0xff] %v13514_v19  ;;  %1076 = vst [vmem:[#allocation2 + $0x38] sm:$0xff] %v13514_v19  ;;  %v12102_v24 = vld [vmem:[%s16334_s9 + $0x7] sm:$0x1]  ;;  %v1319_v26 = vor.u32 %v12098_v23, %v12097_v22  ;;  %v12105_v29 = vld [vmem:[%s16334_s9 + $0x8] sm:$0x1] }
  0x6b   : > { %1077 = vst [vmem:[#allocation2 + $0x40] sm:$0xff] %v13514_v19  ;;  %1078 = vst [vmem:[#allocation2 + $0x48] sm:$0xff] %v13514_v19  ;;  %v12100_v27 = vld [vmem:[%s16331_s8 + $0x7] ss:$8 sm:$0xf]  ;;  %s16250_s2 = smov 31  }
  0x6c   : > { %s1068_s18 = scalar_lea.vmem %s16342_s5, %s12081_s14  ;;  %v12101_v28 = vld [vmem:[%s16331_s8 + $0x7] ss:$8 sm:$0xf0]  ;;  %v12103_v30 = vld [vmem:[%s16331_s8 + $0x40] ss:$8 sm:$0xf] }
  0x6d   : > { %1252 = vperm.xlu1 %13380, %v12093_v14   ;;  %v13805_v25 = vld [vmem:[%s1068_s18] sm:$0xff]  ;;  %v1360_v32 = vor.u32 %v12101_v28, %v12100_v27  ;;  %s16248_s18 = smov 32   ;;  %s16258_s14 = smov 33   ;;  %v13827_v46 = vsub.s32 0, %v13822_v42  ;;  %vm1166_vm1 = vcmask 793600   ;;  %vm1152_vm2 = vcmask 1039360  }
  0x6e   : > { %1205 = vrot.lane.b32.xlu0 %v1203_v15, %s16254_s23  ;;  %1081 = vst [vmem:[#allocation2 + $0x8] ss:$8 sm:$0xf] %v13805_v25  ;;  %1082 = vst [vmem:[#allocation2 + $0x8] ss:$8 sm:$0xf0] %v13805_v25 }
  0x6f   : > { %v12104_v31 = vld [vmem:[%s16331_s8 + $0x40] ss:$8 sm:$0xf0]  ;;  %v12091_v59 = vld [vmem:[%s16331_s8 + $0x4] ss:$8 sm:$0xf] }
  0x70   : > { %v1401_v33 = vor.u32 %v12104_v31, %v12103_v30  ;;  %v1088_v34 = vld [vmem:[%s16331_s8] ss:$8 sm:$0xf]  ;;  %v12092_v60 = vld [vmem:[%s16331_s8 + $0x4] ss:$8 sm:$0xf0] }
  0x71   : > { %1293 = vperm.xlu1 %13380, %v12096_v16   ;;  %v1089_v35 = vld [vmem:[%s16331_s8] ss:$8 sm:$0xf0]  ;;  %v1246_v8 = vor.u32 %v12092_v60, %v12091_v59  ;;  %vm1283_vm3 = vcmask 7168   ;;  %vm1324_vm4 = vcmask 252928   ;;  %vm1365_vm5 = vcmask 261120  }
  0x72   : > { %1334 = vperm.xlu0 %13379, %v12099_v20   ;;  %v1101_v36 = vld [vmem:[%s16334_s9] sm:$0x1]  ;;  %v1090_v37 = vor.u32 %v1089_v35, %v1088_v34  ;;  %vm1406_vm6 = vcmask 269312   ;;  %vm1095_vm7 = vcmask 777216   ;;  %vm1150_vm8 = vcmask 1046528   ;;  %s16348_s5 = smov 31  }
  0x73   : > { %v1439_v38 = vld [vmem:[#allocation3] sm:$0x1]  ;;  %vm1194_vm9 = vcmask 1031168   ;;  %vm1309_vm10 = vcmask 769024   ;;  %vm1350_vm11 = vcmask 523264   ;;  %vm1391_vm12 = vcmask 515072  }
  0x74   : > { %vm1432_vm13 = vcmask 506880   ;;  %s16349_s9 = smov 32   ;;  %s16350_s10 = smov 95   ;;  %vm3570_vm14 = vcmask 916480   ;;  %vm3546_vm15 = vcmask 908288  }
  0x75   : > { %1280 = vrot.lane.b32.xlu1 %v1278_v21, %s16246_s16  ;;  %s16266_s16 = smov 95   ;;  %v1083_v41 = vld [vmem:[#allocation2] ss:$8 sm:$0xf]  ;;  %s16352_s26 = smov 64  }
  0x76   : > { %1375 = vperm.xlu0 %13379, %v12102_v24   ;;  %v1084_v43 = vld [vmem:[#allocation2] ss:$8 sm:$0xf0]  ;;  %s16353_s28 = smov 126   ;;  %s16354_s6 = smov 63  }
  0x77   : > { %v13824_v45 = vor.u32 %v1084_v43, %v1083_v41  ;;  %v13829_v47 = vld [vmem:[#allocation2 + $0x40] ss:$8 sm:$0x1]  ;;  %s16355_s1 = smov 62   ;;  %s16389_s4 = sld [smem:[#allocation17_spill]] }
  0x78   : > { %v1240_v1 = vld [vmem:[#allocation2 + $0x8] ss:$8 sm:$0xf]  ;;  %s16422_s3 = sld [smem:[#allocation31_spill]] }
  0x79   : > { %1321 = vrot.lane.b32.xlu1 %v1319_v26, %s16250_s2  ;;  %v1241_v2 = vld [vmem:[#allocation2 + $0x8] ss:$8 sm:$0xf0]  ;;  %s16343_s2 = smov 96  }
  0x7a   : > { %1416 = vperm.xlu0 %13379, %v12105_v29   ;;  %v1242_v9 = vor.u32 %v1241_v2, %v1240_v1  ;;  %v1270_v15 = vld [vmem:[#allocation2 + $0x8] ss:$8 sm:$0xf]  ;;  %v12108_v1 = vld [vmem:[%s16333_s13 + $0x1] sm:$0x1] }
  0x7b   : > { %v1271_v16 = vld [vmem:[#allocation2 + $0x8] ss:$8 sm:$0xf0]  ;;  %v12111_v2 = vld [vmem:[%s16333_s13 + $0x2] sm:$0x1] }
  0x7c   : > { %v1247_v20 = vmul.f32 %v1246_v8, %v1242_v9  ;;  %v1272_v23 = vor.u32 %v1271_v16, %v1270_v15  ;;  %v1274_v26 = vld [vmem:[#allocation2 + $0x48] ss:$8 sm:$0x1] }
  0x7d   : > { %1362 = vrot.lane.b32.xlu1 %v1360_v32, %s16248_s18  ;;  %s16252_s18 = smov 126  }
  0x7e   : > { %1403 = vrot.lane.b32.xlu0 %v1401_v33, %s16258_s14  ;;  %s16260_s14 = smov 62  }
  0x81   : > { %1104 = vperm.xlu1 %13380, %v1101_v36  }
  0x82   : > { %1092 = vrot.lane.b32.xlu0 %v1090_v37, %s16266_s16 }
  0x85   : > { %1442 = vperm.xlu1 %13380, %v1439_v38  }
  0xd7   : > { %v1121_v40 = vpop.permute.xlu1 %1120 }
  0xd8   : > { %v1122_v44 = vrot.slane %v1121_v40, 7 }
  0xda   : > { %v1124_v48 = vsel %vm1123_vm0, %v1122_v44, %v1121_v40  ;;  %v1128_v51 = vmul.f32 %v1122_v44, %v13829_v47 }
  0xdb   : > { %v1127_v50 = vmul.f32 %v1124_v48, %v13824_v45 }
  0xe1   : > { %v1134_v49 = vpop.permute.xlu0 %1133 }
  0xe2   : > { %v1139_v52 = vrot.slane %v1134_v49, %v13827_v46 }
  0xe4   : > { %v1140_v53 = vmul.f32 %v1139_v52, %v1127_v50  ;;  %v1141_v54 = vmul.f32 %v1139_v52, %v1128_v51 }
  0xe5   : > { %v1177_v55 = vpop.permute.xlu0 %1176 }
  0xe6   : > { %1146 = vrot.lane.b32.xlu0 %v1141_v54, %s16254_s23  ;;  %1144 = vrot.lane.b32.xlu1 %v1140_v53, %s16254_s23  ;;  %v1182_v62 = vrot.slane %v1177_v55, %v13827_v46  ;;  %s16264_s23 = smov 64  }
  0xe8   : > { %v1218_v56 = vpop.permute.xlu1 %1217 }
  0xe9   : > { %v1164_v57 = vpop.permute.xlu0 %1163  ;;  %v1223_v12 = vrot.slane %v1218_v56, %v13827_v46 }
  0xea   : > { %v1165_v58 = vrot.slane %v1164_v57, 7 }
  0xec   : > { %v1253_v61 = vpop.permute.xlu1 %1252  ;;  %v1167_v63 = vsel %vm1166_vm1, %v1165_v58, %v1164_v57  ;;  %v1171_v0 = vmul.f32 %v1165_v58, %v13829_v47 }
  0xed   : > { %v1170_v3 = vmul.f32 %v1167_v63, %v13824_v45  ;;  %v1206_v5 = vpop.permute.xlu0 %1205  ;;  %v1258_v21 = vrot.slane %v1253_v61, %v13827_v46 }
  0xee   : > { %v1207_v6 = vrot.slane %v1206_v5, 7  ;;  %v1184_v7 = vmul.f32 %v1182_v62, %v1171_v0 }
  0xef   : > { %v1183_v11 = vmul.f32 %v1182_v62, %v1170_v3  ;;  %v1259_v30 = vmul.f32 %v1258_v21, %v1247_v20 }
  0xf0   : > { %v1294_v10 = vpop.permute.xlu1 %1293  ;;  %v1208_v13 = vsel %vm1152_vm2, %v1207_v6, %v1206_v5  ;;  %v1212_v14 = vmul.f32 %v1207_v6, %v13829_v47  ;;  %1189 = vrot.lane.b32.xlu0 %v1184_v7, %s16252_s18 }
  0xf1   : > { %v1211_v17 = vmul.f32 %v1208_v13, %v13824_v45  ;;  %v1335_v18 = vpop.permute.xlu0 %1334  ;;  %1187 = vrot.lane.b32.xlu1 %v1183_v11, %s16252_s18  ;;  %v1299_v31 = vrot.slane %v1294_v10, %v13827_v46  ;;  %s16256_s18 = smov 94  }
  0xf2   : > { %v1225_v19 = vmul.f32 %v1223_v12, %v1212_v14  ;;  %v1340_v39 = vrot.slane %v1335_v18, %v13827_v46 }
  0xf3   : > { %v1224_v24 = vmul.f32 %v1223_v12, %v1211_v17 }
  0xf4   : > { %v1281_v22 = vpop.permute.xlu1 %1280  ;;  %1230 = vrot.lane.b32.xlu0 %v1225_v19, %s16343_s2 }
  0xf5   : > { %v1282_v27 = vrot.slane %v1281_v22, 7  ;;  %v1376_v28 = vpop.permute.xlu0 %1375  ;;  %1228 = vrot.lane.b32.xlu1 %v1224_v24, %s16343_s2 }
  0xf6   : > { %v1381_v53 = vrot.slane %v1376_v28, %v13827_v46 }
  0xf7   : > { %v1284_v29 = vsel %vm1283_vm3, %v1282_v27, %v1281_v22  ;;  %v1288_v33 = vmul.f32 %v1282_v27, %v1274_v26 }
  0xf8   : > { %v1287_v32 = vmul.f32 %v1284_v29, %v1272_v23  ;;  %v1322_v34 = vpop.permute.xlu1 %1321 }
  0xf9   : > { %v1323_v35 = vrot.slane %v1322_v34, 7  ;;  %v1417_v36 = vpop.permute.xlu0 %1416  ;;  %1261 = vrot.lane.b32.xlu1 %v1259_v30, %s16266_s16  ;;  %v1301_v43 = vmul.f32 %v1299_v31, %v1288_v33 }
  0xfa   : > { %v1300_v37 = vmul.f32 %v1299_v31, %v1287_v32  ;;  %v1422_v55 = vrot.slane %v1417_v36, %v13827_v46 }
  0xfb   : > { %v1325_v38 = vsel %vm1324_vm4, %v1323_v35, %v1322_v34  ;;  %v1329_v48 = vmul.f32 %v1323_v35, %v1274_v26 }
  0xfc   : > { %v1328_v40 = vmul.f32 %v1325_v38, %v1272_v23  ;;  %v1363_v41 = vpop.permute.xlu1 %1362  ;;  %1304 = vrot.lane.b32.xlu0 %v1300_v37, %s16256_s18 }
  0xfd   : > { %v1364_v44 = vrot.slane %v1363_v41, 7  ;;  %v1404_v49 = vpop.permute.xlu0 %1403  ;;  %1306 = vrot.lane.b32.xlu1 %v1301_v43, %s16256_s18  ;;  %v1342_v59 = vmul.f32 %v1340_v39, %v1329_v48  ;;  %s16262_s18 = smov 63  }
  0xfe   : > { %v1341_v50 = vmul.f32 %v1340_v39, %v1328_v40  ;;  %v1405_v52 = vrot.slane %v1404_v49, 7 }
  0xff   : > { %v1366_v51 = vsel %vm1365_vm5, %v1364_v44, %v1363_v41  ;;  %v1370_v57 = vmul.f32 %v1364_v44, %v1274_v26 }
 0x100   : > { %v1369_v54 = vmul.f32 %v1366_v51, %v1272_v23  ;;  %1345 = vrot.lane.b32.xlu0 %v1341_v50, %s16264_s23  ;;  %v1407_v56 = vsel %vm1406_vm6, %v1405_v52, %v1404_v49  ;;  %v1411_v62 = vmul.f32 %v1405_v52, %v1274_v26  ;;  %v1105_v3 = vpop.permute.xlu1 %1104 }
 0x101   : > { %v1410_v58 = vmul.f32 %v1407_v56, %v1272_v23  ;;  %v1383_v63 = vmul.f32 %v1381_v53, %v1370_v57  ;;  %v1093_v5 = vpop.permute.xlu0 %1092  ;;  %v1110_v18 = vrot.slane %v1105_v3, %v13827_v46 }
 0x102   : > { %v1382_v60 = vmul.f32 %v1381_v53, %v1369_v54  ;;  %v1424_v0 = vmul.f32 %v1422_v55, %v1411_v62  ;;  %v1094_v7 = vrot.slane %v1093_v5, 7 }
 0x103   : > { %v1423_v61 = vmul.f32 %v1422_v55, %v1410_v58 }
 0x104   : > { %1347 = vrot.lane.b32.xlu0 %v1342_v59, %s16264_s23  ;;  %1386 = vrot.lane.b32.xlu1 %v1382_v60, %s16262_s18  ;;  %v13873_v6 = vpop.permute.xlu1 %1442  ;;  %v1096_v12 = vsel %vm1095_vm7, %v1094_v7, %v1093_v5  ;;  %s16346_s23 = smov 127  }
 0x105   : > { %v1448_v5 = vrot.slane %v13873_v6, %v13827_v46  ;;  %v12107_v6 = vld [vmem:[%s16331_s8 + $0x1] ss:$8 sm:$0xf0] }
 0x108   : > { %1388 = vrot.lane.b32.xlu0 %v1383_v63, %s16262_s18  ;;  %1427 = vrot.lane.b32.xlu1 %v1423_v61, %s16260_s14  ;;  %s16345_s18 = smov 97  }
 0x10c   : > { %1429 = vrot.lane.b32.xlu0 %v1424_v0, %s16260_s14  ;;  %1454 = vrot.lane.b32.xlu1 %v13805_v25, %s16266_s16  ;;  %v1099_v25 = vmul.f32 %v1096_v12, %v13824_v45  ;;  %v1100_v45 = vmul.f32 %v1094_v7, %v13829_v47  ;;  %s16344_s14 = smov 33   ;;  %s16347_s16 = smov 1  }
 0x10e   : > { %v1111_v22 = vmul.f32 %v1110_v18, %v1099_v25  ;;  %v1112_v34 = vmul.f32 %v1110_v18, %v1100_v45  ;;  %v12113_v45 = vld [vmem:[%s16331_s8 + $0x3] ss:$8 sm:$0xf0] }
 0x110   : > { %1521 = vperm.xlu0 %13379, %v12108_v1   ;;  %1560 = vperm.xlu1 %13380, %v12111_v2  }
 0x158   : > { %v1147_v8 = vpop.permute.xlu0 %1146  ;;  %v1145_v9 = vpop.permute.xlu1 %1144 }
 0x159   : > { %v1149_v10 = vrot.slane %v1147_v8, 1  ;;  %v1148_v11 = vrot.slane %v1145_v9, 1  ;;  %v1157_v39 = vadd.f32 %v1147_v8, %v1112_v34 }
 0x15b   : > { %v1151_v14 = vsel %vm1150_vm8, %v1148_v11, %v1149_v10 }
 0x15c   : > { %v1153_v19 = vsel %vm1152_vm2, %v1145_v9, %v1151_v14 }
 0x15d   : > { %v1156_v28 = vadd.f32 %v1153_v19, %v1111_v22  ;;  %v12109_v22 = vld [vmem:[%s16331_s8 + $0x2] ss:$8 sm:$0xf] }
 0x162   : > { %v1190_v13 = vpop.permute.xlu0 %1189 }
 0x163   : > { %v1192_v15 = vrot.slane %v1190_v13, 1  ;;  %v1188_v16 = vpop.permute.xlu1 %1187  ;;  %v1199_v41 = vadd.f32 %v1190_v13, %v1157_v39  ;;  %v12124_v39 = vld [vmem:[%s16331_s8 + $0x7] ss:$8 sm:$0xf] }
 0x164   : > { %v1191_v17 = vrot.slane %v1188_v16, 1 }
 0x166   : > { %v1193_v20 = vsel %vm1150_vm8, %v1191_v17, %v1192_v15  ;;  %v1231_v21 = vpop.permute.xlu0 %1230  ;;  %v12106_v17 = vld [vmem:[%s16331_s8 + $0x1] ss:$8 sm:$0xf] }
 0x167   : > { %v1233_v23 = vrot.slane %v1231_v21, 1  ;;  %v1229_v24 = vpop.permute.xlu1 %1228  ;;  %v1195_v26 = vsel %vm1194_vm9, %v1188_v16, %v1193_v20  ;;  %v1239_v49 = vadd.f32 %v1231_v21, %v1199_v41  ;;  %v1507_v21 = vor.u32 %v12107_v6, %v12106_v17  ;;  %v12129_v41 = vld [vmem:[%s16333_s13 + $0x8] sm:$0x1] }
 0x168   : > { %v1232_v27 = vrot.slane %v1229_v24, 1  ;;  %v1198_v30 = vadd.f32 %v1195_v26, %v1156_v28  ;;  %v12117_v28 = vld [vmem:[%s16333_s13 + $0x4] sm:$0x1] }
 0x16a   : > { %v1234_v29 = vsel %vm1150_vm8, %v1232_v27, %v1233_v23  ;;  %v12110_v23 = vld [vmem:[%s16331_s8 + $0x2] ss:$8 sm:$0xf0]  ;;  %v12112_v27 = vld [vmem:[%s16331_s8 + $0x3] ss:$8 sm:$0xf] }
 0x16b   : > { %v1235_v31 = vsel %vm1123_vm0, %v1229_v24, %v1234_v29  ;;  %v1262_v32 = vpop.permute.xlu1 %1261  ;;  %v12114_v24 = vld [vmem:[%s16333_s13 + $0x3] sm:$0x1]  ;;  %v1546_v26 = vor.u32 %v12110_v23, %v12109_v22  ;;  %v1585_v29 = vor.u32 %v12113_v45, %v12112_v27 }
 0x16c   : > { %v1263_v33 = vrot.slane %v1262_v32, 7  ;;  %v1238_v35 = vadd.f32 %v1235_v31, %v1198_v30  ;;  %v12120_v30 = vld [vmem:[%s16333_s13 + $0x5] sm:$0x1] }
 0x16d   : > { %v12118_v31 = vld [vmem:[%s16331_s8 + $0x5] ss:$8 sm:$0xf] }
 0x16e   : > { %v1305_v36 = vpop.permute.xlu0 %1304  ;;  %v1264_v37 = vsel %vm1095_vm7, %v1263_v33, %v1262_v32  ;;  %v1268_v51 = vadd.f32 %v1263_v33, %v1239_v49  ;;  %v12119_v32 = vld [vmem:[%s16331_s8 + $0x5] ss:$8 sm:$0xf0]  ;;  %v12123_v33 = vld [vmem:[%s16333_s13 + $0x6] sm:$0x1] }
 0x16f   : > { %v1308_v38 = vrot.slane %v1305_v36, 7  ;;  %v1307_v40 = vpop.permute.xlu1 %1306  ;;  %v1267_v43 = vadd.f32 %v1264_v37, %v1238_v35  ;;  %v1656_v34 = vor.u32 %v12119_v32, %v12118_v31  ;;  %v12121_v35 = vld [vmem:[%s16331_s8 + $0x6] ss:$8 sm:$0xf]  ;;  %v12126_v37 = vld [vmem:[%s16333_s13 + $0x7] sm:$0x1] }
 0x170   : > { %v1479_v49 = vld [vmem:[%s16331_s8] ss:$8 sm:$0xf] }
 0x171   : > { %v1310_v44 = vsel %vm1309_vm10, %v1308_v38, %v1305_v36  ;;  %v1311_v54 = vsel %vm1309_vm10, %v1308_v38, %v1307_v40  ;;  %v12122_v36 = vld [vmem:[%s16331_s8 + $0x6] ss:$8 sm:$0xf0]  ;;  %v12125_v40 = vld [vmem:[%s16331_s8 + $0x7] ss:$8 sm:$0xf0] }
 0x172   : > { %v1346_v47 = vpop.permute.xlu0 %1345  ;;  %v1314_v50 = vadd.f32 %v1310_v44, %v1267_v43  ;;  %v1315_v59 = vadd.f32 %v1311_v54, %v1268_v51  ;;  %v1694_v38 = vor.u32 %v12122_v36, %v12121_v35  ;;  %v12127_v43 = vld [vmem:[%s16331_s8 + $0x40] ss:$8 sm:$0xf]  ;;  %v1732_v44 = vor.u32 %v12125_v40, %v12124_v39  ;;  %v12115_v36 = vld [vmem:[%s16331_s8 + $0x4] ss:$8 sm:$0xf] }
 0x173   : > { %v1349_v48 = vrot.slane %v1346_v47, 7  ;;  %v1491_v51 = vld [vmem:[%s16333_s13] sm:$0x1]  ;;  %s16351_s13 = smov 94  }
 0x175   : > { %v1351_v55 = vsel %vm1350_vm11, %v1349_v48, %v1346_v47  ;;  %v12128_v47 = vld [vmem:[%s16331_s8 + $0x40] ss:$8 sm:$0xf0] }
 0x176   : > { %v1348_v52 = vpop.permute.xlu0 %1347  ;;  %v1387_v53 = vpop.permute.xlu1 %1386  ;;  %v1355_v60 = vadd.f32 %v1351_v55, %v1314_v50  ;;  %v1480_v50 = vld [vmem:[%s16331_s8] ss:$8 sm:$0xf0] }
 0x177   : > { %v1390_v56 = vrot.slane %v1387_v53, 7  ;;  %v1352_v57 = vsel %vm1350_vm11, %v1349_v48, %v1348_v52  ;;  %v1770_v48 = vor.u32 %v12128_v47, %v12127_v43  ;;  %v1481_v52 = vor.u32 %v1480_v50, %v1479_v49 }
 0x178   : > { %v1356_v1 = vadd.f32 %v1352_v57, %v1315_v59 }
 0x179   : > { %v1392_v58 = vsel %vm1391_vm12, %v1390_v56, %v1387_v53 }
 0x17a   : > { %v1389_v61 = vpop.permute.xlu0 %1388  ;;  %v1428_v62 = vpop.permute.xlu1 %1427  ;;  %v1396_v2 = vadd.f32 %v1392_v58, %v1355_v60 }
 0x17b   : > { %v1393_v63 = vsel %vm1391_vm12, %v1390_v56, %v1389_v61  ;;  %v1431_v0 = vrot.slane %v1428_v62, 7 }
 0x17c   : > { %v1397_v7 = vadd.f32 %v1393_v63, %v1356_v1 }
 0x17d   : > { %v1433_v3 = vsel %vm1432_vm13, %v1431_v0, %v1428_v62 }
 0x17e   : > { %v1437_v8 = vadd.f32 %v1433_v3, %v1396_v2  ;;  %v1430_v9 = vpop.permute.xlu0 %1429  ;;  %v1455_v10 = vpop.permute.xlu1 %1454  ;;  %v13940_v3 = vld [vmem:[#allocation2 + $0x48] ss:$8 sm:$0x1] }
 0x17f   : > { %v1434_v11 = vsel %vm1432_vm13, %v1431_v0, %v1430_v9  ;;  %v1456_v12 = vrot.slane %v1455_v10, 7 }
 0x180   : > { %v1438_v13 = vadd.f32 %v1434_v11, %v1397_v7  ;;  %v1449_v25 = vadd.f32 %v1448_v5, %v1437_v8 }
 0x181   : > { %v1457_v14 = vsel %vm1095_vm7, %v1456_v12, %v1455_v10 }
 0x182   : > { %v1450_v15 = vadd.f32 %v1448_v5, %v1438_v13  ;;  %v1451_v16 = vmax.f32 %v1449_v25, 0.0 }
 0x184   : > { %v1452_v18 = vmax.f32 %v1450_v15, 0.0  ;;  %v13899_v19 = vadd.f32 %v1457_v14, %v1451_v16 }
 0x186   : > { %1464 = vrot.lane.b32.xlu0 %v13899_v19, %s16344_s14  ;;  %v13903_v20 = vadd.f32 %v1456_v12, %v1452_v18 }
 0x188   : > { %1466 = vrot.lane.b32.xlu1 %v13903_v20, %s16344_s14 }
 0x18a   : > { %1509 = vrot.lane.b32.xlu0 %v1507_v21, %s16343_s2 }
 0x18c   : > { %1599 = vperm.xlu1 %13380, %v12114_v24   ;;  %v1806_v24 = vld [vmem:[#allocation4] sm:$0x1] }
 0x18e   : > { %1548 = vrot.lane.b32.xlu0 %v1546_v26, %s16345_s18 }
 0x18f   : > { %v1522_v53 = vpop.permute.xlu0 %1521  ;;  %v1561_v54 = vpop.permute.xlu1 %1560 }
 0x190   : > { %1633 = vperm.xlu1 %13380, %v12117_v28  }
 0x192   : > { %1587 = vrot.lane.b32.xlu0 %v1585_v29, %s16346_s23  ;;  %v1527_v29 = vrot.slane %v1522_v53, %v13827_v46 }
 0x194   : > { %1670 = vperm.xlu1 %13380, %v12120_v30  }
 0x196   : > { %1708 = vperm.xlu0 %13379, %v12123_v33  }
 0x198   : > { %1658 = vrot.lane.b32.xlu1 %v1656_v34, %s16347_s16 }
 0x19a   : > { %1746 = vperm.xlu0 %13379, %v12126_v37   ;;  %v12116_v37 = vld [vmem:[%s16331_s8 + $0x4] ss:$8 sm:$0xf0] }
 0x19c   : > { %1696 = vrot.lane.b32.xlu1 %v1694_v38, %s16348_s5  ;;  %v1566_v38 = vrot.slane %v1561_v54, %v13827_v46 }
 0x19e   : > { %1784 = vperm.xlu0 %13379, %v12129_v41  }
 0x1a0   : > { %1734 = vrot.lane.b32.xlu1 %v1732_v44, %s16349_s9 }
 0x1a2   : > { %1772 = vrot.lane.b32.xlu0 %v1770_v48, %s16344_s14 }
 0x1a4   : > { %1494 = vperm.xlu1 %13380, %v1491_v51  }
 0x1a6   : > { %1483 = vrot.lane.b32.xlu0 %v1481_v52, %s16350_s10  ;;  %v1627_v52 = vor.u32 %v12116_v37, %v12115_v36 }
 0x1f8   : > { %v1465_v55 = vpop.permute.xlu0 %1464 }
 0x1f9   : > { %v1468_v57 = vrot.slane %v1465_v55, 1 }
 0x1fa   : > { %v1467_v56 = vpop.permute.xlu1 %1466 }
 0x1fb   : > { %v1469_v58 = vrot.slane %v1467_v56, 1 }
 0x1fc   : > { %v1510_v61 = vpop.permute.xlu0 %1509 }
 0x1fd   : > { %v1470_v59 = vsel %vm1150_vm8, %v1468_v57, %v1469_v58  ;;  %v1511_v7 = vrot.slane %v1510_v61, 7 }
 0x1fe   : > { %v1471_v60 = vsel %vm1406_vm6, %v1465_v55, %v1470_v59 }
 0x1ff   : > { %1473 = vst [vmem:[#allocation2 + $0x8] ss:$8 sm:$0xf] %v1471_v60  ;;  %1474 = vst [vmem:[#allocation2 + $0x8] ss:$8 sm:$0xf0] %v1471_v60  ;;  %v1512_v6 = vsel %vm1123_vm0, %v1511_v7, %v1510_v61 }
 0x200   : > { %v1549_v63 = vpop.permute.xlu0 %1548 }
 0x201   : > { %v1550_v18 = vrot.slane %v1549_v63, 7 }
 0x203   : > { %v1551_v28 = vsel %vm1166_vm1, %v1550_v18, %v1549_v63 }
 0x204   : > { %v1588_v2 = vpop.permute.xlu0 %1587 }
 0x205   : > { %v1589_v30 = vrot.slane %v1588_v2, 7 }
 0x206   : > { %v1475_v10 = vld [vmem:[#allocation2] ss:$8 sm:$0xf] }
 0x207   : > { %v1476_v11 = vld [vmem:[#allocation2] ss:$8 sm:$0xf0]  ;;  %v1590_v43 = vsel %vm1152_vm2, %v1589_v30, %v1588_v2 }
 0x208   : > { %v13946_v14 = vor.u32 %v1476_v11, %v1475_v10  ;;  %v13949_v17 = vld [vmem:[#allocation2 + $0x40] ss:$8 sm:$0x1] }
 0x209   : > { %v1516_v27 = vmul.f32 %v1511_v7, %v13949_v17  ;;  %v1555_v32 = vmul.f32 %v1550_v18, %v13949_v17  ;;  %v1622_v39 = vld [vmem:[#allocation2 + $0x8] ss:$8 sm:$0xf]  ;;  %v1594_v51 = vmul.f32 %v1589_v30, %v13949_v17 }
 0x20a   : > { %v1515_v26 = vmul.f32 %v1512_v6, %v13946_v14  ;;  %v1554_v31 = vmul.f32 %v1551_v28, %v13946_v14  ;;  %v1623_v40 = vld [vmem:[#allocation2 + $0x8] ss:$8 sm:$0xf0]  ;;  %v1593_v55 = vmul.f32 %v1590_v43, %v13946_v14 }
 0x20b   : > { %v1600_v62 = vpop.permute.xlu1 %1599  ;;  %v1529_v35 = vmul.f32 %v1527_v29, %v1516_v27  ;;  %v1650_v47 = vld [vmem:[#allocation2 + $0x8] ss:$8 sm:$0xf]  ;;  %v1568_v50 = vmul.f32 %v1566_v38, %v1555_v32  ;;  %v1624_v56 = vor.u32 %v1623_v40, %v1622_v39 }
 0x20c   : > { %v1528_v34 = vmul.f32 %v1527_v29, %v1515_v26  ;;  %v1651_v44 = vld [vmem:[#allocation2 + $0x8] ss:$8 sm:$0xf0]  ;;  %v1605_v48 = vrot.slane %v1600_v62, %v13827_v46  ;;  %v1567_v49 = vmul.f32 %v1566_v38, %v1554_v31  ;;  %v12131_v26 = vld [vmem:[%s16331_s8 + $0x1] ss:$8 sm:$0xf0] }
 0x20d   : > { %v1652_v57 = vor.u32 %v1651_v44, %v1650_v47 }
 0x20e   : > { %v1606_v59 = vmul.f32 %v1605_v48, %v1593_v55  ;;  %v1607_v60 = vmul.f32 %v1605_v48, %v1594_v51 }
 0x20f   : > { %v13938_v0 = vpop.permute.xlu1 %1633 }
 0x210   : > { %v1639_v61 = vrot.slane %v13938_v0, %v13827_v46 }
 0x213   : > { %v1671_v1 = vpop.permute.xlu1 %1670 }
 0x214   : > { %v13943_v12 = vrot.slane %v1671_v1, %v13827_v46 }
 0x215   : > { %v1709_v8 = vpop.permute.xlu0 %1708 }
 0x216   : > { %v1714_v21 = vrot.slane %v1709_v8, %v13827_v46 }
 0x217   : > { %v1659_v5 = vpop.permute.xlu1 %1658 }
 0x218   : > { %v1660_v9 = vrot.slane %v1659_v5, 7 }
 0x219   : > { %v1747_v22 = vpop.permute.xlu0 %1746 }
 0x21a   : > { %v1665_v13 = vmul.f32 %v1660_v9, %v13940_v3  ;;  %v1661_v53 = vsel %vm1283_vm3, %v1660_v9, %v1659_v5  ;;  %v1628_v5 = vmul.f32 %v1627_v52, %v1624_v56  ;;  %v1752_v0 = vrot.slane %v1747_v22, %v13827_v46 }
 0x21b   : > { %v1697_v25 = vpop.permute.xlu1 %1696  ;;  %v1664_v62 = vmul.f32 %v1661_v53, %v1652_v57 }
 0x21c   : > { %v1698_v15 = vrot.slane %v1697_v25, 7  ;;  %v1678_v16 = vmul.f32 %v13943_v12, %v1665_v13  ;;  %v1640_v7 = vmul.f32 %v1639_v61, %v1628_v5 }
 0x21d   : > { %v1785_v33 = vpop.permute.xlu0 %1784  ;;  %v1677_v10 = vmul.f32 %v13943_v12, %v1664_v62 }
 0x21e   : > { %v1703_v23 = vmul.f32 %v1698_v15, %v13940_v3  ;;  %1683 = vrot.lane.b32.xlu1 %v1678_v16, %s16351_s13  ;;  %v1699_v63 = vsel %vm1324_vm4, %v1698_v15, %v1697_v25  ;;  %v1790_v6 = vrot.slane %v1785_v33, %v13827_v46 }
 0x21f   : > { %v1735_v41 = vpop.permute.xlu1 %1734  ;;  %v1702_v8 = vmul.f32 %v1699_v63, %v1652_v57 }
 0x220   : > { %v1716_v45 = vmul.f32 %v1714_v21, %v1703_v23  ;;  %v1736_v54 = vrot.slane %v1735_v41, 7 }
 0x221   : > { %v1773_v58 = vpop.permute.xlu0 %1772  ;;  %v1715_v15 = vmul.f32 %v1714_v21, %v1702_v8 }
 0x222   : > { %1809 = vperm.xlu1 %13380, %v1806_v24   ;;  %1721 = vrot.lane.b32.xlu0 %v1716_v45, %s16352_s26  ;;  %v1737_v1 = vsel %vm1365_vm5, %v1736_v54, %v1735_v41  ;;  %v1774_v2 = vrot.slane %v1773_v58, 7  ;;  %v1741_v13 = vmul.f32 %v1736_v54, %v13940_v3  ;;  %v12130_v24 = vld [vmem:[%s16331_s8 + $0x1] ss:$8 sm:$0xf] }
 0x223   : > { %v1740_v9 = vmul.f32 %v1737_v1, %v1652_v57  ;;  %v1924_v21 = vor.u32 %v12131_v26, %v12130_v24  ;;  %v1495_v29 = vpop.permute.xlu1 %1494 }
 0x224   : > { %v1775_v11 = vsel %vm1406_vm6, %v1774_v2, %v1773_v58  ;;  %v1779_v12 = vmul.f32 %v1774_v2, %v13940_v3  ;;  %v1754_v18 = vmul.f32 %v1752_v0, %v1741_v13  ;;  %v1500_v47 = vrot.slane %v1495_v29, %v13827_v46 }
 0x225   : > { %v1778_v25 = vmul.f32 %v1775_v11, %v1652_v57  ;;  %v1753_v16 = vmul.f32 %v1752_v0, %v1740_v9  ;;  %v1484_v27 = vpop.permute.xlu0 %1483 }
 0x226   : > { %1532 = vrot.lane.b32.xlu1 %v1528_v34, %s16346_s23  ;;  %1534 = vrot.lane.b32.xlu0 %v1529_v35, %s16346_s23  ;;  %v1792_v23 = vmul.f32 %v1790_v6, %v1779_v12  ;;  %v1485_v31 = vrot.slane %v1484_v27, 7 }
 0x227   : > { %v1791_v22 = vmul.f32 %v1790_v6, %v1778_v25 }
 0x228   : > { %v1486_v34 = vsel %vm1095_vm7, %v1485_v31, %v1484_v27  ;;  %v1490_v39 = vmul.f32 %v1485_v31, %v13949_v17 }
 0x229   : > { %v1489_v38 = vmul.f32 %v1486_v34, %v13946_v14 }
 0x22a   : > { %1571 = vrot.lane.b32.xlu1 %v1567_v49, %s16353_s28  ;;  %1573 = vrot.lane.b32.xlu0 %v1568_v50, %s16353_s28  ;;  %v1502_v50 = vmul.f32 %v1500_v47, %v1490_v39  ;;  %v12133_v39 = vld [vmem:[%s16331_s8 + $0x2] ss:$8 sm:$0xf] }
 0x22b   : > { %v1501_v51 = vmul.f32 %v1500_v47, %v1489_v38  ;;  %v12132_v47 = vld [vmem:[%s13572_s17 + $0x2] sm:$0x3] }
 0x22e   : > { %1610 = vrot.lane.b32.xlu1 %v1606_v59, %s16343_s2  ;;  %1612 = vrot.lane.b32.xlu0 %v1607_v60, %s16343_s2 }
 0x232   : > { %1642 = vrot.lane.b32.xlu1 %v1640_v7, %s16350_s10  ;;  %1681 = vrot.lane.b32.xlu0 %v1677_v10, %s16351_s13 }
 0x236   : > { %1719 = vrot.lane.b32.xlu0 %v1715_v15, %s16352_s26  ;;  %1757 = vrot.lane.b32.xlu1 %v1753_v16, %s16354_s6 }
 0x23a   : > { %1759 = vrot.lane.b32.xlu0 %v1754_v18, %s16354_s6  ;;  %1795 = vrot.lane.b32.xlu1 %v1791_v22, %s16355_s1 }
 0x23e   : > { %1797 = vrot.lane.b32.xlu0 %v1792_v23, %s16355_s1  ;;  %1926 = vrot.lane.b32.xlu1 %v1924_v21, %s16343_s2 }
 0x290   : > { %v1684_v30 = vpop.permute.xlu1 %1683 }
 0x294   : > { %v1722_v45 = vpop.permute.xlu0 %1721 }
 0x298   : > { %v1535_v28 = vpop.permute.xlu0 %1534 }
 0x299   : > { %v1537_v36 = vrot.slane %v1535_v28, 1  ;;  %v1543_v14 = vadd.f32 %v1535_v28, %v1502_v50  ;;  %v12138_v50 = vld [vmem:[%s13572_s17 + $0x6] sm:$0x3] }
 0x29c   : > { %v1574_v3 = vpop.permute.xlu0 %1573 }
 0x29d   : > { %v1576_v44 = vrot.slane %v1574_v3, 1  ;;  %v1582_v58 = vadd.f32 %v1574_v3, %v1543_v14  ;;  %v12145_v14 = vld [vmem:[%s16331_s8 + $0x6] ss:$8 sm:$0xf] }
 0x2a0   : > { %v1613_v33 = vpop.permute.xlu0 %1612 }
 0x2a1   : > { %v1810_v32 = vpop.permute.xlu1 %1809  ;;  %v1615_v55 = vrot.slane %v1613_v33, 1  ;;  %v1621_v1 = vadd.f32 %v1613_v33, %v1582_v58  ;;  %v12149_v58 = vld [vmem:[%s16331_s8 + $0x7] ss:$8 sm:$0xf0] }
 0x2a2   : > { %v1815_v31 = vrot.slane %v1810_v32, %v13827_v46 }
 0x2a4   : > { %v1682_v41 = vpop.permute.xlu0 %1681 }
 0x2a5   : > { %v1533_v35 = vpop.permute.xlu1 %1532  ;;  %v1685_v61 = vrot.slane %v1682_v41, 7 }
 0x2a6   : > { %v1536_v37 = vrot.slane %v1533_v35, 1 }
 0x2a7   : > { %v1687_v10 = vsel %vm1309_vm10, %v1685_v61, %v1684_v30  ;;  %v1686_v25 = vsel %vm1309_vm10, %v1685_v61, %v1682_v41  ;;  %v12151_v61 = vld [vmem:[%s16331_s8 + $0x40] ss:$8 sm:$0xf] }
 0x2a8   : > { %v1538_v40 = vsel %vm1150_vm8, %v1536_v37, %v1537_v36  ;;  %v1720_v57 = vpop.permute.xlu0 %1719 }
 0x2a9   : > { %v1572_v43 = vpop.permute.xlu1 %1571  ;;  %v1539_v49 = vsel %vm1152_vm2, %v1533_v35, %v1538_v40  ;;  %v1723_v7 = vrot.slane %v1720_v57, 7  ;;  %v12134_v40 = vld [vmem:[%s16331_s8 + $0x2] ss:$8 sm:$0xf0] }
 0x2aa   : > { %v1575_v48 = vrot.slane %v1572_v43, 1  ;;  %v1542_v17 = vadd.f32 %v1539_v49, %v1501_v51  ;;  %v2052_v32 = vor.u32 %v12134_v40, %v12133_v39  ;;  %v12135_v49 = vld [vmem:[%s13572_s17 + $0x4] sm:$0x3] }
 0x2ab   : > { %v1725_v6 = vsel %vm1350_vm11, %v1723_v7, %v1722_v45  ;;  %v1724_v18 = vsel %vm1350_vm11, %v1723_v7, %v1720_v57  ;;  %v12142_v51 = vld [vmem:[%s16331_s8 + $0x5] ss:$8 sm:$0xf]  ;;  %v12148_v57 = vld [vmem:[%s16331_s8 + $0x7] ss:$8 sm:$0xf] }
 0x2ac   : > { %v1577_v52 = vsel %vm1150_vm8, %v1575_v48, %v1576_v44  ;;  %v1760_v11 = vpop.permute.xlu0 %1759  ;;  %v12136_v44 = vld [vmem:[%s16331_s8 + $0x3] ss:$8 sm:$0xf] }
 0x2ad   : > { %v1578_v53 = vsel %vm1194_vm9, %v1572_v43, %v1577_v52  ;;  %v1611_v54 = vpop.permute.xlu1 %1610  ;;  %v12137_v48 = vld [vmem:[%s16331_s8 + $0x3] ss:$8 sm:$0xf0]  ;;  %v12143_v52 = vld [vmem:[%s16331_s8 + $0x5] ss:$8 sm:$0xf0] }
 0x2ae   : > { %v1614_v56 = vrot.slane %v1611_v54, 1  ;;  %v1581_v59 = vadd.f32 %v1578_v53, %v1542_v17  ;;  %v12144_v53 = vld [vmem:[%s13572_s17 + $0xa] sm:$0x3]  ;;  %v12147_v17 = vld [vmem:[%s13572_s17 + $0xc] sm:$0x3] }
 0x2b0   : > { %v1616_v60 = vsel %vm1150_vm8, %v1614_v56, %v1615_v55  ;;  %v1798_v29 = vpop.permute.xlu0 %1797  ;;  %v12146_v55 = vld [vmem:[%s16331_s8 + $0x6] ss:$8 sm:$0xf0] }
 0x2b1   : > { %v1617_v62 = vsel %vm1123_vm0, %v1611_v54, %v1616_v60  ;;  %v1643_v63 = vpop.permute.xlu1 %1642  ;;  %v2424_v54 = vor.u32 %v12143_v52, %v12142_v51  ;;  %v2552_v56 = vor.u32 %v12146_v55, %v12145_v14  ;;  %v2680_v60 = vor.u32 %v12149_v58, %v12148_v57 }
 0x2b2   : > { %v1620_v2 = vadd.f32 %v1617_v62, %v1581_v59  ;;  %v1644_v5 = vrot.slane %v1643_v63, 7  ;;  %v12150_v59 = vld [vmem:[%s13572_s17 + $0xe] sm:$0x3]  ;;  %v12152_v62 = vld [vmem:[%s16331_s8 + $0x40] ss:$8 sm:$0xf0] }
 0x2b4   : > { %v1645_v8 = vsel %vm1095_vm7, %v1644_v5, %v1643_v63  ;;  %v1649_v9 = vadd.f32 %v1644_v5, %v1621_v1  ;;  %v12153_v63 = vld [vmem:[%s13572_s17 + $0x10] sm:$0x3]  ;;  %v2808_v1 = vor.u32 %v12152_v62, %v12151_v61 }
 0x2b5   : > { %v1648_v0 = vadd.f32 %v1645_v8, %v1620_v2  ;;  %v1758_v13 = vpop.permute.xlu1 %1757  ;;  %v1839_v2 = vld [vmem:[%s16331_s8] ss:$8 sm:$0xf] }
 0x2b6   : > { %v1691_v15 = vadd.f32 %v1687_v10, %v1649_v9  ;;  %v1761_v16 = vrot.slane %v1758_v13, 7  ;;  %v1840_v5 = vld [vmem:[%s16331_s8] ss:$8 sm:$0xf0] }
 0x2b7   : > { %v1690_v12 = vadd.f32 %v1686_v25, %v1648_v0  ;;  %v1841_v7 = vor.u32 %v1840_v5, %v1839_v2  ;;  %v1851_v8 = vld [vmem:[%s13572_s17] sm:$0x3] }
 0x2b8   : > { %v1729_v22 = vadd.f32 %v1725_v6, %v1691_v15  ;;  %v1763_v23 = vsel %vm1391_vm12, %v1761_v16, %v1760_v11  ;;  %v1762_v21 = vsel %vm1391_vm12, %v1761_v16, %v1758_v13 }
 0x2b9   : > { %v1728_v24 = vadd.f32 %v1724_v18, %v1690_v12  ;;  %v1796_v26 = vpop.permute.xlu1 %1795 }
 0x2ba   : > { %v1767_v27 = vadd.f32 %v1763_v23, %v1729_v22  ;;  %v1799_v28 = vrot.slane %v1796_v26, 7 }
 0x2bb   : > { %v1766_v30 = vadd.f32 %v1762_v21, %v1728_v24  ;;  %v14063_v21 = vsub.s32 2, %v13822_v42 }
 0x2bc   : > { %v1800_v3 = vsel %vm1432_vm13, %v1799_v28, %v1796_v26  ;;  %v1801_v45 = vsel %vm1432_vm13, %v1799_v28, %v1798_v29 }
 0x2bd   : > { %v1804_v33 = vadd.f32 %v1800_v3, %v1766_v30  ;;  %v1805_v34 = vadd.f32 %v1801_v45, %v1767_v27  ;;  %v14050_v9 = vpop.permute.xlu1 %1926  ;;  %v14066_v27 = vsub.s32 1, %v13822_v42  ;;  %v14076_v30 = vsub.s32 3, %v13822_v42 }
 0x2be   : > { %v16280_v12 = vrot.slane %v14050_v9, 7 }
 0x2bf   : > { %v1816_v35 = vadd.f32 %v1815_v31, %v1804_v33  ;;  %v1817_v36 = vadd.f32 %v1815_v31, %v1805_v34  ;;  %16356 = vst [vmem:[#allocation37_spill] sm:$0xff] %v14066_v27 }
 0x2c0   : > { %v1929_v28 = vsel %vm1123_vm0, %v16280_v12, %v14050_v9  ;;  %v2975_v12 = vld [vmem:[%s13695_s24 + $0x148] sm:$0xff] }
 0x2c1   : > { %v1818_v37 = vmax.f32 %v1816_v35, 0.0  ;;  %v1819_v38 = vmax.f32 %v1817_v36, 0.0 }
 0x2c3   : > { %v1820_v41 = vadd.f32 %v1818_v37, %v13899_v19  ;;  %v1821_v43 = vadd.f32 %v1819_v38, %v13903_v20  ;;  %v2180_v19 = vor.u32 %v12137_v48, %v12136_v44  ;;  %v12141_v20 = vld [vmem:[%s13572_s17 + $0x8] sm:$0x3] }
 0x2c5   : > { %1824 = vrot.lane.b32.xlu1 %v1820_v41, %s16344_s14  ;;  %1826 = vrot.lane.b32.xlu0 %v1821_v43, %s16344_s14  ;;  %v12139_v43 = vld [vmem:[%s16331_s8 + $0x4] ss:$8 sm:$0xf] }
 0x2c9   : > { %2054 = vrot.lane.b32.xlu1 %v2052_v32, %s16345_s18  ;;  %1938 = vperm.xlu0 %13379, %v12132_v47   ;;  %v12140_v32 = vld [vmem:[%s16331_s8 + $0x4] ss:$8 sm:$0xf0]  ;;  %s13532_s18 = smov 119  }
 0x2cd   : > { %2182 = vrot.lane.b32.xlu1 %v2180_v19, %s16346_s23  ;;  %2066 = vperm.xlu0 %13379, %v12135_v49  }
 0x2d1   : > { %2317 = vperm.xlu1 %13380, %v12141_v20   ;;  %2194 = vperm.xlu0 %13379, %v12138_v50   ;;  %v2311_v50 = vor.u32 %v12140_v32, %v12139_v43 }
 0x2d5   : > { %2438 = vperm.xlu1 %13380, %v12144_v53   ;;  %2426 = vrot.lane.b32.xlu0 %v2424_v54, %s16347_s16 }
 0x2d9   : > { %2566 = vperm.xlu1 %13380, %v12147_v17   ;;  %2554 = vrot.lane.b32.xlu0 %v2552_v56, %s16348_s5  ;;  %s13525_s5 = smov 112  }
 0x2dd   : > { %2694 = vperm.xlu1 %13380, %v12150_v59   ;;  %2682 = vrot.lane.b32.xlu0 %v2680_v60, %s16349_s9  ;;  %v14133_v59 = vsub.s32 5, %v13822_v42  ;;  %s13526_s9 = smov 111  }
 0x2e1   : > { %2822 = vperm.xlu1 %13380, %v12153_v63   ;;  %2810 = vrot.lane.b32.xlu0 %v2808_v1, %s16344_s14 }
 0x2e5   : > { %1854 = vperm.xlu1 %13380, %v1851_v8   ;;  %1843 = vrot.lane.b32.xlu0 %v1841_v7, %s16350_s10  ;;  %v2980_v8 = vld [vmem:[%s13695_s24 + $0x170] sm:$0xff] }
 0x337   : > { %v1825_v10 = vpop.permute.xlu1 %1824  ;;  %v1827_v11 = vpop.permute.xlu0 %1826 }
 0x338   : > { %v1828_v0 = vrot.slane %v1825_v10, 1  ;;  %v1829_v13 = vrot.slane %v1827_v11, 1 }
 0x33a   : > { %v1830_v25 = vsel %vm1150_vm8, %v1828_v0, %v1829_v13  ;;  %vm6765_vm8 = vcmask 72704  }
 0x33b   : > { %v1831_v15 = vsel %vm1406_vm6, %v1825_v10, %v1830_v25  ;;  %v2055_v16 = vpop.permute.xlu1 %2054 }
 0x33c   : > { %1833 = vst [vmem:[#allocation2 + $0x8] ss:$8 sm:$0xf] %v1831_v15  ;;  %1834 = vst [vmem:[#allocation2 + $0x8] ss:$8 sm:$0xf0] %v1831_v15 }
 0x33d   : > { %v2056_v6 = vrot.slane %v2055_v16, 7 }
 0x33f   : > { %v14080_v45 = vpop.permute.xlu1 %2182  ;;  %v2057_v34 = vsel %vm1166_vm1, %v2056_v6, %v2055_v16  ;;  %vm3791_vm1 = vcmask 121856  }
 0x340   : > { %v16279_v39 = vrot.slane %v14080_v45, 7 }
 0x342   : > { %v2185_v49 = vsel %vm1152_vm2, %v16279_v39, %v14080_v45  ;;  %v2968_v39 = vld [vmem:[%s13695_s24 + $0x110] sm:$0xff] }
 0x343   : > { %v1835_v18 = vld [vmem:[#allocation2] ss:$8 sm:$0xf] }
 0x344   : > { %v1836_v22 = vld [vmem:[#allocation2] ss:$8 sm:$0xf0] }
 0x345   : > { %v14055_v23 = vld [vmem:[#allocation2 + $0x40] ss:$8 sm:$0x1]  ;;  %v14057_v24 = vor.u32 %v1836_v22, %v1835_v18 }
 0x346   : > { %v14060_v26 = vmul.f32 %v2056_v6, %v14055_v23  ;;  %v2306_v47 = vld [vmem:[#allocation2 + $0x8] ss:$8 sm:$0xf] }
 0x347   : > { %v14073_v29 = vmul.f32 %v1929_v28, %v14057_v24  ;;  %v14097_v41 = vmul.f32 %v2057_v34, %v14057_v24  ;;  %v2307_v44 = vld [vmem:[#allocation2 + $0x8] ss:$8 sm:$0xf0]  ;;  %v14120_v55 = vmul.f32 %v2185_v49, %v14057_v24 }
 0x348   : > { %v14078_v3 = vpop.permute.xlu0 %1938  ;;  %v2308_v53 = vor.u32 %v2307_v44, %v2306_v47  ;;  %v2418_v1 = vld [vmem:[#allocation2 + $0x8] ss:$8 sm:$0xf] }
 0x349   : > { %v1954_v31 = vrot.slane %v14073_v29, %v14063_v21  ;;  %v1950_v33 = vrot.slane %v14073_v29, %v14066_v27  ;;  %v1958_v37 = vrot.slane %v14073_v29, %v14076_v30  ;;  %v1946_v38 = vrot.slane %v14073_v29, %v13827_v46  ;;  %v2419_v2 = vld [vmem:[#allocation2 + $0x8] ss:$8 sm:$0xf0] }
 0x34a   : > { %v2082_v51 = vrot.slane %v14097_v41, %v14063_v21  ;;  %v2078_v52 = vrot.slane %v14097_v41, %v14066_v27  ;;  %v2086_v56 = vrot.slane %v14097_v41, %v14076_v30  ;;  %v2074_v57 = vrot.slane %v14097_v41, %v13827_v46 }
 0x34b   : > { %v1990_v35 = vmul.f32 %v1954_v31, %v14078_v3  ;;  %v1989_v36 = vmul.f32 %v1950_v33, %v14078_v3  ;;  %v1991_v48 = vmul.f32 %v1958_v37, %v14078_v3  ;;  %v1988_v19 = vmul.f32 %v1946_v38, %v14078_v3  ;;  %v14176_v38 = vld [vmem:[#allocation2 + $0x48] ss:$8 sm:$0x1] }
 0x34c   : > { %v14094_v40 = vpop.permute.xlu0 %2066  ;;  %v14130_v58 = vmul.f32 %v2311_v50, %v2308_v53  ;;  %v2210_v5 = vrot.slane %v14120_v55, %v14063_v21  ;;  %v2206_v7 = vrot.slane %v14120_v55, %v14066_v27  ;;  %v2420_v13 = vor.u32 %v2419_v2, %v2418_v1 }
 0x34d   : > { %2010 = vrot.lane.b32.xlu1 %v1990_v35, %s16346_s23  ;;  %2008 = vrot.lane.b32.xlu0 %v1989_v36, %s16346_s23  ;;  %v2118_v54 = vmul.f32 %v2082_v51, %v14094_v40  ;;  %v2117_v14 = vmul.f32 %v2078_v52, %v14094_v40  ;;  %v2119_v61 = vmul.f32 %v2086_v56, %v14094_v40  ;;  %v14199_v53 = vsub.s32 4, %v13822_v42 }
 0x34e   : > { %v2116_v62 = vmul.f32 %v2074_v57, %v14094_v40  ;;  %v2214_v15 = vrot.slane %v14120_v55, %v14076_v30  ;;  %v2202_v16 = vrot.slane %v14120_v55, %v13827_v46  ;;  %v2324_v35 = vrot.slane %v14130_v58, %v13827_v46 }
 0x34f   : > { %v2328_v37 = vrot.slane %v14130_v58, %v14066_v27  ;;  %v2332_v32 = vrot.slane %v14130_v58, %v14063_v21 }
 0x350   : > { %v14109_v20 = vpop.permute.xlu0 %2194  ;;  %v14164_v18 = vpop.permute.xlu1 %2317 }
 0x351   : > { %2012 = vrot.lane.b32.xlu0 %v1991_v48, %s16346_s23  ;;  %2006 = vrot.lane.b32.xlu1 %v1988_v19, %s16346_s23  ;;  %v2246_v11 = vmul.f32 %v2210_v5, %v14109_v20  ;;  %v2245_v0 = vmul.f32 %v2206_v7, %v14109_v20  ;;  %v2247_v28 = vmul.f32 %v2214_v15, %v14109_v20 }
 0x352   : > { %v2244_v31 = vmul.f32 %v2202_v16, %v14109_v20  ;;  %v2361_v43 = vmul.f32 %v2324_v35, %v14164_v18  ;;  %v2362_v49 = vmul.f32 %v2328_v37, %v14164_v18  ;;  %v2363_v56 = vmul.f32 %v2332_v32, %v14164_v18  ;;  %v2972_v32 = vld [vmem:[%s13695_s24 + $0x130] sm:$0xff]  ;;  %v2978_v35 = vld [vmem:[%s13695_s24 + $0x160] sm:$0xff] }
 0x354   : > { %v14122_v17 = vpop.permute.xlu0 %2426 }
 0x355   : > { %16357 = vst [vmem:[#allocation38_spill] sm:$0xff] %v14122_v17  ;;  %2138 = vrot.lane.b32.xlu1 %v2118_v54, %s16353_s28  ;;  %2136 = vrot.lane.b32.xlu0 %v2117_v14, %s16353_s28  ;;  %v16278_v60 = vrot.slane %v14122_v17, 7  ;;  %v14201_v54 = vpop.permute.xlu1 %2438 }
 0x357   : > { %v2429_v10 = vsel %vm1283_vm3, %v16278_v60, %v14122_v17  ;;  %v2947_v60 = vld [vmem:[%s13695_s24 + $0x68] sm:$0xff] }
 0x358   : > { %v14138_v63 = vpop.permute.xlu0 %2554  ;;  %v14162_v6 = vmul.f32 %v2429_v10, %v2420_v13 }
 0x359   : > { %16358 = vst [vmem:[#allocation39_spill] sm:$0xff] %v14138_v63  ;;  %2140 = vrot.lane.b32.xlu0 %v2119_v61, %s16353_s28  ;;  %2134 = vrot.lane.b32.xlu1 %v2116_v62, %s16353_s28  ;;  %v16277_v22 = vrot.slane %v14138_v63, 7  ;;  %v14244_v37 = vpop.permute.xlu1 %2566 }
 0x35a   : > { %v2446_v47 = vrot.slane %v14162_v6, %v13827_v46  ;;  %v2450_v57 = vrot.slane %v14162_v6, %v14066_v27  ;;  %v2454_v1 = vrot.slane %v14162_v6, %v14063_v21 }
 0x35b   : > { %v2557_v44 = vsel %vm1324_vm4, %v16277_v22, %v14138_v63  ;;  %v2944_v22 = vld [vmem:[%s13695_s24 + $0x50] sm:$0xff]  ;;  %vm3589_vm4 = vcmask 130048  }
 0x35c   : > { %v14154_v25 = vpop.permute.xlu0 %2682  ;;  %v14208_v61 = vmul.f32 %v2557_v44, %v2420_v13  ;;  %v2488_v62 = vmul.f32 %v2446_v47, %v14201_v54  ;;  %v2489_v15 = vmul.f32 %v2450_v57, %v14201_v54  ;;  %v2970_v47 = vld [vmem:[%s13695_s24 + $0x120] sm:$0xff] }
 0x35d   : > { %16359 = vst [vmem:[#allocation40_spill] sm:$0xff] %v14154_v25  ;;  %2266 = vrot.lane.b32.xlu1 %v2246_v11, %s16343_s2  ;;  %2264 = vrot.lane.b32.xlu0 %v2245_v0, %s16343_s2  ;;  %v16276_v33 = vrot.slane %v14154_v25, 7  ;;  %v2983_v11 = vld [vmem:[%s13695_s24 + $0x188] sm:$0xff] }
 0x35e   : > { %v2578_v16 = vrot.slane %v14208_v61, %v14066_v27 }
 0x35f   : > { %v2685_v50 = vsel %vm1365_vm5, %v16276_v33, %v14154_v25  ;;  %v2938_v33 = vld [vmem:[%s13695_s24 + $0x20] sm:$0xff]  ;;  %vm3594_vm5 = vcmask 64512  }
 0x360   : > { %v2811_v34 = vpop.permute.xlu0 %2810  ;;  %v14215_v5 = vmul.f32 %v2685_v50, %v2420_v13  ;;  %v2617_v44 = vmul.f32 %v2578_v16, %v14244_v37  ;;  %v14259_v50 = vsub.s32 7, %v13822_v42  ;;  %v1966_v16 = vrot.slane %v14073_v29, %v14133_v59 }
 0x361   : > { %2268 = vrot.lane.b32.xlu0 %v2247_v28, %s16343_s2  ;;  %2262 = vrot.lane.b32.xlu1 %v2244_v31, %s16343_s2  ;;  %v2812_v36 = vrot.slane %v2811_v34, 7  ;;  %v2966_v31 = vld [vmem:[%s13695_s24 + $0x100] sm:$0xff] }
 0x362   : > { %v2982_v28 = vld [vmem:[%s13695_s24 + $0x180] sm:$0xff] }
 0x363   : > { %v2813_v48 = vsel %vm1406_vm6, %v2812_v36, %v2811_v34  ;;  %v14189_v19 = vmul.f32 %v2812_v36, %v14176_v38  ;;  %v2957_v34 = vld [vmem:[%s13695_s24 + $0xb8] sm:$0xff]  ;;  %v2976_v36 = vld [vmem:[%s13695_s24 + $0x150] sm:$0xff] }
 0x364   : > { %v14196_v51 = vmul.f32 %v2813_v48, %v2420_v13  ;;  %v1844_v52 = vpop.permute.xlu0 %1843  ;;  %v2490_v13 = vmul.f32 %v2454_v1, %v14201_v54  ;;  %v2951_v1 = vld [vmem:[%s13695_s24 + $0x88] sm:$0xff] }
 0x365   : > { %16360 = vst [vmem:[#allocation41_spill] sm:$0xff] %v14189_v19  ;;  %2377 = vrot.lane.b32.xlu0 %v2361_v43, %s16350_s10  ;;  %2379 = vrot.lane.b32.xlu1 %v2362_v49, %s16350_s10  ;;  %v1845_v14 = vrot.slane %v1844_v52, 7  ;;  %v2582_v43 = vrot.slane %v14208_v61, %v14063_v21  ;;  %v2702_v49 = vrot.slane %v14215_v5, %v13827_v46 }
 0x367   : > { %v1846_v7 = vsel %vm1095_vm7, %v1845_v14, %v1844_v52  ;;  %v14219_v10 = vmul.f32 %v1845_v14, %v14055_v23  ;;  %v14262_v52 = vsub.s32 6, %v13822_v42  ;;  %v2618_v57 = vmul.f32 %v2582_v43, %v14244_v37  ;;  %v2941_v14 = vld [vmem:[%s13695_s24 + $0x38] sm:$0xff] }
 0x368   : > { %v14224_v0 = vmul.f32 %v1846_v7, %v14057_v24  ;;  %v2574_v24 = vrot.slane %v14208_v61, %v13827_v46  ;;  %v2706_v7 = vrot.slane %v14215_v5, %v14066_v27 }
 0x369   : > { %16361 = vst [vmem:[#allocation42_spill] sm:$0xff] %v14219_v10  ;;  %2381 = vrot.lane.b32.xlu0 %v2363_v56, %s16350_s10  ;;  %2506 = vrot.lane.b32.xlu1 %v2488_v62, %s16351_s13  ;;  %v14268_v56 = vpop.permute.xlu1 %2694  ;;  %v2939_v62 = vld [vmem:[%s13695_s24 + $0x28] sm:$0xff]  ;;  %v2989_v10 = vld [vmem:[%s13695_s24 + $0x1b8] sm:$0xff] }
 0x36a   : > { %v2616_v48 = vmul.f32 %v2574_v24, %v14244_v37  ;;  %v2744_v42 = vmul.f32 %v2702_v49, %v14268_v56  ;;  %v2745_v43 = vmul.f32 %v2706_v7, %v14268_v56  ;;  %v2830_v49 = vrot.slane %v14196_v51, %v13827_v46 }
 0x36b   : > { %v1962_v7 = vrot.slane %v14073_v29, %v14199_v53  ;;  %v1862_v19 = vrot.slane %v14224_v0, %v13827_v46 }
 0x36d   : > { %2508 = vrot.lane.b32.xlu0 %v2489_v15, %s16351_s13  ;;  %2510 = vrot.lane.b32.xlu1 %v2490_v13, %s16351_s13  ;;  %v2710_v15 = vrot.slane %v14215_v5, %v14063_v21  ;;  %v2943_v13 = vld [vmem:[%s13695_s24 + $0x48] sm:$0xff] }
 0x371   : > { %2636 = vrot.lane.b32.xlu1 %v2617_v44, %s16352_s26  ;;  %2634 = vrot.lane.b32.xlu0 %v2616_v48, %s16352_s26  ;;  %v2746_v44 = vmul.f32 %v2710_v15, %v14268_v56  ;;  %v2834_v48 = vrot.slane %v14196_v51, %v14066_v27  ;;  %v2838_v15 = vrot.slane %v14196_v51, %v14063_v21 }
 0x375   : > { %2638 = vrot.lane.b32.xlu0 %v2618_v57, %s16352_s26  ;;  %2762 = vrot.lane.b32.xlu1 %v2744_v42, %s16354_s6  ;;  %v14296_v57 = vpop.permute.xlu1 %2822 }
 0x376   : > { %v2873_v42 = vmul.f32 %v2834_v48, %v14296_v57  ;;  %v2872_v4 = vmul.f32 %v2830_v49, %v14296_v57  ;;  %v2090_v48 = vrot.slane %v14097_v41, %v14199_v53 }
 0x378   : > { %v2120_v49 = vmul.f32 %v2090_v48, %v14094_v40 }
 0x379   : > { %2764 = vrot.lane.b32.xlu0 %v2745_v43, %s16354_s6  ;;  %2766 = vrot.lane.b32.xlu1 %v2746_v44, %s16354_s6  ;;  %v1992_v43 = vmul.f32 %v1962_v7, %v14078_v3  ;;  %v2874_v44 = vmul.f32 %v2838_v15, %v14296_v57  ;;  %v2094_v7 = vrot.slane %v14097_v41, %v14133_v59 }
 0x37d   : > { %2892 = vrot.lane.b32.xlu1 %v2873_v42, %s16355_s1  ;;  %2890 = vrot.lane.b32.xlu0 %v2872_v4, %s16355_s1  ;;  %v1993_v42 = vmul.f32 %v1966_v16, %v14078_v3  ;;  %v2218_v4 = vrot.slane %v14120_v55, %v14199_v53  ;;  %v2336_v16 = vrot.slane %v14130_v58, %v14076_v30 }
 0x37f   : > { %v2248_v15 = vmul.f32 %v2218_v4, %v14109_v20  ;;  %v2364_v48 = vmul.f32 %v2336_v16, %v14164_v18  ;;  %v2340_v4 = vrot.slane %v14130_v58, %v14199_v53  ;;  %v2462_v16 = vrot.slane %v14162_v6, %v14199_v53 }
 0x381   : > { %2014 = vrot.lane.b32.xlu1 %v1992_v43, %s16346_s23  ;;  %2894 = vrot.lane.b32.xlu0 %v2874_v44, %s16355_s1  ;;  %v2121_v43 = vmul.f32 %v2094_v7, %v14094_v40  ;;  %v2222_v44 = vrot.slane %v14120_v55, %v14133_v59 }
 0x385   : > { %2142 = vrot.lane.b32.xlu1 %v2120_v49, %s16353_s28  ;;  %2016 = vrot.lane.b32.xlu0 %v1993_v42, %s16346_s23  ;;  %v2249_v49 = vmul.f32 %v2222_v44, %v14109_v20  ;;  %v2458_v42 = vrot.slane %v14162_v6, %v14076_v30 }
 0x387   : > { %v2491_v7 = vmul.f32 %v2458_v42, %v14201_v54  ;;  %v2590_v42 = vrot.slane %v14208_v61, %v14199_v53 }
 0x389   : > { %2270 = vrot.lane.b32.xlu1 %v2248_v15, %s16343_s2  ;;  %2144 = vrot.lane.b32.xlu0 %v2121_v43, %s16353_s28  ;;  %v2365_v15 = vmul.f32 %v2340_v4, %v14164_v18  ;;  %v2586_v43 = vrot.slane %v14208_v61, %v14076_v30 }
 0x38b   : > { %v2619_v44 = vmul.f32 %v2586_v43, %v14244_v37 }
 0x38d   : > { %2383 = vrot.lane.b32.xlu1 %v2364_v48, %s16350_s10  ;;  %2272 = vrot.lane.b32.xlu0 %v2249_v49, %s16343_s2  ;;  %v2492_v48 = vmul.f32 %v2462_v16, %v14201_v54  ;;  %v2718_v49 = vrot.slane %v14215_v5, %v14199_v53  ;;  %v2935_v16 = vld [vmem:[%s13695_s24 + $0x8] sm:$0xff] }
 0x38f   : > { %v2748_v4 = vmul.f32 %v2718_v49, %v14268_v56 }
 0x391   : > { %2512 = vrot.lane.b32.xlu1 %v2491_v7, %s16351_s13  ;;  %2385 = vrot.lane.b32.xlu0 %v2365_v15, %s16350_s10  ;;  %v2620_v7 = vmul.f32 %v2590_v42, %v14244_v37  ;;  %v2714_v15 = vrot.slane %v14215_v5, %v14076_v30  ;;  %v2936_v42 = vld [vmem:[%s13695_s24 + $0x10] sm:$0xff] }
 0x393   : > { %v2747_v43 = vmul.f32 %v2714_v15, %v14268_v56  ;;  %v2945_v15 = vld [vmem:[%s13695_s24 + $0x58] sm:$0xff] }
 0x395   : > { %2640 = vrot.lane.b32.xlu1 %v2619_v44, %s16352_s26  ;;  %2514 = vrot.lane.b32.xlu0 %v2492_v48, %s16351_s13  ;;  %v2937_v44 = vld [vmem:[%s13695_s24 + $0x18] sm:$0xff]  ;;  %v2934_v48 = vld [vmem:[%s13695_s24] sm:$0xff] }
 0x396   : > { %v12875_v49 = vpack.c.bf16 %v2937_v44, %v2935_v16  ;;  %v12877_v24 = vpack.c.bf16 %v2936_v42, %v2934_v48  ;;  %v12883_v16 = vpack.c.bf16 %v2945_v15, %v2943_v13  ;;  %v2942_v44 = vld [vmem:[%s13695_s24 + $0x40] sm:$0xff]  ;;  %v2948_v42 = vld [vmem:[%s13695_s24 + $0x70] sm:$0xff]  ;;  %v2955_v15 = vld [vmem:[%s13695_s24 + $0xa8] sm:$0xff] }
 0x398   : > { %12876 = vmatprep.subr.bf16.mxu0 %v12875_v49  ;;  %v2946_v49 = vld [vmem:[%s13695_s24 + $0x60] sm:$0xff] }
 0x399   : > { %2770 = vrot.lane.b32.xlu1 %v2748_v4, %s16354_s6  ;;  %2642 = vrot.lane.b32.xlu0 %v2620_v7, %s16352_s26  ;;  %v12879_v4 = vpack.c.bf16 %v2941_v14, %v2939_v62  ;;  %v2940_v7 = vld [vmem:[%s13695_s24 + $0x30] sm:$0xff]  ;;  %v2949_v14 = vld [vmem:[%s13695_s24 + $0x78] sm:$0xff]  ;;  %v12885_v62 = vpack.c.bf16 %v2944_v22, %v2942_v44  ;;  %v12889_v13 = vpack.c.bf16 %v2948_v42, %v2946_v49  ;;  %v14384_v22 = vpop.permute.xlu1 %1854 }
 0x39a   : > { %12878 = vmatpush1.bf16.msra.mxu0 %v12877_v24  ;;  %v12887_v48 = vpack.c.bf16 %v2949_v14, %v2947_v60  ;;  %v2956_v44 = vld [vmem:[%s13695_s24 + $0xb0] sm:$0xff]  ;;  %v2959_v14 = vld [vmem:[%s13695_s24 + $0xc8] sm:$0xff] }
 0x39b   : > { %12880 = vmatprep.subr.bf16.mxu0 %v12879_v4  ;;  %v2950_v4 = vld [vmem:[%s13695_s24 + $0x80] sm:$0xff] }
 0x39d   : > { %2768 = vrot.lane.b32.xlu0 %v2747_v43, %s16354_s6  ;;  %v12881_v43 = vpack.c.bf16 %v2940_v7, %v2938_v33  ;;  %v2953_v33 = vld [vmem:[%s13695_s24 + $0x98] sm:$0xff]  ;;  %v2952_v7 = vld [vmem:[%s13695_s24 + $0x90] sm:$0xff] }
 0x39e   : > { %v12891_v24 = vpack.c.bf16 %v2953_v33, %v2951_v1  ;;  %v12893_v60 = vpack.c.bf16 %v2952_v7, %v2950_v4  ;;  %v2958_v33 = vld [vmem:[%s13695_s24 + $0xc0] sm:$0xff] }
 0x39f   : > { %12882 = vmatpush1.bf16.msra.mxu0 %v12881_v43  ;;  %v12895_v43 = vpack.c.bf16 %v2957_v34, %v2955_v15  ;;  %v2965_v34 = vld [vmem:[%s13695_s24 + $0xf8] sm:$0xff] }
 0x3a0   : > { %12884 = vmatprep.subr.bf16.mxu0 %v12883_v16  ;;  %v2954_v16 = vld [vmem:[%s13695_s24 + $0xa0] sm:$0xff] }
 0x3a1   : > { %v12897_v1 = vpack.c.bf16 %v2956_v44, %v2954_v16  ;;  %v2962_v16 = vld [vmem:[%s13695_s24 + $0xe0] sm:$0xff]  ;;  %v2964_v44 = vld [vmem:[%s13695_s24 + $0xf0] sm:$0xff] }
 0x3a3   : > { %12886 = vmatpush1.bf16.msra.mxu0 %v12885_v62  ;;  %v2961_v62 = vld [vmem:[%s13695_s24 + $0xd8] sm:$0xff] }
 0x3a4   : > { %12888 = vmatprep.subr.bf16.mxu0 %v12887_v48  ;;  %v12899_v42 = vpack.c.bf16 %v2961_v62, %v2959_v14  ;;  %v2969_v14 = vld [vmem:[%s13695_s24 + $0x118] sm:$0xff]  ;;  %v12905_v62 = vpack.c.bf16 %v2964_v44, %v2962_v16 }
 0x3a7   : > { %12890 = vmatpush1.bf16.msra.mxu0 %v12889_v13  ;;  %v2960_v13 = vld [vmem:[%s13695_s24 + $0xd0] sm:$0xff] }
 0x3a8   : > { %12892 = vmatprep.subr.bf16.mxu0 %v12891_v24  ;;  %v2963_v24 = vld [vmem:[%s13695_s24 + $0xe8] sm:$0xff]  ;;  %v12901_v4 = vpack.c.bf16 %v2960_v13, %v2958_v33 }
 0x3ab   : > { %12894 = vmatpush1.bf16.msra.mxu0 %v12893_v60  ;;  %v12903_v60 = vpack.c.bf16 %v2965_v34, %v2963_v24  ;;  %v2973_v24 = vld [vmem:[%s13695_s24 + $0x138] sm:$0xff]  ;;  %v12909_v34 = vpack.c.bf16 %v2968_v39, %v2966_v31 }
 0x3ac   : > { %12896 = vmatprep.subr.bf16.mxu0 %v12895_v43  ;;  %v2967_v43 = vld [vmem:[%s13695_s24 + $0x108] sm:$0xff] }
 0x3ad   : > { %v12907_v13 = vpack.c.bf16 %v2969_v14, %v2967_v43  ;;  %v12913_v43 = vpack.c.bf16 %v2972_v32, %v2970_v47 }
 0x3af   : > { %12898 = vmatpush1.bf16.msra.mxu0 %v12897_v1 }
 0x3b0   : > { %12900 = vmatprep.subr.bf16.mxu0 %v12899_v42  ;;  %v2971_v42 = vld [vmem:[%s13695_s24 + $0x128] sm:$0xff] }
 0x3b1   : > { %v12911_v44 = vpack.c.bf16 %v2973_v24, %v2971_v42  ;;  %v2981_v42 = vld [vmem:[%s13695_s24 + $0x178] sm:$0xff] }
 0x3b3   : > { %12902 = vmatpush1.bf16.msra.mxu0 %v12901_v4 }
 0x3b4   : > { %12904 = vmatprep.subr.bf16.mxu0 %v12903_v60  ;;  %v2977_v60 = vld [vmem:[%s13695_s24 + $0x158] sm:$0xff] }
 0x3b5   : > { %v12915_v31 = vpack.c.bf16 %v2977_v60, %v2975_v12  ;;  %v12921_v12 = vpack.c.bf16 %v2980_v8, %v2978_v35 }
 0x3b7   : > { %12906 = vmatpush1.bf16.msra.mxu0 %v12905_v62  ;;  %v2974_v62 = vld [vmem:[%s13695_s24 + $0x140] sm:$0xff] }
 0x3b8   : > { %12908 = vmatprep.subr.bf16.mxu0 %v12907_v13  ;;  %v2979_v13 = vld [vmem:[%s13695_s24 + $0x168] sm:$0xff]  ;;  %v12917_v24 = vpack.c.bf16 %v2976_v36, %v2974_v62  ;;  %v2984_v36 = vld [vmem:[%s13695_s24 + $0x190] sm:$0xff] }
 0x3b9   : > { %v12919_v47 = vpack.c.bf16 %v2981_v42, %v2979_v13  ;;  %v2987_v62 = vld [vmem:[%s13695_s24 + $0x1a8] sm:$0xff] }
 0x3ba   : > { %v12927_v25 = vpack.c.bf16 %v2989_v10, %v2987_v62  ;;  %v1866_v10 = vrot.slane %v14224_v0, %v14066_v27  ;;  %v2988_v62 = vld [vmem:[%s13695_s24 + $0x1b0] sm:$0xff] }
 0x3bb   : > { %12910 = vmatpush1.bf16.msra.mxu0 %v12909_v34 }
 0x3bc   : > { %12912 = vmatprep.subr.bf16.mxu0 %v12911_v44  ;;  %v2985_v44 = vld [vmem:[%s13695_s24 + $0x198] sm:$0xff] }
 0x3bf   : > { %v14390_v48 = vpop.permute.xlu1 %2010  ;;  %v14392_v49 = vpop.permute.xlu0 %2008  ;;  %12914 = vmatpush1.bf16.msra.mxu0 %v12913_v43  ;;  %v12923_v43 = vpack.c.bf16 %v2985_v44, %v2983_v11  ;;  %v1904_v11 = vmul.f32 %v1862_v19, %v14384_v22 }
 0x3c0   : > { %12916 = vmatprep.subr.bf16.mxu0 %v12915_v31  ;;  %v12925_v31 = vpack.c.bf16 %v2984_v36, %v2982_v28  ;;  %v2986_v36 = vld [vmem:[%s13695_s24 + $0x1a0] sm:$0xff] }
 0x3c3   : > { %v14398_v7 = vpop.permute.xlu1 %2006  ;;  %v14400_v15 = vpop.permute.xlu0 %2012  ;;  %12918 = vmatpush1.bf16.msra.mxu0 %v12917_v24 }
 0x3c4   : > { %12920 = vmatprep.subr.bf16.mxu0 %v12919_v47  ;;  %v2024_v8 = vsel %vm1152_vm2, %v14398_v7, %v14392_v49 }
 0x3c5   : > { %v2041_v47 = vadd.f32 %v2024_v8, %v1904_v11  ;;  %v1905_v8 = vmul.f32 %v1866_v10, %v14384_v22 }
 0x3c7   : > { %v14406_v1 = vpop.permute.xlu1 %2138  ;;  %v14408_v33 = vpop.permute.xlu0 %2136  ;;  %12922 = vmatpush1.bf16.msra.mxu0 %v12921_v12 }
 0x3c8   : > { %12924 = vmatprep.subr.bf16.mxu0 %v12923_v43  ;;  %v2025_v43 = vsel %vm1152_vm2, %v14392_v49, %v14390_v48  ;;  %v2153_v49 = vsel %vm1194_vm9, %v14408_v33, %v14406_v1 }
 0x3cb   : > { %v2135_v4 = vpop.permute.xlu1 %2134  ;;  %v14414_v16 = vpop.permute.xlu0 %2140  ;;  %12926 = vmatpush1.bf16.msra.mxu0 %v12925_v31  ;;  %v2991_v31 = vld [vmem:[%s13695_s24 + $0x1c8] sm:$0xff] }
 0x3cc   : > { %v2152_v35 = vsel %vm1194_vm9, %v2135_v4, %v14408_v33  ;;  %12928 = vmatprep.subr.bf16.mxu0 %v12927_v25  ;;  %v2026_v4 = vsel %vm1152_vm2, %v14390_v48, %v14400_v15  ;;  %v2154_v48 = vsel %vm1194_vm9, %v14406_v1, %v14414_v16  ;;  %v2992_v1 = vld [vmem:[%s13695_s24 + $0x1d0] sm:$0xff] }
 0x3cd   : > { %v2169_v44 = vadd.f32 %v2152_v35, %v2041_v47  ;;  %v12929_v35 = vpack.c.bf16 %v2988_v62, %v2986_v36  ;;  %v2993_v47 = vld [vmem:[%s13695_s24 + $0x1d8] sm:$0xff]  ;;  %v2990_v62 = vld [vmem:[%s13695_s24 + $0x1c0] sm:$0xff] }
 0x3cf   : > { %v14420_v14 = vpop.permute.xlu1 %2266  ;;  %v14422_v39 = vpop.permute.xlu0 %2264  ;;  %12930 = vmatpush1.bf16.msra.mxu0 %v12929_v35 }
 0x3d3   : > { %v2263_v34 = vpop.permute.xlu1 %2262  ;;  %v14428_v32 = vpop.permute.xlu0 %2268 }
 0x3d4   : > { %v2280_v7 = vsel %vm1123_vm0, %v2263_v34, %v14422_v39  ;;  %v16362_v34 = vrot.slane %v14224_v0, %v14063_v21  ;;  %v2281_v21 = vsel %vm1123_vm0, %v14422_v39, %v14420_v14  ;;  %v2282_v36 = vsel %vm1123_vm0, %v14420_v14, %v14428_v32 }
 0x3d5   : > { %v2297_v25 = vadd.f32 %v2280_v7, %v2169_v44  ;;  %v12931_v7 = vpack.c.bf16 %v2993_v47, %v2991_v31  ;;  %v2042_v44 = vadd.f32 %v2025_v43, %v1905_v8  ;;  %v12933_v31 = vpack.c.bf16 %v2992_v1, %v2990_v62  ;;  %v2996_v1 = vld [vmem:[%s13695_s24 + $0x1f0] sm:$0xff] }
 0x3d6   : > { %v1906_v11 = vmul.f32 %v16362_v34, %v14384_v22 }
 0x3d7   : > { %v2380_v60 = vpop.permute.xlu1 %2379  ;;  %v2378_v2 = vpop.permute.xlu0 %2377  ;;  %12932 = vmatprep.subr.bf16.mxu0 %v12931_v7  ;;  %v2170_v43 = vadd.f32 %v2153_v49, %v2042_v44  ;;  %v2995_v7 = vld [vmem:[%s13695_s24 + $0x1e8] sm:$0xff]  ;;  %v2997_v44 = vld [vmem:[%s13695_s24 + $0x1f8] sm:$0xff] }
 0x3d8   : > { %v2043_v10 = vadd.f32 %v2026_v4, %v1906_v11  ;;  %v2409_v33 = vadd.f32 %v2378_v2, %v2297_v25  ;;  %v2393_v8 = vsel %vm1095_vm7, %v2378_v2, %v2380_v60  ;;  %12934 = vmatpush1.bf16.msra.mxu0 %v12933_v31  ;;  %v2994_v2 = vld [vmem:[%s13695_s24 + $0x1e0] sm:$0xff]  ;;  %v12935_v62 = vpack.c.bf16 %v2997_v44, %v2995_v7 }
 0x3d9   : > { %v2298_v11 = vadd.f32 %v2281_v21, %v2170_v43  ;;  %v12937_v43 = vpack.c.bf16 %v2996_v1, %v2994_v2  ;;  %v1970_v1 = vrot.slane %v14073_v29, %v14262_v52 }
 0x3da   : > { %v2171_v4 = vadd.f32 %v2154_v48, %v2043_v10  ;;  %12936 = vmatprep.subr.bf16.mxu0 %v12935_v62 }
 0x3db   : > { %v2507_v13 = vpop.permute.xlu1 %2506  ;;  %v14440_v42 = vpop.permute.xlu0 %2381  ;;  %v2410_v10 = vadd.f32 %v2393_v8, %v2298_v11 }
 0x3dc   : > { %v2541_v34 = vadd.f32 %v2507_v13, %v2409_v33  ;;  %v2394_v39 = vsel %vm1095_vm7, %v2380_v60, %v14440_v42  ;;  %v2299_v35 = vadd.f32 %v2282_v36, %v2171_v4  ;;  %12938 = vmatpush1.bf16.msra.mxu0 %v12937_v43 }
 0x3de   : > { %v2411_v33 = vadd.f32 %v2394_v39, %v2299_v35 }
 0x3df   : > { %v14448_v24 = vpop.permute.xlu1 %2510  ;;  %v2509_v28 = vpop.permute.xlu0 %2508 }
 0x3e0   : > { %v2524_v47 = vsel %vm1309_vm10, %v2507_v13, %v2509_v28  ;;  %v2525_v49 = vsel %vm1309_vm10, %v2509_v28, %v14448_v24 }
 0x3e1   : > { %v2542_v4 = vadd.f32 %v2524_v47, %v2410_v10  ;;  %v2543_v13 = vadd.f32 %v2525_v49, %v2411_v33  ;;  %v2102_v10 = vrot.slane %v14097_v41, %v14259_v50  ;;  %v16364_v33 = vrot.slane %v14196_v51, %v14076_v30 }
 0x3e3   : > { %v2637_v19 = vpop.permute.xlu1 %2636  ;;  %v2635_v12 = vpop.permute.xlu0 %2634  ;;  %v2875_v62 = vmul.f32 %v16364_v33, %v14296_v57  ;;  %v16371_v33 = vrot.slane %v14080_v45, 7  ;;  %v3001_v45 = vld [vmem:[%s13695_s24 + $0x218] sm:$0xff] }
 0x3e4   : > { %v2669_v48 = vadd.f32 %v2635_v12, %v2541_v34  ;;  %v2652_v60 = vsel %vm1350_vm11, %v2635_v12, %v2637_v19 }
 0x3e5   : > { %v2670_v39 = vadd.f32 %v2652_v60, %v2542_v4  ;;  %v2123_v60 = vmul.f32 %v2102_v10, %v14094_v40  ;;  %v2098_v4 = vrot.slane %v14097_v41, %v14262_v52 }
 0x3e7   : > { %v2763_v27 = vpop.permute.xlu1 %2762  ;;  %v14475_v63 = vpop.permute.xlu0 %2638 }
 0x3e8   : > { %v2797_v21 = vadd.f32 %v2763_v27, %v2669_v48  ;;  %v2653_v36 = vsel %vm1350_vm11, %v2637_v19, %v14475_v63  ;;  %v1974_v48 = vrot.slane %v14073_v29, %v14259_v50  ;;  %v2348_v29 = vrot.slane %v14130_v58, %v14262_v52 }
 0x3e9   : > { %v2671_v11 = vadd.f32 %v2653_v36, %v2543_v13  ;;  %v1994_v36 = vmul.f32 %v1970_v1, %v14078_v3  ;;  %v2122_v13 = vmul.f32 %v2098_v4, %v14094_v40  ;;  %v2999_v4 = vld [vmem:[%s13695_s24 + $0x208] sm:$0xff] }
 0x3ea   : > { %v1995_v2 = vmul.f32 %v1974_v48, %v14078_v3 }
 0x3eb   : > { %v14488_v14 = vpop.permute.xlu1 %2766  ;;  %v2765_v25 = vpop.permute.xlu0 %2764 }
 0x3ec   : > { %v2780_v28 = vsel %vm1391_vm12, %v2763_v27, %v2765_v25  ;;  %v2781_v8 = vsel %vm1391_vm12, %v2765_v25, %v14488_v14  ;;  %v16363_v27 = vrot.slane %v14196_v51, %v14199_v53 }
 0x3ed   : > { %v2798_v19 = vadd.f32 %v2780_v28, %v2670_v39  ;;  %v2799_v35 = vadd.f32 %v2781_v8, %v2671_v11  ;;  %v2470_v28 = vrot.slane %v14162_v6, %v14262_v52  ;;  %v2226_v8 = vrot.slane %v14120_v55, %v14262_v52 }
 0x3ee   : > { %v2876_v25 = vmul.f32 %v16363_v27, %v14296_v57  ;;  %v2598_v39 = vrot.slane %v14208_v61, %v14262_v52  ;;  %v16365_v11 = vrot.slane %v14130_v58, %v14133_v59 }
 0x3ef   : > { %v2893_v31 = vpop.permute.xlu1 %2892  ;;  %v2891_v17 = vpop.permute.xlu0 %2890  ;;  %v2250_v41 = vmul.f32 %v2226_v8, %v14109_v20 }
 0x3f0   : > { %v2925_v34 = vadd.f32 %v2891_v17, %v2797_v21  ;;  %v2908_v12 = vsel %vm1432_vm13, %v2891_v17, %v2893_v31  ;;  %v2230_v21 = vrot.slane %v14120_v55, %v14259_v50  ;;  %v2622_v55 = vmul.f32 %v2598_v39, %v14244_v37 }
 0x3f1   : > { %v2926_v7 = vadd.f32 %v2908_v12, %v2798_v19  ;;  %v2366_v12 = vmul.f32 %v16365_v11, %v14164_v18  ;;  %v16366_v19 = vrot.slane %v14162_v6, %v14133_v59 }
 0x3f2   : > { %3205 = vrot.lane.b32.xlu0 %v2925_v34, %s16344_s14  ;;  %v2251_v43 = vmul.f32 %v2230_v21, %v14109_v20  ;;  %v2494_v34 = vmul.f32 %v2470_v28, %v14201_v54 }
 0x3f3   : > { %v14505_v47 = vpop.permute.xlu0 %2894  ;;  %v2015_v28 = vpop.permute.xlu1 %2014 }
 0x3f4   : > { %v2909_v49 = vsel %vm1432_vm13, %v2893_v31, %v14505_v47  ;;  %v2367_v31 = vmul.f32 %v2348_v29, %v14164_v18 }
 0x3f5   : > { %v2927_v44 = vadd.f32 %v2909_v49, %v2799_v35  ;;  %v2493_v35 = vmul.f32 %v16366_v19, %v14201_v54  ;;  %v16367_v49 = vrot.slane %v14215_v5, %v14133_v59  ;;  %v2027_v19 = vsel %vm1152_vm2, %v14400_v15, %v2015_v28 }
 0x3f6   : > { %2898 = vrot.lane.b32.xlu0 %v2876_v25, %s16355_s1  ;;  %v16368_v25 = vrot.slane %v14050_v9, 7 }
 0x3f7   : > { %v13381_v17 = vpack.i.bf16 %v2927_v44, %v2926_v7  ;;  %v2749_v27 = vmul.f32 %v16367_v49, %v14268_v56  ;;  %v16369_v7 = vrot.slane %v14208_v61, %v14133_v59  ;;  %v16372_v49 = vrot.slane %v14224_v0, %v14076_v30 }
 0x3f8   : > { %v1933_v48 = vmul.f32 %v16368_v25, %v14055_v23  ;;  %v16373_v25 = vrot.slane %v14224_v0, %v14199_v53 }
 0x3f9   : > { %13382 = vrot.lane.b32.xlu1 %v13381_v17, %s16344_s14  ;;  %v2621_v44 = vmul.f32 %v16369_v7, %v14244_v37  ;;  %v2726_v17 = vrot.slane %v14215_v5, %v14262_v52 }
 0x3fa   : > { %2020 = vrot.lane.b32.xlu0 %v1995_v2, %s16346_s23  ;;  %v16370_v2 = vrot.slane %v14196_v51, %v14133_v59  ;;  %v1978_v10 = vrot.slane %v1933_v48, %v13827_v46  ;;  %v1908_v48 = vmul.f32 %v16373_v25, %v14384_v22 }
 0x3fb   : > { %v2750_v1 = vmul.f32 %v2726_v17, %v14268_v56 }
 0x3fc   : > { %v2877_v9 = vmul.f32 %v16370_v2, %v14296_v57 }
 0x3fd   : > { %2896 = vrot.lane.b32.xlu1 %v2875_v62, %s16355_s1  ;;  %v2189_v62 = vmul.f32 %v16371_v33, %v14055_v23  ;;  %v12939_v23 = vpack.c.bf16 %v3001_v45, %v2999_v4 }
 0x3fe   : > { %2148 = vrot.lane.b32.xlu0 %v2123_v60, %s16353_s28  ;;  %v1996_v60 = vmul.f32 %v1978_v10, %v14078_v3  ;;  %v2602_v3 = vrot.slane %v14208_v61, %v14259_v50  ;;  %v2143_v61 = vpop.permute.xlu1 %2142 }
 0x3ff   : > { %v2234_v21 = vrot.slane %v2189_v62, %v13827_v46  ;;  %12940 = vmatprep.subr.bf16.mxu0 %v12939_v23 }
 0x401   : > { %2018 = vrot.lane.b32.xlu1 %v1994_v36, %s16346_s23  ;;  %v2252_v36 = vmul.f32 %v2234_v21, %v14109_v20  ;;  %v2730_v20 = vrot.slane %v14215_v5, %v14259_v50 }
 0x402   : > { %2276 = vrot.lane.b32.xlu0 %v2251_v43, %s16343_s2  ;;  %v2474_v43 = vrot.slane %v14162_v6, %v14259_v50 }
 0x403   : > { %v2751_v6 = vmul.f32 %v2730_v20, %v14268_v56 }
 0x404   : > { %v2495_v29 = vmul.f32 %v2474_v43, %v14201_v54 }
 0x405   : > { %2146 = vrot.lane.b32.xlu1 %v2122_v13, %s16353_s28  ;;  %v2623_v13 = vmul.f32 %v2602_v3, %v14244_v37  ;;  %v3000_v3 = vld [vmem:[%s13695_s24 + $0x210] sm:$0xff] }
 0x406   : > { %2389 = vrot.lane.b32.xlu0 %v2367_v31, %s16350_s10  ;;  %v14611_v31 = vpop.permute.xlu0 %2016 }
 0x409   : > { %2274 = vrot.lane.b32.xlu1 %v2250_v41, %s16343_s2 }
 0x40a   : > { %2518 = vrot.lane.b32.xlu0 %v2494_v34, %s16351_s13  ;;  %v14613_v8 = vpop.permute.xlu0 %2144  ;;  %v2271_v34 = vpop.permute.xlu1 %2270 }
 0x40b   : > { %v2156_v15 = vsel %vm1194_vm9, %v2143_v61, %v14613_v8 }
 0x40d   : > { %2387 = vrot.lane.b32.xlu1 %v2366_v12, %s16350_s10 }
 0x40e   : > { %2646 = vrot.lane.b32.xlu0 %v2622_v55, %s16352_s26  ;;  %v14615_v41 = vpop.permute.xlu0 %2272  ;;  %v2384_v11 = vpop.permute.xlu1 %2383 }
 0x40f   : > { %v2284_v30 = vsel %vm1123_vm0, %v2271_v34, %v14615_v41  ;;  %v2395_v62 = vsel %vm1095_vm7, %v14440_v42, %v2384_v11 }
 0x411   : > { %2516 = vrot.lane.b32.xlu1 %v2493_v35, %s16351_s13  ;;  %v2028_v35 = vsel %vm1152_vm2, %v2015_v28, %v14611_v31  ;;  %v3005_v28 = vld [vmem:[%s13695_s24 + $0x238] sm:$0xff] }
 0x412   : > { %2772 = vrot.lane.b32.xlu0 %v2749_v27, %s16354_s6  ;;  %v14617_v39 = vpop.permute.xlu0 %2385  ;;  %v2513_v5 = vpop.permute.xlu1 %2512  ;;  %v1907_v27 = vmul.f32 %v16372_v49, %v14384_v22  ;;  %v2045_v2 = vadd.f32 %v2028_v35, %v1908_v48  ;;  %v3004_v48 = vld [vmem:[%s13695_s24 + $0x230] sm:$0xff] }
 0x414   : > { %v2044_v17 = vadd.f32 %v2027_v19, %v1907_v27  ;;  %v2173_v53 = vadd.f32 %v2156_v15, %v2045_v2  ;;  %v3007_v2 = vld [vmem:[%s13695_s24 + $0x248] sm:$0xff] }
 0x415   : > { %2644 = vrot.lane.b32.xlu1 %v2621_v44, %s16352_s26  ;;  %v2155_v44 = vsel %vm1194_vm9, %v14414_v16, %v2143_v61  ;;  %v2396_v16 = vsel %vm1095_vm7, %v2384_v11, %v14617_v39 }
 0x416   : > { %2900 = vrot.lane.b32.xlu0 %v2877_v9, %s16355_s1  ;;  %v14619_v12 = vpop.permute.xlu0 %2514  ;;  %v2641_v7 = vpop.permute.xlu1 %2640  ;;  %v2283_v9 = vsel %vm1123_vm0, %v14428_v32, %v2271_v34  ;;  %v2172_v10 = vadd.f32 %v2155_v44, %v2044_v17  ;;  %v2526_v32 = vsel %vm1309_vm10, %v14448_v24, %v2513_v5  ;;  %v3003_v24 = vld [vmem:[%s13695_s24 + $0x228] sm:$0xff] }
 0x417   : > { %v2654_v42 = vsel %vm1350_vm11, %v14475_v63, %v2641_v7  ;;  %v12943_v25 = vpack.c.bf16 %v3005_v28, %v3003_v24 }
 0x419   : > { %2774 = vrot.lane.b32.xlu1 %v2750_v1, %s16354_s6  ;;  %v2300_v1 = vadd.f32 %v2283_v9, %v2172_v10  ;;  %v3009_v9 = vld [vmem:[%s13695_s24 + $0x258] sm:$0xff] }
 0x41a   : > { %2022 = vrot.lane.b32.xlu0 %v1996_v60, %s16346_s23  ;;  %v14621_v55 = vpop.permute.xlu0 %2642  ;;  %v2301_v60 = vadd.f32 %v2284_v30, %v2173_v53  ;;  %v14647_v21 = vpop.permute.xlu1 %2770 }
 0x41b   : > { %v2412_v43 = vadd.f32 %v2395_v62, %v2300_v1  ;;  %v2655_v23 = vsel %vm1350_vm11, %v2641_v7, %v14621_v55  ;;  %v3006_v1 = vld [vmem:[%s13695_s24 + $0x240] sm:$0xff] }
 0x41c   : > { %v2413_v4 = vadd.f32 %v2396_v16, %v2301_v60  ;;  %v12947_v16 = vpack.c.bf16 %v3009_v9, %v3007_v2  ;;  %v3008_v60 = vld [vmem:[%s13695_s24 + $0x250] sm:$0xff]  ;;  %v16379_v2 = vrot.slane %v14130_v58, %v14259_v50 }
 0x41e   : > { %2278 = vrot.lane.b32.xlu0 %v2252_v36, %s16343_s2  ;;  %v2769_v33 = vpop.permute.xlu0 %2768  ;;  %v2527_v36 = vsel %vm1309_vm10, %v2513_v5, %v14619_v12  ;;  %v2368_v9 = vmul.f32 %v16379_v2, %v14164_v18  ;;  %v3044_v2 = vld [vmem:[%s13695_s24 + $0x370] sm:$0xff]  ;;  %s16290_s2 = smov 120  }
 0x41f   : > { %v2545_v20 = vadd.f32 %v2527_v36, %v2413_v4  ;;  %v2782_v61 = vsel %vm1391_vm12, %v14488_v14, %v2769_v33  ;;  %v2783_v34 = vsel %vm1391_vm12, %v2769_v33, %v14647_v21  ;;  %v3002_v14 = vld [vmem:[%s13695_s24 + $0x220] sm:$0xff]  ;;  %v3011_v36 = vld [vmem:[%s13695_s24 + $0x268] sm:$0xff] }
 0x420   : > { %v12945_v62 = vpack.c.bf16 %v3004_v48, %v3002_v14  ;;  %v3018_v14 = vld [vmem:[%s13695_s24 + $0x2a0] sm:$0xff]  ;;  %v3020_v48 = vld [vmem:[%s13695_s24 + $0x2b0] sm:$0xff] }
 0x421   : > { %v2673_v19 = vadd.f32 %v2655_v23, %v2545_v20  ;;  %v16374_v23 = vrot.slane %v14196_v51, %v14262_v52  ;;  %v2106_v20 = vrot.slane %v14060_v26, %v13827_v46  ;;  %v3021_v26 = vld [vmem:[%s13695_s24 + $0x2b8] sm:$0xff] }
 0x422   : > { %2520 = vrot.lane.b32.xlu0 %v2495_v29, %s16351_s13  ;;  %v2998_v29 = vld [vmem:[%s13695_s24 + $0x200] sm:$0xff] }
 0x423   : > { %v12941_v35 = vpack.c.bf16 %v3000_v3, %v2998_v29  ;;  %v2801_v44 = vadd.f32 %v2783_v34, %v2673_v19  ;;  %v2878_v29 = vmul.f32 %v16374_v23, %v14296_v57  ;;  %v3015_v3 = vld [vmem:[%s13695_s24 + $0x288] sm:$0xff]  ;;  %v3016_v34 = vld [vmem:[%s13695_s24 + $0x290] sm:$0xff]  ;;  %v3026_v23 = vld [vmem:[%s13695_s24 + $0x2e0] sm:$0xff] }
 0x426   : > { %2648 = vrot.lane.b32.xlu0 %v2623_v13, %s16352_s26  ;;  %v2544_v13 = vadd.f32 %v2526_v32, %v2412_v43  ;;  %v3013_v43 = vld [vmem:[%s13695_s24 + $0x278] sm:$0xff] }
 0x427   : > { %v12951_v4 = vpack.c.bf16 %v3013_v43, %v3011_v36  ;;  %v3027_v36 = vld [vmem:[%s13695_s24 + $0x2e8] sm:$0xff]  ;;  %v3029_v43 = vld [vmem:[%s13695_s24 + $0x2f8] sm:$0xff] }
 0x428   : > { %v2672_v5 = vadd.f32 %v2654_v42, %v2544_v13  ;;  %v3012_v42 = vld [vmem:[%s13695_s24 + $0x270] sm:$0xff]  ;;  %v3017_v13 = vld [vmem:[%s13695_s24 + $0x298] sm:$0xff] }
 0x429   : > { %v12955_v28 = vpack.c.bf16 %v3017_v13, %v3015_v3 }
 0x42a   : > { %2776 = vrot.lane.b32.xlu0 %v2751_v6, %s16354_s6  ;;  %v2800_v7 = vadd.f32 %v2782_v61, %v2672_v5  ;;  %v3014_v61 = vld [vmem:[%s13695_s24 + $0x280] sm:$0xff] }
 0x464   : > { %v3206_v45 = vpop.permute.xlu0 %3205 }
 0x468   : > { %v14675_v15 = vpop.permute.xlu0 %2898 }
 0x46b   : > { %v14659_v6 = vpop.permute.xlu1 %13382 }
 0x46c   : > { %v13385_v63 = vunpack.i.h.bf16 %v14659_v6  ;;  %v13384_v11 = vunpack.i.l.bf16 %v14659_v6 }
 0x46e   : > { %v3224_v49 = vsel %vm1406_vm6, %v13384_v11, %v13385_v63  ;;  %v3223_v27 = vsel %vm1406_vm6, %v3206_v45, %v13384_v11  ;;  %v3010_v45 = vld [vmem:[%s13695_s24 + $0x260] sm:$0xff]  ;;  %v16375_v11 = vld [vmem:[#allocation38_spill] sm:$0xff] }
 0x46f   : > { %v2897_v17 = vpop.permute.xlu1 %2896  ;;  %3303 = vmatprep.mubr.f32.mxu0 %v3224_v49  ;;  %v12953_v24 = vpack.c.bf16 %v3012_v42, %v3010_v45  ;;  %v16376_v5 = vrot.slane %v16375_v11, 7  ;;  %v3019_v49 = vld [vmem:[%s13695_s24 + $0x2a8] sm:$0xff]  ;;  %v16382_v11 = vrot.slane %v14196_v51, %v14259_v50  ;;  %v3040_v51 = vld [vmem:[%s13695_s24 + $0x350] sm:$0xff] }
 0x470   : > { %v2910_v30 = vsel %vm1432_vm13, %v14505_v47, %v2897_v17  ;;  %v2911_v10 = vsel %vm1432_vm13, %v2897_v17, %v14675_v15  ;;  %3304 = vmatmul.mubr.f32.vlgmr.msra.gmra.mrb[0].mxu0 %v3223_v27  ;;  %v12949_v47 = vpack.c.bf16 %v3008_v60, %v3006_v1  ;;  %v12957_v27 = vpack.c.bf16 %v3016_v34, %v3014_v61  ;;  %v16380_v60 = vld [vmem:[#allocation40_spill] sm:$0xff]  ;;  %v3035_v61 = vld [vmem:[%s13695_s24 + $0x328] sm:$0xff] }
 0x471   : > { %v2928_v53 = vadd.f32 %v2910_v30, %v2800_v7  ;;  %v2929_v33 = vadd.f32 %v2911_v10, %v2801_v44  ;;  %12942 = vmatpush1.bf16.msra.mxu0 %v12941_v35  ;;  %v2433_v19 = vmul.f32 %v16376_v5, %v14176_v38  ;;  %v2124_v35 = vmul.f32 %v2106_v20, %v14094_v40  ;;  %v16377_v44 = vld [vmem:[#allocation39_spill] sm:$0xff]  ;;  %v3023_v30 = vld [vmem:[%s13695_s24 + $0x2c8] sm:$0xff] }
 0x472   : > { %12944 = vmatprep.subr.bf16.mxu0 %v12943_v25  ;;  %v12959_v25 = vpack.c.bf16 %v3021_v26, %v3019_v49  ;;  %v16378_v17 = vrot.slane %v16377_v44, 7  ;;  %v3025_v10 = vld [vmem:[%s13695_s24 + $0x2d8] sm:$0xff]  ;;  %v16381_v58 = vrot.slane %v16380_v60, 7  ;;  %v2879_v5 = vmul.f32 %v16382_v11, %v14296_v57  ;;  %v3039_v49 = vld [vmem:[%s13695_s24 + $0x348] sm:$0xff] }
 0x473   : > { %v13386_v32 = vpack.i.bf16 %v2929_v33, %v2928_v53  ;;  %v2478_v7 = vrot.slane %v2433_v19, %v13827_v46  ;;  %v12961_v53 = vpack.c.bf16 %v3020_v48, %v3018_v14  ;;  %v12963_v33 = vpack.c.bf16 %v3025_v10, %v3023_v30  ;;  %v3034_v19 = vld [vmem:[%s13695_s24 + $0x320] sm:$0xff]  ;;  %v3041_v26 = vld [vmem:[%s13695_s24 + $0x358] sm:$0xff]  ;;  %v3043_v48 = vld [vmem:[%s13695_s24 + $0x368] sm:$0xff] }
 0x474   : > { %v2561_v40 = vmul.f32 %v16378_v17, %v14176_v38  ;;  %v2689_v18 = vmul.f32 %v16381_v58, %v14176_v38  ;;  %v3028_v38 = vld [vmem:[%s13695_s24 + $0x2f0] sm:$0xff]  ;;  %v3038_v14 = vld [vmem:[%s13695_s24 + $0x340] sm:$0xff]  ;;  %v3049_v30 = vld [vmem:[%s13695_s24 + $0x398] sm:$0xff] }
 0x475   : > { %13387 = vrot.lane.b32.xlu1 %v13386_v32, %s16344_s14  ;;  %12946 = vmatpush1.bf16.msra.mxu0 %v12945_v62  ;;  %v3022_v62 = vld [vmem:[%s13695_s24 + $0x2c0] sm:$0xff]  ;;  %v2496_v32 = vmul.f32 %v2478_v7, %v14201_v54  ;;  %v3033_v54 = vld [vmem:[%s13695_s24 + $0x318] sm:$0xff]  ;;  %v12969_v3 = vpack.c.bf16 %v3028_v38, %v3026_v23  ;;  %v12981_v44 = vpack.c.bf16 %v3040_v51, %v3038_v14  ;;  %v3059_v23 = vld [vmem:[%s13695_s24 + $0x3e8] sm:$0xff] }
 0x476   : > { %12948 = vmatprep.subr.bf16.mxu0 %v12947_v16  ;;  %v3024_v16 = vld [vmem:[%s13695_s24 + $0x2d0] sm:$0xff]  ;;  %v2606_v1 = vrot.slane %v2561_v40, %v13827_v46  ;;  %v2734_v45 = vrot.slane %v2689_v18, %v13827_v46  ;;  %v3045_v7 = vld [vmem:[%s13695_s24 + $0x378] sm:$0xff]  ;;  %v3042_v40 = vld [vmem:[%s13695_s24 + $0x360] sm:$0xff]  ;;  %v16383_v14 = vrot.slane %v14224_v0, %v14133_v59 }
 0x477   : > { %v12983_v17 = vpack.c.bf16 %v3045_v7, %v3043_v48  ;;  %v12985_v10 = vpack.c.bf16 %v3044_v2, %v3042_v40  ;;  %v3050_v18 = vld [vmem:[%s13695_s24 + $0x3a0] sm:$0xff]  ;;  %v3061_v38 = vld [vmem:[%s13695_s24 + $0x3f8] sm:$0xff]  ;;  %v16384_v40 = vrot.slane %v14224_v0, %v14262_v52 }
 0x478   : > { %v2624_v42 = vmul.f32 %v2606_v1, %v14244_v37  ;;  %v2752_v13 = vmul.f32 %v2734_v45, %v14268_v56  ;;  %v3037_v37 = vld [vmem:[%s13695_s24 + $0x338] sm:$0xff]  ;;  %v3054_v45 = vld [vmem:[%s13695_s24 + $0x3c0] sm:$0xff]  ;;  %v1909_v51 = vmul.f32 %v16383_v14, %v14384_v22 }
 0x479   : > { %2902 = vrot.lane.b32.xlu1 %v2878_v29, %s16355_s1  ;;  %12950 = vmatpush1.bf16.msra.mxu0 %v12949_v47  ;;  %v12965_v47 = vpack.c.bf16 %v3024_v16, %v3022_v62  ;;  %v3031_v29 = vld [vmem:[%s13695_s24 + $0x308] sm:$0xff]  ;;  %v12975_v56 = vpack.c.bf16 %v3037_v37, %v3035_v61  ;;  %v3048_v62 = vld [vmem:[%s13695_s24 + $0x390] sm:$0xff]  ;;  %v3053_v1 = vld [vmem:[%s13695_s24 + $0x3b8] sm:$0xff]  ;;  %v14777_v37 = vpop.permute.xlu0 %2020 }
 0x47a   : > { %12952 = vmatprep.subr.bf16.mxu0 %v12951_v4  ;;  %v12967_v4 = vpack.c.bf16 %v3029_v43, %v3027_v36  ;;  %v12971_v20 = vpack.c.bf16 %v3033_v54, %v3031_v29  ;;  %v3051_v16 = vld [vmem:[%s13695_s24 + $0x3a8] sm:$0xff]  ;;  %v3057_v43 = vld [vmem:[%s13695_s24 + $0x3d8] sm:$0xff]  ;;  %v12999_v54 = vpack.c.bf16 %v3061_v38, %v3059_v23 }
 0x47b   : > { %v12991_v58 = vpack.c.bf16 %v3053_v1, %v3051_v16  ;;  %v3055_v36 = vld [vmem:[%s13695_s24 + $0x3c8] sm:$0xff]  ;;  %v3069_v23 = vld [vmem:[%s13695_s24 + $0x438] sm:$0xff] }
 0x47c   : > { %v3073_v14 = vld [vmem:[%s13695_s24 + $0x458] sm:$0xff] }
 0x47d   : > { %2150 = vrot.lane.b32.xlu1 %v2124_v35, %s16353_s28  ;;  %12954 = vmatpush1.bf16.msra.mxu0 %v12953_v24  ;;  %v3030_v24 = vld [vmem:[%s13695_s24 + $0x300] sm:$0xff]  ;;  %v3036_v35 = vld [vmem:[%s13695_s24 + $0x330] sm:$0xff]  ;;  %v14779_v11 = vpop.permute.xlu0 %2148  ;;  %s13530_s28 = smov 17  }
 0x47e   : > { %12956 = vmatprep.subr.bf16.mxu0 %v12955_v28  ;;  %v3032_v28 = vld [vmem:[%s13695_s24 + $0x310] sm:$0xff] }
 0x47f   : > { %v12973_v34 = vpack.c.bf16 %v3032_v28, %v3030_v24  ;;  %v3065_v24 = vld [vmem:[%s13695_s24 + $0x418] sm:$0xff] }
 0x481   : > { %2391 = vrot.lane.b32.xlu1 %v2368_v9, %s16350_s10  ;;  %12958 = vmatpush1.bf16.msra.mxu0 %v12957_v27  ;;  %v12977_v27 = vpack.c.bf16 %v3036_v35, %v3034_v19  ;;  %v3047_v9 = vld [vmem:[%s13695_s24 + $0x388] sm:$0xff]  ;;  %s16390_s10 = sld [smem:[#allocation28_spill]] }
 0x482   : > { %12960 = vmatprep.subr.bf16.mxu0 %v12959_v25  ;;  %v12979_v25 = vpack.c.bf16 %v3041_v26, %v3039_v49 }
 0x485   : > { %2522 = vrot.lane.b32.xlu1 %v2496_v32, %s16351_s13  ;;  %12962 = vmatpush1.bf16.msra.mxu0 %v12961_v53  ;;  %v12987_v53 = vpack.c.bf16 %v3049_v30, %v3047_v9  ;;  %v3052_v32 = vld [vmem:[%s13695_s24 + $0x3b0] sm:$0xff]  ;;  %s13527_s13 = smov 113  }
 0x486   : > { %12964 = vmatprep.subr.bf16.mxu0 %v12963_v33  ;;  %v3046_v33 = vld [vmem:[%s13695_s24 + $0x380] sm:$0xff] }
 0x487   : > { %v12989_v60 = vpack.c.bf16 %v3048_v62, %v3046_v33 }
 0x489   : > { %2650 = vrot.lane.b32.xlu1 %v2624_v42, %s16352_s26  ;;  %12966 = vmatpush1.bf16.msra.mxu0 %v12965_v47  ;;  %v12993_v47 = vpack.c.bf16 %v3052_v32, %v3050_v18  ;;  %v3056_v42 = vld [vmem:[%s13695_s24 + $0x3d0] sm:$0xff]  ;;  %s13529_s26 = smov 16  }
 0x48a   : > { %12968 = vmatprep.subr.bf16.mxu0 %v12967_v4  ;;  %v12995_v4 = vpack.c.bf16 %v3057_v43, %v3055_v36  ;;  %v12997_v29 = vpack.c.bf16 %v3056_v42, %v3054_v45 }
 0x48d   : > { %2778 = vrot.lane.b32.xlu1 %v2752_v13, %s16354_s6  ;;  %12970 = vmatpush1.bf16.msra.mxu0 %v12969_v3  ;;  %v3058_v3 = vld [vmem:[%s13695_s24 + $0x3e0] sm:$0xff]  ;;  %v3060_v13 = vld [vmem:[%s13695_s24 + $0x3f0] sm:$0xff]  ;;  %s16391_s6 = sld [smem:[#allocation26_spill]] }
 0x48e   : > { %12972 = vmatprep.subr.bf16.mxu0 %v12971_v20  ;;  %v3063_v20 = vld [vmem:[%s13695_s24 + $0x408] sm:$0xff]  ;;  %v13001_v28 = vpack.c.bf16 %v3060_v13, %v3058_v3 }
 0x48f   : > { %v13003_v61 = vpack.c.bf16 %v3065_v24, %v3063_v20 }
 0x491   : > { %2904 = vrot.lane.b32.xlu1 %v2879_v5, %s16355_s1  ;;  %12974 = vmatpush1.bf16.msra.mxu0 %v12973_v34  ;;  %v2019_v34 = vpop.permute.xlu1 %2018 }
 0x492   : > { %12976 = vmatprep.subr.bf16.mxu0 %v12975_v56  ;;  %v14781_v56 = vpop.permute.xlu0 %2276 }
 0x495   : > { %12978 = vmatpush1.bf16.msra.mxu0 %v12977_v27  ;;  %v2147_v5 = vpop.permute.xlu1 %2146 }
 0x496   : > { %12980 = vmatprep.subr.bf16.mxu0 %v12979_v25  ;;  %v14783_v35 = vpop.permute.xlu0 %2389  ;;  %v2029_v25 = vsel %vm1152_vm2, %v14611_v31, %v2019_v34  ;;  %v2157_v48 = vsel %vm1194_vm9, %v14613_v8, %v2147_v5  ;;  %v1910_v31 = vmul.f32 %v16384_v40, %v14384_v22  ;;  %v2158_v30 = vsel %vm1194_vm9, %v2147_v5, %v14779_v11  ;;  %v3066_v5 = vld [vmem:[%s13695_s24 + $0x420] sm:$0xff]  ;;  %v3072_v40 = vld [vmem:[%s13695_s24 + $0x450] sm:$0xff] }
 0x497   : > { %v2046_v7 = vadd.f32 %v2029_v25, %v1909_v51  ;;  %v3071_v25 = vld [vmem:[%s13695_s24 + $0x448] sm:$0xff] }
 0x499   : > { %12982 = vmatpush1.bf16.msra.mxu0 %v12981_v44  ;;  %v2275_v19 = vpop.permute.xlu1 %2274  ;;  %v2030_v44 = vsel %vm1152_vm2, %v2019_v34, %v14777_v37  ;;  %v2174_v2 = vadd.f32 %v2157_v48, %v2046_v7 }
 0x49a   : > { %12984 = vmatprep.subr.bf16.mxu0 %v12983_v17  ;;  %v14785_v26 = vpop.permute.xlu0 %2518  ;;  %v2285_v17 = vsel %vm1123_vm0, %v14615_v41, %v2275_v19  ;;  %v2286_v41 = vsel %vm1123_vm0, %v2275_v19, %v14781_v56  ;;  %v3068_v19 = vld [vmem:[%s13695_s24 + $0x430] sm:$0xff] }
 0x49b   : > { %v13009_v7 = vpack.c.bf16 %v3068_v19, %v3066_v5 }
 0x49d   : > { %12986 = vmatpush1.bf16.msra.mxu0 %v12985_v10  ;;  %v2388_v49 = vpop.permute.xlu1 %2387  ;;  %v2047_v10 = vadd.f32 %v2030_v44, %v1910_v31  ;;  %v13011_v44 = vpack.c.bf16 %v3073_v14, %v3071_v25  ;;  %v16385_v31 = vld [vmem:[#allocation41_spill] sm:$0xff] }
 0x49e   : > { %12988 = vmatprep.subr.bf16.mxu0 %v12987_v53  ;;  %v14803_v9 = vpop.permute.xlu0 %2646  ;;  %v2397_v8 = vsel %vm1095_vm7, %v14617_v39, %v2388_v49  ;;  %v2302_v53 = vadd.f32 %v2285_v17, %v2174_v2  ;;  %v2398_v16 = vsel %vm1095_vm7, %v2388_v49, %v14783_v35  ;;  %v3070_v17 = vld [vmem:[%s13695_s24 + $0x440] sm:$0xff] }
 0x49f   : > { %v2175_v33 = vadd.f32 %v2158_v30, %v2047_v10  ;;  %v3077_v30 = vld [vmem:[%s13695_s24 + $0x478] sm:$0xff]  ;;  %v3090_v14 = vld [vmem:[%s13695_s24 + $0x4e0] sm:$0xff] }
 0x4a0   : > { %v2414_v62 = vadd.f32 %v2397_v8, %v2302_v53  ;;  %v13013_v8 = vpack.c.bf16 %v3072_v40, %v3070_v17  ;;  %v3074_v53 = vld [vmem:[%s13695_s24 + $0x460] sm:$0xff] }
 0x4a1   : > { %12990 = vmatpush1.bf16.msra.mxu0 %v12989_v60  ;;  %v2517_v27 = vpop.permute.xlu1 %2516  ;;  %v2303_v1 = vadd.f32 %v2286_v41, %v2175_v33  ;;  %v3076_v41 = vld [vmem:[%s13695_s24 + $0x470] sm:$0xff]  ;;  %v3079_v33 = vld [vmem:[%s13695_s24 + $0x488] sm:$0xff]  ;;  %v3094_v40 = vld [vmem:[%s13695_s24 + $0x500] sm:$0xff] }
 0x4a2   : > { %12992 = vmatprep.subr.bf16.mxu0 %v12991_v58  ;;  %v2528_v52 = vsel %vm1309_vm10, %v14619_v12, %v2517_v27  ;;  %v2773_v58 = vpop.permute.xlu0 %2772  ;;  %v2529_v32 = vsel %vm1309_vm10, %v2517_v27, %v14785_v26 }
 0x4a3   : > { %v2546_v60 = vadd.f32 %v2528_v52, %v2414_v62  ;;  %v2415_v36 = vadd.f32 %v2398_v16, %v2303_v1  ;;  %v2784_v38 = vsel %vm1391_vm12, %v14647_v21, %v2773_v58  ;;  %v3081_v62 = vld [vmem:[%s13695_s24 + $0x498] sm:$0xff]  ;;  %v3190_v16 = vld [vmem:[%s13625_s12] sm:$0x3] }
 0x4a4   : > { %v14866_v1 = vld [vmem:[%s16332_s7 + $0x1] ss:$8 sm:$0x3] }
 0x4a5   : > { %12994 = vmatpush1.bf16.msra.mxu0 %v12993_v47  ;;  %v2645_v59 = vpop.permute.xlu1 %2644  ;;  %v3062_v47 = vld [vmem:[%s13695_s24 + $0x400] sm:$0xff]  ;;  %v2547_v45 = vadd.f32 %v2529_v32, %v2415_v36  ;;  %v3080_v32 = vld [vmem:[%s13695_s24 + $0x490] sm:$0xff]  ;;  %v3083_v36 = vld [vmem:[%s13695_s24 + $0x4a8] sm:$0xff] }
 0x4a6   : > { %12996 = vmatprep.subr.bf16.mxu0 %v12995_v4  ;;  %v2656_v39 = vsel %vm1350_vm11, %v14621_v55, %v2645_v59  ;;  %v2657_v43 = vsel %vm1350_vm11, %v2645_v59, %v14803_v9  ;;  %v3064_v4 = vld [vmem:[%s13695_s24 + $0x410] sm:$0xff]  ;;  %v3067_v55 = vld [vmem:[%s13695_s24 + $0x428] sm:$0xff]  ;;  %v2901_v24 = vpop.permute.xlu0 %2900 }
 0x4a7   : > { %v2674_v12 = vadd.f32 %v2656_v39, %v2546_v60  ;;  %v2675_v13 = vadd.f32 %v2657_v43, %v2547_v45  ;;  %v13007_v34 = vpack.c.bf16 %v3069_v23, %v3067_v55  ;;  %v2912_v51 = vsel %vm1432_vm13, %v14675_v15, %v2901_v24  ;;  %v3075_v59 = vld [vmem:[%s13695_s24 + $0x468] sm:$0xff]  ;;  %v3082_v55 = vld [vmem:[%s13695_s24 + $0x4a0] sm:$0xff]  ;;  %v3084_v23 = vld [vmem:[%s13695_s24 + $0x4b0] sm:$0xff] }
 0x4a8   : > { %v2862_v15 = vrot.slane %v16385_v31, %v13827_v46  ;;  %v13015_v10 = vpack.c.bf16 %v3077_v30, %v3075_v59  ;;  %v13017_v39 = vpack.c.bf16 %v3076_v41, %v3074_v53  ;;  %v13019_v60 = vpack.c.bf16 %v3081_v62, %v3079_v33  ;;  %v3096_v31 = vld [vmem:[%s13695_s24 + $0x510] sm:$0xff]  ;;  %v3098_v53 = vld [vmem:[%s13695_s24 + $0x520] sm:$0xff]  ;;  %v3105_v33 = vld [vmem:[%s13695_s24 + $0x558] sm:$0xff] }
 0x4a9   : > { %12998 = vmatpush1.bf16.msra.mxu0 %v12997_v29  ;;  %v14817_v18 = vpop.permute.xlu1 %2774  ;;  %v2802_v20 = vadd.f32 %v2784_v38, %v2674_v12  ;;  %v16386_v12 = vld [vmem:[#allocation37_spill] sm:$0xff]  ;;  %v13037_v30 = vpack.c.bf16 %v3096_v31, %v3094_v40  ;;  %v3100_v41 = vld [vmem:[%s13695_s24 + $0x530] sm:$0xff]  ;;  %v3125_v40 = vld [vmem:[%s13695_s24 + $0x5f8] sm:$0xff] }
 0x4aa   : > { %13000 = vmatprep.subr.bf16.mxu0 %v12999_v54  ;;  %v2785_v29 = vsel %vm1391_vm12, %v2773_v58, %v14817_v18  ;;  %v2880_v52 = vmul.f32 %v2862_v15, %v14296_v57  ;;  %v3078_v58 = vld [vmem:[%s13695_s24 + $0x480] sm:$0xff]  ;;  %v3085_v57 = vld [vmem:[%s13695_s24 + $0x4b8] sm:$0xff]  ;;  %v3565_v43 = vrot.slane %v14866_v1, %v16386_v12  ;;  %v3087_v38 = vld [vmem:[%s13695_s24 + $0x4c8] sm:$0xff] }
 0x4ab   : > { %v2803_v49 = vadd.f32 %v2785_v29, %v2675_v13  ;;  %v13023_v45 = vpack.c.bf16 %v3085_v57, %v3083_v36  ;;  %v3089_v29 = vld [vmem:[%s13695_s24 + $0x4d8] sm:$0xff]  ;;  %v13025_v13 = vpack.c.bf16 %v3084_v23, %v3082_v55  ;;  %v3099_v15 = vld [vmem:[%s13695_s24 + $0x528] sm:$0xff]  ;;  %v3106_v55 = vld [vmem:[%s13695_s24 + $0x560] sm:$0xff] }
 0x4ac   : > { %v3107_v36 = vld [vmem:[%s13695_s24 + $0x568] sm:$0xff]  ;;  %v3109_v57 = vld [vmem:[%s13695_s24 + $0x578] sm:$0xff]  ;;  %v3108_v23 = vld [vmem:[%s13695_s24 + $0x570] sm:$0xff] }
 0x4ad   : > { %13002 = vmatpush1.bf16.msra.mxu0 %v13001_v28  ;;  %v13005_v28 = vpack.c.bf16 %v3064_v4, %v3062_v47  ;;  %v13021_v47 = vpack.c.bf16 %v3080_v32, %v3078_v58  ;;  %v14875_v4 = vld [vmem:[%s16332_s7] ss:$8 sm:$0x3]  ;;  %v3104_v32 = vld [vmem:[%s13695_s24 + $0x550] sm:$0xff] }
 0x4ae   : > { %13004 = vmatprep.subr.bf16.mxu0 %v13003_v61  ;;  %v3102_v58 = vld [vmem:[%s13695_s24 + $0x540] sm:$0xff] }
 0x4e7   : > { %v14825_v42 = vpop.permute.xlu1 %13387 }
 0x4e8   : > { %v13390_v54 = vunpack.i.h.bf16 %v14825_v42  ;;  %v13389_v3 = vunpack.i.l.bf16 %v14825_v42 }
 0x4ea   : > { %v3226_v61 = vsel %vm1406_vm6, %v13389_v3, %v13390_v54  ;;  %v3225_v21 = vsel %vm1406_vm6, %v13385_v63, %v13389_v3  ;;  %v2930_v63 = vadd.f32 %v2912_v51, %v2802_v20  ;;  %v3541_v3 = vrot.slane %v14875_v4, %v16386_v12  ;;  %v14885_v20 = vld [vmem:[%s16332_s7 + $0x2] ss:$8 sm:$0x3]  ;;  %v3092_v51 = vld [vmem:[%s13695_s24 + $0x4f0] sm:$0xff] }
 0x4eb   : > { %v14843_v27 = vpop.permute.xlu1 %2902  ;;  %3374 = vmatprep.mubr.f32.mxu0 %v3226_v61  ;;  %v3088_v61 = vld [vmem:[%s13695_s24 + $0x4d0] sm:$0xff]  ;;  %v3767_v5 = vrot.slane %v14885_v20, %v16386_v12 }
 0x4ec   : > { %v2913_v6 = vsel %vm1432_vm13, %v2901_v24, %v14843_v27  ;;  %3375 = vmatmul.mubr.f32.vlgmr.msra.gmra.mrb[0].mxu0 %v3225_v21  ;;  %v13027_v24 = vpack.c.bf16 %v3089_v29, %v3087_v38  ;;  %v3091_v21 = vld [vmem:[%s13695_s24 + $0x4e8] sm:$0xff]  ;;  %v3113_v29 = vld [vmem:[%s13695_s24 + $0x598] sm:$0xff] }
 0x4ed   : > { %v2931_v48 = vadd.f32 %v2913_v6, %v2803_v49  ;;  %13006 = vmatpush1.bf16.msra.mxu0 %v13005_v28  ;;  %v3086_v28 = vld [vmem:[%s13695_s24 + $0x4c0] sm:$0xff]  ;;  %v3095_v6 = vld [vmem:[%s13695_s24 + $0x508] sm:$0xff] }
 0x4ee   : > { %13008 = vmatprep.subr.bf16.mxu0 %v13007_v34  ;;  %v3093_v34 = vld [vmem:[%s13695_s24 + $0x4f8] sm:$0xff]  ;;  %v13029_v19 = vpack.c.bf16 %v3088_v61, %v3086_v28  ;;  %v14895_v49 = vld [vmem:[%s16332_s7 + $0x3] ss:$8 sm:$0x3]  ;;  %v3112_v28 = vld [vmem:[%s13695_s24 + $0x590] sm:$0xff] }
 0x4ef   : > { %v13391_v2 = vpack.i.bf16 %v2931_v48, %v2930_v63  ;;  %v13031_v25 = vpack.c.bf16 %v3093_v34, %v3091_v21  ;;  %v3097_v63 = vld [vmem:[%s13695_s24 + $0x518] sm:$0xff]  ;;  %v3882_v48 = vrot.slane %v14895_v49, %v16386_v12  ;;  %v3111_v38 = vld [vmem:[%s13695_s24 + $0x588] sm:$0xff] }
 0x4f0   : > { %v13035_v17 = vpack.c.bf16 %v3097_v63, %v3095_v6  ;;  %v3115_v61 = vld [vmem:[%s13695_s24 + $0x5a8] sm:$0xff]  ;;  %v3117_v21 = vld [vmem:[%s13695_s24 + $0x5b8] sm:$0xff] }
 0x4f1   : > { %13392 = vrot.lane.b32.xlu0 %v13391_v2, %s16344_s14  ;;  %13010 = vmatpush1.bf16.msra.mxu0 %v13009_v7  ;;  %v13033_v7 = vpack.c.bf16 %v3092_v51, %v3090_v14  ;;  %v3101_v2 = vld [vmem:[%s13695_s24 + $0x538] sm:$0xff]  ;;  %v3119_v14 = vld [vmem:[%s13695_s24 + $0x5c8] sm:$0xff] }
 0x4f2   : > { %13012 = vmatprep.subr.bf16.mxu0 %v13011_v44  ;;  %v14905_v44 = vld [vmem:[%s16332_s7 + $0x5] ss:$8 sm:$0x3]  ;;  %v3121_v51 = vld [vmem:[%s13695_s24 + $0x5d8] sm:$0xff] }
 0x4f3   : > { %v4091_v59 = vrot.slane %v14905_v44, %v16386_v12  ;;  %v13059_v63 = vpack.c.bf16 %v3121_v51, %v3119_v14  ;;  %v3128_v14 = vld [vmem:[%s13695_s24 + $0x610] sm:$0xff] }
 0x4f5   : > { %2906 = vrot.lane.b32.xlu0 %v2880_v52, %s16355_s1  ;;  %13014 = vmatpush1.bf16.msra.mxu0 %v13013_v8  ;;  %v14915_v8 = vld [vmem:[%s16332_s7 + $0x6] ss:$8 sm:$0x3]  ;;  %s13528_s1 = smov 15  }
 0x4f6   : > { %13016 = vmatprep.subr.bf16.mxu0 %v13015_v10  ;;  %v13039_v10 = vpack.c.bf16 %v3101_v2, %v3099_v15  ;;  %v3103_v52 = vld [vmem:[%s13695_s24 + $0x548] sm:$0xff]  ;;  %v4204_v62 = vrot.slane %v14915_v8, %v16386_v12  ;;  %v3122_v2 = vld [vmem:[%s13695_s24 + $0x5e0] sm:$0xff] }
 0x4f9   : > { %3193 = vperm.xlu0 %13379, %v3190_v16   ;;  %13018 = vmatpush1.bf16.msra.mxu0 %v13017_v39  ;;  %v13041_v16 = vpack.c.bf16 %v3100_v41, %v3098_v53  ;;  %v14925_v39 = vld [vmem:[%s16332_s7 + $0x7] ss:$8 sm:$0x3] }
 0x4fa   : > { %13020 = vmatprep.subr.bf16.mxu0 %v13019_v60  ;;  %v13043_v60 = vpack.c.bf16 %v3105_v33, %v3103_v52  ;;  %v2151_v52 = vpop.permute.xlu1 %2150  ;;  %v2023_v33 = vpop.permute.xlu0 %2022 }
 0x4fd   : > { %3568 = vrot.lane.b32.xlu0 %v3565_v43, %s13525_s5  ;;  %13022 = vmatpush1.bf16.msra.mxu0 %v13021_v47  ;;  %v4317_v43 = vrot.slane %v14925_v39, %v16386_v12  ;;  %v13045_v47 = vpack.c.bf16 %v3104_v32, %v3102_v58  ;;  %v16387_v58 = vrot.slane %v14224_v0, %v14259_v50 }
 0x4fe   : > { %13024 = vmatprep.subr.bf16.mxu0 %v13023_v45  ;;  %v13047_v45 = vpack.c.bf16 %v3109_v57, %v3107_v36  ;;  %v2159_v36 = vsel %vm1194_vm9, %v14779_v11, %v2151_v52  ;;  %v16388_v57 = vld [vmem:[#allocation42_spill] sm:$0xff]  ;;  %vm6860_vm9 = vcmask 56320  }
 0x4ff   : > { %v1911_v32 = vmul.f32 %v16387_v58, %v14384_v22 }
 0x501   : > { %3544 = vrot.lane.b32.xlu0 %v3541_v3, %s13526_s9  ;;  %13026 = vmatpush1.bf16.msra.mxu0 %v13025_v13  ;;  %v13049_v3 = vpack.c.bf16 %v3108_v23, %v3106_v55  ;;  %v13051_v13 = vpack.c.bf16 %v3113_v29, %v3111_v38 }
 0x502   : > { %13028 = vmatprep.subr.bf16.mxu0 %v13027_v24  ;;  %v3110_v24 = vld [vmem:[%s13695_s24 + $0x580] sm:$0xff] }
 0x503   : > { %v13053_v34 = vpack.c.bf16 %v3112_v28, %v3110_v24 }
 0x505   : > { %3770 = vrot.lane.b32.xlu0 %v3767_v5, %s13527_s13  ;;  %13030 = vmatpush1.bf16.msra.mxu0 %v13029_v19  ;;  %v13055_v5 = vpack.c.bf16 %v3117_v21, %v3115_v61  ;;  %v3114_v19 = vld [vmem:[%s13695_s24 + $0x5a0] sm:$0xff] }
 0x506   : > { %13032 = vmatprep.subr.bf16.mxu0 %v13031_v25  ;;  %v3116_v25 = vld [vmem:[%s13695_s24 + $0x5b0] sm:$0xff] }
 0x507   : > { %v13057_v6 = vpack.c.bf16 %v3116_v25, %v3114_v19  ;;  %v3126_v25 = vld [vmem:[%s13695_s24 + $0x600] sm:$0xff] }
 0x509   : > { %3885 = vrot.lane.b32.xlu0 %v3882_v48, %s16346_s23  ;;  %13034 = vmatpush1.bf16.msra.mxu0 %v13033_v7  ;;  %v3118_v48 = vld [vmem:[%s13695_s24 + $0x5c0] sm:$0xff]  ;;  %v3120_v7 = vld [vmem:[%s13695_s24 + $0x5d0] sm:$0xff] }
 0x50a   : > { %13036 = vmatprep.subr.bf16.mxu0 %v13035_v17  ;;  %v3123_v17 = vld [vmem:[%s13695_s24 + $0x5e8] sm:$0xff]  ;;  %v13061_v31 = vpack.c.bf16 %v3120_v7, %v3118_v48  ;;  %v3133_v7 = vld [vmem:[%s13695_s24 + $0x638] sm:$0xff] }
 0x50b   : > { %v13063_v15 = vpack.c.bf16 %v3125_v40, %v3123_v17 }
 0x50d   : > { %4094 = vrot.lane.b32.xlu0 %v4091_v59, %s16347_s16  ;;  %13038 = vmatpush1.bf16.msra.mxu0 %v13037_v30  ;;  %v3124_v59 = vld [vmem:[%s13695_s24 + $0x5f0] sm:$0xff]  ;;  %v3127_v30 = vld [vmem:[%s13695_s24 + $0x608] sm:$0xff] }
 0x50e   : > { %13040 = vmatprep.subr.bf16.mxu0 %v13039_v10  ;;  %v3129_v10 = vld [vmem:[%s13695_s24 + $0x618] sm:$0xff]  ;;  %v13065_v53 = vpack.c.bf16 %v3124_v59, %v3122_v2  ;;  %v13069_v2 = vpack.c.bf16 %v3128_v14, %v3126_v25  ;;  %v3878_v25 = vrot.slane %v14895_v49, %v13827_v46  ;;  %v3150_v14 = vld [vmem:[%s13695_s24 + $0x6c0] sm:$0xff] }
 0x50f   : > { %v13067_v41 = vpack.c.bf16 %v3129_v10, %v3127_v30 }
 0x511   : > { %4207 = vrot.lane.b32.xlu0 %v4204_v62, %s13528_s1  ;;  %13042 = vmatpush1.bf16.msra.mxu0 %v13041_v16  ;;  %v2392_v62 = vpop.permute.xlu1 %2391  ;;  %v2279_v16 = vpop.permute.xlu0 %2278 }
 0x512   : > { %13044 = vmatprep.subr.bf16.mxu0 %v13043_v60  ;;  %v2031_v60 = vsel %vm1152_vm2, %v14777_v37, %v2023_v33  ;;  %v2287_v37 = vsel %vm1123_vm0, %v14781_v56, %v2279_v16  ;;  %v2399_v50 = vsel %vm1095_vm7, %v14783_v35, %v2392_v62  ;;  %vm3772_vm0 = vcmask 924672  }
 0x513   : > { %vm13537_vm7 = vmmov 0  }
 0x515   : > { %4320 = vrot.lane.b32.xlu0 %v4317_v43, %s13529_s26  ;;  %13046 = vmatpush1.bf16.msra.mxu0 %v13045_v47  ;;  %v1894_v43 = vrot.slane %v16388_v57, %v13827_v46  ;;  %v2048_v47 = vadd.f32 %v2031_v60, %v1911_v32  ;;  %v2521_v55 = vpop.permute.xlu0 %2520  ;;  %v3136_v57 = vld [vmem:[%s13695_s24 + $0x650] sm:$0xff] }
 0x516   : > { %13048 = vmatprep.subr.bf16.mxu0 %v13047_v45  ;;  %v2523_v45 = vpop.permute.xlu1 %2522 }
 0x517   : > { %v2176_v23 = vadd.f32 %v2159_v36, %v2048_v47  ;;  %v1912_v38 = vmul.f32 %v1894_v43, %v14384_v22  ;;  %v2530_v22 = vsel %vm1309_vm10, %v14785_v26, %v2521_v55  ;;  %v3131_v26 = vld [vmem:[%s13695_s24 + $0x628] sm:$0xff]  ;;  %v3134_v36 = vld [vmem:[%s13695_s24 + $0x640] sm:$0xff] }
 0x518   : > { %v3139_v47 = vld [vmem:[%s13695_s24 + $0x668] sm:$0xff] }
 0x519   : > { %13050 = vmatpush1.bf16.msra.mxu0 %v13049_v3  ;;  %v2049_v29 = vadd.f32 %v2023_v33, %v1912_v38  ;;  %v2304_v3 = vadd.f32 %v2287_v37, %v2176_v23  ;;  %v2649_v11 = vpop.permute.xlu0 %2648  ;;  %v3561_v23 = vrot.slane %v14866_v1, %v13827_v46  ;;  %v3138_v37 = vld [vmem:[%s13695_s24 + $0x660] sm:$0xff] }
 0x51a   : > { %13052 = vmatprep.subr.bf16.mxu0 %v13051_v13  ;;  %v2651_v0 = vpop.permute.xlu1 %2650  ;;  %v2658_v19 = vsel %vm1350_vm11, %v14803_v9, %v2649_v11 }
 0x51b   : > { %v2177_v13 = vadd.f32 %v2151_v52, %v2049_v29  ;;  %v2416_v24 = vadd.f32 %v2399_v50, %v2304_v3  ;;  %v2659_v35 = vsel %vm1350_vm11, %v2649_v11, %v2651_v0  ;;  %v3132_v52 = vld [vmem:[%s13695_s24 + $0x630] sm:$0xff]  ;;  %v3143_v3 = vld [vmem:[%s13695_s24 + $0x688] sm:$0xff]  ;;  %v3145_v0 = vld [vmem:[%s13695_s24 + $0x698] sm:$0xff]  ;;  %v3537_v11 = vrot.slane %v14875_v4, %v13827_v46 }
 0x51c   : > { %v3140_v29 = vld [vmem:[%s13695_s24 + $0x670] sm:$0xff]  ;;  %v13083_v1 = vpack.c.bf16 %v3145_v0, %v3143_v3  ;;  %v3179_v3 = vld [vmem:[%s13695_s24 + $0x7a8] sm:$0xff]  ;;  %v3181_v0 = vld [vmem:[%s13695_s24 + $0x7b8] sm:$0xff] }
 0x51d   : > { %13054 = vmatpush1.bf16.msra.mxu0 %v13053_v34  ;;  %v2305_v28 = vadd.f32 %v2279_v16, %v2177_v13  ;;  %v2777_v21 = vpop.permute.xlu0 %2776  ;;  %v2548_v56 = vadd.f32 %v2530_v22, %v2416_v24  ;;  %v2531_v34 = vsel %vm1309_vm10, %v2521_v55, %v2523_v45  ;;  %v3137_v16 = vld [vmem:[%s13695_s24 + $0x658] sm:$0xff]  ;;  %v13077_v55 = vpack.c.bf16 %v3136_v57, %v3134_v36  ;;  %v3142_v13 = vld [vmem:[%s13695_s24 + $0x680] sm:$0xff]  ;;  %v3144_v24 = vld [vmem:[%s13695_s24 + $0x690] sm:$0xff] }
 0x51e   : > { %13056 = vmatprep.subr.bf16.mxu0 %v13055_v5  ;;  %v2779_v61 = vpop.permute.xlu1 %2778  ;;  %v3141_v45 = vld [vmem:[%s13695_s24 + $0x678] sm:$0xff]  ;;  %v13081_v50 = vpack.c.bf16 %v3140_v29, %v3138_v37  ;;  %v13085_v22 = vpack.c.bf16 %v3144_v24, %v3142_v13  ;;  %v3174_v37 = vld [vmem:[%s13695_s24 + $0x780] sm:$0xff]  ;;  %v3176_v29 = vld [vmem:[%s13695_s24 + $0x790] sm:$0xff]  ;;  %vm9259_vm10 = vcmask 31744  }
 0x51f   : > { %v2417_v5 = vadd.f32 %v2392_v62, %v2305_v28  ;;  %v2787_v17 = vsel %vm1391_vm12, %v2777_v21, %v2779_v61  ;;  %v13079_v38 = vpack.c.bf16 %v3141_v45, %v3139_v47  ;;  %v3147_v28 = vld [vmem:[%s13695_s24 + $0x6a8] sm:$0xff]  ;;  %v3149_v61 = vld [vmem:[%s13695_s24 + $0x6b8] sm:$0xff]  ;;  %v3172_v47 = vld [vmem:[%s13695_s24 + $0x770] sm:$0xff] }
 0x520   : > { %v13087_v4 = vpack.c.bf16 %v3149_v61, %v3147_v28  ;;  %v3175_v45 = vld [vmem:[%s13695_s24 + $0x788] sm:$0xff]  ;;  %v3180_v13 = vld [vmem:[%s13695_s24 + $0x7b0] sm:$0xff]  ;;  %v3185_v28 = vld [vmem:[%s13695_s24 + $0x7d8] sm:$0xff] }
 0x521   : > { %13058 = vmatpush1.bf16.msra.mxu0 %v13057_v6  ;;  %v2549_v51 = vadd.f32 %v2531_v34, %v2417_v5  ;;  %v3148_v34 = vld [vmem:[%s13695_s24 + $0x6b0] sm:$0xff]  ;;  %v3151_v5 = vld [vmem:[%s13695_s24 + $0x6c8] sm:$0xff] }
 0x522   : > { %13060 = vmatprep.subr.bf16.mxu0 %v13059_v63  ;;  %v2905_v6 = vpop.permute.xlu1 %2904  ;;  %v2676_v63 = vadd.f32 %v2658_v19, %v2548_v56  ;;  %v3146_v56 = vld [vmem:[%s13695_s24 + $0x6a0] sm:$0xff]  ;;  %v3153_v19 = vld [vmem:[%s13695_s24 + $0x6d8] sm:$0xff]  ;;  %v3183_v24 = vld [vmem:[%s13695_s24 + $0x7c8] sm:$0xff] }
 0x523   : > { %v2914_v59 = vsel %vm1432_vm13, %v14843_v27, %v2905_v6  ;;  %v3135_v27 = vld [vmem:[%s13695_s24 + $0x648] sm:$0xff] }
 0x524   : > { %v13075_v32 = vpack.c.bf16 %v3137_v16, %v3135_v27  ;;  %v3167_v27 = vld [vmem:[%s13695_s24 + $0x748] sm:$0xff]  ;;  %v3169_v16 = vld [vmem:[%s13695_s24 + $0x758] sm:$0xff] }
 0x525   : > { %13062 = vmatpush1.bf16.msra.mxu0 %v13061_v31  ;;  %v2786_v31 = vsel %vm1391_vm12, %v14817_v18, %v2777_v21  ;;  %v3763_v21 = vrot.slane %v14885_v20, %v13827_v46  ;;  %v13091_v20 = vpack.c.bf16 %v3153_v19, %v3151_v5  ;;  %vm9436_vm12 = vcmask 23552  }
 0x526   : > { %13064 = vmatprep.subr.bf16.mxu0 %v13063_v15  ;;  %v2677_v15 = vadd.f32 %v2659_v35, %v2549_v51  ;;  %v2804_v18 = vadd.f32 %v2786_v31, %v2676_v63  ;;  %v13089_v35 = vpack.c.bf16 %v3148_v34, %v3146_v56  ;;  %v3152_v51 = vld [vmem:[%s13695_s24 + $0x6d0] sm:$0xff]  ;;  %v3157_v63 = vld [vmem:[%s13695_s24 + $0x6f8] sm:$0xff]  ;;  %v3159_v31 = vld [vmem:[%s13695_s24 + $0x708] sm:$0xff] }
 0x527   : > { %v3187_v56 = vld [vmem:[%s13695_s24 + $0x7e8] sm:$0xff]  ;;  %v3189_v34 = vld [vmem:[%s13695_s24 + $0x7f8] sm:$0xff] }
 0x528   : > { %v2805_v33 = vadd.f32 %v2787_v17, %v2677_v15  ;;  %v2932_v58 = vadd.f32 %v2914_v59, %v2804_v18  ;;  %v3154_v17 = vld [vmem:[%s13695_s24 + $0x6e0] sm:$0xff]  ;;  %v3161_v15 = vld [vmem:[%s13695_s24 + $0x718] sm:$0xff]  ;;  %v4200_v59 = vrot.slane %v14915_v8, %v13827_v46  ;;  %v13127_v19 = vpack.c.bf16 %v3189_v34, %v3187_v56 }
 0x529   : > { %13066 = vmatpush1.bf16.msra.mxu0 %v13065_v53  ;;  %v13071_v53 = vpack.c.bf16 %v3133_v7, %v3131_v26  ;;  %v13093_v26 = vpack.c.bf16 %v3152_v51, %v3150_v14  ;;  %v4087_v7 = vrot.slane %v14905_v44, %v13827_v46  ;;  %v13099_v44 = vpack.c.bf16 %v3161_v15, %v3159_v31  ;;  %v3162_v18 = vld [vmem:[%s13695_s24 + $0x720] sm:$0xff] }
 0x52a   : > { %13068 = vmatprep.subr.bf16.mxu0 %v13067_v41  ;;  %v3130_v41 = vld [vmem:[%s13695_s24 + $0x620] sm:$0xff] }
 0x563   : > { %v14978_v48 = vpop.permute.xlu0 %13392 }
 0x564   : > { %v13395_v40 = vunpack.i.h.bf16 %v14978_v48  ;;  %v13394_v9 = vunpack.i.l.bf16 %v14978_v48 }
 0x566   : > { %v3228_v30 = vsel %vm1406_vm6, %v13394_v9, %v13395_v40  ;;  %v3227_v10 = vsel %vm1406_vm6, %v13390_v54, %v13394_v9  ;;  %v13073_v54 = vpack.c.bf16 %v3132_v52, %v3130_v41  ;;  %v3156_v9 = vld [vmem:[%s13695_s24 + $0x6f0] sm:$0xff]  ;;  %v3165_v41 = vld [vmem:[%s13695_s24 + $0x738] sm:$0xff] }
 0x567   : > { %v2907_v62 = vpop.permute.xlu0 %2906  ;;  %3445 = vmatprep.mubr.f32.mxu0 %v3228_v30  ;;  %v3158_v30 = vld [vmem:[%s13695_s24 + $0x700] sm:$0xff] }
 0x568   : > { %v2915_v60 = vsel %vm1432_vm13, %v2905_v6, %v2907_v62  ;;  %3446 = vmatmul.mubr.f32.vlgmr.msra.gmra.mrb[0].mxu0 %v3227_v10  ;;  %v3155_v6 = vld [vmem:[%s13695_s24 + $0x6e8] sm:$0xff]  ;;  %v3160_v10 = vld [vmem:[%s13695_s24 + $0x710] sm:$0xff]  ;;  %vm11972_vm13 = vcmask 73728  }
 0x569   : > { %v2933_v42 = vadd.f32 %v2915_v60, %v2805_v33  ;;  %13070 = vmatpush1.bf16.msra.mxu0 %v13069_v2  ;;  %v13095_v49 = vpack.c.bf16 %v3157_v63, %v3155_v6  ;;  %v13097_v2 = vpack.c.bf16 %v3156_v9, %v3154_v17  ;;  %v13101_v52 = vpack.c.bf16 %v3160_v10, %v3158_v30  ;;  %v3164_v62 = vld [vmem:[%s13695_s24 + $0x730] sm:$0xff] }
 0x56a   : > { %13072 = vmatprep.subr.bf16.mxu0 %v13071_v53  ;;  %v3163_v53 = vld [vmem:[%s13695_s24 + $0x728] sm:$0xff]  ;;  %v4313_v33 = vrot.slane %v14925_v39, %v13827_v46  ;;  %v13105_v60 = vpack.c.bf16 %v3164_v62, %v3162_v18 }
 0x56b   : > { %v13396_v43 = vpack.i.bf16 %v2933_v42, %v2932_v58  ;;  %v13103_v8 = vpack.c.bf16 %v3165_v41, %v3163_v53  ;;  %v13107_v58 = vpack.c.bf16 %v3169_v16, %v3167_v27  ;;  %v3166_v42 = vld [vmem:[%s13695_s24 + $0x740] sm:$0xff]  ;;  %v3171_v39 = vld [vmem:[%s13695_s24 + $0x768] sm:$0xff] }
 0x56d   : > { %13397 = vrot.lane.b32.xlu1 %v13396_v43, %s16344_s14  ;;  %13074 = vmatpush1.bf16.msra.mxu0 %v13073_v54  ;;  %v3168_v54 = vld [vmem:[%s13695_s24 + $0x750] sm:$0xff]  ;;  %v3170_v43 = vld [vmem:[%s13695_s24 + $0x760] sm:$0xff]  ;;  %s16286_s14 = smov 121  }
 0x56e   : > { %13076 = vmatprep.subr.bf16.mxu0 %v13075_v32  ;;  %v3173_v32 = vld [vmem:[%s13695_s24 + $0x778] sm:$0xff]  ;;  %v13109_v36 = vpack.c.bf16 %v3168_v54, %v3166_v42 }
 0x56f   : > { %v13111_v57 = vpack.c.bf16 %v3173_v32, %v3171_v39 }
 0x571   : > { %13078 = vmatpush1.bf16.msra.mxu0 %v13077_v55  ;;  %3566 = vrot.lane.b32.xlu1 %v3561_v23, %s13525_s5  ;;  %v3177_v55 = vld [vmem:[%s13695_s24 + $0x798] sm:$0xff]  ;;  %v13113_v23 = vpack.c.bf16 %v3172_v47, %v3170_v43 }
 0x572   : > { %13080 = vmatprep.subr.bf16.mxu0 %v13079_v38  ;;  %v13115_v38 = vpack.c.bf16 %v3177_v55, %v3175_v45 }
 0x575   : > { %13082 = vmatpush1.bf16.msra.mxu0 %v13081_v50  ;;  %3542 = vrot.lane.b32.xlu1 %v3537_v11, %s13526_s9  ;;  %v13117_v50 = vpack.c.bf16 %v3176_v29, %v3174_v37  ;;  %v13119_v11 = vpack.c.bf16 %v3181_v0, %v3179_v3 }
 0x576   : > { %13084 = vmatprep.subr.bf16.mxu0 %v13083_v1  ;;  %v3178_v1 = vld [vmem:[%s13695_s24 + $0x7a0] sm:$0xff] }
 0x577   : > { %v13121_v61 = vpack.c.bf16 %v3180_v13, %v3178_v1 }
 0x578   : > { %v3194_v9 = vpop.permute.xlu0 %3193 }
 0x579   : > { %13086 = vmatpush1.bf16.msra.mxu0 %v13085_v22  ;;  %3768 = vrot.lane.b32.xlu1 %v3763_v21, %s13527_s13  ;;  %v13123_v22 = vpack.c.bf16 %v3185_v28, %v3183_v24  ;;  %v3182_v21 = vld [vmem:[%s13695_s24 + $0x7c0] sm:$0xff]  ;;  %v15128_v28 = vld [vmem:[#allocation2 + $0x18] sm:$0xff] }
 0x57a   : > { %13088 = vmatprep.subr.bf16.mxu0 %v13087_v4  ;;  %v3184_v4 = vld [vmem:[%s13695_s24 + $0x7d0] sm:$0xff] }
 0x57b   : > { %v13125_v5 = vpack.c.bf16 %v3184_v4, %v3182_v21 }
 0x57c   : > { %v3569_v10 = vpop.permute.xlu0 %3568 }
 0x57d   : > { %13090 = vmatpush1.bf16.msra.mxu0 %v13089_v35  ;;  %3883 = vrot.lane.b32.xlu1 %v3878_v25, %s16346_s23  ;;  %v3186_v35 = vld [vmem:[%s13695_s24 + $0x7e0] sm:$0xff]  ;;  %v3188_v25 = vld [vmem:[%s13695_s24 + $0x7f0] sm:$0xff] }
 0x57e   : > { %13092 = vmatprep.subr.bf16.mxu0 %v13091_v20  ;;  %v13129_v20 = vpack.c.bf16 %v3188_v25, %v3186_v35 }
 0x580   : > { %v3545_v27 = vpop.permute.xlu0 %3544 }
 0x581   : > { %13094 = vmatpush1.bf16.msra.mxu0 %v13093_v26  ;;  %4092 = vrot.lane.b32.xlu1 %v4087_v7, %s16347_s16 }
 0x582   : > { %13096 = vmatprep.subr.bf16.mxu0 %v13095_v49  ;;  %v15080_v49 = vld [vmem:[#allocation2] sm:$0xff] }
 0x584   : > { %v3771_v54 = vpop.permute.xlu0 %3770 }
 0x585   : > { %13098 = vmatpush1.bf16.msra.mxu0 %v13097_v2  ;;  %4205 = vrot.lane.b32.xlu1 %v4200_v59, %s13528_s1 }
 0x586   : > { %13100 = vmatprep.subr.bf16.mxu0 %v13099_v44 }
 0x588   : > { %v3886_v45 = vpop.permute.xlu0 %3885 }
 0x589   : > { %13102 = vmatpush1.bf16.msra.mxu0 %v13101_v52  ;;  %4318 = vrot.lane.b32.xlu1 %v4313_v33, %s13529_s26  ;;  %v12176_v33 = vld [vmem:[%s16332_s7 + $0x10] ss:$8 sm:$0x3] }
 0x58a   : > { %13104 = vmatprep.subr.bf16.mxu0 %v13103_v8  ;;  %v4430_v16 = vrot.slane %v12176_v33, %v16386_v12 }
 0x58c   : > { %v4095_v29 = vpop.permute.xlu0 %4094 }
 0x58d   : > { %13106 = vmatpush1.bf16.msra.mxu0 %v13105_v60  ;;  %v4426_v60 = vrot.slane %v12176_v33, %v13827_v46 }
 0x58e   : > { %13108 = vmatprep.subr.bf16.mxu0 %v13107_v58 }
 0x590   : > { %v4208_v24 = vpop.permute.xlu0 %4207 }
 0x591   : > { %13110 = vmatpush1.bf16.msra.mxu0 %v13109_v36  ;;  %v4215_v56 = vmul.f32 %v4208_v24, %v15128_v28 }
 0x592   : > { %13112 = vmatprep.subr.bf16.mxu0 %v13111_v57 }
 0x594   : > { %v4321_v34 = vpop.permute.xlu0 %4320 }
 0x595   : > { %13114 = vmatpush1.bf16.msra.mxu0 %v13113_v23 }
 0x596   : > { %13116 = vmatprep.subr.bf16.mxu0 %v13115_v38 }
 0x599   : > { %13118 = vmatpush1.bf16.msra.mxu0 %v13117_v50 }
 0x59a   : > { %13120 = vmatprep.subr.bf16.mxu0 %v13119_v11 }
 0x59d   : > { %13122 = vmatpush1.bf16.msra.mxu0 %v13121_v61 }
 0x59e   : > { %13124 = vmatprep.subr.bf16.mxu0 %v13123_v22  ;;  %v4102_v22 = vmul.f32 %v4095_v29, %v15128_v28 }
 0x5a1   : > { %13126 = vmatpush1.bf16.msra.mxu0 %v13125_v5 }
 0x5a2   : > { %13128 = vmatprep.subr.bf16.mxu0 %v13127_v19 }
 0x5a5   : > { %13130 = vmatpush1.bf16.msra.mxu0 %v13129_v20 }
 0x5df   : > { %v13398_v14 = vpop.permute.xlu1 %13397 }
 0x5e0   : > { %v13400_v51 = vunpack.i.h.bf16 %v13398_v14  ;;  %v13399_v6 = vunpack.i.l.bf16 %v13398_v14  ;;  %v4328_v14 = vmul.f32 %v4321_v34, %v15128_v28 }
 0x5e2   : > { %v3230_v63 = vsel %vm1406_vm6, %v13399_v6, %v13400_v51  ;;  %v3229_v26 = vsel %vm1406_vm6, %v13395_v40, %v13399_v6  ;;  %vm3678_vm6 = vcmask 138240  }
 0x5e3   : > { %3516 = vmatprep.mubr.f32.mxu0 %v3230_v63  ;;  %v3567_v7 = vpop.permute.xlu1 %3566 }
 0x5e4   : > { %3517 = vmatmul.mubr.f32.vlgmr.msra.gmra.mrb[0].mxu0 %v3229_v26  ;;  %v3575_v17 = vmul.f32 %v15080_v49, %v3567_v7  ;;  %v3571_v41 = vsel %vm3570_vm14, %v3567_v7, %v3569_v10  ;;  %v12155_v7 = vld [vmem:[%s13577_s21 + $0x2] sm:$0x3] }
 0x5e6   : > { %3583 = vrot.lane.b32.xlu1 %v3575_v17, %s13529_s26 }
 0x5e7   : > { %v3543_v8 = vpop.permute.xlu1 %3542 }
 0x5e8   : > { %v3547_v58 = vsel %vm3546_vm15, %v3543_v8, %v3545_v27  ;;  %v3551_v57 = vmul.f32 %v15080_v49, %v3543_v8 }
 0x5eb   : > { %v3769_v42 = vpop.permute.xlu1 %3768 }
 0x5ec   : > { %v3773_v32 = vsel %vm3772_vm0, %v3769_v42, %v3771_v54  ;;  %v3777_v55 = vmul.f32 %v15080_v49, %v3769_v42 }
 0x5ef   : > { %v3884_v43 = vpop.permute.xlu1 %3883 }
 0x5f0   : > { %v3887_v38 = vsel %vm1152_vm2, %v3884_v43, %v3886_v45  ;;  %v3891_v11 = vmul.f32 %v15080_v49, %v3884_v43  ;;  %v12164_v43 = vld [vmem:[%s16332_s7 + $0x4] ss:$8 sm:$0x3] }
 0x5f3   : > { %v4093_v37 = vpop.permute.xlu1 %4092 }
 0x5f4   : > { %v4096_v50 = vsel %vm1283_vm3, %v4093_v37, %v4095_v29  ;;  %v3995_v29 = vrot.slane %v12164_v43, %v16386_v12 }
 0x5f7   : > { %v4206_v13 = vpop.permute.xlu1 %4205 }
 0x5f8   : > { %v4209_v21 = vsel %vm3791_vm1, %v4206_v13, %v4208_v24  ;;  %v3991_v24 = vrot.slane %v12164_v43, %v13827_v46 }
 0x5fb   : > { %v4319_v4 = vpop.permute.xlu1 %4318 }
 0x5fc   : > { %v4322_v19 = vsel %vm3589_vm4, %v4319_v4, %v4321_v34 }
 0x658   : > { %v3584_v51 = vpop.permute.xlu1 %3583 }
 0x6b7   : > { %v3518_v31 = vpop.f32.mrb[0].mxu0 }
 0x6b8   : > { %v13179_v15 = vadd.f32 %v3518_v31, %v3194_v9  ;;  %v3520_v2 = vpop.f32.mrb[1].mxu0 }
 0x6b9   : > { %v13180_v59 = vadd.f32 %v3520_v2, %v3194_v9 }
 0x6ba   : > { %v3523_v44 = vmax.f32 %v13179_v15, 0.0 }
 0x6bb   : > { %v3524_v30 = vmax.f32 %v13180_v59, 0.0 }
 0x6bc   : > { %v15084_v48 = vadd.f32 %v13179_v15, %v3523_v44 }
 0x6bd   : > { %v15086_v40 = vadd.f32 %v13180_v59, %v3524_v30  ;;  %v4533_v30 = vld [vmem:[%s13630_s20] sm:$0x3] }
 0x6be   : > { %3527 = vst [vmem:[#allocation2 + $0x8] sm:$0x3] %v15084_v48 }
 0x6bf   : > { %3528 = vst [vmem:[#allocation2 + $0x10] sm:$0x3] %v15086_v40 }
 0x6c5   : > { %v15090_v53 = vld [vmem:[#allocation2 + $0x8] sm:$0xff] }
 0x6c6   : > { %v15093_v52 = vld [vmem:[#allocation2 + $0x10] sm:$0xff]  ;;  %v3576_v18 = vmul.f32 %v3571_v41, %v15090_v53  ;;  %v3552_v36 = vmul.f32 %v3547_v58, %v15090_v53  ;;  %v3778_v47 = vmul.f32 %v3773_v32, %v15090_v53  ;;  %v3892_v0 = vmul.f32 %v3887_v38, %v15090_v53 }
 0x6c7   : > { %v3577_v62 = vmul.f32 %v15093_v52, %v3569_v10  ;;  %v3553_v39 = vmul.f32 %v15093_v52, %v3545_v27  ;;  %v3779_v23 = vmul.f32 %v15093_v52, %v3771_v54  ;;  %v3893_v3 = vmul.f32 %v15093_v52, %v3886_v45  ;;  %v15159_v10 = vld [vmem:[%s16332_s7 + $0x1] ss:$8 sm:$0x3]  ;;  %v15167_v27 = vld [vmem:[%s16332_s7] ss:$8 sm:$0x3] }
 0x6c8   : > { %3585 = vrot.lane.b32.xlu1 %v3576_v18, %s13529_s26  ;;  %v4101_v1 = vmul.f32 %v4096_v50, %v15093_v52  ;;  %v4100_v61 = vmul.f32 %v4093_v37, %v15090_v53  ;;  %v4214_v5 = vmul.f32 %v4209_v21, %v15093_v52  ;;  %v4327_v35 = vmul.f32 %v4322_v19, %v15093_v52  ;;  %v12159_v38 = vld [vmem:[%s13577_s21 + $0x4] sm:$0x3] }
 0x6c9   : > { %3587 = vrot.lane.b32.xlu0 %v3577_v62, %s13529_s26  ;;  %v4213_v25 = vmul.f32 %v4206_v13, %v15090_v53  ;;  %v4326_v20 = vmul.f32 %v4319_v4, %v15090_v53  ;;  %v4581_v18 = vrot.slane %v15159_v10, %v16386_v12  ;;  %v4559_v42 = vrot.slane %v15167_v27, %v16386_v12  ;;  %v12162_v4 = vld [vmem:[%s13577_s21 + $0x6] sm:$0x3] }
 0x6ca   : > { %v3999_v13 = vmul.f32 %v15093_v52, %v3995_v29 }
 0x6cc   : > { %4433 = vrot.lane.b32.xlu1 %v4430_v16, %s13530_s28 }
 0x6cd   : > { %4431 = vrot.lane.b32.xlu0 %v4426_v60, %s13530_s28  ;;  %v3554_v60 = vld [vmem:[%s13577_s21] sm:$0x3] }
 0x6d0   : > { %3676 = vrot.lane.b32.xlu1 %v3553_v39, %s13530_s28  ;;  %v15177_v39 = vld [vmem:[%s16332_s7 + $0x2] ss:$8 sm:$0x3] }
 0x6d1   : > { %3674 = vrot.lane.b32.xlu0 %v3552_v36, %s13530_s28 }
 0x6d4   : > { %3787 = vrot.lane.b32.xlu1 %v3778_v47, %s13528_s1  ;;  %v4778_v47 = vrot.slane %v15177_v39, %v16386_v12 }
 0x6d5   : > { %3672 = vrot.lane.b32.xlu0 %v3551_v57, %s13530_s28 }
 0x6d8   : > { %3785 = vrot.lane.b32.xlu1 %v3777_v55, %s13528_s1  ;;  %v15187_v55 = vld [vmem:[%s16332_s7 + $0x3] ss:$8 sm:$0x3] }
 0x6d9   : > { %3789 = vrot.lane.b32.xlu0 %v3779_v23, %s13528_s1 }
 0x6dc   : > { %3903 = vrot.lane.b32.xlu1 %v3893_v3, %s16347_s16  ;;  %v4890_v3 = vrot.slane %v15187_v55, %v16386_v12 }
 0x6dd   : > { %3901 = vrot.lane.b32.xlu0 %v3892_v0, %s16347_s16  ;;  %v12192_v0 = vld [vmem:[%s16332_s7 + $0x5] ss:$8 sm:$0x3] }
 0x6e0   : > { %4110 = vrot.lane.b32.xlu1 %v4101_v1, %s16346_s23 }
 0x6e1   : > { %3899 = vrot.lane.b32.xlu0 %v3891_v11, %s16347_s16 }
 0x6e4   : > { %4108 = vrot.lane.b32.xlu1 %v4100_v61, %s16346_s23  ;;  %v5097_v61 = vrot.slane %v12192_v0, %v16386_v12 }
 0x6e5   : > { %4112 = vrot.lane.b32.xlu0 %v4102_v22, %s16346_s23  ;;  %v12195_v22 = vld [vmem:[%s16332_s7 + $0x6] ss:$8 sm:$0x3] }
 0x6e6   : > { %v5209_v34 = vrot.slane %v12195_v22, %v16386_v12 }
 0x6e8   : > { %4225 = vrot.lane.b32.xlu1 %v4215_v56, %s13527_s13  ;;  %v3998_v56 = vmul.f32 %v3991_v24, %v15090_v53 }
 0x6e9   : > { %4223 = vrot.lane.b32.xlu0 %v4214_v5, %s13527_s13 }
 0x6ec   : > { %4336 = vrot.lane.b32.xlu1 %v4327_v35, %s13525_s5 }
 0x6ed   : > { %4221 = vrot.lane.b32.xlu0 %v4213_v25, %s13527_s13  ;;  %v12165_v25 = vld [vmem:[%s13577_s21 + $0x8] sm:$0x3] }
 0x6f0   : > { %4334 = vrot.lane.b32.xlu1 %v4326_v20, %s13525_s5 }
 0x6f1   : > { %4338 = vrot.lane.b32.xlu0 %v4328_v14, %s13525_s5  ;;  %v4577_v14 = vrot.slane %v15159_v10, %v13827_v46  ;;  %v5093_v10 = vrot.slane %v12192_v0, %v13827_v46 }
 0x73a   : > { %v3586_v6 = vpop.permute.xlu1 %3585 }
 0x73b   : > { %v3588_v63 = vpop.permute.xlu0 %3587  ;;  %v3590_v17 = vsel %vm3589_vm4, %v3584_v51, %v3586_v6 }
 0x73c   : > { %v3591_v26 = vsel %vm3589_vm4, %v3586_v6, %v3588_v63 }
 0x73d   : > { %3598 = vmatprep.subr.mxu1 %v3591_v26  ;;  %v4555_v26 = vrot.slane %v15167_v27, %v13827_v46 }
 0x73e   : > { %3599 = vmatpush1.msra.mxu1 %v3590_v17  ;;  %v4434_v9 = vpop.permute.xlu1 %4433 }
 0x73f   : > { %v4441_v31 = vmul.f32 %v4434_v9, %v15128_v28  ;;  %v4432_v15 = vpop.permute.xlu0 %4431  ;;  %12156 = vmatmul.mubr.msk.f32.vlgmr.msra.gmra.mrb[0].mxu1 %vm3594_vm5, %v12155_v7  ;;  %v12168_v7 = vld [vmem:[%s13577_s21 + $0xa] sm:$0x3] }
 0x740   : > { %v4435_v2 = vsel %vm3678_vm6, %v4432_v15, %v4434_v9  ;;  %3750 = vmatprep.mubr.f32.mxu1 %v15080_v49  ;;  %v4439_v8 = vmul.f32 %v4432_v15, %v15090_v53  ;;  %v4774_v9 = vrot.slane %v15177_v39, %v13827_v46 }
 0x741   : > { %v4440_v59 = vmul.f32 %v4435_v2, %v15093_v52  ;;  %4451 = vrot.lane.b32.xlu1 %v4441_v31, %s13526_s9  ;;  %v12198_v52 = vld [vmem:[%s16332_s7 + $0x7] ss:$8 sm:$0x3] }
 0x742   : > { %v3677_v44 = vpop.permute.xlu1 %3676  ;;  %v5321_v53 = vrot.slane %v12198_v52, %v16386_v12 }
 0x743   : > { %4449 = vrot.lane.b32.xlu0 %v4440_v59, %s13526_s9  ;;  %v3675_v41 = vpop.permute.xlu0 %3674  ;;  %v4886_v59 = vrot.slane %v15187_v55, %v13827_v46 }
 0x744   : > { %v3680_v33 = vsel %vm3678_vm6, %v3675_v41, %v3677_v44 }
 0x745   : > { %4536 = vperm.xlu1 %13380, %v4533_v30   ;;  %3686 = vmatprep.subr.mxu1 %v3680_v33  ;;  %v12171_v30 = vld [vmem:[%s13577_s21 + $0xc] sm:$0x3]  ;;  %v5205_v33 = vrot.slane %v12195_v22, %v13827_v46 }
 0x746   : > { %v3788_v62 = vpop.permute.xlu1 %3787 }
 0x747   : > { %4447 = vrot.lane.b32.xlu0 %v4439_v8, %s13526_s9  ;;  %v3673_v16 = vpop.permute.xlu0 %3672  ;;  %v12174_v8 = vld [vmem:[%s13577_s21 + $0xe] sm:$0x3] }
 0x748   : > { %v3679_v58 = vsel %vm3678_vm6, %v3673_v16, %v3675_v41 }
 0x749   : > { %3687 = vmatpush1.msra.mxu1 %v3679_v58  ;;  %4584 = vrot.lane.b32.xlu1 %v4581_v18, %s13525_s5  ;;  %v5317_v18 = vrot.slane %v12198_v52, %v13827_v46  ;;  %v12177_v58 = vld [vmem:[%s13577_s21 + $0x10] sm:$0x3] }
 0x74a   : > { %v3786_v54 = vpop.permute.xlu1 %3785  ;;  %12157 = vmatmul.mubr.msk.f32.vlgmr.msra.gmra.mrb[0].mxu1 %vm3594_vm5, %v3554_v60 }
 0x74b   : > { %v3790_v32 = vpop.permute.xlu0 %3789  ;;  %3863 = vmatprep.mubr.f32.mxu1 %v15080_v49  ;;  %v3792_v57 = vsel %vm3791_vm1, %v3786_v54, %v3788_v62  ;;  %4582 = vrot.lane.b32.xlu0 %v4577_v14, %s13525_s5 }
 0x74c   : > { %v3793_v36 = vsel %vm3791_vm1, %v3788_v62, %v3790_v32 }
 0x74d   : > { %3799 = vmatprep.subr.mxu1 %v3793_v36  ;;  %4562 = vrot.lane.b32.xlu1 %v4559_v42, %s13526_s9 }
 0x74e   : > { %v3904_v45 = vpop.permute.xlu1 %3903  ;;  %3800 = vmatpush1.msra.mxu1 %v3792_v57 }
 0x74f   : > { %v3902_v23 = vpop.permute.xlu0 %3901  ;;  %4560 = vrot.lane.b32.xlu0 %v4555_v26, %s13526_s9 }
 0x750   : > { %v3906_v37 = vsel %vm1283_vm3, %v3902_v23, %v3904_v45 }
 0x751   : > { %3912 = vmatprep.subr.mxu1 %v3906_v37  ;;  %4781 = vrot.lane.b32.xlu1 %v4778_v47, %s13527_s13 }
 0x752   : > { %12160 = vmatmul.mubr.msk.f32.vlgmr.msra.gmra.mrb[0].mxu1 %vm3594_vm5, %v12159_v38  ;;  %v4111_v11 = vpop.permute.xlu1 %4110 }
 0x753   : > { %v3900_v50 = vpop.permute.xlu0 %3899  ;;  %3976 = vmatprep.mubr.f32.mxu1 %v15080_v49  ;;  %4779 = vrot.lane.b32.xlu0 %v4774_v9, %s13527_s13 }
 0x754   : > { %v3905_v1 = vsel %vm1283_vm3, %v3900_v50, %v3902_v23  ;;  %v12201_v50 = vld [vmem:[%s16332_s7 + $0x10] ss:$8 sm:$0x3] }
 0x755   : > { %3913 = vmatpush1.msra.mxu1 %v3905_v1  ;;  %4893 = vrot.lane.b32.xlu1 %v4890_v3, %s16346_s23  ;;  %v5429_v24 = vrot.slane %v12201_v50, %v13827_v46 }
 0x756   : > { %4005 = vmatprep.subr.mxu1 %v3999_v13  ;;  %v4109_v5 = vpop.permute.xlu1 %4108 }
 0x757   : > { %v4113_v21 = vpop.permute.xlu0 %4112  ;;  %v4114_v51 = vsel %vm1152_vm2, %v4109_v5, %v4111_v11  ;;  %4891 = vrot.lane.b32.xlu0 %v4886_v59, %s16346_s23 }
 0x758   : > { %v4115_v19 = vsel %vm1152_vm2, %v4111_v11, %v4113_v21 }
 0x759   : > { %5100 = vrot.lane.b32.xlu1 %v5097_v61, %s16347_s16 }
 0x75a   : > { %12163 = vmatmul.mubr.msk.f32.vlgmr.msra.gmra.mrb[0].mxu1 %vm3594_vm5, %v12162_v4  ;;  %v4226_v20 = vpop.permute.xlu1 %4225 }
 0x75b   : > { %4006 = vmatpush1.msra.mxu1 %v3998_v56  ;;  %4069 = vmatprep.mubr.f32.mxu1 %v15080_v49  ;;  %v4224_v35 = vpop.permute.xlu0 %4223 }
 0x75c   : > { %4121 = vmatprep.subr.mxu1 %v4115_v19  ;;  %v4228_v63 = vsel %vm3772_vm0, %v4224_v35, %v4226_v20  ;;  %5098 = vrot.lane.b32.xlu0 %v5093_v10, %s16347_s16 }
 0x75d   : > { %5212 = vrot.lane.b32.xlu1 %v5209_v34, %s13528_s1 }
 0x75e   : > { %v4337_v31 = vpop.permute.xlu1 %4336 }
 0x75f   : > { %v4222_v6 = vpop.permute.xlu0 %4221 }
 0x760   : > { %v4227_v15 = vsel %vm3772_vm0, %v4222_v6, %v4224_v35  ;;  %5210 = vrot.lane.b32.xlu0 %v5205_v33, %s13528_s1 }
 0x761   : > { %5324 = vrot.lane.b32.xlu1 %v5321_v53, %s13529_s26 }
 0x762   : > { %12166 = vmatmul.mubr.msk.f32.vlgmr.msra.gmra.mrb[0].mxu1 %vm3594_vm5, %v12165_v25  ;;  %v4335_v44 = vpop.permute.xlu1 %4334 }
 0x763   : > { %4122 = vmatpush1.msra.mxu1 %v4114_v51  ;;  %4185 = vmatprep.mubr.f32.mxu1 %v15080_v49  ;;  %v4339_v17 = vpop.permute.xlu0 %4338  ;;  %v4340_v41 = vsel %vm3570_vm14, %v4335_v44, %v4337_v31 }
 0x764   : > { %4234 = vmatprep.subr.mxu1 %v4228_v63  ;;  %v4341_v2 = vsel %vm3570_vm14, %v4337_v31, %v4339_v17  ;;  %5322 = vrot.lane.b32.xlu0 %v5317_v18, %s13529_s26 }
 0x76a   : > { %12169 = vmatmul.mubr.msk.f32.vlgmr.msra.gmra.mrb[0].mxu1 %vm3594_vm5, %v12168_v7 }
 0x76b   : > { %4235 = vmatpush1.msra.mxu1 %v4227_v15  ;;  %4298 = vmatprep.mubr.f32.mxu1 %v15080_v49 }
 0x76c   : > { %4347 = vmatprep.subr.mxu1 %v4341_v2 }
 0x772   : > { %12172 = vmatmul.mubr.msk.f32.vlgmr.msra.gmra.mrb[0].mxu1 %vm3594_vm5, %v12171_v30 }
 0x773   : > { %4348 = vmatpush1.msra.mxu1 %v4340_v41  ;;  %4411 = vmatprep.mubr.f32.mxu1 %v15080_v49 }
 0x77a   : > { %12175 = vmatmul.mubr.msk.f32.vlgmr.msra.gmra.mrb[0].mxu1 %vm3594_vm5, %v12174_v8 }
 0x77b   : > { %4524 = vmatprep.mubr.f32.mxu1 %v15080_v49 }
 0x7b3   : > { %v4452_v62 = vpop.permute.xlu1 %4451 }
 0x7b5   : > { %v4450_v27 = vpop.permute.xlu0 %4449 }
 0x7b6   : > { %v4454_v16 = vsel %vm3546_vm15, %v4450_v27, %v4452_v62 }
 0x7b7   : > { %4460 = vmatprep.subr.mxu1 %v4454_v16 }
 0x7b9   : > { %v4448_v60 = vpop.permute.xlu0 %4447 }
 0x7ba   : > { %v4453_v42 = vsel %vm3546_vm15, %v4448_v60, %v4450_v27 }
 0x7bb   : > { %4461 = vmatpush1.msra.mxu1 %v4453_v42 }
 0x7bc   : > { %12178 = vmatmul.mubr.msk.f32.vlgmr.msra.gmra.mrb[0].mxu1 %vm3594_vm5, %v12177_v58 }
 0x7bd   : > { %4675 = vmatprep.mubr.f32.mxu1 %v15080_v49  ;;  %v4583_v54 = vpop.permute.xlu0 %4582 }
 0x7be   : > { %v4590_v39 = vmul.f32 %v15080_v49, %v4583_v54 }
 0x7c0   : > { %4598 = vrot.lane.b32.xlu0 %v4590_v39, %s13529_s26 }
 0x7c1   : > { %v4561_v11 = vpop.permute.xlu0 %4560 }
 0x7c2   : > { %v4568_v5 = vmul.f32 %v15080_v49, %v4561_v11 }
 0x7c4   : > { %v4537_v32 = vpop.permute.xlu1 %4536 }
 0x7c5   : > { %v4780_v22 = vpop.permute.xlu0 %4779 }
 0x7c6   : > { %v4787_v53 = vmul.f32 %v15080_v49, %v4780_v22 }
 0x7c8   : > { %v4585_v37 = vpop.permute.xlu1 %4584 }
 0x7c9   : > { %v4586_v3 = vsel %vm3570_vm14, %v4583_v54, %v4585_v37  ;;  %v4892_v52 = vpop.permute.xlu0 %4891  ;;  %v12180_v54 = vld [vmem:[%s13582_s25 + $0x2] sm:$0x3] }
 0x7ca   : > { %v4899_v7 = vmul.f32 %v15080_v49, %v4892_v52 }
 0x7cc   : > { %v4563_v13 = vpop.permute.xlu1 %4562 }
 0x7cd   : > { %v4564_v61 = vsel %vm3546_vm15, %v4561_v11, %v4563_v13 }
 0x7ce   : > { %v5099_v14 = vpop.permute.xlu0 %5098 }
 0x7d0   : > { %v4782_v21 = vpop.permute.xlu1 %4781 }
 0x7d1   : > { %v4783_v56 = vsel %vm3772_vm0, %v4780_v22, %v4782_v21 }
 0x7d2   : > { %v5211_v9 = vpop.permute.xlu0 %5210 }
 0x7d4   : > { %v4894_v35 = vpop.permute.xlu1 %4893 }
 0x7d5   : > { %v4895_v20 = vsel %vm1152_vm2, %v4892_v52, %v4894_v35 }
 0x7d6   : > { %v5323_v44 = vpop.permute.xlu0 %5322 }
 0x7d8   : > { %v5101_v51 = vpop.permute.xlu1 %5100 }
 0x7d9   : > { %v5102_v26 = vsel %vm1283_vm3, %v5099_v14, %v5101_v51  ;;  %v5108_v2 = vmul.f32 %v5101_v51, %v15128_v28 }
 0x7dc   : > { %v5213_v31 = vpop.permute.xlu1 %5212 }
 0x7dd   : > { %v5214_v59 = vsel %vm3791_vm1, %v5211_v9, %v5213_v31  ;;  %v5220_v30 = vmul.f32 %v5213_v31, %v15128_v28 }
 0x7e0   : > { %v5325_v10 = vpop.permute.xlu1 %5324 }
 0x7e1   : > { %v5326_v33 = vsel %vm3589_vm4, %v5323_v44, %v5325_v10  ;;  %v5332_v27 = vmul.f32 %v5325_v10, %v15128_v28 }
 0x832   : > { %v4599_v16 = vpop.permute.xlu0 %4598 }
 0x88f   : > { %v4526_v36 = vpop.f32.mrb[0].mxu1 }
 0x890   : > { %v4539_v57 = vadd.f32 %v4537_v32, %v4526_v36  ;;  %v4528_v43 = vpop.f32.mrb[1].mxu1 }
 0x891   : > { %v4540_v47 = vadd.f32 %v4537_v32, %v4528_v43 }
 0x892   : > { %v4541_v45 = vmax.f32 %v4539_v57, 0.0 }
 0x893   : > { %v4542_v55 = vmax.f32 %v4540_v47, 0.0 }
 0x894   : > { %v15258_v23 = vadd.f32 %v4541_v45, %v15084_v48 }
 0x895   : > { %v15261_v38 = vadd.f32 %v4542_v55, %v15086_v40  ;;  %v5433_v40 = vrot.slane %v12201_v50, %v16386_v12  ;;  %v5536_v55 = vld [vmem:[%s13635_s27] sm:$0x3] }
 0x896   : > { %4545 = vst [vmem:[#allocation2 + $0x8] sm:$0x3] %v15258_v23 }
 0x897   : > { %4546 = vst [vmem:[#allocation2 + $0x10] sm:$0x3] %v15261_v38 }
 0x89d   : > { %v15265_v29 = vld [vmem:[#allocation2 + $0x8] sm:$0xff] }
 0x89e   : > { %v15268_v0 = vld [vmem:[#allocation2 + $0x10] sm:$0xff]  ;;  %v4591_v1 = vmul.f32 %v4586_v3, %v15265_v29  ;;  %v4569_v34 = vmul.f32 %v4564_v61, %v15265_v29  ;;  %v4788_v19 = vmul.f32 %v4783_v56, %v15265_v29  ;;  %v4900_v63 = vmul.f32 %v4895_v20, %v15265_v29 }
 0x89f   : > { %v4592_v48 = vmul.f32 %v15268_v0, %v4585_v37  ;;  %v4570_v4 = vmul.f32 %v15268_v0, %v4563_v13  ;;  %v4789_v25 = vmul.f32 %v15268_v0, %v4782_v21  ;;  %v4901_v6 = vmul.f32 %v15268_v0, %v4894_v35  ;;  %v15332_v37 = vld [vmem:[%s16332_s7 + $0x1] ss:$8 sm:$0x3]  ;;  %v15350_v21 = vld [vmem:[%s16332_s7 + $0x2] ss:$8 sm:$0x3] }
 0x8a0   : > { %4600 = vrot.lane.b32.xlu0 %v4591_v1, %s13529_s26  ;;  %v5107_v17 = vmul.f32 %v5102_v26, %v15268_v0  ;;  %v5106_v15 = vmul.f32 %v5099_v14, %v15265_v29  ;;  %v5219_v41 = vmul.f32 %v5214_v59, %v15268_v0  ;;  %v5331_v8 = vmul.f32 %v5326_v33, %v15268_v0  ;;  %v15360_v35 = vld [vmem:[%s16332_s7 + $0x3] ss:$8 sm:$0x3]  ;;  %v12187_v59 = vld [vmem:[%s13582_s25 + $0x6] sm:$0x3] }
 0x8a1   : > { %4602 = vrot.lane.b32.xlu1 %v4592_v48, %s13529_s26  ;;  %v5218_v18 = vmul.f32 %v5211_v9, %v15265_v29  ;;  %v5330_v62 = vmul.f32 %v5323_v44, %v15265_v29  ;;  %v5584_v11 = vrot.slane %v15332_v37, %v16386_v12  ;;  %v15340_v48 = vld [vmem:[%s16332_s7] ss:$8 sm:$0x3]  ;;  %v5781_v52 = vrot.slane %v15350_v21, %v16386_v12 }
 0x8a2   : > { %v5562_v61 = vrot.slane %v15340_v48, %v16386_v12  ;;  %v5893_v51 = vrot.slane %v15360_v35, %v16386_v12 }
 0x8a4   : > { %5436 = vrot.lane.b32.xlu0 %v5433_v40, %s13530_s28  ;;  %v4571_v40 = vld [vmem:[%s13582_s25] sm:$0x3] }
 0x8a5   : > { %5434 = vrot.lane.b32.xlu1 %v5429_v24, %s13530_s28 }
 0x8a8   : > { %4689 = vrot.lane.b32.xlu0 %v4570_v4, %s13530_s28 }
 0x8a9   : > { %4687 = vrot.lane.b32.xlu1 %v4569_v34, %s13530_s28 }
 0x8ac   : > { %4797 = vrot.lane.b32.xlu0 %v4788_v19, %s13528_s1 }
 0x8ad   : > { %4685 = vrot.lane.b32.xlu1 %v4568_v5, %s13530_s28  ;;  %v12189_v5 = vld [vmem:[%s16332_s7 + $0x4] ss:$8 sm:$0x3] }
 0x8ae   : > { %v5002_v14 = vrot.slane %v12189_v5, %v16386_v12  ;;  %v4998_v9 = vrot.slane %v12189_v5, %v13827_v46 }
 0x8b0   : > { %4795 = vrot.lane.b32.xlu0 %v4787_v53, %s13528_s1  ;;  %v5005_v44 = vmul.f32 %v4998_v9, %v15265_v29 }
 0x8b1   : > { %4799 = vrot.lane.b32.xlu1 %v4789_v25, %s13528_s1  ;;  %v12184_v25 = vld [vmem:[%s13582_s25 + $0x4] sm:$0x3] }
 0x8b4   : > { %4911 = vrot.lane.b32.xlu0 %v4901_v6, %s16347_s16  ;;  %v12217_v6 = vld [vmem:[%s16332_s7 + $0x5] ss:$8 sm:$0x3] }
 0x8b5   : > { %4909 = vrot.lane.b32.xlu1 %v4900_v63, %s16347_s16  ;;  %v6100_v31 = vrot.slane %v12217_v6, %v16386_v12 }
 0x8b8   : > { %5116 = vrot.lane.b32.xlu0 %v5107_v17, %s16346_s23  ;;  %v5006_v17 = vmul.f32 %v15268_v0, %v5002_v14 }
 0x8b9   : > { %4907 = vrot.lane.b32.xlu1 %v4899_v7, %s16347_s16 }
 0x8bc   : > { %5114 = vrot.lane.b32.xlu0 %v5106_v15, %s16346_s23  ;;  %v12220_v15 = vld [vmem:[%s16332_s7 + $0x6] ss:$8 sm:$0x3] }
 0x8bd   : > { %5118 = vrot.lane.b32.xlu1 %v5108_v2, %s16346_s23 }
 0x8c0   : > { %5230 = vrot.lane.b32.xlu0 %v5220_v30, %s13527_s13  ;;  %v6212_v30 = vrot.slane %v12220_v15, %v16386_v12 }
 0x8c1   : > { %5228 = vrot.lane.b32.xlu1 %v5219_v41, %s13527_s13 }
 0x8c4   : > { %5340 = vrot.lane.b32.xlu0 %v5331_v8, %s13525_s5  ;;  %v12190_v8 = vld [vmem:[%s13582_s25 + $0x8] sm:$0x3] }
 0x8c5   : > { %5226 = vrot.lane.b32.xlu1 %v5218_v18, %s13527_s13 }
 0x8c8   : > { %5338 = vrot.lane.b32.xlu0 %v5330_v62, %s13525_s5  ;;  %v5580_v62 = vrot.slane %v15332_v37, %v13827_v46 }
 0x8c9   : > { %5342 = vrot.lane.b32.xlu1 %v5332_v27, %s13525_s5 }
 0x912   : > { %v4601_v60 = vpop.permute.xlu0 %4600 }
 0x913   : > { %v4603_v58 = vpop.permute.xlu1 %4602  ;;  %v4604_v39 = vsel %vm3589_vm4, %v4599_v16, %v4601_v60 }
 0x914   : > { %v4605_v42 = vsel %vm3589_vm4, %v4601_v60, %v4603_v58  ;;  %v5558_v58 = vrot.slane %v15340_v48, %v13827_v46 }
 0x915   : > { %4611 = vmatprep.subr.mxu1 %v4605_v42  ;;  %v12193_v42 = vld [vmem:[%s13582_s25 + $0xa] sm:$0x3] }
 0x916   : > { %4612 = vmatpush1.msra.mxu1 %v4604_v39  ;;  %v5437_v32 = vpop.permute.xlu0 %5436  ;;  %v5777_v39 = vrot.slane %v15350_v21, %v13827_v46 }
 0x917   : > { %v5444_v36 = vmul.f32 %v5437_v32, %v15128_v28  ;;  %v5435_v57 = vpop.permute.xlu1 %5434  ;;  %12181 = vmatmul.mubr.msk.f32.vlgmr.msra.gmra.mrb[2].mxu1 %vm3594_vm5, %v12180_v54 }
 0x918   : > { %v5438_v43 = vsel %vm3678_vm6, %v5435_v57, %v5437_v32  ;;  %4762 = vmatprep.mubr.f32.mxu1 %v15080_v49  ;;  %v5442_v50 = vmul.f32 %v5435_v57, %v15265_v29 }
 0x919   : > { %v5443_v47 = vmul.f32 %v5438_v43, %v15268_v0  ;;  %5454 = vrot.lane.b32.xlu0 %v5444_v36, %s13526_s9  ;;  %v12223_v0 = vld [vmem:[%s16332_s7 + $0x7] ss:$8 sm:$0x3]  ;;  %v5889_v43 = vrot.slane %v15360_v35, %v13827_v46 }
 0x91a   : > { %v4690_v45 = vpop.permute.xlu0 %4689  ;;  %v6324_v29 = vrot.slane %v12223_v0, %v16386_v12 }
 0x91b   : > { %v4688_v3 = vpop.permute.xlu1 %4687  ;;  %5452 = vrot.lane.b32.xlu1 %v5443_v47, %s13526_s9 }
 0x91c   : > { %v4692_v28 = vsel %vm3678_vm6, %v4688_v3, %v4690_v45  ;;  %v12196_v45 = vld [vmem:[%s13582_s25 + $0xc] sm:$0x3] }
 0x91d   : > { %5539 = vperm.xlu0 %13379, %v5536_v55   ;;  %4698 = vmatprep.subr.mxu1 %v4692_v28  ;;  %v6096_v55 = vrot.slane %v12217_v6, %v13827_v46  ;;  %v12199_v28 = vld [vmem:[%s13582_s25 + $0xe] sm:$0x3]  ;;  %v12226_v6 = vld [vmem:[%s16332_s7 + $0x10] ss:$8 sm:$0x3] }
 0x91e   : > { %v4798_v1 = vpop.permute.xlu0 %4797 }
 0x91f   : > { %v4686_v13 = vpop.permute.xlu1 %4685  ;;  %5450 = vrot.lane.b32.xlu1 %v5442_v50, %s13526_s9  ;;  %v6320_v50 = vrot.slane %v12223_v0, %v13827_v46 }
 0x920   : > { %v4691_v24 = vsel %vm3678_vm6, %v4686_v13, %v4688_v3  ;;  %v6208_v3 = vrot.slane %v12220_v15, %v13827_v46 }
 0x921   : > { %4699 = vmatpush1.msra.mxu1 %v4691_v24  ;;  %5587 = vrot.lane.b32.xlu0 %v5584_v11, %s13525_s5 }
 0x922   : > { %12182 = vmatmul.mubr.msk.f32.vlgmr.msra.gmra.mrb[2].mxu1 %vm3594_vm5, %v4571_v40  ;;  %v4796_v22 = vpop.permute.xlu0 %4795  ;;  %v12202_v40 = vld [vmem:[%s13582_s25 + $0x10] sm:$0x3] }
 0x923   : > { %v4800_v4 = vpop.permute.xlu1 %4799  ;;  %4872 = vmatprep.mubr.f32.mxu1 %v15080_v49  ;;  %v4801_v34 = vsel %vm3791_vm1, %v4796_v22, %v4798_v1  ;;  %5585 = vrot.lane.b32.xlu1 %v5580_v62, %s13525_s5 }
 0x924   : > { %v4802_v56 = vsel %vm3791_vm1, %v4798_v1, %v4800_v4 }
 0x925   : > { %4808 = vmatprep.subr.mxu1 %v4802_v56  ;;  %5565 = vrot.lane.b32.xlu0 %v5562_v61, %s13526_s9 }
 0x926   : > { %4809 = vmatpush1.msra.mxu1 %v4801_v34  ;;  %v4912_v19 = vpop.permute.xlu0 %4911 }
 0x927   : > { %v4910_v53 = vpop.permute.xlu1 %4909  ;;  %5563 = vrot.lane.b32.xlu1 %v5558_v58, %s13526_s9 }
 0x928   : > { %v4914_v20 = vsel %vm1283_vm3, %v4910_v53, %v4912_v19 }
 0x929   : > { %4920 = vmatprep.subr.mxu1 %v4914_v20  ;;  %5784 = vrot.lane.b32.xlu0 %v5781_v52, %s13527_s13 }
 0x92a   : > { %12185 = vmatmul.mubr.msk.f32.vlgmr.msra.gmra.mrb[2].mxu1 %vm3594_vm5, %v12184_v25  ;;  %v5117_v26 = vpop.permute.xlu0 %5116 }
 0x92b   : > { %v4908_v63 = vpop.permute.xlu1 %4907  ;;  %4984 = vmatprep.mubr.f32.mxu1 %v15080_v49  ;;  %5782 = vrot.lane.b32.xlu1 %v5777_v39, %s13527_s13 }
 0x92c   : > { %v4913_v7 = vsel %vm1283_vm3, %v4908_v63, %v4910_v53 }
 0x92d   : > { %4921 = vmatpush1.msra.mxu1 %v4913_v7  ;;  %5896 = vrot.lane.b32.xlu0 %v5893_v51, %s16346_s23 }
 0x92e   : > { %5012 = vmatprep.subr.mxu1 %v5006_v17  ;;  %v5115_v10 = vpop.permute.xlu0 %5114 }
 0x92f   : > { %v5119_v2 = vpop.permute.xlu1 %5118  ;;  %v5120_v27 = vsel %vm1152_vm2, %v5115_v10, %v5117_v26  ;;  %5894 = vrot.lane.b32.xlu1 %v5889_v43, %s16346_s23 }
 0x930   : > { %v5121_v41 = vsel %vm1152_vm2, %v5117_v26, %v5119_v2 }
 0x931   : > { %6103 = vrot.lane.b32.xlu0 %v6100_v31, %s16347_s16 }
 0x932   : > { %12188 = vmatmul.mubr.msk.f32.vlgmr.msra.gmra.mrb[2].mxu1 %vm3594_vm5, %v12187_v59  ;;  %v5231_v18 = vpop.permute.xlu0 %5230 }
 0x933   : > { %5013 = vmatpush1.msra.mxu1 %v5005_v44  ;;  %5076 = vmatprep.mubr.f32.mxu1 %v15080_v49  ;;  %v5229_v33 = vpop.permute.xlu1 %5228 }
 0x934   : > { %5127 = vmatprep.subr.mxu1 %v5121_v41  ;;  %v5233_v60 = vsel %vm3772_vm0, %v5229_v33, %v5231_v18  ;;  %6101 = vrot.lane.b32.xlu1 %v6096_v55, %s16347_s16 }
 0x935   : > { %6215 = vrot.lane.b32.xlu0 %v6212_v30, %s13528_s1 }
 0x936   : > { %v5341_v32 = vpop.permute.xlu0 %5340 }
 0x937   : > { %v5227_v16 = vpop.permute.xlu1 %5226 }
 0x938   : > { %v5232_v36 = vsel %vm3772_vm0, %v5227_v16, %v5229_v33  ;;  %6213 = vrot.lane.b32.xlu1 %v6208_v3, %s13528_s1 }
 0x939   : > { %6327 = vrot.lane.b32.xlu0 %v6324_v29, %s13529_s26 }
 0x93a   : > { %12191 = vmatmul.mubr.msk.f32.vlgmr.msra.gmra.mrb[2].mxu1 %vm3594_vm5, %v12190_v8  ;;  %v5339_v47 = vpop.permute.xlu0 %5338 }
 0x93b   : > { %5128 = vmatpush1.msra.mxu1 %v5120_v27  ;;  %5191 = vmatprep.mubr.f32.mxu1 %v15080_v49  ;;  %v5343_v54 = vpop.permute.xlu1 %5342  ;;  %v5344_v37 = vsel %vm3570_vm14, %v5339_v47, %v5341_v32 }
 0x93c   : > { %5239 = vmatprep.subr.mxu1 %v5233_v60  ;;  %v5345_v57 = vsel %vm3570_vm14, %v5341_v32, %v5343_v54  ;;  %6325 = vrot.lane.b32.xlu1 %v6320_v50, %s13529_s26  ;;  %v6090_v32 = vld [vmem:[#allocation2 + $0x18] sm:$0xff] }
 0x942   : > { %12194 = vmatmul.mubr.msk.f32.vlgmr.msra.gmra.mrb[2].mxu1 %vm3594_vm5, %v12193_v42 }
 0x943   : > { %5240 = vmatpush1.msra.mxu1 %v5232_v36  ;;  %5303 = vmatprep.mubr.f32.mxu1 %v15080_v49 }
 0x944   : > { %5351 = vmatprep.subr.mxu1 %v5345_v57 }
 0x94a   : > { %12197 = vmatmul.mubr.msk.f32.vlgmr.msra.gmra.mrb[2].mxu1 %vm3594_vm5, %v12196_v45 }
 0x94b   : > { %5352 = vmatpush1.msra.mxu1 %v5344_v37  ;;  %5415 = vmatprep.mubr.f32.mxu1 %v15080_v49 }
 0x952   : > { %12200 = vmatmul.mubr.msk.f32.vlgmr.msra.gmra.mrb[2].mxu1 %vm3594_vm5, %v12199_v28 }
 0x953   : > { %5527 = vmatprep.mubr.f32.mxu1 %v15080_v49 }
 0x98b   : > { %v5455_v11 = vpop.permute.xlu0 %5454 }
 0x98d   : > { %v5453_v1 = vpop.permute.xlu1 %5452 }
 0x98e   : > { %v5457_v48 = vsel %vm3546_vm15, %v5453_v1, %v5455_v11 }
 0x98f   : > { %5463 = vmatprep.subr.mxu1 %v5457_v48 }
 0x991   : > { %v5451_v13 = vpop.permute.xlu1 %5450 }
 0x992   : > { %v5456_v24 = vsel %vm3546_vm15, %v5451_v13, %v5453_v1 }
 0x993   : > { %5464 = vmatpush1.msra.mxu1 %v5456_v24  ;;  %v12205_v24 = vld [vmem:[%s13587_s29 + $0x4] sm:$0xf] }
 0x994   : > { %12203 = vmatmul.mubr.msk.f32.vlgmr.msra.gmra.mrb[2].mxu1 %vm3594_vm5, %v12202_v40 }
 0x995   : > { %5678 = vmatprep.mubr.f32.mxu1 %v15080_v49  ;;  %v5586_v61 = vpop.permute.xlu1 %5585 }
 0x996   : > { %v5593_v22 = vmul.f32 %v15080_v49, %v5586_v61 }
 0x998   : > { %5601 = vrot.lane.b32.xlu1 %v5593_v22, %s13529_s26 }
 0x999   : > { %v5564_v63 = vpop.permute.xlu1 %5563 }
 0x99a   : > { %v5571_v30 = vmul.f32 %v15080_v49, %v5564_v63 }
 0x99c   : > { %v5540_v21 = vpop.permute.xlu0 %5539 }
 0x99d   : > { %v5783_v31 = vpop.permute.xlu1 %5782 }
 0x99e   : > { %v5790_v33 = vmul.f32 %v15080_v49, %v5783_v31 }
 0x9a0   : > { %v5588_v25 = vpop.permute.xlu0 %5587 }
 0x9a1   : > { %v5589_v14 = vsel %vm3570_vm14, %v5586_v61, %v5588_v25  ;;  %v5895_v10 = vpop.permute.xlu1 %5894 }
 0x9a2   : > { %v5902_v58 = vmul.f32 %v15080_v49, %v5895_v10 }
 0x9a4   : > { %v5566_v17 = vpop.permute.xlu0 %5565 }
 0x9a5   : > { %v5567_v9 = vsel %vm3546_vm15, %v5564_v63, %v5566_v17  ;;  %v5574_v63 = vld [vmem:[%s13587_s29] sm:$0xf] }
 0x9a6   : > { %v6102_v18 = vpop.permute.xlu1 %6101 }
 0x9a8   : > { %v5785_v15 = vpop.permute.xlu0 %5784 }
 0x9a9   : > { %v5786_v59 = vsel %vm3772_vm0, %v5783_v31, %v5785_v15 }
 0x9aa   : > { %v6214_v54 = vpop.permute.xlu1 %6213 }
 0x9ac   : > { %v5897_v41 = vpop.permute.xlu0 %5896 }
 0x9ad   : > { %v5898_v8 = vsel %vm1152_vm2, %v5895_v10, %v5897_v41 }
 0x9ae   : > { %v6326_v47 = vpop.permute.xlu1 %6325 }
 0x9b0   : > { %v6104_v62 = vpop.permute.xlu0 %6103 }
 0x9b1   : > { %v6105_v60 = vsel %vm1283_vm3, %v6102_v18, %v6104_v62  ;;  %v6111_v57 = vmul.f32 %v6104_v62, %v6090_v32 }
 0x9b4   : > { %v6216_v39 = vpop.permute.xlu0 %6215 }
 0x9b5   : > { %v6217_v43 = vsel %vm3791_vm1, %v6214_v54, %v6216_v39  ;;  %v6223_v49 = vmul.f32 %v6216_v39, %v6090_v32 }
 0x9b8   : > { %v6328_v45 = vpop.permute.xlu0 %6327 }
 0x9b9   : > { %v6329_v37 = vsel %vm3589_vm4, %v6326_v47, %v6328_v45  ;;  %v6335_v11 = vmul.f32 %v6328_v45, %v6090_v32 }
 0xa0a   : > { %v5602_v1 = vpop.permute.xlu1 %5601 }
 0xa67   : > { %v5529_v4 = vpop.f32.mrb[2].mxu1 }
 0xa68   : > { %v5542_v56 = vadd.f32 %v5540_v21, %v5529_v4  ;;  %v5531_v34 = vpop.f32.mrb[3].mxu1 }
 0xa69   : > { %v5543_v5 = vadd.f32 %v5540_v21, %v5531_v34  ;;  %v15490_v34 = vld [vmem:[#allocation2] sm:$0xff] }
 0xa6a   : > { %v5544_v52 = vmax.f32 %v5542_v56, 0.0  ;;  %12730 = vmatprep.mubr.msk.f32.mxu0 %vm13537_vm7, %v15490_v34 }
 0xa6b   : > { %v5545_v19 = vmax.f32 %v5543_v5, 0.0 }
 0xa6c   : > { %v5546_v35 = vadd.f32 %v5544_v52, %v15258_v23  ;;  %v6436_v23 = vrot.slane %v12226_v6, %v16386_v12 }
 0xa6d   : > { %v5547_v53 = vadd.f32 %v5545_v19, %v15261_v38  ;;  %v6432_v38 = vrot.slane %v12226_v6, %v13827_v46  ;;  %v6571_v19 = vld [vmem:[%s16389_s4] sm:$0xf]  ;;  %s16409_s4 = smov 123  }
 0xa6e   : > { %5548 = vst [vmem:[#allocation2 + $0x8] sm:$0x3] %v5546_v35 }
 0xa6f   : > { %5549 = vst [vmem:[#allocation2 + $0x10] sm:$0x3] %v5547_v53 }
 0xa75   : > { %v15432_v20 = vld [vmem:[#allocation2 + $0x8] sm:$0xff] }
 0xa76   : > { %v15435_v51 = vld [vmem:[#allocation2 + $0x10] sm:$0xff]  ;;  %v5594_v26 = vmul.f32 %v5589_v14, %v15432_v20  ;;  %v5572_v44 = vmul.f32 %v5567_v9, %v15432_v20  ;;  %v5791_v0 = vmul.f32 %v5786_v59, %v15432_v20  ;;  %v5903_v16 = vmul.f32 %v5898_v8, %v15432_v20  ;;  %v12212_v8 = vld [vmem:[%s13587_s29 + $0xc] sm:$0xf] }
 0xa77   : > { %v5595_v7 = vmul.f32 %v15435_v51, %v5588_v25  ;;  %v5573_v2 = vmul.f32 %v15435_v51, %v5566_v17  ;;  %v5792_v29 = vmul.f32 %v15435_v51, %v5785_v15  ;;  %v5904_v27 = vmul.f32 %v15435_v51, %v5897_v41  ;;  %v12214_v9 = vld [vmem:[%s16332_s7 + $0x4] ss:$8 sm:$0x3]  ;;  %s16412_s7 = smov 125  }
 0xa78   : > { %5603 = vrot.lane.b32.xlu1 %v5594_v26, %s13529_s26  ;;  %v6110_v42 = vmul.f32 %v6105_v60, %v15435_v51  ;;  %v6109_v36 = vmul.f32 %v6102_v18, %v15432_v20  ;;  %v6222_v55 = vmul.f32 %v6217_v43, %v15435_v51  ;;  %v6334_v3 = vmul.f32 %v6329_v37, %v15435_v51  ;;  %v6556_v37 = vld [vmem:[%s16390_s10 + $0x88] sm:$0xff] }
 0xa79   : > { %5605 = vrot.lane.b32.xlu0 %v5595_v7, %s13529_s26  ;;  %v6221_v28 = vmul.f32 %v6214_v54, %v15432_v20  ;;  %v6333_v50 = vmul.f32 %v6326_v47, %v15432_v20  ;;  %v12224_v47 = vld [vmem:[%s13587_s29 + $0x1c] sm:$0xf]  ;;  %s16393_s26 = sld [smem:[#allocation11_spill]] }
 0xa7c   : > { %6439 = vrot.lane.b32.xlu1 %v6436_v23, %s13530_s28 }
 0xa7d   : > { %6437 = vrot.lane.b32.xlu0 %v6432_v38, %s13530_s28 }
 0xa80   : > { %5692 = vrot.lane.b32.xlu1 %v5573_v2, %s13530_s28  ;;  %v12209_v2 = vld [vmem:[%s13587_s29 + $0x8] sm:$0xf] }
 0xa81   : > { %5690 = vrot.lane.b32.xlu0 %v5572_v44, %s13530_s28  ;;  %v6005_v44 = vrot.slane %v12214_v9, %v16386_v12 }
 0xa83   : > { %v6009_v41 = vmul.f32 %v15435_v51, %v6005_v44 }
 0xa84   : > { %5800 = vrot.lane.b32.xlu1 %v5791_v0, %s13528_s1 }
 0xa85   : > { %5688 = vrot.lane.b32.xlu0 %v5571_v30, %s13530_s28  ;;  %s16394_s28 = smov %s16393_s26 }
 0xa88   : > { %5798 = vrot.lane.b32.xlu1 %v5790_v33, %s13528_s1  ;;  %v6001_v33 = vrot.slane %v12214_v9, %v13827_v46 }
 0xa89   : > { %5802 = vrot.lane.b32.xlu0 %v5792_v29, %s13528_s1  ;;  %s16392_s1 = sld [smem:[#allocation18_spill]] }
 0xa8a   : > { %v6008_v12 = vmul.f32 %v6001_v33, %v15432_v20  ;;  %v6568_v33 = vld [vmem:[%s16390_s10 + $0xe8] sm:$0xff] }
 0xa8c   : > { %5914 = vrot.lane.b32.xlu1 %v5904_v27, %s16347_s16 }
 0xa8d   : > { %5912 = vrot.lane.b32.xlu0 %v5903_v16, %s16347_s16 }
 0xa90   : > { %6119 = vrot.lane.b32.xlu1 %v6110_v42, %s16346_s23 }
 0xa91   : > { %5910 = vrot.lane.b32.xlu0 %v5902_v58, %s16347_s16  ;;  %v12218_v58 = vld [vmem:[%s13587_s29 + $0x14] sm:$0xf] }
 0xa94   : > { %6117 = vrot.lane.b32.xlu1 %v6109_v36, %s16346_s23 }
 0xa95   : > { %6121 = vrot.lane.b32.xlu0 %v6111_v57, %s16346_s23  ;;  %v12221_v57 = vld [vmem:[%s13587_s29 + $0x18] sm:$0xf] }
 0xa98   : > { %6233 = vrot.lane.b32.xlu1 %v6223_v49, %s13527_s13 }
 0xa99   : > { %6231 = vrot.lane.b32.xlu0 %v6222_v55, %s13527_s13  ;;  %v6555_v55 = vld [vmem:[%s16390_s10 + $0x80] sm:$0xff] }
 0xa9c   : > { %6343 = vrot.lane.b32.xlu1 %v6334_v3, %s13525_s5 }
 0xa9d   : > { %6229 = vrot.lane.b32.xlu0 %v6221_v28, %s13527_s13  ;;  %v6539_v28 = vld [vmem:[%s16390_s10] sm:$0xff]  ;;  %s16288_s13 = smov 8  }
 0xaa0   : > { %6341 = vrot.lane.b32.xlu1 %v6333_v50, %s13525_s5  ;;  %v6540_v50 = vld [vmem:[%s16390_s10 + $0x8] sm:$0xff] }
 0xaa1   : > { %6345 = vrot.lane.b32.xlu0 %v6335_v11, %s13525_s5  ;;  %v6557_v11 = vld [vmem:[%s16390_s10 + $0x90] sm:$0xff]  ;;  %s13534_s5 = smov 7  }
 0xaea   : > { %v5604_v48 = vpop.permute.xlu1 %5603 }
 0xaeb   : > { %v5606_v13 = vpop.permute.xlu0 %5605  ;;  %v5607_v61 = vsel %vm3589_vm4, %v5602_v1, %v5604_v48  ;;  %v6558_v1 = vld [vmem:[%s16390_s10 + $0x98] sm:$0xff] }
 0xaec   : > { %v5608_v40 = vsel %vm3589_vm4, %v5604_v48, %v5606_v13  ;;  %v13131_v48 = vpack.c.bf16 %v6556_v37, %v6555_v55 }
 0xaed   : > { %5614 = vmatprep.subr.mxu1 %v5608_v40  ;;  %v12227_v40 = vld [vmem:[%s13587_s29 + $0x20] sm:$0xf] }
 0xaee   : > { %v6440_v22 = vpop.permute.xlu1 %6439  ;;  %5615 = vmatpush1.msra.mxu1 %v5607_v61 }
 0xaef   : > { %v6447_v21 = vmul.f32 %v6440_v22, %v6090_v32  ;;  %v6438_v4 = vpop.permute.xlu0 %6437  ;;  %12206 = vmatmul.mubr.msk.f32.vlgmr.msra.gmra.mrb[4].mxu1 %vm3594_vm5, %v12205_v24  ;;  %v13133_v24 = vpack.c.bf16 %v6540_v50, %v6539_v28 }
 0xaf0   : > { %v6441_v56 = vsel %vm3678_vm6, %v6438_v4, %v6440_v22  ;;  %5765 = vmatprep.mubr.f32.mxu1 %v15490_v34  ;;  %v6445_v25 = vmul.f32 %v6438_v4, %v15432_v20  ;;  %v13135_v22 = vpack.c.bf16 %v6558_v1, %v6557_v11  ;;  %v6542_v4 = vld [vmem:[%s16390_s10 + $0x18] sm:$0xff] }
 0xaf1   : > { %v6446_v5 = vmul.f32 %v6441_v56, %v15435_v51  ;;  %6457 = vrot.lane.b32.xlu1 %v6447_v21, %s13526_s9  ;;  %v12215_v51 = vld [vmem:[%s13587_s29 + $0x10] sm:$0xf]  ;;  %v6559_v56 = vld [vmem:[%s16390_s10 + $0xa0] sm:$0xff] }
 0xaf2   : > { %v5693_v52 = vpop.permute.xlu1 %5692  ;;  %v6541_v21 = vld [vmem:[%s16390_s10 + $0x10] sm:$0xff] }
 0xaf3   : > { %6455 = vrot.lane.b32.xlu0 %v6446_v5, %s13526_s9  ;;  %v5691_v35 = vpop.permute.xlu0 %5690  ;;  %v6560_v5 = vld [vmem:[%s16390_s10 + $0xa8] sm:$0xff] }
 0xaf4   : > { %v5695_v53 = vsel %vm3678_vm6, %v5691_v35, %v5693_v52  ;;  %v13137_v52 = vpack.c.bf16 %v6542_v4, %v6541_v21 }
 0xaf5   : > { %6574 = vperm.xlu1 %13380, %v6571_v19   ;;  %5701 = vmatprep.subr.mxu1 %v5695_v53  ;;  %v13139_v19 = vpack.c.bf16 %v6560_v5, %v6559_v56  ;;  %v6544_v53 = vld [vmem:[%s16390_s10 + $0x28] sm:$0xff] }
 0xaf6   : > { %v5801_v14 = vpop.permute.xlu1 %5800 }
 0xaf7   : > { %6453 = vrot.lane.b32.xlu0 %v6445_v25, %s13526_s9  ;;  %v5689_v6 = vpop.permute.xlu0 %5688  ;;  %v6561_v25 = vld [vmem:[%s16390_s10 + $0xb0] sm:$0xff]  ;;  %s13535_s9 = smov 9  }
 0xaf8   : > { %v5694_v26 = vsel %vm3678_vm6, %v5689_v6, %v5691_v35  ;;  %v6543_v35 = vld [vmem:[%s16390_s10 + $0x20] sm:$0xff] }
 0xaf9   : > { %5702 = vmatpush1.msra.mxu1 %v5694_v26  ;;  %v13141_v6 = vpack.c.bf16 %v6544_v53, %v6543_v35  ;;  %v6545_v26 = vld [vmem:[%s16390_s10 + $0x30] sm:$0xff] }
 0xafa   : > { %v5799_v7 = vpop.permute.xlu1 %5798  ;;  %12207 = vmatmul.mubr.msk.f32.vlgmr.msra.gmra.mrb[4].mxu1 %vm3594_vm5, %v5574_v63 }
 0xafb   : > { %v5803_v17 = vpop.permute.xlu0 %5802  ;;  %5875 = vmatprep.mubr.f32.mxu1 %v15490_v34  ;;  %v5804_v38 = vsel %vm3791_vm1, %v5799_v7, %v5801_v14  ;;  %v6546_v7 = vld [vmem:[%s16390_s10 + $0x38] sm:$0xff] }
 0xafc   : > { %v5805_v23 = vsel %vm3791_vm1, %v5801_v14, %v5803_v17  ;;  %v6562_v14 = vld [vmem:[%s16390_s10 + $0xb8] sm:$0xff]  ;;  %v6563_v17 = vld [vmem:[%s16390_s10 + $0xc0] sm:$0xff] }
 0xafd   : > { %5811 = vmatprep.subr.mxu1 %v5805_v23  ;;  %v13143_v63 = vpack.c.bf16 %v6562_v14, %v6561_v25  ;;  %v6564_v23 = vld [vmem:[%s16390_s10 + $0xc8] sm:$0xff]  ;;  %v7474_v14 = vld [vmem:[%s16392_s1] sm:$0xf]  ;;  %s16395_s1 = sld [smem:[#allocation19_spill]] }
 0xafe   : > { %v5915_v31 = vpop.permute.xlu1 %5914  ;;  %5812 = vmatpush1.msra.mxu1 %v5804_v38  ;;  %v13145_v38 = vpack.c.bf16 %v6546_v7, %v6545_v26  ;;  %v13147_v9 = vpack.c.bf16 %v6564_v23, %v6563_v17 }
 0xaff   : > { %v5913_v15 = vpop.permute.xlu0 %5912 }
 0xb00   : > { %v5917_v59 = vsel %vm1283_vm3, %v5913_v15, %v5915_v31  ;;  %v6547_v31 = vld [vmem:[%s16390_s10 + $0x40] sm:$0xff] }
 0xb01   : > { %5923 = vmatprep.subr.mxu1 %v5917_v59  ;;  %v6566_v59 = vld [vmem:[%s16390_s10 + $0xd8] sm:$0xff] }
 0xb02   : > { %12210 = vmatmul.mubr.msk.f32.vlgmr.msra.gmra.mrb[4].mxu1 %vm3594_vm5, %v12209_v2  ;;  %v6120_v10 = vpop.permute.xlu1 %6119  ;;  %v6565_v2 = vld [vmem:[%s16390_s10 + $0xd0] sm:$0xff] }
 0xb03   : > { %v5911_v30 = vpop.permute.xlu0 %5910  ;;  %5987 = vmatprep.mubr.f32.mxu1 %v15490_v34 }
 0xb04   : > { %v5916_v0 = vsel %vm1283_vm3, %v5911_v30, %v5913_v15  ;;  %v6548_v15 = vld [vmem:[%s16390_s10 + $0x48] sm:$0xff]  ;;  %v13151_v30 = vpack.c.bf16 %v6566_v59, %v6565_v2  ;;  %v6664_v59 = vld [vmem:[%s16394_s28] sm:$0xf] }
 0xb05   : > { %5924 = vmatpush1.msra.mxu1 %v5916_v0  ;;  %v13149_v44 = vpack.c.bf16 %v6548_v15, %v6547_v31  ;;  %v6550_v0 = vld [vmem:[%s16390_s10 + $0x58] sm:$0xff]  ;;  %v12231_v31 = vld [vmem:[%s16393_s26 + $0x4] sm:$0xf]  ;;  %s16396_s26 = sld [smem:[#allocation12_spill]] }
 0xb06   : > { %6015 = vmatprep.subr.mxu1 %v6009_v41  ;;  %v6118_v18 = vpop.permute.xlu1 %6117  ;;  %v6567_v41 = vld [vmem:[%s16390_s10 + $0xe0] sm:$0xff] }
 0xb07   : > { %v6122_v29 = vpop.permute.xlu0 %6121  ;;  %v6123_v46 = vsel %vm1152_vm2, %v6118_v18, %v6120_v10  ;;  %v6552_v18 = vld [vmem:[%s16390_s10 + $0x68] sm:$0xff] }
 0xb08   : > { %v6124_v62 = vsel %vm1152_vm2, %v6120_v10, %v6122_v29  ;;  %v6549_v10 = vld [vmem:[%s16390_s10 + $0x50] sm:$0xff]  ;;  %vm6649_vm2 = vcmask 519168  }
 0xb09   : > { %v13153_v29 = vpack.c.bf16 %v6550_v0, %v6549_v10  ;;  %v12235_v0 = vld [vmem:[%s16394_s28 + $0x8] sm:$0xf] }
 0xb0a   : > { %12213 = vmatmul.mubr.msk.f32.vlgmr.msra.gmra.mrb[4].mxu1 %vm3594_vm5, %v12212_v8  ;;  %v6234_v16 = vpop.permute.xlu1 %6233  ;;  %v13155_v8 = vpack.c.bf16 %v6568_v33, %v6567_v41  ;;  %v15672_v33 = vld [vmem:[%s16391_s6 + $0x4] ss:$0 sm:$0xff] }
 0xb0b   : > { %6016 = vmatpush1.msra.mxu1 %v6008_v12  ;;  %6079 = vmatprep.mubr.f32.mxu1 %v15490_v34  ;;  %v6232_v27 = vpop.permute.xlu0 %6231  ;;  %v6551_v12 = vld [vmem:[%s16390_s10 + $0x60] sm:$0xff] }
 0xb0c   : > { %6130 = vmatprep.subr.mxu1 %v6124_v62  ;;  %v6236_v20 = vsel %vm3772_vm0, %v6232_v27, %v6234_v16  ;;  %v6569_v62 = vld [vmem:[%s16390_s10 + $0xf0] sm:$0xff] }
 0xb0e   : > { %v6344_v54 = vpop.permute.xlu1 %6343 }
 0xb0f   : > { %v6230_v60 = vpop.permute.xlu0 %6229 }
 0xb10   : > { %v6235_v39 = vsel %vm3772_vm0, %v6230_v60, %v6232_v27  ;;  %v6570_v27 = vld [vmem:[%s16390_s10 + $0xf8] sm:$0xff] }
 0xb11   : > { %v13159_v16 = vpack.c.bf16 %v6570_v27, %v6569_v62  ;;  %v6554_v60 = vld [vmem:[%s16390_s10 + $0x78] sm:$0xff]  ;;  %v12241_v27 = vld [vmem:[%s16394_s28 + $0x10] sm:$0xf] }
 0xb12   : > { %12216 = vmatmul.mubr.msk.f32.vlgmr.msra.gmra.mrb[4].mxu1 %vm3594_vm5, %v12215_v51  ;;  %v6342_v36 = vpop.permute.xlu1 %6341  ;;  %v13157_v51 = vpack.c.bf16 %v6552_v18, %v6551_v12  ;;  %v12238_v12 = vld [vmem:[%s16394_s28 + $0xc] sm:$0xf] }
 0xb13   : > { %6131 = vmatpush1.msra.mxu1 %v6123_v46  ;;  %6194 = vmatprep.mubr.f32.mxu1 %v15490_v34  ;;  %v6346_v42 = vpop.permute.xlu0 %6345  ;;  %v6347_v43 = vsel %vm3570_vm14, %v6342_v36, %v6344_v54  ;;  %v6553_v46 = vld [vmem:[%s16390_s10 + $0x70] sm:$0xff]  ;;  %v15598_v36 = vld [vmem:[%s16391_s6 + $0x5] ss:$0 sm:$0xff] }
 0xb14   : > { %6242 = vmatprep.subr.mxu1 %v6236_v20  ;;  %v6348_v32 = vsel %vm3570_vm14, %v6344_v54, %v6346_v42  ;;  %v13161_v20 = vpack.c.bf16 %v6554_v60, %v6553_v46  ;;  %v15577_v42 = vld [vmem:[%s16391_s6] ss:$0 sm:$0xff]  ;;  %v15584_v54 = vld [vmem:[%s16391_s6 + $0x3] ss:$0 sm:$0xff]  ;;  %v12247_v60 = vld [vmem:[%s16394_s28 + $0x18] sm:$0xf] }
 0xb15   : > { %6659 = vrot.lane.b32.xlu1 %v15577_v42, %s13532_s18 }
 0xb19   : > { %6943 = vrot.lane.b32.xlu1 %v15584_v54, %s16346_s23 }
 0xb1a   : > { %12219 = vmatmul.mubr.msk.f32.vlgmr.msra.gmra.mrb[4].mxu1 %vm3594_vm5, %v12218_v58  ;;  %v15574_v58 = vld [vmem:[%s16391_s6 + $0x1] ss:$0 sm:$0xff] }
 0xb1b   : > { %6243 = vmatpush1.msra.mxu1 %v6235_v39  ;;  %6306 = vmatprep.mubr.f32.mxu1 %v15490_v34  ;;  %v15587_v39 = vld [vmem:[%s16391_s6 + $0x2] ss:$0 sm:$0xff] }
 0xb1c   : > { %6354 = vmatprep.subr.mxu1 %v6348_v32  ;;  %6671 = vrot.lane.b32.xlu0 %v15574_v58, %s16290_s2  ;;  %v15595_v32 = vld [vmem:[%s16391_s6 + $0x6] ss:$0 sm:$0xff] }
 0xb1d   : > { %7210 = vrot.lane.b32.xlu1 %v15595_v32, %s13534_s5 }
 0xb20   : > { %6847 = vrot.lane.b32.xlu0 %v15587_v39, %s16286_s14 }
 0xb22   : > { %12222 = vmatmul.mubr.msk.f32.vlgmr.msra.gmra.mrb[4].mxu1 %vm3594_vm5, %v12221_v57  ;;  %v15605_v57 = vld [vmem:[%s16391_s6 + $0x8] ss:$0 sm:$0xff] }
 0xb23   : > { %6355 = vmatpush1.msra.mxu1 %v6347_v43  ;;  %6418 = vmatprep.mubr.f32.mxu1 %v15490_v34  ;;  %v15608_v43 = vld [vmem:[%s16391_s6 + $0x7] ss:$0 sm:$0xff] }
 0xb24   : > { %7120 = vrot.lane.b32.xlu0 %v15598_v36, %s16347_s16  ;;  %7390 = vrot.lane.b32.xlu1 %v15605_v57, %s13535_s9 }
 0xb28   : > { %7300 = vrot.lane.b32.xlu0 %v15608_v43, %s16288_s13 }
 0xb2a   : > { %12225 = vmatmul.mubr.msk.f32.vlgmr.msra.gmra.mrb[4].mxu1 %vm3594_vm5, %v12224_v47 }
 0xb2b   : > { %6530 = vmatprep.mubr.f32.mxu1 %v15490_v34 }
 0xb63   : > { %v6458_v49 = vpop.permute.xlu1 %6457 }
 0xb65   : > { %v6456_v45 = vpop.permute.xlu0 %6455 }
 0xb66   : > { %v6460_v3 = vsel %vm3546_vm15, %v6456_v45, %v6458_v49 }
 0xb67   : > { %6466 = vmatprep.subr.mxu1 %v6460_v3 }
 0xb69   : > { %v6454_v13 = vpop.permute.xlu0 %6453 }
 0xb6a   : > { %v6459_v61 = vsel %vm3546_vm15, %v6454_v13, %v6456_v45 }
 0xb6b   : > { %6467 = vmatpush1.msra.mxu1 %v6459_v61 }
 0xb6c   : > { %12228 = vmatmul.mubr.msk.f32.vlgmr.msra.gmra.mrb[4].mxu1 %vm3594_vm5, %v12227_v40  ;;  %13132 = vmatprep.subr.bf16.mxu1 %v13131_v48 }
 0xb6d   : > { %13134 = vmatpush3.bf16.msra.mxu1 %v13133_v24 }
 0xb6e   : > { %13136 = vmatprep.subr.bf16.mxu1 %v13135_v22 }
 0xb71   : > { %13138 = vmatpush3.bf16.msra.mxu1 %v13137_v52 }
 0xb72   : > { %13140 = vmatprep.subr.bf16.mxu1 %v13139_v19 }
 0xb74   : > { %v6575_v45 = vpop.permute.xlu1 %6574 }
 0xb75   : > { %13142 = vmatpush3.bf16.msra.mxu1 %v13141_v6 }
 0xb76   : > { %13144 = vmatprep.subr.bf16.mxu1 %v13143_v63 }
 0xb79   : > { %13146 = vmatpush3.bf16.msra.mxu1 %v13145_v38 }
 0xb7a   : > { %13148 = vmatprep.subr.bf16.mxu1 %v13147_v9 }
 0xb7d   : > { %13150 = vmatpush3.bf16.msra.mxu1 %v13149_v44 }
 0xb7e   : > { %13152 = vmatprep.subr.bf16.mxu1 %v13151_v30 }
 0xb81   : > { %13154 = vmatpush3.bf16.msra.mxu1 %v13153_v29 }
 0xb82   : > { %13156 = vmatprep.subr.bf16.mxu1 %v13155_v8 }
 0xb85   : > { %13158 = vmatpush3.bf16.msra.mxu1 %v13157_v51 }
 0xb86   : > { %13160 = vmatprep.subr.bf16.mxu1 %v13159_v16  ;;  %v12244_v16 = vld [vmem:[%s16394_s28 + $0x14] sm:$0xf] }
 0xb87   : > { %v6660_v3 = vpop.permute.xlu1 %6659 }
 0xb88   : > { %v6662_v28 = vmul.f32 %v15490_v34, %v6660_v3 }
 0xb89   : > { %13162 = vmatpush3.bf16.msra.mxu1 %v13161_v20 }
 0xb8a   : > { %12579 = vmatprep.subr.mxu1 %v15490_v34 }
 0xb8b   : > { %v6944_v1 = vpop.permute.xlu1 %6943 }
 0xb8c   : > { %v6946_v48 = vmul.f32 %v15490_v34, %v6944_v1 }
 0xb8e   : > { %v6672_v55 = vpop.permute.xlu0 %6671 }
 0xb8f   : > { %v6674_v37 = vmul.f32 %v15490_v34, %v6672_v55  ;;  %v7211_v6 = vpop.permute.xlu1 %7210 }
 0xb91   : > { %6680 = vrot.lane.b32.xlu0 %v6674_v37, %s16288_s13 }
 0xb92   : > { %v6848_v50 = vpop.permute.xlu0 %6847 }
 0xb93   : > { %v6850_v11 = vmul.f32 %v15490_v34, %v6848_v50 }
 0xb95   : > { %6761 = vrot.lane.b32.xlu0 %v6662_v28, %s13535_s9 }
 0xb96   : > { %v7121_v4 = vpop.permute.xlu0 %7120  ;;  %v7391_v7 = vpop.permute.xlu1 %7390 }
 0xb99   : > { %6856 = vrot.lane.b32.xlu0 %v6850_v11, %s13534_s5 }
 0xb9a   : > { %v7301_v19 = vpop.permute.xlu0 %7300 }
 0xb9d   : > { %6952 = vrot.lane.b32.xlu0 %v6946_v48, %s16347_s16 }
 0xc03   : > { %v6681_v23 = vpop.permute.xlu0 %6680 }
 0xc07   : > { %v6762_v38 = vpop.permute.xlu0 %6761 }
 0xc0b   : > { %v6857_v30 = vpop.permute.xlu0 %6856 }
 0xc0f   : > { %v6953_v29 = vpop.permute.xlu0 %6952 }
 0xc3f   : > { %v6532_v47 = vpop.f32.mrb[4].mxu1 }
 0xc40   : > { %v6534_v49 = vpop.f32.mrb[5].mxu1 }
 0xc41   : > { %6641 = vmatprep.mubr.f32.mxu1 %v6534_v49 }
 0xc42   : > { %6642 = vmatmul.mubr.f32.vlgmr.msra.gmra.mrb[6].mxu1 %v6532_v47  ;;  %v12250_v47 = vld [vmem:[%s16394_s28 + $0x1c] sm:$0xf] }
 0xc43   : > { %12581 = vmatprep.mubr.msk.f32.mxu1 %vm13537_vm7, %v15490_v34 }
 0xd15   : > { %v12446_v13 = vpop.f32.mrb[6].mxu1 }
 0xd16   : > { %v12447_v40 = vpop.f32.mrb[7].mxu1 }
 0xd17   : > { %v12448_v24 = vadd.f32 %v12447_v40, %v12446_v13 }
 0xd19   : > { %v6644_v61 = vadd.f32 %v12448_v24, %v6575_v45  ;;  %v12253_v45 = vld [vmem:[%s16394_s28 + $0x20] sm:$0xf] }
 0xd1b   : > { %v6647_v22 = vmax.f32 %v6644_v61, 0.0 }
 0xd1d   : > { %v15622_v21 = vadd.f32 %v6647_v22, %v6644_v61 }
 0xd1f   : > { %6650 = vst.msk [vmem:[#allocation2 + $0x8] sm:$0xf] %vm6649_vm2, %v15622_v21 }
 0xd26   : > { %v6652_v56 = vld [vmem:[#allocation2 + $0x8] sm:$0xff] }
 0xd27   : > { %v6675_v5 = vmul.f32 %v6672_v55, %v6652_v56  ;;  %v7123_v52 = vmul.f32 %v7121_v4, %v6652_v56  ;;  %v6663_v35 = vmul.f32 %v6660_v3, %v6652_v56  ;;  %v7303_v53 = vmul.f32 %v7301_v19, %v6652_v56 }
 0xd28   : > { %v6851_v25 = vmul.f32 %v6848_v50, %v6652_v56  ;;  %v6947_v63 = vmul.f32 %v6944_v1, %v6652_v56  ;;  %v7213_v26 = vmul.f32 %v7211_v6, %v6652_v56  ;;  %v7393_v17 = vmul.f32 %v7391_v7, %v6652_v56 }
 0xd29   : > { %6682 = vrot.lane.b32.xlu1 %v6675_v5, %s16288_s13  ;;  %7127 = vrot.lane.b32.xlu0 %v7123_v52, %s16346_s23  ;;  %v7037_v62 = vmul.f32 %v15672_v33, %v6652_v56 }
 0xd2d   : > { %6763 = vrot.lane.b32.xlu1 %v6663_v35, %s13535_s9  ;;  %7307 = vrot.lane.b32.xlu0 %v7303_v53, %s16290_s2 }
 0xd31   : > { %6858 = vrot.lane.b32.xlu1 %v6851_v25, %s13534_s5  ;;  %7477 = vperm.xlu0 %13379, %v7474_v14  }
 0xd35   : > { %6954 = vrot.lane.b32.xlu1 %v6947_v63, %s16347_s16  ;;  %7492 = vrot.lane.b32.xlu0 %v15577_v42, %s13532_s18 }
 0xd39   : > { %7217 = vrot.lane.b32.xlu1 %v7213_v26, %s16286_s14  ;;  %7774 = vrot.lane.b32.xlu0 %v15584_v54, %s16346_s23 }
 0xd3d   : > { %7397 = vrot.lane.b32.xlu1 %v7393_v17, %s13532_s18  ;;  %8041 = vrot.lane.b32.xlu0 %v15595_v32, %s13534_s5 }
 0xd41   : > { %7504 = vrot.lane.b32.xlu1 %v15574_v58, %s16290_s2  ;;  %8221 = vrot.lane.b32.xlu0 %v15605_v57, %s13535_s9 }
 0xd45   : > { %7679 = vrot.lane.b32.xlu1 %v15587_v39, %s16286_s14  ;;  %s16397_s14 = smov %s16396_s26 }
 0xd49   : > { %7951 = vrot.lane.b32.xlu1 %v15598_v36, %s16347_s16 }
 0xd4d   : > { %8131 = vrot.lane.b32.xlu1 %v15608_v43, %s16288_s13 }
 0xd9b   : > { %v6683_v9 = vpop.permute.xlu1 %6682  ;;  %v7128_v51 = vpop.permute.xlu0 %7127 }
 0xd9c   : > { %v6684_v15 = vsel %vm3594_vm5, %v6681_v23, %v6683_v9 }
 0xd9d   : > { %12580 = vmatpush3.msra.mxu1 %v6684_v15 }
 0xd9e   : > { %12582 = vmatmul.mubr.msk.f32.vlgmr.msra.gmra.mrb[8].mxu1 %vm3594_vm5, %v12231_v31  ;;  %12584 = vmatprep.subr.mxu1 %v15490_v34 }
 0xd9f   : > { %v6764_v2 = vpop.permute.xlu1 %6763  ;;  %12586 = vmatprep.mubr.msk.f32.mxu1 %vm13537_vm7, %v15490_v34  ;;  %v7308_v20 = vpop.permute.xlu0 %7307 }
 0xda0   : > { %v6766_v44 = vsel %vm6765_vm8, %v6762_v38, %v6764_v2 }
 0xda1   : > { %12585 = vmatpush3.msra.mxu1 %v6766_v44 }
 0xda2   : > { %12587 = vmatmul.mubr.msk.f32.vlgmr.msra.gmra.mrb[10].mxu1 %vm3594_vm5, %v6664_v59  ;;  %12589 = vmatprep.subr.mxu1 %v15490_v34 }
 0xda3   : > { %v6859_v10 = vpop.permute.xlu1 %6858  ;;  %12591 = vmatprep.mubr.msk.f32.mxu1 %vm13537_vm7, %v15490_v34 }
 0xda4   : > { %v6861_v41 = vsel %vm6860_vm9, %v6857_v30, %v6859_v10 }
 0xda5   : > { %12590 = vmatpush3.msra.mxu1 %v6861_v41 }
 0xda6   : > { %12592 = vmatmul.mubr.msk.f32.vlgmr.msra.gmra.mrb[12].mxu1 %vm3594_vm5, %v12235_v0  ;;  %12594 = vmatprep.subr.mxu1 %v15490_v34 }
 0xda7   : > { %v6955_v8 = vpop.permute.xlu1 %6954  ;;  %12596 = vmatprep.mubr.msk.f32.mxu1 %vm13537_vm7, %v15490_v34 }
 0xda8   : > { %v6956_v18 = vsel %vm1283_vm3, %v6953_v29, %v6955_v8 }
 0xda9   : > { %12595 = vmatpush3.msra.mxu1 %v6956_v18 }
 0xdaa   : > { %12597 = vmatmul.mubr.msk.f32.vlgmr.msra.gmra.mrb[14].mxu1 %vm3594_vm5, %v12238_v12  ;;  %12599 = vmatprep.subr.mxu1 %v15490_v34 }
 0xdab   : > { %12600 = vmatpush3.msra.mxu1 %v7037_v62  ;;  %12601 = vmatprep.mubr.msk.f32.mxu1 %vm13537_vm7, %v15490_v34  ;;  %v7218_v46 = vpop.permute.xlu1 %7217 }
 0xdac   : > { %12604 = vmatprep.subr.mxu1 %v15490_v34 }
 0xdae   : > { %12602 = vmatmul.mubr.msk.f32.vlgmr.msra.gmra.mrb[16].mxu1 %vm3594_vm5, %v12241_v27 }
 0xdaf   : > { %12605 = vmatpush3.msra.mxu1 %v7128_v51  ;;  %12606 = vmatprep.mubr.msk.f32.mxu1 %vm13537_vm7, %v15490_v34  ;;  %v7398_v49 = vpop.permute.xlu1 %7397 }
 0xdb0   : > { %12609 = vmatprep.subr.mxu1 %v15490_v34  ;;  %v7478_v3 = vpop.permute.xlu0 %7477 }
 0xdb2   : > { %12607 = vmatmul.mubr.msk.f32.vlgmr.msra.gmra.mrb[18].mxu1 %vm3594_vm5, %v12244_v16 }
 0xdb3   : > { %12610 = vmatpush3.msra.mxu1 %v7218_v46  ;;  %12611 = vmatprep.mubr.msk.f32.mxu1 %vm13537_vm7, %v15490_v34  ;;  %v7505_v55 = vpop.permute.xlu1 %7504 }
 0xdb4   : > { %12614 = vmatprep.subr.mxu1 %v15490_v34  ;;  %v7507_v37 = vmul.f32 %v15490_v34, %v7505_v55  ;;  %v7493_v28 = vpop.permute.xlu0 %7492 }
 0xdb5   : > { %v7495_v50 = vmul.f32 %v15490_v34, %v7493_v28 }
 0xdb6   : > { %12612 = vmatmul.mubr.msk.f32.vlgmr.msra.gmra.mrb[20].mxu1 %vm3594_vm5, %v12247_v60  ;;  %7513 = vrot.lane.b32.xlu1 %v7507_v37, %s16288_s13  ;;  %v12261_v37 = vld [vmem:[%s16397_s14 + $0x8] sm:$0xf] }
 0xdb7   : > { %12615 = vmatpush3.msra.mxu1 %v7308_v20  ;;  %12616 = vmatprep.mubr.msk.f32.mxu1 %vm13537_vm7, %v15490_v34  ;;  %v7680_v11 = vpop.permute.xlu1 %7679 }
 0xdb8   : > { %12619 = vmatprep.subr.mxu1 %v15490_v34  ;;  %v7682_v1 = vmul.f32 %v15490_v34, %v7680_v11  ;;  %v7775_v48 = vpop.permute.xlu0 %7774 }
 0xdb9   : > { %v7777_v13 = vmul.f32 %v15490_v34, %v7775_v48 }
 0xdba   : > { %12617 = vmatmul.mubr.msk.f32.vlgmr.msra.gmra.mrb[22].mxu1 %vm3594_vm5, %v12250_v47  ;;  %7594 = vrot.lane.b32.xlu1 %v7495_v50, %s13535_s9 }
 0xdbb   : > { %12620 = vmatpush3.msra.mxu1 %v7398_v49  ;;  %12621 = vmatprep.mubr.msk.f32.mxu1 %vm13537_vm7, %v15490_v34  ;;  %v7952_v41 = vpop.permute.xlu1 %7951 }
 0xdbc   : > { %12624 = vmatprep.subr.mxu1 %v15490_v34  ;;  %v8042_v16 = vpop.permute.xlu0 %8041 }
 0xdbe   : > { %12622 = vmatmul.mubr.msk.f32.vlgmr.msra.gmra.mrb[24].mxu1 %vm3594_vm5, %v12253_v45  ;;  %7688 = vrot.lane.b32.xlu1 %v7682_v1, %s13534_s5 }
 0xdbf   : > { %12626 = vmatprep.mubr.msk.f32.mxu1 %vm13537_vm7, %v15490_v34  ;;  %v8132_v12 = vpop.permute.xlu1 %8131 }
 0xdc0   : > { %v8222_v20 = vpop.permute.xlu0 %8221 }
 0xdc2   : > { %7783 = vrot.lane.b32.xlu1 %v7777_v13, %s16347_s16 }
 0xe71   : > { %v6755_v40 = vpop.f32.mrb[8].mxu1 }
 0xe72   : > { %v12583_v24 = vpop.f32.mrb[9].mxu1 }
 0xe75   : > { %v6837_v61 = vpop.f32.mrb[10].mxu1 }
 0xe76   : > { %v6838_v22 = vadd.f32 %v6837_v61, %v6755_v40  ;;  %v12588_v4 = vpop.f32.mrb[11].mxu1  ;;  %v12267_v40 = vld [vmem:[%s16397_s14 + $0x10] sm:$0xf] }
 0xe77   : > { %v12273_v4 = vld [vmem:[%s16397_s14 + $0x18] sm:$0xf] }
 0xe79   : > { %v6932_v56 = vpop.f32.mrb[12].mxu1 }
 0xe7a   : > { %v6936_v5 = vadd.f32 %v6932_v56, %v6838_v22  ;;  %v12593_v52 = vpop.f32.mrb[13].mxu1  ;;  %v12270_v22 = vld [vmem:[%s16397_s14 + $0x14] sm:$0xf] }
 0xe7d   : > { %v7027_v19 = vpop.f32.mrb[14].mxu1 }
 0xe7e   : > { %v7031_v35 = vadd.f32 %v7027_v19, %v6936_v5  ;;  %v12598_v53 = vpop.f32.mrb[15].mxu1  ;;  %v12276_v19 = vld [vmem:[%s16397_s14 + $0x1c] sm:$0xf] }
 0xe81   : > { %v7109_v25 = vpop.f32.mrb[16].mxu1 }
 0xe82   : > { %v7113_v14 = vadd.f32 %v7109_v25, %v7031_v35  ;;  %v12603_v6 = vpop.f32.mrb[17].mxu1  ;;  %v12279_v35 = vld [vmem:[%s16397_s14 + $0x20] sm:$0xf] }
 0xe85   : > { %v7199_v63 = vpop.f32.mrb[18].mxu1 }
 0xe86   : > { %v7203_v26 = vadd.f32 %v7199_v63, %v7113_v14  ;;  %v12608_v7 = vpop.f32.mrb[19].mxu1 }
 0xe89   : > { %v7289_v17 = vpop.f32.mrb[20].mxu1 }
 0xe8a   : > { %v7293_v23 = vadd.f32 %v7289_v17, %v7203_v26  ;;  %v12613_v38 = vpop.f32.mrb[21].mxu1 }
 0xe8d   : > { %v7379_v9 = vpop.f32.mrb[22].mxu1 }
 0xe8e   : > { %v7383_v31 = vadd.f32 %v7379_v9, %v7293_v23  ;;  %v12618_v15 = vpop.f32.mrb[23].mxu1 }
 0xe91   : > { %v7469_v2 = vpop.f32.mrb[24].mxu1 }
 0xe92   : > { %v7473_v59 = vadd.f32 %v7469_v2, %v7383_v31  ;;  %v12623_v44 = vpop.f32.mrb[25].mxu1 }
 0xe94   : > { %v7480_v30 = vadd.f32 %v7478_v3, %v7473_v59 }
 0xe96   : > { %v7481_v10 = vmax.f32 %v7480_v30, 0.0 }
 0xe98   : > { %v15717_v0 = vadd.f32 %v7481_v10, %v15622_v21  ;;  %v8305_v21 = vld [vmem:[%s16395_s1] sm:$0xf]  ;;  %s16399_s1 = smov 8  }
 0xe9a   : > { %7483 = vst.msk [vmem:[#allocation2 + $0x8] sm:$0xf] %vm6649_vm2, %v15717_v0 }
 0xea1   : > { %v7485_v29 = vld [vmem:[#allocation2 + $0x8] sm:$0xff] }
 0xea2   : > { %v7954_v8 = vmul.f32 %v7952_v41, %v7485_v29  ;;  %v7508_v18 = vmul.f32 %v7505_v55, %v7485_v29  ;;  %v8134_v62 = vmul.f32 %v8132_v12, %v7485_v29  ;;  %v7496_v27 = vmul.f32 %v7493_v28, %v7485_v29 }
 0xea3   : > { %v7683_v51 = vmul.f32 %v7680_v11, %v7485_v29  ;;  %v7778_v46 = vmul.f32 %v7775_v48, %v7485_v29  ;;  %v8044_v60 = vmul.f32 %v8042_v16, %v7485_v29  ;;  %v8224_v47 = vmul.f32 %v8222_v20, %v7485_v29  ;;  %v12264_v11 = vld [vmem:[%s16397_s14 + $0xc] sm:$0xf] }
 0xea4   : > { %7958 = vrot.lane.b32.xlu1 %v7954_v8, %s16346_s23  ;;  %7515 = vrot.lane.b32.xlu0 %v7508_v18, %s16288_s13  ;;  %s16398_s13 = smov 121   ;;  %v7868_v48 = vmul.f32 %v15672_v33, %v7485_v29 }
 0xea8   : > { %8138 = vrot.lane.b32.xlu1 %v8134_v62, %s16290_s2  ;;  %7596 = vrot.lane.b32.xlu0 %v7496_v27, %s13535_s9 }
 0xeac   : > { %8308 = vperm.xlu1 %13380, %v8305_v21   ;;  %7690 = vrot.lane.b32.xlu0 %v7683_v51, %s13534_s5 }
 0xeb0   : > { %8323 = vrot.lane.b32.xlu1 %v15577_v42, %s13532_s18  ;;  %7785 = vrot.lane.b32.xlu0 %v7778_v46, %s16347_s16  ;;  %v7514_v42 = vpop.permute.xlu1 %7513 }
 0xeb4   : > { %8605 = vrot.lane.b32.xlu1 %v15584_v54, %s16346_s23  ;;  %8048 = vrot.lane.b32.xlu0 %v8044_v60, %s16398_s13  ;;  %v7595_v54 = vpop.permute.xlu1 %7594 }
 0xeb8   : > { %8872 = vrot.lane.b32.xlu1 %v15595_v32, %s13534_s5  ;;  %8228 = vrot.lane.b32.xlu0 %v8224_v47, %s13532_s18  ;;  %v12257_v32 = vld [vmem:[%s16396_s26 + $0x4] sm:$0xf]  ;;  %s16400_s26 = sld [smem:[#allocation20_spill]] }
 0xebc   : > { %8335 = vrot.lane.b32.xlu0 %v15574_v58, %s16290_s2 }
 0xec0   : > { %8510 = vrot.lane.b32.xlu0 %v15587_v39, %s16398_s13  ;;  %v7497_v39 = vld [vmem:[%s16397_s14] sm:$0xf] }
 0xec4   : > { %8782 = vrot.lane.b32.xlu0 %v15598_v36, %s16347_s16 }
 0xec8   : > { %8962 = vrot.lane.b32.xlu0 %v15608_v43, %s16399_s1  ;;  %v7689_v43 = vpop.permute.xlu1 %7688 }
 0xecc   : > { %v7784_v28 = vpop.permute.xlu1 %7783 }
 0xf16   : > { %v7516_v49 = vpop.permute.xlu0 %7515  ;;  %v7959_v24 = vpop.permute.xlu1 %7958 }
 0xf17   : > { %v7517_v45 = vsel %vm3594_vm5, %v7514_v42, %v7516_v49 }
 0xf18   : > { %12625 = vmatpush3.msra.mxu1 %v7517_v45 }
 0xf19   : > { %12627 = vmatmul.mubr.msk.f32.vlgmr.msra.gmra.mrb[26].mxu1 %vm3594_vm5, %v12257_v32  ;;  %12629 = vmatprep.subr.mxu1 %v15490_v34 }
 0xf1a   : > { %v7597_v58 = vpop.permute.xlu0 %7596  ;;  %12631 = vmatprep.mubr.msk.f32.mxu1 %vm13537_vm7, %v15490_v34  ;;  %v8139_v52 = vpop.permute.xlu1 %8138 }
 0xf1b   : > { %v7598_v36 = vsel %vm6765_vm8, %v7595_v54, %v7597_v58 }
 0xf1c   : > { %12630 = vmatpush3.msra.mxu1 %v7598_v36 }
 0xf1d   : > { %12632 = vmatmul.mubr.msk.f32.vlgmr.msra.gmra.mrb[28].mxu1 %vm3594_vm5, %v7497_v39  ;;  %12634 = vmatprep.subr.mxu1 %v15490_v34 }
 0xf1e   : > { %v7691_v55 = vpop.permute.xlu0 %7690  ;;  %12636 = vmatprep.mubr.msk.f32.mxu1 %vm13537_vm7, %v15490_v34 }
 0xf1f   : > { %v7692_v3 = vsel %vm6860_vm9, %v7689_v43, %v7691_v55 }
 0xf20   : > { %12635 = vmatpush3.msra.mxu1 %v7692_v3 }
 0xf21   : > { %12637 = vmatmul.mubr.msk.f32.vlgmr.msra.gmra.mrb[30].mxu1 %vm3594_vm5, %v12261_v37  ;;  %12639 = vmatprep.subr.mxu1 %v15490_v34 }
 0xf22   : > { %v7786_v50 = vpop.permute.xlu0 %7785  ;;  %12641 = vmatprep.mubr.msk.f32.mxu1 %vm13537_vm7, %v15490_v34 }
 0xf23   : > { %v7787_v1 = vsel %vm1283_vm3, %v7784_v28, %v7786_v50 }
 0xf24   : > { %12640 = vmatpush3.msra.mxu1 %v7787_v1  ;;  %v9144_v1 = vld [vmem:[%s16400_s26] sm:$0xff]  ;;  %s16291_s26 = smov 123  }
 0xf25   : > { %12642 = vmatmul.mubr.msk.f32.vlgmr.msra.gmra.mrb[32].mxu1 %vm3594_vm5, %v12264_v11  ;;  %12644 = vmatprep.subr.mxu1 %v15490_v34 }
 0xf26   : > { %12645 = vmatpush3.msra.mxu1 %v7868_v48  ;;  %v8049_v13 = vpop.permute.xlu0 %8048  ;;  %12646 = vmatprep.mubr.msk.f32.mxu1 %vm13537_vm7, %v15490_v34 }
 0xf27   : > { %12649 = vmatprep.subr.mxu1 %v15490_v34 }
 0xf29   : > { %12647 = vmatmul.mubr.msk.f32.vlgmr.msra.gmra.mrb[34].mxu1 %vm3594_vm5, %v12267_v40 }
 0xf2a   : > { %12650 = vmatpush3.msra.mxu1 %v7959_v24  ;;  %v8229_v61 = vpop.permute.xlu0 %8228  ;;  %12651 = vmatprep.mubr.msk.f32.mxu1 %vm13537_vm7, %v15490_v34  ;;  %v13538_v24 = vmov 0.0|0.0  }
 0xf2b   : > { %12654 = vmatprep.subr.mxu1 %v15490_v34  ;;  %v8309_v21 = vpop.permute.xlu1 %8308  ;;  %13163 = vmatprep.subr.bf16.mxu0 %v13538_v24 }
 0xf2d   : > { %12652 = vmatmul.mubr.msk.f32.vlgmr.msra.gmra.mrb[36].mxu1 %vm3594_vm5, %v12270_v22 }
 0xf2e   : > { %12655 = vmatpush3.msra.mxu1 %v8049_v13  ;;  %12656 = vmatprep.mubr.msk.f32.mxu1 %vm13537_vm7, %v15490_v34  ;;  %v8336_v56 = vpop.permute.xlu0 %8335 }
 0xf2f   : > { %12659 = vmatprep.subr.mxu1 %v15490_v34  ;;  %v8338_v5 = vmul.f32 %v15490_v34, %v8336_v56  ;;  %v8324_v46 = vpop.permute.xlu1 %8323 }
 0xf30   : > { %v8326_v32 = vmul.f32 %v15490_v34, %v8324_v46 }
 0xf31   : > { %12657 = vmatmul.mubr.msk.f32.vlgmr.msra.gmra.mrb[38].mxu1 %vm3594_vm5, %v12273_v4  ;;  %8344 = vrot.lane.b32.xlu1 %v8338_v5, %s16399_s1 }
 0xf32   : > { %12660 = vmatpush3.msra.mxu1 %v8139_v52  ;;  %12661 = vmatprep.mubr.msk.f32.mxu1 %vm13537_vm7, %v15490_v34  ;;  %v8511_v45 = vpop.permute.xlu0 %8510 }
 0xf33   : > { %12664 = vmatprep.subr.mxu1 %v15490_v34  ;;  %v8606_v20 = vpop.permute.xlu1 %8605 }
 0xf34   : > { %v8608_v43 = vmul.f32 %v15490_v34, %v8606_v20 }
 0xf35   : > { %12662 = vmatmul.mubr.msk.f32.vlgmr.msra.gmra.mrb[40].mxu1 %vm3594_vm5, %v12276_v19  ;;  %9052 = vrot.lane.b32.xlu1 %v15605_v57, %s13535_s9 }
 0xf36   : > { %12665 = vmatpush3.msra.mxu1 %v8229_v61  ;;  %12666 = vmatprep.mubr.msk.f32.mxu1 %vm13537_vm7, %v15490_v34  ;;  %v8783_v55 = vpop.permute.xlu0 %8782 }
 0xf37   : > { %12669 = vmatprep.subr.mxu1 %v15490_v34  ;;  %v8873_v49 = vpop.permute.xlu1 %8872 }
 0xf39   : > { %12667 = vmatmul.mubr.msk.f32.vlgmr.msra.gmra.mrb[42].mxu1 %vm3594_vm5, %v12279_v35 }
 0xf3a   : > { %12671 = vmatprep.mubr.msk.f32.mxu1 %vm13537_vm7, %v15490_v34  ;;  %v8963_v50 = vpop.permute.xlu0 %8962 }
 0xfa3   : > { %v8345_v39 = vpop.permute.xlu1 %8344 }
 0xfa7   : > { %v9053_v3 = vpop.permute.xlu1 %9052 }
 0xfec   : > { %v7588_v53 = vpop.f32.mrb[26].mxu1 }
 0xfed   : > { %v12628_v25 = vpop.f32.mrb[27].mxu1 }
 0xfee   : > { %v15833_v25 = vld [vmem:[#allocation2] sm:$0xff] }
 0xff0   : > { %v7669_v14 = vpop.f32.mrb[28].mxu1 }
 0xff1   : > { %v7670_v6 = vadd.f32 %v7669_v14, %v7588_v53  ;;  %v12633_v63 = vpop.f32.mrb[29].mxu1 }
 0xff4   : > { %v7763_v26 = vpop.f32.mrb[30].mxu1 }
 0xff5   : > { %v7767_v7 = vadd.f32 %v7763_v26, %v7670_v6  ;;  %v12638_v57 = vpop.f32.mrb[31].mxu1 }
 0xff8   : > { %v7858_v17 = vpop.f32.mrb[32].mxu1 }
 0xff9   : > { %v7862_v23 = vadd.f32 %v7858_v17, %v7767_v7  ;;  %v12643_v38 = vpop.f32.mrb[33].mxu1 }
 0xffc   : > { %v7940_v9 = vpop.f32.mrb[34].mxu1 }
 0xffd   : > { %v7944_v31 = vadd.f32 %v7940_v9, %v7862_v23  ;;  %v12648_v15 = vpop.f32.mrb[35].mxu1 }
0x1000   : > { %v8030_v2 = vpop.f32.mrb[36].mxu1 }
0x1001   : > { %v8034_v59 = vadd.f32 %v8030_v2, %v7944_v31  ;;  %v12653_v44 = vpop.f32.mrb[37].mxu1 }
0x1004   : > { %v8120_v30 = vpop.f32.mrb[38].mxu1 }
0x1005   : > { %v8124_v10 = vadd.f32 %v8120_v30, %v8034_v59  ;;  %v12658_v41 = vpop.f32.mrb[39].mxu1 }
0x1008   : > { %v8210_v29 = vpop.f32.mrb[40].mxu1 }
0x1009   : > { %v8214_v8 = vadd.f32 %v8210_v29, %v8124_v10  ;;  %v12663_v12 = vpop.f32.mrb[41].mxu1 }
0x100c   : > { %v8300_v18 = vpop.f32.mrb[42].mxu1 }
0x100d   : > { %v8304_v62 = vadd.f32 %v8300_v18, %v8214_v8  ;;  %v12668_v27 = vpop.f32.mrb[43].mxu1 }
0x100f   : > { %v8311_v51 = vadd.f32 %v8309_v21, %v8304_v62 }
0x1011   : > { %v8312_v16 = vmax.f32 %v8311_v51, 0.0 }
0x1013   : > { %v8313_v60 = vadd.f32 %v8312_v16, %v15717_v0  ;;  %v8513_v0 = vmul.f32 %v15490_v34, %v8511_v45 }
0x1015   : > { %8314 = vst.msk [vmem:[#allocation2 + $0x8] sm:$0xf] %vm6649_vm2, %v8313_v60 }
0x101c   : > { %v15800_v47 = vld [vmem:[#allocation2 + $0x8] sm:$0xff] }
0x101d   : > { %v8339_v42 = vmul.f32 %v8336_v56, %v15800_v47  ;;  %v8327_v54 = vmul.f32 %v8324_v46, %v15800_v47  ;;  %v8514_v58 = vmul.f32 %v8511_v45, %v15800_v47  ;;  %v8609_v36 = vmul.f32 %v8606_v20, %v15800_v47 }
0x101e   : > { %v8875_v37 = vmul.f32 %v8873_v49, %v15800_v47  ;;  %v8785_v28 = vmul.f32 %v8783_v55, %v15800_v47  ;;  %v9055_v34 = vmul.f32 %v9053_v3, %v15800_v47  ;;  %v8965_v11 = vmul.f32 %v8963_v50, %v15800_v47 }
0x101f   : > { %8346 = vrot.lane.b32.xlu0 %v8339_v42, %s16399_s1  ;;  %8427 = vrot.lane.b32.xlu1 %v8327_v54, %s13535_s9  ;;  %s16401_s1 = sld [smem:[#allocation29_spill]]  ;;  %v8699_v30 = vmul.f32 %v15672_v33, %v15800_v47 }
0x1023   : > { %8425 = vrot.lane.b32.xlu0 %v8326_v32, %s13535_s9  ;;  %8521 = vrot.lane.b32.xlu1 %v8514_v58, %s13534_s5  ;;  %s16405_s9 = sld [smem:[#allocation27_spill]] }
0x1025   : > { %s16402_s2 = smov %s16401_s1  ;;  %v9136_v48 = vld [vmem:[%s16401_s1] sm:$0xff]  ;;  %s16293_s1 = smov 125  }
0x1026   : > { %v9137_v13 = vld [vmem:[%s16402_s2 + $0x8] sm:$0xff]  ;;  %v9138_v40 = vld [vmem:[%s16402_s2 + $0x10] sm:$0xff]  ;;  %v9139_v22 = vld [vmem:[%s16402_s2 + $0x18] sm:$0xff] }
0x1027   : > { %8616 = vrot.lane.b32.xlu1 %v8609_v36, %s16347_s16  ;;  %8519 = vrot.lane.b32.xlu0 %v8513_v0, %s13534_s5  ;;  %s16403_s5 = smov 120   ;;  %v13164_v61 = vpack.c.bf16 %v9137_v13, %v9136_v48  ;;  %v13167_v4 = vpack.c.bf16 %v9139_v22, %v9138_v40  ;;  %v9140_v56 = vld [vmem:[%s16402_s2 + $0x20] sm:$0xff]  ;;  %v9141_v5 = vld [vmem:[%s16402_s2 + $0x28] sm:$0xff] }
0x1028   : > { %v13170_v52 = vpack.c.bf16 %v9141_v5, %v9140_v56  ;;  %v9142_v19 = vld [vmem:[%s16402_s2 + $0x30] sm:$0xff]  ;;  %v9143_v35 = vld [vmem:[%s16402_s2 + $0x38] sm:$0xff]  ;;  %s16408_s2 = smov 3  }
0x1029   : > { %13165 = vmatpush3.bf16.msra.mxu0 %v13164_v61  ;;  %v13173_v53 = vpack.c.bf16 %v9143_v35, %v9142_v19  ;;  %v15888_v21 = vld [vmem:[%s16405_s9 + $0x1] ss:$0 sm:$0xff]  ;;  %v15891_v51 = vld [vmem:[%s16405_s9] ss:$0 sm:$0xff]  ;;  %v15898_v16 = vld [vmem:[%s16405_s9 + $0x2] ss:$0 sm:$0xff] }
0x102a   : > { %13166 = vmatprep.subr.bf16.mxu0 %v13538_v24  ;;  %v15901_v46 = vld [vmem:[%s16405_s9 + $0x3] ss:$0 sm:$0xff]  ;;  %v15908_v60 = vld [vmem:[%s16405_s9 + $0x5] ss:$0 sm:$0xff]  ;;  %v15911_v20 = vld [vmem:[%s16405_s9 + $0x6] ss:$0 sm:$0xff] }
0x102b   : > { %8879 = vrot.lane.b32.xlu1 %v8875_v37, %s16398_s13  ;;  %8614 = vrot.lane.b32.xlu0 %v8608_v43, %s16347_s16  ;;  %s16295_s13 = smov 124   ;;  %v15918_v47 = vld [vmem:[%s16405_s9 + $0x7] ss:$0 sm:$0xff]  ;;  %v15921_v42 = vld [vmem:[%s16405_s9 + $0x8] ss:$0 sm:$0xff] }
0x102d   : > { %13168 = vmatpush3.bf16.msra.mxu0 %v13167_v4 }
0x102e   : > { %13169 = vmatprep.subr.bf16.mxu0 %v13538_v24 }
0x102f   : > { %9059 = vrot.lane.b32.xlu1 %v9055_v34, %s13532_s18  ;;  %8789 = vrot.lane.b32.xlu0 %v8785_v28, %s16346_s23  ;;  %s16404_s18 = sld [smem:[#allocation13_spill]] }
0x1031   : > { %13171 = vmatpush3.bf16.msra.mxu0 %v13170_v52 }
0x1032   : > { %13172 = vmatprep.subr.bf16.mxu0 %v13538_v24 }
0x1033   : > { %8969 = vrot.lane.b32.xlu0 %v8965_v11, %s16403_s5  ;;  %9246 = vrot.lane.b32.xlu1 %v15888_v21, %s16295_s13  ;;  %s16297_s5 = smov 3   ;;  %s16406_s13 = sld [smem:[#allocation21_spill]] }
0x1035   : > { %13174 = vmatpush3.bf16.msra.mxu0 %v13173_v53  ;;  %v12283_v6 = vld [vmem:[%s16404_s18 + $0x8] sm:$0xff]  ;;  %v8328_v38 = vld [vmem:[%s16404_s18] sm:$0xff]  ;;  %v12287_v15 = vld [vmem:[%s16404_s18 + $0x10] sm:$0xff] }
0x1036   : > { %12733 = vmatprep.subr.mxu0 %v15833_v25  ;;  %v12290_v44 = vld [vmem:[%s16404_s18 + $0x18] sm:$0xff]  ;;  %v12293_v10 = vld [vmem:[%s16404_s18 + $0x20] sm:$0xff]  ;;  %v12296_v33 = vld [vmem:[%s16404_s18 + $0x28] sm:$0xff] }
0x1037   : > { %9147 = vperm.xlu0 %13379, %v9144_v1   ;;  %v12299_v8 = vld [vmem:[%s16404_s18 + $0x30] sm:$0xff]  ;;  %v12302_v18 = vld [vmem:[%s16404_s18 + $0x38] sm:$0xff]  ;;  %v12305_v27 = vld [vmem:[%s16404_s18 + $0x40] sm:$0xff]  ;;  %9423 = vrot.lane.b32.xlu1 %v15898_v16, %s16293_s1  ;;  %s13544_s1 = smov 5  }
0x1039   : > { %v10050_v4 = vld [vmem:[%s16406_s13] sm:$0xff]  ;;  %s16413_s13 = smov 4  }
0x103b   : > { %9234 = vrot.lane.b32.xlu0 %v15891_v51, %s16291_s26  ;;  %9696 = vrot.lane.b32.xlu1 %v15908_v60, %s16347_s16  ;;  %s16300_s26 = smov 4  }
0x103f   : > { %9519 = vrot.lane.b32.xlu0 %v15901_v46, %s16346_s23  ;;  %9876 = vrot.lane.b32.xlu1 %v15918_v47, %s16300_s26 }
0x1043   : > { %9786 = vrot.lane.b32.xlu0 %v15911_v20, %s16297_s5 }
0x1047   : > { %9966 = vrot.lane.b32.xlu0 %v15921_v42, %s13544_s1 }
0x1091   : > { %v8347_v14 = vpop.permute.xlu0 %8346  ;;  %v8428_v26 = vpop.permute.xlu1 %8427 }
0x1092   : > { %v8348_v63 = vsel %vm3594_vm5, %v8345_v39, %v8347_v14 }
0x1093   : > { %12670 = vmatpush3.msra.mxu1 %v8348_v63 }
0x1094   : > { %12672 = vmatmul.mubr.msk.f32.vlgmr.msra.gmra.mrb[44].mxu1 %vm3594_vm5, %v12283_v6  ;;  %12674 = vmatprep.subr.mxu1 %v15833_v25 }
0x1095   : > { %v8426_v7 = vpop.permute.xlu0 %8425  ;;  %12676 = vmatprep.mubr.msk.f32.mxu1 %vm13537_vm7, %v15833_v25  ;;  %v8522_v17 = vpop.permute.xlu1 %8521 }
0x1096   : > { %v8429_v57 = vsel %vm6765_vm8, %v8426_v7, %v8428_v26 }
0x1097   : > { %12675 = vmatpush3.msra.mxu1 %v8429_v57 }
0x1098   : > { %12679 = vmatprep.subr.mxu1 %v15833_v25 }
0x1099   : > { %v8520_v23 = vpop.permute.xlu0 %8519  ;;  %v8617_v2 = vpop.permute.xlu1 %8616 }
0x109a   : > { %v8523_v9 = vsel %vm6860_vm9, %v8520_v23, %v8522_v17 }
0x109c   : > { %12677 = vmatmul.mubr.msk.f32.vlgmr.msra.gmra.mrb[44].mxu1 %vm3594_vm5, %v8328_v38 }
0x109d   : > { %12680 = vmatpush3.msra.mxu1 %v8523_v9  ;;  %12681 = vmatprep.mubr.msk.f32.mxu1 %vm13537_vm7, %v15833_v25  ;;  %v8615_v31 = vpop.permute.xlu0 %8614  ;;  %v8880_v29 = vpop.permute.xlu1 %8879 }
0x109e   : > { %12684 = vmatprep.subr.mxu1 %v15833_v25  ;;  %v8618_v59 = vsel %vm1283_vm3, %v8615_v31, %v8617_v2  ;;  %v15977_v31 = vld [vmem:[%s16405_s9 + $0x4] ss:$0 sm:$0xff] }
0x10a1   : > { %v8790_v41 = vpop.permute.xlu0 %8789  ;;  %v9060_v62 = vpop.permute.xlu1 %9059 }
0x10a4   : > { %12682 = vmatmul.mubr.msk.f32.vlgmr.msra.gmra.mrb[44].mxu1 %vm3594_vm5, %v12287_v15 }
0x10a5   : > { %12685 = vmatpush3.msra.mxu1 %v8618_v59  ;;  %12686 = vmatprep.mubr.msk.f32.mxu1 %vm13537_vm7, %v15833_v25  ;;  %v8970_v12 = vpop.permute.xlu0 %8969  ;;  %v9247_v54 = vpop.permute.xlu1 %9246 }
0x10a6   : > { %12689 = vmatprep.subr.mxu1 %v15833_v25  ;;  %v9249_v49 = vmul.f32 %v15833_v25, %v9247_v54 }
0x10a8   : > { %9255 = vrot.lane.b32.xlu1 %v9249_v49, %s16300_s26 }
0x10a9   : > { %v9424_v36 = vpop.permute.xlu1 %9423 }
0x10aa   : > { %v9426_v43 = vmul.f32 %v15833_v25, %v9424_v36 }
0x10ac   : > { %12687 = vmatmul.mubr.msk.f32.vlgmr.msra.gmra.mrb[44].mxu1 %vm3594_vm5, %v12290_v44 }
0x10ad   : > { %12690 = vmatpush3.msra.mxu1 %v8699_v30  ;;  %12691 = vmatprep.mubr.msk.f32.mxu1 %vm13537_vm7, %v15833_v25  ;;  %v9697_v1 = vpop.permute.xlu1 %9696 }
0x10ae   : > { %12694 = vmatprep.subr.mxu1 %v15833_v25 }
0x10b1   : > { %v9877_v40 = vpop.permute.xlu1 %9876 }
0x10b4   : > { %12692 = vmatmul.mubr.msk.f32.vlgmr.msra.gmra.mrb[44].mxu1 %vm3594_vm5, %v12293_v10 }
0x10b5   : > { %12695 = vmatpush3.msra.mxu1 %v8790_v41  ;;  %12696 = vmatprep.mubr.msk.f32.mxu1 %vm13537_vm7, %v15833_v25 }
0x10b6   : > { %12699 = vmatprep.subr.mxu1 %v15833_v25  ;;  %v9148_v58 = vpop.permute.xlu0 %9147 }
0x10ba   : > { %v9235_v0 = vpop.permute.xlu0 %9234 }
0x10bb   : > { %v9237_v39 = vmul.f32 %v15833_v25, %v9235_v0 }
0x10bc   : > { %12697 = vmatmul.mubr.msk.f32.vlgmr.msra.gmra.mrb[44].mxu1 %vm3594_vm5, %v12296_v33 }
0x10bd   : > { %12700 = vmatpush3.msra.mxu1 %v8880_v29  ;;  %12701 = vmatprep.mubr.msk.f32.mxu1 %vm13537_vm7, %v15833_v25 }
0x10be   : > { %12704 = vmatprep.subr.mxu1 %v15833_v25  ;;  %9337 = vrot.lane.b32.xlu1 %v9237_v39, %s13544_s1  ;;  %v9520_v55 = vpop.permute.xlu0 %9519 }
0x10bf   : > { %v9522_v37 = vmul.f32 %v15833_v25, %v9520_v55 }
0x10c2   : > { %9432 = vrot.lane.b32.xlu1 %v9426_v43, %s16297_s5  ;;  %s16407_s5 = smov 124   ;;  %v9787_v5 = vpop.permute.xlu0 %9786 }
0x10c4   : > { %12702 = vmatmul.mubr.msk.f32.vlgmr.msra.gmra.mrb[44].mxu1 %vm3594_vm5, %v12299_v8 }
0x10c5   : > { %12705 = vmatpush3.msra.mxu1 %v8970_v12  ;;  %12706 = vmatprep.mubr.msk.f32.mxu1 %vm13537_vm7, %v15833_v25 }
0x10c6   : > { %12709 = vmatprep.subr.mxu1 %v15833_v25  ;;  %9528 = vrot.lane.b32.xlu1 %v9522_v37, %s16347_s16  ;;  %v9967_v35 = vpop.permute.xlu0 %9966 }
0x10cc   : > { %12707 = vmatmul.mubr.msk.f32.vlgmr.msra.gmra.mrb[44].mxu1 %vm3594_vm5, %v12302_v18 }
0x10cd   : > { %12710 = vmatpush3.msra.mxu1 %v9060_v62  ;;  %12711 = vmatprep.mubr.msk.f32.mxu1 %vm13537_vm7, %v15833_v25 }
0x10ce   : > { %12743 = vmatprep.subr.mxu1 %v15833_v25 }
0x10d4   : > { %12712 = vmatmul.mubr.msk.f32.vlgmr.msra.gmra.mrb[44].mxu1 %vm3594_vm5, %v12305_v27 }
0x10d5   : > { %12745 = vmatprep.mubr.msk.f32.mxu1 %vm13537_vm7, %v15833_v25 }
0x111a   : > { %v9256_v14 = vpop.permute.xlu1 %9255 }
0x1130   : > { %v9338_v6 = vpop.permute.xlu1 %9337 }
0x1134   : > { %v9433_v7 = vpop.permute.xlu1 %9432 }
0x1138   : > { %v9529_v9 = vpop.permute.xlu1 %9528 }
0x11a7   : > { %v9131_v32 = vpop.f32.mrb[44].mxu1 }
0x11a8   : > { %v12713_v45 = vpop.f32.mrb[45].mxu1  ;;  %12731 = vmatmul.mubr.msk.f32.vlgmr.msra.gmra.mrb[2].mxu0 %vm1350_vm11, %v9131_v32  ;;  %vm9341_vm11 = vcmask 39936  }
0x11a9   : > { %12735 = vmatprep.mubr.msk.f32.mxu0 %vm13537_vm7, %v15833_v25 }
0x127b   : > { %v9219_v3 = vpop.f32.mrb[2].mxu0 }
0x127c   : > { %v9220_v28 = vadd.f32 %v9219_v3, %v9148_v58  ;;  %v12732_v34 = vpop.f32.mrb[3].mxu0 }
0x127e   : > { %v9223_v50 = vmax.f32 %v9220_v28, 0.0 }
0x1280   : > { %v15938_v11 = vadd.f32 %v9223_v50, %v9220_v28 }
0x1282   : > { %9225 = vst.msk [vmem:[#allocation2 + $0x8] sm:$0xff] %vm3589_vm4, %v15938_v11 }
0x1289   : > { %v9227_v48 = vld [vmem:[#allocation2 + $0x8] sm:$0xff] }
0x128a   : > { %v9699_v13 = vmul.f32 %v9697_v1, %v9227_v48  ;;  %v9250_v24 = vmul.f32 %v9247_v54, %v9227_v48  ;;  %v9879_v61 = vmul.f32 %v9877_v40, %v9227_v48  ;;  %v9238_v22 = vmul.f32 %v9235_v0, %v9227_v48 }
0x128b   : > { %v9427_v56 = vmul.f32 %v9424_v36, %v9227_v48  ;;  %v9523_v52 = vmul.f32 %v9520_v55, %v9227_v48  ;;  %v9789_v19 = vmul.f32 %v9787_v5, %v9227_v48  ;;  %v9969_v53 = vmul.f32 %v9967_v35, %v9227_v48 }
0x128c   : > { %9703 = vrot.lane.b32.xlu1 %v9699_v13, %s16346_s23  ;;  %9257 = vrot.lane.b32.xlu0 %v9250_v24, %s16300_s26  ;;  %s16410_s26 = sld [smem:[#allocation14_spill]]  ;;  %v9613_v44 = vmul.f32 %v15977_v31, %v9227_v48 }
0x1290   : > { %9883 = vrot.lane.b32.xlu1 %v9879_v61, %s16407_s5  ;;  %9339 = vrot.lane.b32.xlu0 %v9238_v22, %s13544_s1 }
0x1292   : > { %s16411_s6 = smov %s16410_s26  ;;  %v12310_v26 = vld [vmem:[%s16410_s26 + $0x8] sm:$0xff]  ;;  %s16414_s26 = sld [smem:[#allocation22_spill]] }
0x1293   : > { %v9239_v23 = vld [vmem:[%s16411_s6] sm:$0xff]  ;;  %v12314_v2 = vld [vmem:[%s16411_s6 + $0x10] sm:$0xff]  ;;  %v12317_v10 = vld [vmem:[%s16411_s6 + $0x18] sm:$0xff] }
0x1294   : > { %10053 = vperm.xlu1 %13380, %v10050_v4   ;;  %9434 = vrot.lane.b32.xlu0 %v9427_v56, %s16408_s2  ;;  %v12320_v29 = vld [vmem:[%s16411_s6 + $0x20] sm:$0xff]  ;;  %v12323_v12 = vld [vmem:[%s16411_s6 + $0x28] sm:$0xff]  ;;  %v12326_v18 = vld [vmem:[%s16411_s6 + $0x30] sm:$0xff] }
0x1295   : > { %v12329_v54 = vld [vmem:[%s16411_s6 + $0x38] sm:$0xff]  ;;  %v12332_v49 = vld [vmem:[%s16411_s6 + $0x40] sm:$0xff]  ;;  %s16415_s6 = sld [smem:[#allocation15_spill]] }
0x1298   : > { %10068 = vrot.lane.b32.xlu1 %v15891_v51, %s16409_s4  ;;  %9530 = vrot.lane.b32.xlu0 %v9523_v52, %s16347_s16 }
0x129c   : > { %10350 = vrot.lane.b32.xlu1 %v15901_v46, %s16346_s23  ;;  %9793 = vrot.lane.b32.xlu0 %v9789_v19, %s16412_s7 }
0x12a0   : > { %10617 = vrot.lane.b32.xlu1 %v15911_v20, %s16408_s2  ;;  %9973 = vrot.lane.b32.xlu0 %v9969_v53, %s16409_s4 }
0x12a4   : > { %10797 = vrot.lane.b32.xlu1 %v15921_v42, %s13544_s1  ;;  %10080 = vrot.lane.b32.xlu0 %v15888_v21, %s16407_s5 }
0x12a8   : > { %10255 = vrot.lane.b32.xlu0 %v15898_v16, %s16412_s7 }
0x12ac   : > { %10527 = vrot.lane.b32.xlu0 %v15908_v60, %s16347_s16 }
0x12b0   : > { %10707 = vrot.lane.b32.xlu0 %v15918_v47, %s16413_s13 }
0x12fe   : > { %v9258_v63 = vpop.permute.xlu0 %9257  ;;  %v9704_v41 = vpop.permute.xlu1 %9703 }
0x12ff   : > { %v9260_v57 = vsel %vm9259_vm10, %v9256_v14, %v9258_v63 }
0x1300   : > { %12734 = vmatpush3.msra.mxu0 %v9260_v57 }
0x1301   : > { %12738 = vmatprep.subr.mxu0 %v15833_v25  ;;  %12736 = vmatmul.mubr.msk.f32.vlgmr.msra.gmra.mrb[4].mxu0 %vm3594_vm5, %v12310_v26 }
0x1302   : > { %v9340_v17 = vpop.permute.xlu0 %9339  ;;  %12740 = vmatprep.mubr.msk.f32.mxu0 %vm13537_vm7, %v15833_v25  ;;  %v9884_v62 = vpop.permute.xlu1 %9883 }
0x1303   : > { %v9342_v38 = vsel %vm9341_vm11, %v9338_v6, %v9340_v17 }
0x1304   : > { %12739 = vmatpush3.msra.mxu0 %v9342_v38 }
0x1305   : > { %12741 = vmatmul.mubr.msk.f32.vlgmr.msra.gmra.mrb[6].mxu0 %vm3594_vm5, %v9239_v23  ;;  %12748 = vmatprep.subr.mxu0 %v15833_v25 }
0x1306   : > { %v9435_v15 = vpop.permute.xlu0 %9434  ;;  %12750 = vmatprep.mubr.msk.f32.mxu0 %vm13537_vm7, %v15833_v25 }
0x1307   : > { %v9437_v59 = vsel %vm9436_vm12, %v9433_v7, %v9435_v15 }
0x1308   : > { %12744 = vmatpush3.msra.mxu1 %v9437_v59 }
0x1309   : > { %12753 = vmatprep.subr.mxu1 %v15833_v25  ;;  %12746 = vmatmul.mubr.msk.f32.vlgmr.msra.gmra.mrb[46].mxu1 %vm3594_vm5, %v12314_v2 }
0x130a   : > { %12754 = vmatpush3.msra.mxu1 %v9613_v44  ;;  %v9531_v30 = vpop.permute.xlu0 %9530  ;;  %12755 = vmatprep.mubr.msk.f32.mxu1 %vm13537_vm7, %v15833_v25 }
0x130b   : > { %v9532_v33 = vsel %vm1283_vm3, %v9529_v9, %v9531_v30  ;;  %12763 = vmatprep.subr.mxu1 %v15833_v25 }
0x130c   : > { %12749 = vmatpush3.msra.mxu0 %v9532_v33 }
0x130d   : > { %12751 = vmatmul.mubr.msk.f32.vlgmr.msra.gmra.mrb[8].mxu0 %vm3594_vm5, %v12317_v10  ;;  %12758 = vmatprep.subr.mxu0 %v15833_v25 }
0x130e   : > { %12759 = vmatpush3.msra.mxu0 %v9704_v41  ;;  %v9794_v8 = vpop.permute.xlu0 %9793  ;;  %12756 = vmatmul.mubr.msk.f32.vlgmr.msra.gmra.mrb[48].mxu1 %vm3594_vm5, %v12320_v29  ;;  %v10881_v29 = vld [vmem:[%s16414_s26] sm:$0xff]  ;;  %s16416_s26 = sld [smem:[#allocation16_spill]] }
0x130f   : > { %12764 = vmatpush3.msra.mxu1 %v9794_v8  ;;  %12760 = vmatprep.mubr.msk.f32.mxu0 %vm13537_vm7, %v15833_v25 }
0x1310   : > { %12768 = vmatprep.subr.mxu0 %v15833_v25  ;;  %12765 = vmatprep.mubr.msk.f32.mxu1 %vm13537_vm7, %v15833_v25 }
0x1311   : > { %12761 = vmatmul.mubr.msk.f32.vlgmr.msra.gmra.mrb[10].mxu0 %vm3594_vm5, %v12323_v12  ;;  %12773 = vmatprep.subr.mxu1 %v15833_v25 }
0x1312   : > { %12769 = vmatpush3.msra.mxu0 %v9884_v62  ;;  %v9974_v27 = vpop.permute.xlu0 %9973  ;;  %12766 = vmatmul.mubr.msk.f32.vlgmr.msra.gmra.mrb[50].mxu1 %vm3594_vm5, %v12326_v18 }
0x1313   : > { %12774 = vmatpush3.msra.mxu1 %v9974_v27  ;;  %12770 = vmatprep.mubr.msk.f32.mxu0 %vm13537_vm7, %v15833_v25  ;;  %v10054_v32 = vpop.permute.xlu1 %10053 }
0x1314   : > { %12775 = vmatprep.mubr.msk.f32.mxu1 %vm13537_vm7, %v15833_v25  ;;  %12778 = vmatprep.subr.mxu0 %v15833_v25 }
0x1315   : > { %12771 = vmatmul.mubr.msk.f32.vlgmr.msra.gmra.mrb[12].mxu0 %vm3594_vm5, %v12329_v54  ;;  %12783 = vmatprep.subr.mxu1 %v15833_v25 }
0x1316   : > { %12776 = vmatmul.mubr.msk.f32.vlgmr.msra.gmra.mrb[52].mxu1 %vm3594_vm5, %v12332_v49  ;;  %12780 = vmatprep.mubr.msk.f32.mxu0 %vm13537_vm7, %v15833_v25  ;;  %v10081_v45 = vpop.permute.xlu0 %10080  ;;  %v12336_v49 = vld [vmem:[%s16415_s6 + $0x8] sm:$0xff] }
0x1317   : > { %12785 = vmatprep.mubr.msk.f32.mxu1 %vm13537_vm7, %v15833_v25  ;;  %v10083_v58 = vmul.f32 %v15833_v25, %v10081_v45  ;;  %v10069_v0 = vpop.permute.xlu1 %10068 }
0x1318   : > { %v10071_v39 = vmul.f32 %v15833_v25, %v10069_v0 }
0x1319   : > { %10089 = vrot.lane.b32.xlu0 %v10083_v58, %s16413_s13  ;;  %v12340_v58 = vld [vmem:[%s16415_s6 + $0x10] sm:$0xff] }
0x131a   : > { %v10256_v36 = vpop.permute.xlu0 %10255 }
0x131b   : > { %v10258_v43 = vmul.f32 %v15833_v25, %v10256_v36  ;;  %v10351_v55 = vpop.permute.xlu1 %10350 }
0x131c   : > { %v10353_v37 = vmul.f32 %v15833_v25, %v10351_v55 }
0x131d   : > { %10170 = vrot.lane.b32.xlu0 %v10071_v39, %s13544_s1 }
0x131e   : > { %v10528_v2 = vpop.permute.xlu0 %10527 }
0x131f   : > { %v10618_v8 = vpop.permute.xlu1 %10617 }
0x1321   : > { %10264 = vrot.lane.b32.xlu0 %v10258_v43, %s16408_s2  ;;  %v12343_v43 = vld [vmem:[%s16415_s6 + $0x18] sm:$0xff] }
0x1322   : > { %v10708_v10 = vpop.permute.xlu0 %10707 }
0x1323   : > { %v10798_v62 = vpop.permute.xlu1 %10797 }
0x1325   : > { %10359 = vrot.lane.b32.xlu0 %v10353_v37, %s16347_s16 }
0x13d4   : > { %v9331_v3 = vpop.f32.mrb[4].mxu0 }
0x13d5   : > { %v12737_v28 = vpop.f32.mrb[5].mxu0 }
0x13d8   : > { %v9413_v34 = vpop.f32.mrb[6].mxu0 }
0x13d9   : > { %v9414_v50 = vadd.f32 %v9413_v34, %v9331_v3  ;;  %v12742_v1 = vpop.f32.mrb[7].mxu0  ;;  %v12346_v3 = vld [vmem:[%s16415_s6 + $0x20] sm:$0xff]  ;;  %v12349_v34 = vld [vmem:[%s16415_s6 + $0x28] sm:$0xff] }
0x13dc   : > { %v9508_v48 = vpop.f32.mrb[46].mxu1 }
0x13dd   : > { %v9512_v13 = vadd.f32 %v9508_v48, %v9414_v50  ;;  %v12747_v40 = vpop.f32.mrb[47].mxu1  ;;  %v12352_v50 = vld [vmem:[%s16415_s6 + $0x30] sm:$0xff] }
0x13de   : > { %v12358_v40 = vld [vmem:[%s16415_s6 + $0x40] sm:$0xff] }
0x13e0   : > { %v9603_v24 = vpop.f32.mrb[8].mxu0 }
0x13e1   : > { %v9607_v61 = vadd.f32 %v9603_v24, %v9512_v13  ;;  %v9685_v22 = vpop.f32.mrb[48].mxu1  ;;  %v12752_v4 = vpop.f32.mrb[9].mxu0  ;;  %v12355_v13 = vld [vmem:[%s16415_s6 + $0x38] sm:$0xff] }
0x13e2   : > { %v12757_v56 = vpop.f32.mrb[49].mxu1 }
0x13e3   : > { %v9689_v5 = vadd.f32 %v9685_v22, %v9607_v61 }
0x13e4   : > { %v9775_v52 = vpop.f32.mrb[10].mxu0 }
0x13e5   : > { %v9779_v19 = vadd.f32 %v9775_v52, %v9689_v5  ;;  %v9865_v35 = vpop.f32.mrb[50].mxu1  ;;  %v12762_v53 = vpop.f32.mrb[11].mxu0 }
0x13e6   : > { %v12767_v14 = vpop.f32.mrb[51].mxu1 }
0x13e7   : > { %v9869_v6 = vadd.f32 %v9865_v35, %v9779_v19 }
0x13e8   : > { %v9955_v63 = vpop.f32.mrb[12].mxu0 }
0x13e9   : > { %v9959_v26 = vadd.f32 %v9955_v63, %v9869_v6  ;;  %v10045_v7 = vpop.f32.mrb[52].mxu1  ;;  %v12772_v57 = vpop.f32.mrb[13].mxu0 }
0x13ea   : > { %v12777_v17 = vpop.f32.mrb[53].mxu1 }
0x13eb   : > { %v10049_v23 = vadd.f32 %v10045_v7, %v9959_v26 }
0x13ed   : > { %v10056_v38 = vadd.f32 %v10054_v32, %v10049_v23 }
0x13ef   : > { %v10057_v9 = vmax.f32 %v10056_v38, 0.0 }
0x13f1   : > { %v16029_v15 = vadd.f32 %v10057_v9, %v15938_v11 }
0x13f3   : > { %10059 = vst.msk [vmem:[#allocation2 + $0x8] sm:$0xff] %vm3589_vm4, %v16029_v15 }
0x13fa   : > { %v10061_v59 = vld [vmem:[#allocation2 + $0x8] sm:$0xff] }
0x13fb   : > { %v10084_v44 = vmul.f32 %v10081_v45, %v10061_v59  ;;  %v10530_v30 = vmul.f32 %v10528_v2, %v10061_v59  ;;  %v10072_v41 = vmul.f32 %v10069_v0, %v10061_v59  ;;  %v10710_v33 = vmul.f32 %v10708_v10, %v10061_v59 }
0x13fc   : > { %v10259_v11 = vmul.f32 %v10256_v36, %v10061_v59  ;;  %v10354_v12 = vmul.f32 %v10351_v55, %v10061_v59  ;;  %v10620_v18 = vmul.f32 %v10618_v8, %v10061_v59  ;;  %v10800_v27 = vmul.f32 %v10798_v62, %v10061_v59  ;;  %v12362_v62 = vld [vmem:[%s16416_s26 + $0x10] sm:$0xff] }
0x13fd   : > { %10091 = vrot.lane.b32.xlu1 %v10084_v44, %s16413_s13  ;;  %10534 = vrot.lane.b32.xlu0 %v10530_v30, %s16346_s23  ;;  %v10444_v39 = vmul.f32 %v15977_v31, %v10061_v59 }
0x1401   : > { %10172 = vrot.lane.b32.xlu1 %v10072_v41, %s13544_s1  ;;  %10714 = vrot.lane.b32.xlu0 %v10710_v33, %s16407_s5 }
0x1405   : > { %10266 = vrot.lane.b32.xlu1 %v10259_v11, %s16408_s2  ;;  %10884 = vperm.xlu0 %13379, %v10881_v29  }
0x1409   : > { %10361 = vrot.lane.b32.xlu1 %v10354_v12, %s16347_s16  ;;  %10899 = vrot.lane.b32.xlu0 %v15891_v51, %s16409_s4  ;;  %v10090_v51 = vpop.permute.xlu0 %10089 }
0x140d   : > { %10624 = vrot.lane.b32.xlu1 %v10620_v18, %s16412_s7  ;;  %11209 = vrot.lane.b32.xlu0 %v15901_v46, %s16346_s23  ;;  %v10171_v46 = vpop.permute.xlu0 %10170 }
0x1411   : > { %10804 = vrot.lane.b32.xlu1 %v10800_v27, %s16409_s4  ;;  %11506 = vrot.lane.b32.xlu0 %v15911_v20, %s16408_s2  ;;  %v10265_v32 = vpop.permute.xlu0 %10264 }
0x1415   : > { %10912 = vrot.lane.b32.xlu1 %v15888_v21, %s16407_s5 }
0x1419   : > { %11104 = vrot.lane.b32.xlu1 %v15898_v16, %s16412_s7  ;;  %v10073_v16 = vld [vmem:[%s16415_s6] sm:$0xff]  ;;  %s16417_s6 = smov %s16416_s26  ;;  %s16418_s26 = sld [smem:[#allocation23_spill]] }
0x141d   : > { %11406 = vrot.lane.b32.xlu1 %v15908_v60, %s16347_s16 }
0x141f   : > { %s16419_s8 = smov %s16418_s26 }
0x1421   : > { %11606 = vrot.lane.b32.xlu1 %v15918_v47, %s16413_s13  ;;  %v10360_v47 = vpop.permute.xlu0 %10359 }
0x146f   : > { %v10092_v54 = vpop.permute.xlu1 %10091  ;;  %v10535_v55 = vpop.permute.xlu0 %10534 }
0x1470   : > { %v10093_v20 = vsel %vm9259_vm10, %v10090_v51, %v10092_v54 }
0x1471   : > { %12779 = vmatpush3.msra.mxu0 %v10093_v20 }
0x1472   : > { %12781 = vmatmul.mubr.msk.f32.vlgmr.msra.gmra.mrb[14].mxu0 %vm3594_vm5, %v12336_v49  ;;  %12788 = vmatprep.subr.mxu0 %v15833_v25 }
0x1473   : > { %v10173_v21 = vpop.permute.xlu1 %10172  ;;  %12790 = vmatprep.mubr.msk.f32.mxu0 %vm13537_vm7, %v15833_v25  ;;  %v10715_v1 = vpop.permute.xlu0 %10714 }
0x1474   : > { %v10174_v60 = vsel %vm9341_vm11, %v10171_v46, %v10173_v21 }
0x1475   : > { %12784 = vmatpush3.msra.mxu1 %v10174_v60 }
0x1476   : > { %12786 = vmatmul.mubr.msk.f32.vlgmr.msra.gmra.mrb[54].mxu1 %vm3594_vm5, %v10073_v16  ;;  %12793 = vmatprep.subr.mxu1 %v15833_v25 }
0x1477   : > { %v10267_v45 = vpop.permute.xlu1 %10266  ;;  %12795 = vmatprep.mubr.msk.f32.mxu1 %vm13537_vm7, %v15833_v25 }
0x1478   : > { %v10268_v0 = vsel %vm9436_vm12, %v10265_v32, %v10267_v45 }
0x1479   : > { %12789 = vmatpush3.msra.mxu0 %v10268_v0 }
0x147a   : > { %12798 = vmatprep.subr.mxu0 %v15833_v25  ;;  %12791 = vmatmul.mubr.msk.f32.vlgmr.msra.gmra.mrb[16].mxu0 %vm3594_vm5, %v12340_v58 }
0x147b   : > { %v10362_v36 = vpop.permute.xlu1 %10361  ;;  %12799 = vmatpush3.msra.mxu0 %v10444_v39  ;;  %12800 = vmatprep.mubr.msk.f32.mxu0 %vm13537_vm7, %v15833_v25 }
0x147c   : > { %v10363_v37 = vsel %vm1283_vm3, %v10360_v47, %v10362_v36  ;;  %12808 = vmatprep.subr.mxu0 %v15833_v25 }
0x147d   : > { %12794 = vmatpush3.msra.mxu1 %v10363_v37  ;;  %v11802_v37 = vld [vmem:[%s16419_s8] sm:$0xff] }
0x147e   : > { %12796 = vmatmul.mubr.msk.f32.vlgmr.msra.gmra.mrb[56].mxu1 %vm3594_vm5, %v12343_v43  ;;  %12803 = vmatprep.subr.mxu1 %v15833_v25 }
0x147f   : > { %v10625_v28 = vpop.permute.xlu1 %10624  ;;  %12804 = vmatpush3.msra.mxu1 %v10535_v55  ;;  %12801 = vmatmul.mubr.msk.f32.vlgmr.msra.gmra.mrb[18].mxu0 %vm3594_vm5, %v12346_v3 }
0x1480   : > { %12809 = vmatpush3.msra.mxu0 %v10625_v28  ;;  %12805 = vmatprep.mubr.msk.f32.mxu1 %vm13537_vm7, %v15833_v25 }
0x1481   : > { %12813 = vmatprep.subr.mxu1 %v15833_v25  ;;  %12810 = vmatprep.mubr.msk.f32.mxu0 %vm13537_vm7, %v15833_v25 }
0x1482   : > { %12806 = vmatmul.mubr.msk.f32.vlgmr.msra.gmra.mrb[58].mxu1 %vm3594_vm5, %v12349_v34  ;;  %12818 = vmatprep.subr.mxu0 %v15833_v25 }
0x1483   : > { %12814 = vmatpush3.msra.mxu1 %v10715_v1  ;;  %v10805_v48 = vpop.permute.xlu1 %10804  ;;  %12811 = vmatmul.mubr.msk.f32.vlgmr.msra.gmra.mrb[20].mxu0 %vm3594_vm5, %v12352_v50 }
0x1484   : > { %12819 = vmatpush3.msra.mxu0 %v10805_v48  ;;  %12815 = vmatprep.mubr.msk.f32.mxu1 %vm13537_vm7, %v15833_v25  ;;  %v10885_v11 = vpop.permute.xlu0 %10884 }
0x1485   : > { %12820 = vmatprep.mubr.msk.f32.mxu0 %vm13537_vm7, %v15833_v25 }
0x1486   : > { %12816 = vmatmul.mubr.msk.f32.vlgmr.msra.gmra.mrb[60].mxu1 %vm3594_vm5, %v12355_v13  ;;  %v12363_v13 = vld [vmem:[%s16417_s6 + $0x18] sm:$0xff] }
0x1487   : > { %12821 = vmatmul.mubr.msk.f32.vlgmr.msra.gmra.mrb[22].mxu0 %vm3594_vm5, %v12358_v40  ;;  %v10913_v24 = vpop.permute.xlu1 %10912  ;;  %12825 = vmatprep.mubr.msk.f32.mxu1 %vm3594_vm5, %v12362_v62  ;;  %v10904_v40 = vld [vmem:[%s16417_s6] sm:$0xff] }
0x1488   : > { %v10915_v61 = vmul.f32 %v15833_v25, %v10913_v24  ;;  %v10900_v12 = vpop.permute.xlu0 %10899 }
0x1489   : > { %v10902_v32 = vmul.f32 %v15833_v25, %v10900_v12 }
0x148a   : > { %10922 = vrot.lane.b32.xlu0 %v10915_v61, %s16413_s13 }
0x148b   : > { %v11105_v20 = vpop.permute.xlu1 %11104 }
0x148c   : > { %v11210_v27 = vpop.permute.xlu0 %11209  ;;  %v11107_v21 = vmul.f32 %v15833_v25, %v11105_v20 }
0x148d   : > { %v11212_v47 = vmul.f32 %v15833_v25, %v11210_v27  ;;  %v11803_v25 = vld [vmem:[%s16418_s26 + $0x8] sm:$0xff] }
0x148e   : > { %11706 = vrot.lane.b32.xlu0 %v15921_v42, %s13544_s1 }
0x148f   : > { %v11407_v58 = vpop.permute.xlu1 %11406 }
0x1490   : > { %v11507_v54 = vpop.permute.xlu0 %11506 }
0x1493   : > { %v11607_v43 = vpop.permute.xlu1 %11606 }
0x14fc   : > { %v10923_v16 = vpop.permute.xlu0 %10922 }
0x1500   : > { %v11707_v0 = vpop.permute.xlu0 %11706 }
0x1545   : > { %v10164_v22 = vpop.f32.mrb[14].mxu0 }
0x1546   : > { %v12782_v4 = vpop.f32.mrb[15].mxu0 }
0x1549   : > { %v10245_v56 = vpop.f32.mrb[54].mxu1 }
0x154a   : > { %v10246_v5 = vadd.f32 %v10245_v56, %v10164_v22  ;;  %v12787_v52 = vpop.f32.mrb[55].mxu1 }
0x154b   : > { %v12369_v52 = vld [vmem:[%s16417_s6 + $0x20] sm:$0xff] }
0x154d   : > { %v10339_v19 = vpop.f32.mrb[16].mxu0 }
0x154e   : > { %v10343_v35 = vadd.f32 %v10339_v19, %v10246_v5  ;;  %v12792_v53 = vpop.f32.mrb[17].mxu0  ;;  %v10905_v5 = vld [vmem:[%s16417_s6 + $0x8] sm:$0xff] }
0x1551   : > { %v10434_v14 = vpop.f32.mrb[56].mxu1 }
0x1552   : > { %v10438_v6 = vadd.f32 %v10434_v14, %v10343_v35  ;;  %v10516_v63 = vpop.f32.mrb[18].mxu0  ;;  %v12797_v26 = vpop.f32.mrb[57].mxu1  ;;  %v12370_v14 = vld [vmem:[%s16417_s6 + $0x28] sm:$0xff] }
0x1553   : > { %v12802_v7 = vpop.f32.mrb[19].mxu0  ;;  %v12375_v26 = vld [vmem:[%s16417_s6 + $0x38] sm:$0xff] }
0x1554   : > { %v10520_v57 = vadd.f32 %v10516_v63, %v10438_v6  ;;  %v12374_v6 = vld [vmem:[%s16417_s6 + $0x30] sm:$0xff]  ;;  %v12379_v7 = vld [vmem:[%s16417_s6 + $0x40] sm:$0xff] }
0x1555   : > { %v10606_v17 = vpop.f32.mrb[58].mxu1 }
0x1556   : > { %v10610_v23 = vadd.f32 %v10606_v17, %v10520_v57  ;;  %v10696_v38 = vpop.f32.mrb[20].mxu0  ;;  %v12807_v9 = vpop.f32.mrb[59].mxu1  ;;  %v12380_v17 = vld [vmem:[%s16417_s6 + $0x48] sm:$0xff] }
0x1557   : > { %v12812_v42 = vpop.f32.mrb[21].mxu0  ;;  %v12389_v9 = vld [vmem:[%s16417_s6 + $0x60] sm:$0xff] }
0x1558   : > { %v10700_v2 = vadd.f32 %v10696_v38, %v10610_v23  ;;  %v12384_v23 = vld [vmem:[%s16417_s6 + $0x50] sm:$0xff]  ;;  %v12385_v38 = vld [vmem:[%s16417_s6 + $0x58] sm:$0xff] }
0x1559   : > { %v10786_v59 = vpop.f32.mrb[60].mxu1 }
0x155a   : > { %v10790_v44 = vadd.f32 %v10786_v59, %v10700_v2  ;;  %v10876_v30 = vpop.f32.mrb[22].mxu0  ;;  %v12817_v10 = vpop.f32.mrb[61].mxu1  ;;  %v12390_v2 = vld [vmem:[%s16417_s6 + $0x68] sm:$0xff]  ;;  %v12394_v59 = vld [vmem:[%s16417_s6 + $0x70] sm:$0xff] }
0x155b   : > { %v12822_v41 = vpop.f32.mrb[23].mxu0  ;;  %v12399_v10 = vld [vmem:[%s16417_s6 + $0x80] sm:$0xff] }
0x155c   : > { %v10880_v33 = vadd.f32 %v10876_v30, %v10790_v44  ;;  %v12395_v30 = vld [vmem:[%s16417_s6 + $0x78] sm:$0xff]  ;;  %v12400_v41 = vld [vmem:[%s16417_s6 + $0x88] sm:$0xff] }
0x155e   : > { %v10887_v29 = vadd.f32 %v10885_v11, %v10880_v33 }
0x1560   : > { %v10888_v8 = vmax.f32 %v10887_v29, 0.0  ;;  %v13545_v29 = vmov 2  }
0x1562   : > { %v10889_v18 = vadd.f32 %v10888_v8, %v16029_v15 }
0x1564   : > { %10890 = vst.msk [vmem:[#allocation2 + $0x8] sm:$0xff] %vm3589_vm4, %v10889_v18 }
0x156b   : > { %v16108_v51 = vld [vmem:[#allocation2 + $0x8] sm:$0xff] }
0x156c   : > { %v10903_v46 = vmul.f32 %v10900_v12, %v16108_v51  ;;  %v10916_v49 = vmul.f32 %v10913_v24, %v16108_v51  ;;  %v11108_v15 = vmul.f32 %v11105_v20, %v16108_v51  ;;  %v11213_v60 = vmul.f32 %v11210_v27, %v16108_v51 }
0x156d   : > { %v11509_v45 = vmul.f32 %v11507_v54, %v16108_v51  ;;  %v11709_v39 = vmul.f32 %v11707_v0, %v16108_v51  ;;  %v11409_v36 = vmul.f32 %v11407_v58, %v16108_v51  ;;  %v11609_v55 = vmul.f32 %v11607_v43, %v16108_v51  ;;  %v12406_v58 = vld [vmem:[%s13715_s15 + $0x18] sm:$0xff]  ;;  %v11900_v43 = vld [vmem:[%s13715_s15 + $0x8] sm:$0xff] }
0x156e   : > { %11013 = vrot.lane.b32.xlu0 %v10903_v46, %s13544_s1  ;;  %10924 = vrot.lane.b32.xlu1 %v10916_v49, %s16413_s13  ;;  %s16420_s13 = sld [smem:[#allocation30_spill]]  ;;  %v11313_v63 = vmul.f32 %v15977_v31, %v16108_v51  ;;  %v16421_v20 = vmov 0  }
0x1572   : > { %11116 = vrot.lane.b32.xlu0 %v11108_v15, %s16408_s2  ;;  %11011 = vrot.lane.b32.xlu1 %v10902_v32, %s13544_s1  ;;  %v13546_v15 = vmov 1  }
0x1574   : > { %v11800_v3 = vld [vmem:[%s16420_s13] sm:$0xff]  ;;  %v11801_v28 = vld [vmem:[%s16420_s13 + $0x8] sm:$0xff] }
0x1575   : > { %v13175_v34 = vpack.c.bf16 %v11801_v28, %v11800_v3 }
0x1576   : > { %11221 = vrot.lane.b32.xlu0 %v11213_v60, %s16347_s16  ;;  %11114 = vrot.lane.b32.xlu1 %v11107_v21, %s16408_s2  ;;  %v13547_v21 = vmov 3  }
0x1577   : > { %13176 = vmatprep.subr.bf16.mxu0 %v13175_v34 }
0x1578   : > { %13178 = vmatpush3.bf16.msra.mxu0 %v13175_v34 }
0x157a   : > { %11514 = vrot.lane.b32.xlu0 %v11509_v45, %s16412_s7  ;;  %11219 = vrot.lane.b32.xlu1 %v11212_v47, %s16347_s16  ;;  %v12405_v45 = vld [vmem:[%s13715_s15 + $0x10] sm:$0xff]  ;;  %s12411_s7 = sshll.u32 %s13751_s0, 4  ;;  %s13548_s0 = smov [#allocation5]  }
0x157b   : > { %s16191_s2 = scalar_lea.hbm %s13725_s30, %s12411_s7  ;;  %s13415_s26 = sshll.u32 %s13548_s0, 4  ;;  %s13416_s26 = int_to_ptr.vmem [resolvable:$false] %s13415_s26 }
0x157e   : > { %11714 = vrot.lane.b32.xlu0 %v11709_v39, %s16409_s4  ;;  %11414 = vrot.lane.b32.xlu1 %v11409_v36, %s16346_s23  ;;  %v11899_v36 = vld [vmem:[%s13715_s15] sm:$0xff]  ;;  %s1063_s4 = sand.u32 1, %s13465_s22  }
0x157f   : > { %s1064_s16 = scalar_lea.vmem [#allocation5], %s1063_s4  ;;  %s11975_s1 = scalar_lea.sflag [#allocation6], %s1063_s4 }
0x1580   : > { %s11987_s23 = sshll.u32 %s1064_s16, 4  ;;  %s16193_s23 = int_to_ptr.vmem [resolvable:$true] %s11987_s23 }
0x1581   : > { %p13418_p0 = scmp.lt.s32.totalorder %s16193_s23, %s13416_s26 }
0x1582   : > { %11811 = vperm.xlu0 %13379, %v11803_v25   ;;  %11614 = vrot.lane.b32.xlu1 %v11609_v55, %s16407_s5  ;;  %s13411_s5 = scalar_lea.vmem %s16193_s23, 16 }
0x1583   : > { %p13412_p11 = scmp.ne.s32.totalorder %s16193_s23, %s13411_s5 }
0x1585   : > { %p13413_p12 = pnand %p13412_p11, %p13768_p5 }
0x1586   : > { %11806 = vperm.xlu1 %13380, %v11802_v37   ;;  %v12407_v37 = vld [vmem:[%s13715_s15 + $0x20] sm:$0xff] }
0x1587   : > { %p13414_p13 = pneg %p13413_p12 }
0x158a   : > { %13402 = vset.pattern.permute.xlu1 %v13545_v29 }
0x15e0   : > { %v10925_v50 = vpop.permute.xlu1 %10924  ;;  %v11014_v1 = vpop.permute.xlu0 %11013 }
0x15e1   : > { %v10926_v48 = vsel %vm9259_vm10, %v10923_v16, %v10925_v50  ;;  %v12408_v50 = vld [vmem:[%s13715_s15 + $0x28] sm:$0xff] }
0x15e2   : > { %12823 = vmatprep.subr.mxu1 %v10926_v48 }
0x15e3   : > { %12824 = vmatpush3.msra.mxu1 %v10926_v48  ;;  %v12409_v48 = vld [vmem:[%s13715_s15 + $0x30] sm:$0xff] }
0x15e4   : > { %v11012_v24 = vpop.permute.xlu1 %11011  ;;  %12826 = vmatmul.mubr.msk.f32.vlgmr.msra.gmra.mrb[62].mxu1 %vm3594_vm5, %v12363_v13  ;;  %v11117_v22 = vpop.permute.xlu0 %11116 }
0x15e5   : > { %v11015_v61 = vsel %vm9341_vm11, %v11012_v24, %v11014_v1  ;;  %12830 = vmatprep.mubr.msk.f32.mxu1 %vm3594_vm5, %v10904_v40 }
0x15e6   : > { %12828 = vmatprep.subr.mxu1 %v11015_v61 }
0x15e7   : > { %12829 = vmatpush3.msra.mxu1 %v11015_v61 }
0x15e8   : > { %v11115_v4 = vpop.permute.xlu1 %11114  ;;  %v11222_v19 = vpop.permute.xlu0 %11221 }
0x15e9   : > { %v11118_v56 = vsel %vm9436_vm12, %v11115_v4, %v11117_v22  ;;  %v12410_v22 = vld [vmem:[%s13715_s15 + $0x38] sm:$0xff] }
0x15ea   : > { %12833 = vmatprep.subr.mxu1 %v11118_v56 }
0x15ec   : > { %v11220_v35 = vpop.permute.xlu1 %11219  ;;  %12831 = vmatmul.mubr.msk.f32.vlgmr.msra.gmra.mrb[62].mxu1 %vm3594_vm5, %v10905_v5  ;;  %v11515_v31 = vpop.permute.xlu0 %11514 }
0x15ed   : > { %12834 = vmatpush3.msra.mxu1 %v11118_v56  ;;  %v11223_v53 = vsel %vm1283_vm3, %v11220_v35, %v11222_v19  ;;  %12835 = vmatprep.mubr.msk.f32.mxu1 %vm3594_vm5, %v12369_v52  ;;  %vm11960_vm3 = vcmask 80896  }
0x15ee   : > { %12838 = vmatprep.subr.mxu1 %v11223_v53 }
0x15f0   : > { %v11415_v57 = vpop.permute.xlu1 %11414  ;;  %v11715_v44 = vpop.permute.xlu0 %11714 }
0x15f4   : > { %12836 = vmatmul.mubr.msk.f32.vlgmr.msra.gmra.mrb[62].mxu1 %vm3594_vm5, %v12370_v14  ;;  %v11615_v42 = vpop.permute.xlu1 %11614 }
0x15f5   : > { %12839 = vmatpush3.msra.mxu1 %v11223_v53  ;;  %12840 = vmatprep.mubr.msk.f32.mxu1 %vm3594_vm5, %v12374_v6 }
0x15f6   : > { %12843 = vmatprep.subr.mxu1 %v11313_v63 }
0x15fc   : > { %12841 = vmatmul.mubr.msk.f32.vlgmr.msra.gmra.mrb[62].mxu1 %vm3594_vm5, %v12375_v26 }
0x15fd   : > { %12844 = vmatpush3.msra.mxu1 %v11313_v63  ;;  %12845 = vmatprep.mubr.msk.f32.mxu1 %vm3594_vm5, %v12379_v7 }
0x15fe   : > { %12848 = vmatprep.subr.mxu1 %v11415_v57 }
0x1601   : > { %v11812_v8 = vpop.permute.xlu0 %11811 }
0x1604   : > { %12846 = vmatmul.mubr.msk.f32.vlgmr.msra.gmra.mrb[62].mxu1 %vm3594_vm5, %v12380_v17 }
0x1605   : > { %12849 = vmatpush3.msra.mxu1 %v11415_v57  ;;  %12850 = vmatprep.mubr.msk.f32.mxu1 %vm3594_vm5, %v12384_v23  ;;  %v11807_v18 = vpop.permute.xlu1 %11806 }
0x1606   : > { %12853 = vmatprep.subr.mxu1 %v11515_v31 }
0x160c   : > { %12851 = vmatmul.mubr.msk.f32.vlgmr.msra.gmra.mrb[62].mxu1 %vm3594_vm5, %v12385_v38 }
0x160d   : > { %12854 = vmatpush3.msra.mxu1 %v11515_v31  ;;  %12855 = vmatprep.mubr.msk.f32.mxu1 %vm3594_vm5, %v12389_v9  ;;  %v11970_v31 = vld [vmem:[%s16422_s3] sm:$0x1]  ;;  %s13417_s3 = scalar_lea.vmem %s13416_s26, 32 }
0x160e   : > { %12858 = vmatprep.subr.mxu1 %v11615_v42  ;;  %p13419_p1 = scmp.lt.s32.totalorder %s13417_s3, %s13411_s5 }
0x1610   : > { %p13420_p2 = por %p13419_p1, %p13418_p0 }
0x1612   : > { %p13421_p3 = pnand %p13420_p2, %p13414_p13 }
0x1614   : > { %12856 = vmatmul.mubr.msk.f32.vlgmr.msra.gmra.mrb[62].mxu1 %vm3594_vm5, %v12390_v2 }
0x1615   : > { %12859 = vmatpush3.msra.mxu1 %v11615_v42  ;;  %12860 = vmatprep.mubr.msk.f32.mxu1 %vm3594_vm5, %v12394_v59 }
0x1616   : > { %12863 = vmatprep.subr.mxu1 %v11715_v44 }
0x161c   : > { %12861 = vmatmul.mubr.msk.f32.vlgmr.msra.gmra.mrb[62].mxu1 %vm3594_vm5, %v12395_v30 }
0x161d   : > { %12864 = vmatpush3.msra.mxu1 %v11715_v44  ;;  %12865 = vmatprep.mubr.msk.f32.mxu1 %vm3594_vm5, %v12399_v10 }
0x1624   : > { %12866 = vmatmul.mubr.msk.f32.vlgmr.msra.gmra.mrb[62].mxu1 %vm3594_vm5, %v12400_v41 }
0x16f7   : > { %v12867_v33 = vpop.f32.mrb[62].mxu1 }
0x16f8   : > { %v11789_v11 = vpop.f32.mrb[63].mxu1 }
0x16f9   : > { %12872 = vmatprep.mubr.msk.f32.mxu0 %vm3589_vm4, %v11789_v11 }
0x16fa   : > { %12873 = vmatmul.mubr.msk.f32.vlgmr.msra.gmra.mrb[24].mxu0 %vm3589_vm4, %v12867_v33 }
0x17cd   : > { %v12874_v12 = vpop.f32.mrb[24].mxu0 }
0x17ce   : > { %v11892_v62 = vadd.f32 %v12874_v12, %v11812_v8  ;;  %v11886_v27 = vpop.f32.mrb[25].mxu0 }
0x17cf   : > { %v11887_v51 = vadd.f32 %v11886_v27, %v11807_v18 }
0x17d0   : > { %v11896_v46 = vmax.f32 %v11892_v62, 0.0 }
0x17d1   : > { %v11895_v49 = vmax.f32 %v11887_v51, 0.0 }
0x17d2   : > { %v11898_v54 = vadd.f32 %v11896_v46, %v11892_v62 }
0x17d3   : > { %v11897_v32 = vadd.f32 %v11895_v49, %v11887_v51 }
0x17d4   : > { %11938 = vperm.xlu1 %13402, %v11898_v54   ;;  %11908 = vperm.xlu0 %13379, %v11898_v54  }
0x17d8   : > { %13403 = vset.pattern.permute.xlu1 %v16421_v20  ;;  %13401 = vset.pattern.permute.xlu0 %v13546_v15 }
0x17d9   : > { %11903 = vperm.xlu1 %13403, %v11897_v32   ;;  %11923 = vperm.xlu0 %13401, %v11898_v54  }
0x17dd   : > { %13404 = vset.pattern.permute.xlu1 %v13546_v15  ;;  %13406 = vset.pattern.permute.xlu0 %v13547_v21 }
0x17de   : > { %11919 = vperm.xlu1 %13404, %v11897_v32   ;;  %11949 = vperm.xlu0 %13406, %v11897_v32  }
0x17e2   : > { %13405 = vset.pattern.permute.xlu1 %v13545_v29 }
0x17e3   : > { %11934 = vperm.xlu1 %13405, %v11897_v32  }
0x17e7   : > { %13407 = vset.pattern.permute.xlu1 %v13547_v21 }
0x17e8   : > { %11953 = vperm.xlu1 %13407, %v11898_v54  }
0x1853   : > { %v11939_v16 = vpop.permute.xlu1 %11938  ;;  %v11909_v60 = vpop.permute.xlu0 %11908 }
0x1854   : > { %v11912_v28 = vmul.f32 %v11909_v60, %v11900_v43  ;;  %v11942_v4 = vmul.f32 %v12408_v50, %v11939_v16 }
0x1858   : > { %v11904_v47 = vpop.permute.xlu1 %11903  ;;  %v11924_v0 = vpop.permute.xlu0 %11923 }
0x1859   : > { %v11927_v55 = vmul.f32 %v12406_v58, %v11924_v0  ;;  %v11911_v3 = vmul.f32 %v11904_v47, %v11899_v36 }
0x185b   : > { %v11929_v24 = vadd.f32 %v11927_v55, %v11912_v28 }
0x185d   : > { %v11920_v39 = vpop.permute.xlu1 %11919  ;;  %v11950_v13 = vpop.permute.xlu0 %11949  ;;  %v11944_v19 = vadd.f32 %v11942_v4, %v11929_v24 }
0x185e   : > { %v11926_v25 = vmul.f32 %v12405_v45, %v11920_v39  ;;  %v11956_v56 = vmul.f32 %v12409_v48, %v11950_v13 }
0x1860   : > { %v11928_v1 = vadd.f32 %v11926_v25, %v11911_v3 }
0x1862   : > { %v11935_v34 = vpop.permute.xlu1 %11934 }
0x1863   : > { %v11941_v40 = vmul.f32 %v12407_v37, %v11935_v34 }
0x1865   : > { %v11943_v61 = vadd.f32 %v11941_v40, %v11928_v1 }
0x1867   : > { %v11954_v5 = vpop.permute.xlu1 %11953  ;;  %v11958_v52 = vadd.f32 %v11956_v56, %v11943_v61 }
0x1868   : > { %v11957_v35 = vmul.f32 %v12410_v22, %v11954_v5 }
0x1869   : > { %v11961_v14 = vsel %vm11960_vm3, %v11958_v52, 0.0 }
0x186a   : > { %v11959_v53 = vadd.f32 %v11957_v35, %v11944_v19 }
0x186c   : > { %v11962_v6 = vsel %vm11960_vm3, %v11959_v53, 0.0 }
0x186d   : > { %v11963_v63 = vadd.f32 %v11962_v6, %v11961_v14 }
0x186f   : > { %v11964_v26 = vrot.slane %v11963_v63, 4 }
0x1871   : > { %v11965_v7 = vadd.f32 %v11964_v26, %v11963_v63 }
0x1873   : > { %v11966_v57 = vrot.slane %v11965_v7, 2 }
0x1875   : > { %v11967_v17 = vadd.f32 %v11966_v57, %v11965_v7 }
0x1877   : > { %v11968_v23 = vrot.slane %v11967_v17, 1 }
0x1879   : > { %v11969_v38 = vadd.f32 %v11968_v23, %v11967_v17 }
0x187b   : > { %v11971_v9 = vadd.f32 %v11970_v31, %v11969_v38 }
0x187d   : > { %11973 = vst.msk [vmem:[%s1064_s16] sm:$0x1] %vm11972_vm13, %v11971_v9 }
0x187e   : > { %13424 = shalt.err (!%p13421_p3)
}
0x187f   : > { %s13425_s4 = scalar_lea.hbm %s16191_s2, 16  ;;  %s13429_s7 = scalar_lea.hbm %s13725_s30, 32 }
0x1880   : > { %p13426_p4 = scmp.ne.s32.totalorder %s16191_s2, %s13425_s4  ;;  %p13430_p9 = scmp.lt.u32.totalorder %s16191_s2, %s13725_s30 }
0x1881   : > { %p13431_p10 = scmp.lt.u32.totalorder %s13429_s7, %s13425_s4  ;;  %p13433_p12 = scmp.lt.u32.totalorder %s13425_s4, %s16191_s2 }
0x1882   : > { %p13427_p7 = pnand %p13426_p4, %p13768_p5 }
0x1883   : > { %p13432_p11 = por %p13431_p10, %p13430_p9 }
0x1884   : > { %p13428_p8 = pneg %p13427_p7 }
0x1885   : > { %p13434_p0 = por %p13433_p12, %p13432_p11 }
0x1887   : > { %p13435_p13 = pnand %p13434_p0, %p13428_p8 }
0x1889   : > { %13438 = shalt.err (!%p13435_p13)
}
0x188a   : > { %13267 = dma.vmem_to_hbm [thread:$0]  (%p13768_p5), %s16193_s23, 16, %s16191_s2, %s11975_s1  }
0x188b PF: > { %s16423_s3 = sld [smem:[#allocation32_spill]]  ;;  %p13273_p1 = scmp.ge.s32.totalorder %s13473_s19, 2 }
0x188d   : > { %p13270_p2 = pnand %p13273_p1, %p13772_p6 }
0x1891   : > { %s11999_s5 = sand.u32 1, %s16423_s3  }
0x1892   : > { %s12000_s0 = scalar_lea.sflag [#allocation6], %s11999_s5 }
0x1893   : > { %13456 = dma.done.wait (!%p13270_p2), %s12000_s0, 16  }
0x1894   : > { %13458 = vsyncadd (!%p13270_p2), %s12000_s0, 4294967280  ;;  %s16425_s19 = sld [smem:[#allocation34_spill]]  ;;  %s16426_s26 = sld [smem:[#allocation33_spill]] }
0x1895   : > { %s16427_s4 = sld [smem:[#allocation35_spill]]  ;;  %s16428_s1 = smov %s13465_s22 }
0x189a   : > { %p85_p3 = scmp.ge.s32.totalorder %s16425_s19, 4   ;;  %s16429_s22 = smov %s16426_s26 }
0x189b   : > { %s16430_s26 = smov %s16427_s4 }
0x189c   :  { %87 = sbr.rel (!%p85_p3) target bundleno = 74 (0x4a), region = 349 }
0x18a3   :  { %12004 = vsyncpa [#allocation6], 1 }
0x18a4   :  { %12006 = vsyncpa [#allocation6 + $0x1], 1 }

</bundles_post_ra>
